<compile_context>
chip_gen: v7x
topology: tpu7x:2x2x1
jax: 0.10.0
libtpu: 0.0.40
codegen_flags: <defaults>
</compile_context>

<pallas_src>
import functools

import jax
import jax.numpy as jnp
from jax.experimental import pallas as pl
from jax.experimental.pallas import tpu as pltpu


# ---------------------------------------------------------------------------
# Fused kernel (one grid step == one batch sample)
# ---------------------------------------------------------------------------
def _make_fused_kernel(*, H, W, C_IN, C1, C2, HP, WP, n_out, training, binary):
    H1, H2 = H - 2, H - 4          # heights after conv1 / conv2 ((3,1), valid)
    R1, R2 = H1 * W, H2 * W        # (h, w)-major row counts
    P = HP * WP                    # pooled positions per sample

    def kernel(x_ref, w1_ref, b1_ref, m1_ref, w2_ref, b2_ref, m2_ref,
               wl_ref, bl_ref, o_ref, pooled_ref):
        x = x_ref[...]                                       # [H*W, C_IN] f32

        # ---- conv1 (3,1) as three shifted-slice matmuls + bias + ReLU + drop
        acc1 = jnp.dot(x[0:R1, :].astype(jnp.bfloat16), w1_ref[0],
                       preferred_element_type=jnp.float32)
        acc1 += jnp.dot(x[W:W + R1, :].astype(jnp.bfloat16), w1_ref[1],
                        preferred_element_type=jnp.float32)
        acc1 += jnp.dot(x[2 * W:2 * W + R1, :].astype(jnp.bfloat16), w1_ref[2],
                        preferred_element_type=jnp.float32)
        y1 = jnp.maximum(acc1 + b1_ref[...], 0.0) * m1_ref[...]   # [R1, C1]

        # ---- conv2 (3,1) + bias + ReLU + drop
        y1b = y1.astype(jnp.bfloat16)
        acc2 = jnp.dot(y1b[0:R2, :], w2_ref[0],
                       preferred_element_type=jnp.float32)
        acc2 += jnp.dot(y1b[W:W + R2, :], w2_ref[1],
                        preferred_element_type=jnp.float32)
        acc2 += jnp.dot(y1b[2 * W:2 * W + R2, :], w2_ref[2],
                        preferred_element_type=jnp.float32)
        y2 = jnp.maximum(acc2 + b2_ref[...], 0.0) * m2_ref[...]   # [R2, C2]

        # ---- MaxPool2d(3): rows are (h, w)-major; max over h-triples, then
        #      w-triples.  Everything stays VMEM/vreg resident.
        for i in range(HP):
            base = 3 * i * W
            mh = jnp.maximum(
                jnp.maximum(y2[base:base + W, :], y2[base + W:base + 2 * W, :]),
                y2[base + 2 * W:base + 3 * W, :])                 # [W, C2]
            for j in range(WP):
                p = i * WP + j
                pooled_ref[p:p + 1, :] = jnp.max(
                    mh[3 * j:3 * j + 3, :], axis=0, keepdims=True)

        if not training:
            o_ref[...] = pooled_ref[...]                          # [P, C2]
            return

        # ---- Linear(5760, n_out) + softmax/sigmoid head.
        # M=1 / N=n_out(<=4) would waste the MXU; use VPU multiply + XLU
        # reductions instead.  The NCHW flatten permutation is already folded
        # into wl_ref (done once at trace time on the weight).
        pooled = pooled_ref[...]                                  # [P, C2]
        lane = jax.lax.broadcasted_iota(jnp.int32, (1, n_out), 1)
        z = bl_ref[...]                                           # [1, n_out]
        for o in range(n_out):
            zo = jnp.sum(jnp.sum(pooled * wl_ref[o], axis=0, keepdims=True),
                         axis=1, keepdims=True)                   # [1, 1]
            z = z + jnp.where(lane == o, zo, 0.0)

        if binary:                                                # nn.Sigmoid
            o_ref[...] = 1.0 / (1.0 + jnp.exp(-z))
        else:                                                     # Softmax(1)
            z = z - jnp.max(z, axis=1, keepdims=True)
            e = jnp.exp(z)
            o_ref[...] = e / jnp.sum(e, axis=1, keepdims=True)

    return kernel


# ---------------------------------------------------------------------------
# Wrapper: layout plumbing (trace-time only) + single pallas_call
# ---------------------------------------------------------------------------
def conv_forward(x_nchw, params, *, training, binary, dropout_key=None):
    w1, b1, w2, b2, wl, bl = params
    N, C_IN, H, W = x_nchw.shape
    C1, C2 = w1.shape[0], w2.shape[0]
    H1, H2 = H - 2, H - 4
    HP, WP = H2 // 3, W // 3
    P = HP * WP
    n_out = wl.shape[0]
    assert wl.shape[1] == C2 * HP * WP

    # NCHW -> per-sample (h, w)-major rows with channels in lanes.
    x_rows = jnp.transpose(x_nchw, (0, 2, 3, 1)).reshape(N, H * W, C_IN)

    # Conv weights -> [kh, c_in, c_out]; bf16 operands for the MXU dots.
    w1k = jnp.transpose(w1[:, :, :, 0], (2, 1, 0)).astype(jnp.bfloat16)
    w2k = jnp.transpose(w2[:, :, :, 0], (2, 1, 0)).astype(jnp.bfloat16)
    b1r = b1.reshape(1, C1)
    b2r = b2.reshape(1, C2)

    # Fold PyTorch's NCHW flatten permutation into the linear weight:
    # feature f = c*HP*WP + i*WP + j  ->  wlp[o, p=i*WP+j, c].
    wlp = (wl.reshape(n_out, C2, HP, WP).transpose(0, 2, 3, 1)
             .reshape(n_out, P, C2))
    blr = bl.reshape(1, n_out)

    # Inverted-dropout scale masks (host-side RNG; see TODO at top).
    if training:
        k1, k2 = jax.random.split(dropout_key)
        m1 = (jax.random.bernoulli(k1, 0.8, (N, H1 * W, C1)) / 0.8
              ).astype(jnp.float32)
        m2 = (jax.random.bernoulli(k2, 0.7, (N, H2 * W, C2)) / 0.7
              ).astype(jnp.float32)
    else:
        m1 = jnp.ones((N, H1 * W, C1), jnp.float32)
        m2 = jnp.ones((N, H2 * W, C2), jnp.float32)

    kernel = _make_fused_kernel(H=H, W=W, C_IN=C_IN, C1=C1, C2=C2,
                                HP=HP, WP=WP, n_out=n_out,
                                training=training, binary=binary)

    in_specs = [
        pl.BlockSpec((None, H * W, C_IN), lambda n: (n, 0, 0)),   # x
        pl.BlockSpec((3, C_IN, C1), lambda n: (0, 0, 0)),         # w1
        pl.BlockSpec((1, C1), lambda n: (0, 0)),                  # b1
        pl.BlockSpec((None, H1 * W, C1), lambda n: (n, 0, 0)),    # drop mask 1
        pl.BlockSpec((3, C1, C2), lambda n: (0, 0, 0)),           # w2
        pl.BlockSpec((1, C2), lambda n: (0, 0)),                  # b2
        pl.BlockSpec((None, H2 * W, C2), lambda n: (n, 0, 0)),    # drop mask 2
        pl.BlockSpec((n_out, P, C2), lambda n: (0, 0, 0)),        # wl (permuted)
        pl.BlockSpec((1, n_out), lambda n: (0, 0)),               # bl
    ]
    if training:
        out_shape = jax.ShapeDtypeStruct((N, 1, n_out), jnp.float32)
        out_spec = pl.BlockSpec((None, 1, n_out), lambda n: (n, 0, 0))
    else:
        out_shape = jax.ShapeDtypeStruct((N, P, C2), jnp.float32)
        out_spec = pl.BlockSpec((None, P, C2), lambda n: (n, 0, 0))

    out = pl.pallas_call(
        kernel,
        grid=(N,),
        in_specs=in_specs,
        out_specs=out_spec,
        out_shape=out_shape,
        scratch_shapes=[pltpu.VMEM((P, C2), jnp.float32)],
        compiler_params=pltpu.CompilerParams(
            dimension_semantics=("parallel",)),
    )(x_rows, w1k, b1r, m1, w2k, b2r, m2, wlp, blr)

    if training:
        return out.reshape(N, n_out)
    # Eval mode (reference skips the head): flattened features in NCHW order.
    return (out.reshape(N, HP, WP, C2).transpose(0, 3, 1, 2)
               .reshape(N, C2 * HP * WP))


# ---------------------------------------------------------------------------
if __name__ == "__main__":
    TRAINING, BINARY = True, False

    key = jax.random.PRNGKey(0)
    kx, k1, k2, k3, k4, k5, kd = jax.random.split(key, 7)

    # 64 * ((58 - 4)//3) * (15//3) = 64*18*5 = 5760, matching nn.Linear(5760,.)
    x = jax.random.normal(kx, (2, 4, 58, 15), jnp.float32)

    w1 = 0.10 * jax.random.normal(k1, (32, 4, 3, 1), jnp.float32)   # conv1
    b1 = 0.10 * jax.random.normal(k2, (32,), jnp.float32)
    w2 = 0.05 * jax.random.normal(k3, (64, 32, 3, 1), jnp.float32)  # conv2
    b2 = 0.05 * jax.random.normal(k4, (64,), jnp.float32)
    n_out = 1 if BINARY else 4
    wl = 0.01 * jax.random.normal(k5, (n_out, 5760), jnp.float32)   # train_out
    bl = jnp.zeros((n_out,), jnp.float32)

    fwd = jax.jit(functools.partial(conv_forward, training=TRAINING,
                                    binary=BINARY))
    out = fwd(x, (w1, b1, w2, b2, wl, bl), dropout_key=kd)
    out = jax.block_until_ready(out)

    assert out.shape == (2, n_out), out.shape
    assert bool(jnp.all(jnp.isfinite(out)))
    if not BINARY:  # softmax rows sum to 1
        assert bool(jnp.all(jnp.abs(jnp.sum(out, axis=1) - 1.0) < 1e-3))
    print("KERNEL_OK")
</pallas_src>

<mosaic_0001>
module attributes {stable_mosaic.version = 11 : i64} {
  func.func @kernel(%arg0: i32, %arg1: memref<1x870x4xf32, #tpu.memory_space<vmem>>, %arg2: memref<3x4x32xbf16, #tpu.memory_space<vmem>>, %arg3: memref<1x32xf32, #tpu.memory_space<vmem>>, %arg4: memref<1x840x32xf32, #tpu.memory_space<vmem>>, %arg5: memref<3x32x64xbf16, #tpu.memory_space<vmem>>, %arg6: memref<1x64xf32, #tpu.memory_space<vmem>>, %arg7: memref<1x810x64xf32, #tpu.memory_space<vmem>>, %arg8: memref<4x90x64xf32, #tpu.memory_space<vmem>>, %arg9: memref<1x4xf32, #tpu.memory_space<vmem>>, %arg10: memref<1x1x4xf32, #tpu.memory_space<vmem>>, %arg11: memref<90x64xf32, #tpu.memory_space<vmem>>) attributes {dimension_semantics = [#tpu.dimension_semantics<parallel>], iteration_bounds = array<i64: 2>, scalar_prefetch = 0 : i64, scratch_operands = 1 : i64, tpu.core_type = #tpu.core_type<tc>, window_params = [{transform_indices = @transform_0, window_bounds = array<i64: 1, 870, 4>}, {pipeline_mode = #tpu.pipeline_mode<synchronous>, transform_indices = @transform_1, window_bounds = array<i64: 3, 4, 32>}, {pipeline_mode = #tpu.pipeline_mode<synchronous>, transform_indices = @transform_2, window_bounds = array<i64: 1, 32>}, {transform_indices = @transform_3, window_bounds = array<i64: 1, 840, 32>}, {pipeline_mode = #tpu.pipeline_mode<synchronous>, transform_indices = @transform_4, window_bounds = array<i64: 3, 32, 64>}, {pipeline_mode = #tpu.pipeline_mode<synchronous>, transform_indices = @transform_5, window_bounds = array<i64: 1, 64>}, {transform_indices = @transform_6, window_bounds = array<i64: 1, 810, 64>}, {pipeline_mode = #tpu.pipeline_mode<synchronous>, transform_indices = @transform_7, window_bounds = array<i64: 4, 90, 64>}, {pipeline_mode = #tpu.pipeline_mode<synchronous>, transform_indices = @transform_8, window_bounds = array<i64: 1, 4>}, {transform_indices = @transform_9, window_bounds = array<i64: 1, 1, 4>}]} {
    %c0 = arith.constant 0 : index
    %c0_0 = arith.constant 0 : index
    %c0_1 = arith.constant 0 : index
    %0 = vector.load %arg1[%c0, %c0_0, %c0_1] : memref<1x870x4xf32, #tpu.memory_space<vmem>>, vector<1x870x4xf32>
    %1 = vector.shape_cast %0 : vector<1x870x4xf32> to vector<870x4xf32>
    %2 = vector.extract_strided_slice %1 {offsets = [0, 0], sizes = [840, 4], strides = [1, 1]} : vector<870x4xf32> to vector<840x4xf32>
    %3 = arith.truncf %2 : vector<840x4xf32> to vector<840x4xbf16>
    %c0_2 = arith.constant 0 : index
    %c0_3 = arith.constant 0 : index
    %c0_4 = arith.constant 0 : index
    %4 = vector.load %arg2[%c0_2, %c0_3, %c0_4] : memref<3x4x32xbf16, #tpu.memory_space<vmem>>, vector<1x4x32xbf16>
    %5 = vector.shape_cast %4 : vector<1x4x32xbf16> to vector<4x32xbf16>
    %cst = arith.constant dense<0.000000e+00> : vector<840x32xf32>
    %6 = tpu.matmul %3, %5, %cst {dimension_numbers = #tpu.dot_dimension_numbers<[1], [0], [0], [1], [0, 0, 1, 1], [], []>} : vector<840x4xbf16>, vector<4x32xbf16>, vector<840x32xf32> -> vector<840x32xf32>
    %7 = vector.extract_strided_slice %1 {offsets = [15, 0], sizes = [840, 4], strides = [1, 1]} : vector<870x4xf32> to vector<840x4xf32>
    %8 = arith.truncf %7 : vector<840x4xf32> to vector<840x4xbf16>
    %c1 = arith.constant 1 : index
    %c0_5 = arith.constant 0 : index
    %c0_6 = arith.constant 0 : index
    %9 = vector.load %arg2[%c1, %c0_5, %c0_6] : memref<3x4x32xbf16, #tpu.memory_space<vmem>>, vector<1x4x32xbf16>
    %10 = vector.shape_cast %9 : vector<1x4x32xbf16> to vector<4x32xbf16>
    %cst_7 = arith.constant dense<0.000000e+00> : vector<840x32xf32>
    %11 = tpu.matmul %8, %10, %cst_7 {dimension_numbers = #tpu.dot_dimension_numbers<[1], [0], [0], [1], [0, 0, 1, 1], [], []>} : vector<840x4xbf16>, vector<4x32xbf16>, vector<840x32xf32> -> vector<840x32xf32>
    %12 = arith.addf %6, %11 : vector<840x32xf32>
    %13 = vector.extract_strided_slice %1 {offsets = [30, 0], sizes = [840, 4], strides = [1, 1]} : vector<870x4xf32> to vector<840x4xf32>
    %14 = arith.truncf %13 : vector<840x4xf32> to vector<840x4xbf16>
    %c2 = arith.constant 2 : index
    %c0_8 = arith.constant 0 : index
    %c0_9 = arith.constant 0 : index
    %15 = vector.load %arg2[%c2, %c0_8, %c0_9] : memref<3x4x32xbf16, #tpu.memory_space<vmem>>, vector<1x4x32xbf16>
    %16 = vector.shape_cast %15 : vector<1x4x32xbf16> to vector<4x32xbf16>
    %cst_10 = arith.constant dense<0.000000e+00> : vector<840x32xf32>
    %17 = tpu.matmul %14, %16, %cst_10 {dimension_numbers = #tpu.dot_dimension_numbers<[1], [0], [0], [1], [0, 0, 1, 1], [], []>} : vector<840x4xbf16>, vector<4x32xbf16>, vector<840x32xf32> -> vector<840x32xf32>
    %18 = arith.addf %12, %17 : vector<840x32xf32>
    %c0_11 = arith.constant 0 : index
    %c0_12 = arith.constant 0 : index
    %19 = vector.load %arg3[%c0_11, %c0_12] : memref<1x32xf32, #tpu.memory_space<vmem>>, vector<1x32xf32>
    %20 = vector.broadcast %19 : vector<1x32xf32> to vector<840x32xf32>
    %21 = arith.addf %18, %20 : vector<840x32xf32>
    %cst_13 = arith.constant 0.000000e+00 : f32
    %22 = vector.broadcast %cst_13 : f32 to vector<840x32xf32>
    %23 = arith.maximumf %21, %22 : vector<840x32xf32>
    %c0_14 = arith.constant 0 : index
    %c0_15 = arith.constant 0 : index
    %c0_16 = arith.constant 0 : index
    %24 = vector.load %arg4[%c0_14, %c0_15, %c0_16] : memref<1x840x32xf32, #tpu.memory_space<vmem>>, vector<1x840x32xf32>
    %25 = vector.shape_cast %24 : vector<1x840x32xf32> to vector<840x32xf32>
    %26 = arith.mulf %23, %25 : vector<840x32xf32>
    %27 = arith.truncf %26 : vector<840x32xf32> to vector<840x32xbf16>
    %28 = vector.extract_strided_slice %27 {offsets = [0, 0], sizes = [810, 32], strides = [1, 1]} : vector<840x32xbf16> to vector<810x32xbf16>
    %c0_17 = arith.constant 0 : index
    %c0_18 = arith.constant 0 : index
    %c0_19 = arith.constant 0 : index
    %29 = vector.load %arg5[%c0_17, %c0_18, %c0_19] : memref<3x32x64xbf16, #tpu.memory_space<vmem>>, vector<1x32x64xbf16>
    %30 = vector.shape_cast %29 : vector<1x32x64xbf16> to vector<32x64xbf16>
    %cst_20 = arith.constant dense<0.000000e+00> : vector<810x64xf32>
    %31 = tpu.matmul %28, %30, %cst_20 {dimension_numbers = #tpu.dot_dimension_numbers<[1], [0], [0], [1], [0, 0, 1, 1], [], []>} : vector<810x32xbf16>, vector<32x64xbf16>, vector<810x64xf32> -> vector<810x64xf32>
    %32 = vector.extract_strided_slice %27 {offsets = [15, 0], sizes = [810, 32], strides = [1, 1]} : vector<840x32xbf16> to vector<810x32xbf16>
    %c1_21 = arith.constant 1 : index
    %c0_22 = arith.constant 0 : index
    %c0_23 = arith.constant 0 : index
    %33 = vector.load %arg5[%c1_21, %c0_22, %c0_23] : memref<3x32x64xbf16, #tpu.memory_space<vmem>>, vector<1x32x64xbf16>
    %34 = vector.shape_cast %33 : vector<1x32x64xbf16> to vector<32x64xbf16>
    %cst_24 = arith.constant dense<0.000000e+00> : vector<810x64xf32>
    %35 = tpu.matmul %32, %34, %cst_24 {dimension_numbers = #tpu.dot_dimension_numbers<[1], [0], [0], [1], [0, 0, 1, 1], [], []>} : vector<810x32xbf16>, vector<32x64xbf16>, vector<810x64xf32> -> vector<810x64xf32>
    %36 = arith.addf %31, %35 : vector<810x64xf32>
    %37 = vector.extract_strided_slice %27 {offsets = [30, 0], sizes = [810, 32], strides = [1, 1]} : vector<840x32xbf16> to vector<810x32xbf16>
    %c2_25 = arith.constant 2 : index
    %c0_26 = arith.constant 0 : index
    %c0_27 = arith.constant 0 : index
    %38 = vector.load %arg5[%c2_25, %c0_26, %c0_27] : memref<3x32x64xbf16, #tpu.memory_space<vmem>>, vector<1x32x64xbf16>
    %39 = vector.shape_cast %38 : vector<1x32x64xbf16> to vector<32x64xbf16>
    %cst_28 = arith.constant dense<0.000000e+00> : vector<810x64xf32>
    %40 = tpu.matmul %37, %39, %cst_28 {dimension_numbers = #tpu.dot_dimension_numbers<[1], [0], [0], [1], [0, 0, 1, 1], [], []>} : vector<810x32xbf16>, vector<32x64xbf16>, vector<810x64xf32> -> vector<810x64xf32>
    %41 = arith.addf %36, %40 : vector<810x64xf32>
    %c0_29 = arith.constant 0 : index
    %c0_30 = arith.constant 0 : index
    %42 = vector.load %arg6[%c0_29, %c0_30] : memref<1x64xf32, #tpu.memory_space<vmem>>, vector<1x64xf32>
    %43 = vector.broadcast %42 : vector<1x64xf32> to vector<810x64xf32>
    %44 = arith.addf %41, %43 : vector<810x64xf32>
    %cst_31 = arith.constant 0.000000e+00 : f32
    %45 = vector.broadcast %cst_31 : f32 to vector<810x64xf32>
    %46 = arith.maximumf %44, %45 : vector<810x64xf32>
    %c0_32 = arith.constant 0 : index
    %c0_33 = arith.constant 0 : index
    %c0_34 = arith.constant 0 : index
    %47 = vector.load %arg7[%c0_32, %c0_33, %c0_34] : memref<1x810x64xf32, #tpu.memory_space<vmem>>, vector<1x810x64xf32>
    %48 = vector.shape_cast %47 : vector<1x810x64xf32> to vector<810x64xf32>
    %49 = arith.mulf %46, %48 : vector<810x64xf32>
    %50 = vector.extract_strided_slice %49 {offsets = [0, 0], sizes = [15, 64], strides = [1, 1]} : vector<810x64xf32> to vector<15x64xf32>
    %51 = vector.extract_strided_slice %49 {offsets = [15, 0], sizes = [15, 64], strides = [1, 1]} : vector<810x64xf32> to vector<15x64xf32>
    %52 = arith.maximumf %50, %51 : vector<15x64xf32>
    %53 = vector.extract_strided_slice %49 {offsets = [30, 0], sizes = [15, 64], strides = [1, 1]} : vector<810x64xf32> to vector<15x64xf32>
    %54 = arith.maximumf %52, %53 : vector<15x64xf32>
    %55 = vector.extract_strided_slice %54 {offsets = [0, 0], sizes = [3, 64], strides = [1, 1]} : vector<15x64xf32> to vector<3x64xf32>
    %cst_35 = arith.constant dense<0xFF800000> : vector<64xf32>
    %56 = vector.multi_reduction <maximumf>, %55, %cst_35 [0] : vector<3x64xf32> to vector<64xf32>
    %57 = vector.shape_cast %56 : vector<64xf32> to vector<1x64xf32>
    %c0_36 = arith.constant 0 : index
    %c0_37 = arith.constant 0 : index
    %58 = vector.load %arg11[%c0_36, %c0_37] : memref<90x64xf32, #tpu.memory_space<vmem>>, vector<1x64xf32>
    tpu.vector_store %arg11[%c0_36, %c0_37], %57 {strides = array<i32>} : memref<90x64xf32, #tpu.memory_space<vmem>>, vector<1x64xf32>,
    %59 = vector.extract_strided_slice %54 {offsets = [3, 0], sizes = [3, 64], strides = [1, 1]} : vector<15x64xf32> to vector<3x64xf32>
    %cst_38 = arith.constant dense<0xFF800000> : vector<64xf32>
    %60 = vector.multi_reduction <maximumf>, %59, %cst_38 [0] : vector<3x64xf32> to vector<64xf32>
    %61 = vector.shape_cast %60 : vector<64xf32> to vector<1x64xf32>
    %c1_39 = arith.constant 1 : index
    %c0_40 = arith.constant 0 : index
    %62 = vector.load %arg11[%c1_39, %c0_40] : memref<90x64xf32, #tpu.memory_space<vmem>>, vector<1x64xf32>
    tpu.vector_store %arg11[%c1_39, %c0_40], %61 {strides = array<i32>} : memref<90x64xf32, #tpu.memory_space<vmem>>, vector<1x64xf32>,
    %63 = vector.extract_strided_slice %54 {offsets = [6, 0], sizes = [3, 64], strides = [1, 1]} : vector<15x64xf32> to vector<3x64xf32>
    %cst_41 = arith.constant dense<0xFF800000> : vector<64xf32>
    %64 = vector.multi_reduction <maximumf>, %63, %cst_41 [0] : vector<3x64xf32> to vector<64xf32>
    %65 = vector.shape_cast %64 : vector<64xf32> to vector<1x64xf32>
    %c2_42 = arith.constant 2 : index
    %c0_43 = arith.constant 0 : index
    %66 = vector.load %arg11[%c2_42, %c0_43] : memref<90x64xf32, #tpu.memory_space<vmem>>, vector<1x64xf32>
    tpu.vector_store %arg11[%c2_42, %c0_43], %65 {strides = array<i32>} : memref<90x64xf32, #tpu.memory_space<vmem>>, vector<1x64xf32>,
    %67 = vector.extract_strided_slice %54 {offsets = [9, 0], sizes = [3, 64], strides = [1, 1]} : vector<15x64xf32> to vector<3x64xf32>
    %cst_44 = arith.constant dense<0xFF800000> : vector<64xf32>
    %68 = vector.multi_reduction <maximumf>, %67, %cst_44 [0] : vector<3x64xf32> to vector<64xf32>
    %69 = vector.shape_cast %68 : vector<64xf32> to vector<1x64xf32>
    %c3 = arith.constant 3 : index
    %c0_45 = arith.constant 0 : index
    %70 = vector.load %arg11[%c3, %c0_45] : memref<90x64xf32, #tpu.memory_space<vmem>>, vector<1x64xf32>
    tpu.vector_store %arg11[%c3, %c0_45], %69 {strides = array<i32>} : memref<90x64xf32, #tpu.memory_space<vmem>>, vector<1x64xf32>,
    %71 = vector.extract_strided_slice %54 {offsets = [12, 0], sizes = [3, 64], strides = [1, 1]} : vector<15x64xf32> to vector<3x64xf32>
    %cst_46 = arith.constant dense<0xFF800000> : vector<64xf32>
    %72 = vector.multi_reduction <maximumf>, %71, %cst_46 [0] : vector<3x64xf32> to vector<64xf32>
    %73 = vector.shape_cast %72 : vector<64xf32> to vector<1x64xf32>
    %c4 = arith.constant 4 : index
    %c0_47 = arith.constant 0 : index
    %74 = vector.load %arg11[%c4, %c0_47] : memref<90x64xf32, #tpu.memory_space<vmem>>, vector<1x64xf32>
    tpu.vector_store %arg11[%c4, %c0_47], %73 {strides = array<i32>} : memref<90x64xf32, #tpu.memory_space<vmem>>, vector<1x64xf32>,
    %75 = vector.extract_strided_slice %49 {offsets = [45, 0], sizes = [15, 64], strides = [1, 1]} : vector<810x64xf32> to vector<15x64xf32>
    %76 = vector.extract_strided_slice %49 {offsets = [60, 0], sizes = [15, 64], strides = [1, 1]} : vector<810x64xf32> to vector<15x64xf32>
    %77 = arith.maximumf %75, %76 : vector<15x64xf32>
    %78 = vector.extract_strided_slice %49 {offsets = [75, 0], sizes = [15, 64], strides = [1, 1]} : vector<810x64xf32> to vector<15x64xf32>
    %79 = arith.maximumf %77, %78 : vector<15x64xf32>
    %80 = vector.extract_strided_slice %79 {offsets = [0, 0], sizes = [3, 64], strides = [1, 1]} : vector<15x64xf32> to vector<3x64xf32>
    %cst_48 = arith.constant dense<0xFF800000> : vector<64xf32>
    %81 = vector.multi_reduction <maximumf>, %80, %cst_48 [0] : vector<3x64xf32> to vector<64xf32>
    %82 = vector.shape_cast %81 : vector<64xf32> to vector<1x64xf32>
    %c5 = arith.constant 5 : index
    %c0_49 = arith.constant 0 : index
    %83 = vector.load %arg11[%c5, %c0_49] : memref<90x64xf32, #tpu.memory_space<vmem>>, vector<1x64xf32>
    tpu.vector_store %arg11[%c5, %c0_49], %82 {strides = array<i32>} : memref<90x64xf32, #tpu.memory_space<vmem>>, vector<1x64xf32>,
    %84 = vector.extract_strided_slice %79 {offsets = [3, 0], sizes = [3, 64], strides = [1, 1]} : vector<15x64xf32> to vector<3x64xf32>
    %cst_50 = arith.constant dense<0xFF800000> : vector<64xf32>
    %85 = vector.multi_reduction <maximumf>, %84, %cst_50 [0] : vector<3x64xf32> to vector<64xf32>
    %86 = vector.shape_cast %85 : vector<64xf32> to vector<1x64xf32>
    %c6 = arith.constant 6 : index
    %c0_51 = arith.constant 0 : index
    %87 = vector.load %arg11[%c6, %c0_51] : memref<90x64xf32, #tpu.memory_space<vmem>>, vector<1x64xf32>
    tpu.vector_store %arg11[%c6, %c0_51], %86 {strides = array<i32>} : memref<90x64xf32, #tpu.memory_space<vmem>>, vector<1x64xf32>,
    %88 = vector.extract_strided_slice %79 {offsets = [6, 0], sizes = [3, 64], strides = [1, 1]} : vector<15x64xf32> to vector<3x64xf32>
    %cst_52 = arith.constant dense<0xFF800000> : vector<64xf32>
    %89 = vector.multi_reduction <maximumf>, %88, %cst_52 [0] : vector<3x64xf32> to vector<64xf32>
    %90 = vector.shape_cast %89 : vector<64xf32> to vector<1x64xf32>
    %c7 = arith.constant 7 : index
    %c0_53 = arith.constant 0 : index
    %91 = vector.load %arg11[%c7, %c0_53] : memref<90x64xf32, #tpu.memory_space<vmem>>, vector<1x64xf32>
    tpu.vector_store %arg11[%c7, %c0_53], %90 {strides = array<i32>} : memref<90x64xf32, #tpu.memory_space<vmem>>, vector<1x64xf32>,
    %92 = vector.extract_strided_slice %79 {offsets = [9, 0], sizes = [3, 64], strides = [1, 1]} : vector<15x64xf32> to vector<3x64xf32>
    %cst_54 = arith.constant dense<0xFF800000> : vector<64xf32>
    %93 = vector.multi_reduction <maximumf>, %92, %cst_54 [0] : vector<3x64xf32> to vector<64xf32>
    %94 = vector.shape_cast %93 : vector<64xf32> to vector<1x64xf32>
    %c8 = arith.constant 8 : index
    %c0_55 = arith.constant 0 : index
    %95 = vector.load %arg11[%c8, %c0_55] : memref<90x64xf32, #tpu.memory_space<vmem>>, vector<1x64xf32>
    tpu.vector_store %arg11[%c8, %c0_55], %94 {strides = array<i32>} : memref<90x64xf32, #tpu.memory_space<vmem>>, vector<1x64xf32>,
    %96 = vector.extract_strided_slice %79 {offsets = [12, 0], sizes = [3, 64], strides = [1, 1]} : vector<15x64xf32> to vector<3x64xf32>
    %cst_56 = arith.constant dense<0xFF800000> : vector<64xf32>
    %97 = vector.multi_reduction <maximumf>, %96, %cst_56 [0] : vector<3x64xf32> to vector<64xf32>
    %98 = vector.shape_cast %97 : vector<64xf32> to vector<1x64xf32>
    %c9 = arith.constant 9 : index
    %c0_57 = arith.constant 0 : index
    %99 = vector.load %arg11[%c9, %c0_57] : memref<90x64xf32, #tpu.memory_space<vmem>>, vector<1x64xf32>
    tpu.vector_store %arg11[%c9, %c0_57], %98 {strides = array<i32>} : memref<90x64xf32, #tpu.memory_space<vmem>>, vector<1x64xf32>,
    %100 = vector.extract_strided_slice %49 {offsets = [90, 0], sizes = [15, 64], strides = [1, 1]} : vector<810x64xf32> to vector<15x64xf32>
    %101 = vector.extract_strided_slice %49 {offsets = [105, 0], sizes = [15, 64], strides = [1, 1]} : vector<810x64xf32> to vector<15x64xf32>
    %102 = arith.maximumf %100, %101 : vector<15x64xf32>
    %103 = vector.extract_strided_slice %49 {offsets = [120, 0], sizes = [15, 64], strides = [1, 1]} : vector<810x64xf32> to vector<15x64xf32>
    %104 = arith.maximumf %102, %103 : vector<15x64xf32>
    %105 = vector.extract_strided_slice %104 {offsets = [0, 0], sizes = [3, 64], strides = [1, 1]} : vector<15x64xf32> to vector<3x64xf32>
    %cst_58 = arith.constant dense<0xFF800000> : vector<64xf32>
    %106 = vector.multi_reduction <maximumf>, %105, %cst_58 [0] : vector<3x64xf32> to vector<64xf32>
    %107 = vector.shape_cast %106 : vector<64xf32> to vector<1x64xf32>
    %c10 = arith.constant 10 : index
    %c0_59 = arith.constant 0 : index
    %108 = vector.load %arg11[%c10, %c0_59] : memref<90x64xf32, #tpu.memory_space<vmem>>, vector<1x64xf32>
    tpu.vector_store %arg11[%c10, %c0_59], %107 {strides = array<i32>} : memref<90x64xf32, #tpu.memory_space<vmem>>, vector<1x64xf32>,
    %109 = vector.extract_strided_slice %104 {offsets = [3, 0], sizes = [3, 64], strides = [1, 1]} : vector<15x64xf32> to vector<3x64xf32>
    %cst_60 = arith.constant dense<0xFF800000> : vector<64xf32>
    %110 = vector.multi_reduction <maximumf>, %109, %cst_60 [0] : vector<3x64xf32> to vector<64xf32>
    %111 = vector.shape_cast %110 : vector<64xf32> to vector<1x64xf32>
    %c11 = arith.constant 11 : index
    %c0_61 = arith.constant 0 : index
    %112 = vector.load %arg11[%c11, %c0_61] : memref<90x64xf32, #tpu.memory_space<vmem>>, vector<1x64xf32>
    tpu.vector_store %arg11[%c11, %c0_61], %111 {strides = array<i32>} : memref<90x64xf32, #tpu.memory_space<vmem>>, vector<1x64xf32>,
    %113 = vector.extract_strided_slice %104 {offsets = [6, 0], sizes = [3, 64], strides = [1, 1]} : vector<15x64xf32> to vector<3x64xf32>
    %cst_62 = arith.constant dense<0xFF800000> : vector<64xf32>
    %114 = vector.multi_reduction <maximumf>, %113, %cst_62 [0] : vector<3x64xf32> to vector<64xf32>
    %115 = vector.shape_cast %114 : vector<64xf32> to vector<1x64xf32>
    %c12 = arith.constant 12 : index
    %c0_63 = arith.constant 0 : index
    %116 = vector.load %arg11[%c12, %c0_63] : memref<90x64xf32, #tpu.memory_space<vmem>>, vector<1x64xf32>
    tpu.vector_store %arg11[%c12, %c0_63], %115 {strides = array<i32>} : memref<90x64xf32, #tpu.memory_space<vmem>>, vector<1x64xf32>,
    %117 = vector.extract_strided_slice %104 {offsets = [9, 0], sizes = [3, 64], strides = [1, 1]} : vector<15x64xf32> to vector<3x64xf32>
    %cst_64 = arith.constant dense<0xFF800000> : vector<64xf32>
    %118 = vector.multi_reduction <maximumf>, %117, %cst_64 [0] : vector<3x64xf32> to vector<64xf32>
    %119 = vector.shape_cast %118 : vector<64xf32> to vector<1x64xf32>
    %c13 = arith.constant 13 : index
    %c0_65 = arith.constant 0 : index
    %120 = vector.load %arg11[%c13, %c0_65] : memref<90x64xf32, #tpu.memory_space<vmem>>, vector<1x64xf32>
    tpu.vector_store %arg11[%c13, %c0_65], %119 {strides = array<i32>} : memref<90x64xf32, #tpu.memory_space<vmem>>, vector<1x64xf32>,
    %121 = vector.extract_strided_slice %104 {offsets = [12, 0], sizes = [3, 64], strides = [1, 1]} : vector<15x64xf32> to vector<3x64xf32>
    %cst_66 = arith.constant dense<0xFF800000> : vector<64xf32>
    %122 = vector.multi_reduction <maximumf>, %121, %cst_66 [0] : vector<3x64xf32> to vector<64xf32>
    %123 = vector.shape_cast %122 : vector<64xf32> to vector<1x64xf32>
    %c14 = arith.constant 14 : index
    %c0_67 = arith.constant 0 : index
    %124 = vector.load %arg11[%c14, %c0_67] : memref<90x64xf32, #tpu.memory_space<vmem>>, vector<1x64xf32>
    tpu.vector_store %arg11[%c14, %c0_67], %123 {strides = array<i32>} : memref<90x64xf32, #tpu.memory_space<vmem>>, vector<1x64xf32>,
    %125 = vector.extract_strided_slice %49 {offsets = [135, 0], sizes = [15, 64], strides = [1, 1]} : vector<810x64xf32> to vector<15x64xf32>
    %126 = vector.extract_strided_slice %49 {offsets = [150, 0], sizes = [15, 64], strides = [1, 1]} : vector<810x64xf32> to vector<15x64xf32>
    %127 = arith.maximumf %125, %126 : vector<15x64xf32>
    %128 = vector.extract_strided_slice %49 {offsets = [165, 0], sizes = [15, 64], strides = [1, 1]} : vector<810x64xf32> to vector<15x64xf32>
    %129 = arith.maximumf %127, %128 : vector<15x64xf32>
    %130 = vector.extract_strided_slice %129 {offsets = [0, 0], sizes = [3, 64], strides = [1, 1]} : vector<15x64xf32> to vector<3x64xf32>
    %cst_68 = arith.constant dense<0xFF800000> : vector<64xf32>
    %131 = vector.multi_reduction <maximumf>, %130, %cst_68 [0] : vector<3x64xf32> to vector<64xf32>
    %132 = vector.shape_cast %131 : vector<64xf32> to vector<1x64xf32>
    %c15 = arith.constant 15 : index
    %c0_69 = arith.constant 0 : index
    %133 = vector.load %arg11[%c15, %c0_69] : memref<90x64xf32, #tpu.memory_space<vmem>>, vector<1x64xf32>
    tpu.vector_store %arg11[%c15, %c0_69], %132 {strides = array<i32>} : memref<90x64xf32, #tpu.memory_space<vmem>>, vector<1x64xf32>,
    %134 = vector.extract_strided_slice %129 {offsets = [3, 0], sizes = [3, 64], strides = [1, 1]} : vector<15x64xf32> to vector<3x64xf32>
    %cst_70 = arith.constant dense<0xFF800000> : vector<64xf32>
    %135 = vector.multi_reduction <maximumf>, %134, %cst_70 [0] : vector<3x64xf32> to vector<64xf32>
    %136 = vector.shape_cast %135 : vector<64xf32> to vector<1x64xf32>
    %c16 = arith.constant 16 : index
    %c0_71 = arith.constant 0 : index
    %137 = vector.load %arg11[%c16, %c0_71] : memref<90x64xf32, #tpu.memory_space<vmem>>, vector<1x64xf32>
    tpu.vector_store %arg11[%c16, %c0_71], %136 {strides = array<i32>} : memref<90x64xf32, #tpu.memory_space<vmem>>, vector<1x64xf32>,
    %138 = vector.extract_strided_slice %129 {offsets = [6, 0], sizes = [3, 64], strides = [1, 1]} : vector<15x64xf32> to vector<3x64xf32>
    %cst_72 = arith.constant dense<0xFF800000> : vector<64xf32>
    %139 = vector.multi_reduction <maximumf>, %138, %cst_72 [0] : vector<3x64xf32> to vector<64xf32>
    %140 = vector.shape_cast %139 : vector<64xf32> to vector<1x64xf32>
    %c17 = arith.constant 17 : index
    %c0_73 = arith.constant 0 : index
    %141 = vector.load %arg11[%c17, %c0_73] : memref<90x64xf32, #tpu.memory_space<vmem>>, vector<1x64xf32>
    tpu.vector_store %arg11[%c17, %c0_73], %140 {strides = array<i32>} : memref<90x64xf32, #tpu.memory_space<vmem>>, vector<1x64xf32>,
    %142 = vector.extract_strided_slice %129 {offsets = [9, 0], sizes = [3, 64], strides = [1, 1]} : vector<15x64xf32> to vector<3x64xf32>
    %cst_74 = arith.constant dense<0xFF800000> : vector<64xf32>
    %143 = vector.multi_reduction <maximumf>, %142, %cst_74 [0] : vector<3x64xf32> to vector<64xf32>
    %144 = vector.shape_cast %143 : vector<64xf32> to vector<1x64xf32>
    %c18 = arith.constant 18 : index
    %c0_75 = arith.constant 0 : index
    %145 = vector.load %arg11[%c18, %c0_75] : memref<90x64xf32, #tpu.memory_space<vmem>>, vector<1x64xf32>
    tpu.vector_store %arg11[%c18, %c0_75], %144 {strides = array<i32>} : memref<90x64xf32, #tpu.memory_space<vmem>>, vector<1x64xf32>,
    %146 = vector.extract_strided_slice %129 {offsets = [12, 0], sizes = [3, 64], strides = [1, 1]} : vector<15x64xf32> to vector<3x64xf32>
    %cst_76 = arith.constant dense<0xFF800000> : vector<64xf32>
    %147 = vector.multi_reduction <maximumf>, %146, %cst_76 [0] : vector<3x64xf32> to vector<64xf32>
    %148 = vector.shape_cast %147 : vector<64xf32> to vector<1x64xf32>
    %c19 = arith.constant 19 : index
    %c0_77 = arith.constant 0 : index
    %149 = vector.load %arg11[%c19, %c0_77] : memref<90x64xf32, #tpu.memory_space<vmem>>, vector<1x64xf32>
    tpu.vector_store %arg11[%c19, %c0_77], %148 {strides = array<i32>} : memref<90x64xf32, #tpu.memory_space<vmem>>, vector<1x64xf32>,
    %150 = vector.extract_strided_slice %49 {offsets = [180, 0], sizes = [15, 64], strides = [1, 1]} : vector<810x64xf32> to vector<15x64xf32>
    %151 = vector.extract_strided_slice %49 {offsets = [195, 0], sizes = [15, 64], strides = [1, 1]} : vector<810x64xf32> to vector<15x64xf32>
    %152 = arith.maximumf %150, %151 : vector<15x64xf32>
    %153 = vector.extract_strided_slice %49 {offsets = [210, 0], sizes = [15, 64], strides = [1, 1]} : vector<810x64xf32> to vector<15x64xf32>
    %154 = arith.maximumf %152, %153 : vector<15x64xf32>
    %155 = vector.extract_strided_slice %154 {offsets = [0, 0], sizes = [3, 64], strides = [1, 1]} : vector<15x64xf32> to vector<3x64xf32>
    %cst_78 = arith.constant dense<0xFF800000> : vector<64xf32>
    %156 = vector.multi_reduction <maximumf>, %155, %cst_78 [0] : vector<3x64xf32> to vector<64xf32>
    %157 = vector.shape_cast %156 : vector<64xf32> to vector<1x64xf32>
    %c20 = arith.constant 20 : index
    %c0_79 = arith.constant 0 : index
    %158 = vector.load %arg11[%c20, %c0_79] : memref<90x64xf32, #tpu.memory_space<vmem>>, vector<1x64xf32>
    tpu.vector_store %arg11[%c20, %c0_79], %157 {strides = array<i32>} : memref<90x64xf32, #tpu.memory_space<vmem>>, vector<1x64xf32>,
    %159 = vector.extract_strided_slice %154 {offsets = [3, 0], sizes = [3, 64], strides = [1, 1]} : vector<15x64xf32> to vector<3x64xf32>
    %cst_80 = arith.constant dense<0xFF800000> : vector<64xf32>
    %160 = vector.multi_reduction <maximumf>, %159, %cst_80 [0] : vector<3x64xf32> to vector<64xf32>
    %161 = vector.shape_cast %160 : vector<64xf32> to vector<1x64xf32>
    %c21 = arith.constant 21 : index
    %c0_81 = arith.constant 0 : index
    %162 = vector.load %arg11[%c21, %c0_81] : memref<90x64xf32, #tpu.memory_space<vmem>>, vector<1x64xf32>
    tpu.vector_store %arg11[%c21, %c0_81], %161 {strides = array<i32>} : memref<90x64xf32, #tpu.memory_space<vmem>>, vector<1x64xf32>,
    %163 = vector.extract_strided_slice %154 {offsets = [6, 0], sizes = [3, 64], strides = [1, 1]} : vector<15x64xf32> to vector<3x64xf32>
    %cst_82 = arith.constant dense<0xFF800000> : vector<64xf32>
    %164 = vector.multi_reduction <maximumf>, %163, %cst_82 [0] : vector<3x64xf32> to vector<64xf32>
    %165 = vector.shape_cast %164 : vector<64xf32> to vector<1x64xf32>
    %c22 = arith.constant 22 : index
    %c0_83 = arith.constant 0 : index
    %166 = vector.load %arg11[%c22, %c0_83] : memref<90x64xf32, #tpu.memory_space<vmem>>, vector<1x64xf32>
    tpu.vector_store %arg11[%c22, %c0_83], %165 {strides = array<i32>} : memref<90x64xf32, #tpu.memory_space<vmem>>, vector<1x64xf32>,
    %167 = vector.extract_strided_slice %154 {offsets = [9, 0], sizes = [3, 64], strides = [1, 1]} : vector<15x64xf32> to vector<3x64xf32>
    %cst_84 = arith.constant dense<0xFF800000> : vector<64xf32>
    %168 = vector.multi_reduction <maximumf>, %167, %cst_84 [0] : vector<3x64xf32> to vector<64xf32>
    %169 = vector.shape_cast %168 : vector<64xf32> to vector<1x64xf32>
    %c23 = arith.constant 23 : index
    %c0_85 = arith.constant 0 : index
    %170 = vector.load %arg11[%c23, %c0_85] : memref<90x64xf32, #tpu.memory_space<vmem>>, vector<1x64xf32>
    tpu.vector_store %arg11[%c23, %c0_85], %169 {strides = array<i32>} : memref<90x64xf32, #tpu.memory_space<vmem>>, vector<1x64xf32>,
    %171 = vector.extract_strided_slice %154 {offsets = [12, 0], sizes = [3, 64], strides = [1, 1]} : vector<15x64xf32> to vector<3x64xf32>
    %cst_86 = arith.constant dense<0xFF800000> : vector<64xf32>
    %172 = vector.multi_reduction <maximumf>, %171, %cst_86 [0] : vector<3x64xf32> to vector<64xf32>
    %173 = vector.shape_cast %172 : vector<64xf32> to vector<1x64xf32>
    %c24 = arith.constant 24 : index
    %c0_87 = arith.constant 0 : index
    %174 = vector.load %arg11[%c24, %c0_87] : memref<90x64xf32, #tpu.memory_space<vmem>>, vector<1x64xf32>
    tpu.vector_store %arg11[%c24, %c0_87], %173 {strides = array<i32>} : memref<90x64xf32, #tpu.memory_space<vmem>>, vector<1x64xf32>,
    %175 = vector.extract_strided_slice %49 {offsets = [225, 0], sizes = [15, 64], strides = [1, 1]} : vector<810x64xf32> to vector<15x64xf32>
    %176 = vector.extract_strided_slice %49 {offsets = [240, 0], sizes = [15, 64], strides = [1, 1]} : vector<810x64xf32> to vector<15x64xf32>
    %177 = arith.maximumf %175, %176 : vector<15x64xf32>
    %178 = vector.extract_strided_slice %49 {offsets = [255, 0], sizes = [15, 64], strides = [1, 1]} : vector<810x64xf32> to vector<15x64xf32>
    %179 = arith.maximumf %177, %178 : vector<15x64xf32>
    %180 = vector.extract_strided_slice %179 {offsets = [0, 0], sizes = [3, 64], strides = [1, 1]} : vector<15x64xf32> to vector<3x64xf32>
    %cst_88 = arith.constant dense<0xFF800000> : vector<64xf32>
    %181 = vector.multi_reduction <maximumf>, %180, %cst_88 [0] : vector<3x64xf32> to vector<64xf32>
    %182 = vector.shape_cast %181 : vector<64xf32> to vector<1x64xf32>
    %c25 = arith.constant 25 : index
    %c0_89 = arith.constant 0 : index
    %183 = vector.load %arg11[%c25, %c0_89] : memref<90x64xf32, #tpu.memory_space<vmem>>, vector<1x64xf32>
    tpu.vector_store %arg11[%c25, %c0_89], %182 {strides = array<i32>} : memref<90x64xf32, #tpu.memory_space<vmem>>, vector<1x64xf32>,
    %184 = vector.extract_strided_slice %179 {offsets = [3, 0], sizes = [3, 64], strides = [1, 1]} : vector<15x64xf32> to vector<3x64xf32>
    %cst_90 = arith.constant dense<0xFF800000> : vector<64xf32>
    %185 = vector.multi_reduction <maximumf>, %184, %cst_90 [0] : vector<3x64xf32> to vector<64xf32>
    %186 = vector.shape_cast %185 : vector<64xf32> to vector<1x64xf32>
    %c26 = arith.constant 26 : index
    %c0_91 = arith.constant 0 : index
    %187 = vector.load %arg11[%c26, %c0_91] : memref<90x64xf32, #tpu.memory_space<vmem>>, vector<1x64xf32>
    tpu.vector_store %arg11[%c26, %c0_91], %186 {strides = array<i32>} : memref<90x64xf32, #tpu.memory_space<vmem>>, vector<1x64xf32>,
    %188 = vector.extract_strided_slice %179 {offsets = [6, 0], sizes = [3, 64], strides = [1, 1]} : vector<15x64xf32> to vector<3x64xf32>
    %cst_92 = arith.constant dense<0xFF800000> : vector<64xf32>
    %189 = vector.multi_reduction <maximumf>, %188, %cst_92 [0] : vector<3x64xf32> to vector<64xf32>
    %190 = vector.shape_cast %189 : vector<64xf32> to vector<1x64xf32>
    %c27 = arith.constant 27 : index
    %c0_93 = arith.constant 0 : index
    %191 = vector.load %arg11[%c27, %c0_93] : memref<90x64xf32, #tpu.memory_space<vmem>>, vector<1x64xf32>
    tpu.vector_store %arg11[%c27, %c0_93], %190 {strides = array<i32>} : memref<90x64xf32, #tpu.memory_space<vmem>>, vector<1x64xf32>,
    %192 = vector.extract_strided_slice %179 {offsets = [9, 0], sizes = [3, 64], strides = [1, 1]} : vector<15x64xf32> to vector<3x64xf32>
    %cst_94 = arith.constant dense<0xFF800000> : vector<64xf32>
    %193 = vector.multi_reduction <maximumf>, %192, %cst_94 [0] : vector<3x64xf32> to vector<64xf32>
    %194 = vector.shape_cast %193 : vector<64xf32> to vector<1x64xf32>
    %c28 = arith.constant 28 : index
    %c0_95 = arith.constant 0 : index
    %195 = vector.load %arg11[%c28, %c0_95] : memref<90x64xf32, #tpu.memory_space<vmem>>, vector<1x64xf32>
    tpu.vector_store %arg11[%c28, %c0_95], %194 {strides = array<i32>} : memref<90x64xf32, #tpu.memory_space<vmem>>, vector<1x64xf32>,
    %196 = vector.extract_strided_slice %179 {offsets = [12, 0], sizes = [3, 64], strides = [1, 1]} : vector<15x64xf32> to vector<3x64xf32>
    %cst_96 = arith.constant dense<0xFF800000> : vector<64xf32>
    %197 = vector.multi_reduction <maximumf>, %196, %cst_96 [0] : vector<3x64xf32> to vector<64xf32>
    %198 = vector.shape_cast %197 : vector<64xf32> to vector<1x64xf32>
    %c29 = arith.constant 29 : index
    %c0_97 = arith.constant 0 : index
    %199 = vector.load %arg11[%c29, %c0_97] : memref<90x64xf32, #tpu.memory_space<vmem>>, vector<1x64xf32>
    tpu.vector_store %arg11[%c29, %c0_97], %198 {strides = array<i32>} : memref<90x64xf32, #tpu.memory_space<vmem>>, vector<1x64xf32>,
    %200 = vector.extract_strided_slice %49 {offsets = [270, 0], sizes = [15, 64], strides = [1, 1]} : vector<810x64xf32> to vector<15x64xf32>
    %201 = vector.extract_strided_slice %49 {offsets = [285, 0], sizes = [15, 64], strides = [1, 1]} : vector<810x64xf32> to vector<15x64xf32>
    %202 = arith.maximumf %200, %201 : vector<15x64xf32>
    %203 = vector.extract_strided_slice %49 {offsets = [300, 0], sizes = [15, 64], strides = [1, 1]} : vector<810x64xf32> to vector<15x64xf32>
    %204 = arith.maximumf %202, %203 : vector<15x64xf32>
    %205 = vector.extract_strided_slice %204 {offsets = [0, 0], sizes = [3, 64], strides = [1, 1]} : vector<15x64xf32> to vector<3x64xf32>
    %cst_98 = arith.constant dense<0xFF800000> : vector<64xf32>
    %206 = vector.multi_reduction <maximumf>, %205, %cst_98 [0] : vector<3x64xf32> to vector<64xf32>
    %207 = vector.shape_cast %206 : vector<64xf32> to vector<1x64xf32>
    %c30 = arith.constant 30 : index
    %c0_99 = arith.constant 0 : index
    %208 = vector.load %arg11[%c30, %c0_99] : memref<90x64xf32, #tpu.memory_space<vmem>>, vector<1x64xf32>
    tpu.vector_store %arg11[%c30, %c0_99], %207 {strides = array<i32>} : memref<90x64xf32, #tpu.memory_space<vmem>>, vector<1x64xf32>,
    %209 = vector.extract_strided_slice %204 {offsets = [3, 0], sizes = [3, 64], strides = [1, 1]} : vector<15x64xf32> to vector<3x64xf32>
    %cst_100 = arith.constant dense<0xFF800000> : vector<64xf32>
    %210 = vector.multi_reduction <maximumf>, %209, %cst_100 [0] : vector<3x64xf32> to vector<64xf32>
    %211 = vector.shape_cast %210 : vector<64xf32> to vector<1x64xf32>
    %c31 = arith.constant 31 : index
    %c0_101 = arith.constant 0 : index
    %212 = vector.load %arg11[%c31, %c0_101] : memref<90x64xf32, #tpu.memory_space<vmem>>, vector<1x64xf32>
    tpu.vector_store %arg11[%c31, %c0_101], %211 {strides = array<i32>} : memref<90x64xf32, #tpu.memory_space<vmem>>, vector<1x64xf32>,
    %213 = vector.extract_strided_slice %204 {offsets = [6, 0], sizes = [3, 64], strides = [1, 1]} : vector<15x64xf32> to vector<3x64xf32>
    %cst_102 = arith.constant dense<0xFF800000> : vector<64xf32>
    %214 = vector.multi_reduction <maximumf>, %213, %cst_102 [0] : vector<3x64xf32> to vector<64xf32>
    %215 = vector.shape_cast %214 : vector<64xf32> to vector<1x64xf32>
    %c32 = arith.constant 32 : index
    %c0_103 = arith.constant 0 : index
    %216 = vector.load %arg11[%c32, %c0_103] : memref<90x64xf32, #tpu.memory_space<vmem>>, vector<1x64xf32>
    tpu.vector_store %arg11[%c32, %c0_103], %215 {strides = array<i32>} : memref<90x64xf32, #tpu.memory_space<vmem>>, vector<1x64xf32>,
    %217 = vector.extract_strided_slice %204 {offsets = [9, 0], sizes = [3, 64], strides = [1, 1]} : vector<15x64xf32> to vector<3x64xf32>
    %cst_104 = arith.constant dense<0xFF800000> : vector<64xf32>
    %218 = vector.multi_reduction <maximumf>, %217, %cst_104 [0] : vector<3x64xf32> to vector<64xf32>
    %219 = vector.shape_cast %218 : vector<64xf32> to vector<1x64xf32>
    %c33 = arith.constant 33 : index
    %c0_105 = arith.constant 0 : index
    %220 = vector.load %arg11[%c33, %c0_105] : memref<90x64xf32, #tpu.memory_space<vmem>>, vector<1x64xf32>
    tpu.vector_store %arg11[%c33, %c0_105], %219 {strides = array<i32>} : memref<90x64xf32, #tpu.memory_space<vmem>>, vector<1x64xf32>,
    %221 = vector.extract_strided_slice %204 {offsets = [12, 0], sizes = [3, 64], strides = [1, 1]} : vector<15x64xf32> to vector<3x64xf32>
    %cst_106 = arith.constant dense<0xFF800000> : vector<64xf32>
    %222 = vector.multi_reduction <maximumf>, %221, %cst_106 [0] : vector<3x64xf32> to vector<64xf32>
    %223 = vector.shape_cast %222 : vector<64xf32> to vector<1x64xf32>
    %c34 = arith.constant 34 : index
    %c0_107 = arith.constant 0 : index
    %224 = vector.load %arg11[%c34, %c0_107] : memref<90x64xf32, #tpu.memory_space<vmem>>, vector<1x64xf32>
    tpu.vector_store %arg11[%c34, %c0_107], %223 {strides = array<i32>} : memref<90x64xf32, #tpu.memory_space<vmem>>, vector<1x64xf32>,
    %225 = vector.extract_strided_slice %49 {offsets = [315, 0], sizes = [15, 64], strides = [1, 1]} : vector<810x64xf32> to vector<15x64xf32>
    %226 = vector.extract_strided_slice %49 {offsets = [330, 0], sizes = [15, 64], strides = [1, 1]} : vector<810x64xf32> to vector<15x64xf32>
    %227 = arith.maximumf %225, %226 : vector<15x64xf32>
    %228 = vector.extract_strided_slice %49 {offsets = [345, 0], sizes = [15, 64], strides = [1, 1]} : vector<810x64xf32> to vector<15x64xf32>
    %229 = arith.maximumf %227, %228 : vector<15x64xf32>
    %230 = vector.extract_strided_slice %229 {offsets = [0, 0], sizes = [3, 64], strides = [1, 1]} : vector<15x64xf32> to vector<3x64xf32>
    %cst_108 = arith.constant dense<0xFF800000> : vector<64xf32>
    %231 = vector.multi_reduction <maximumf>, %230, %cst_108 [0] : vector<3x64xf32> to vector<64xf32>
    %232 = vector.shape_cast %231 : vector<64xf32> to vector<1x64xf32>
    %c35 = arith.constant 35 : index
    %c0_109 = arith.constant 0 : index
    %233 = vector.load %arg11[%c35, %c0_109] : memref<90x64xf32, #tpu.memory_space<vmem>>, vector<1x64xf32>
    tpu.vector_store %arg11[%c35, %c0_109], %232 {strides = array<i32>} : memref<90x64xf32, #tpu.memory_space<vmem>>, vector<1x64xf32>,
    %234 = vector.extract_strided_slice %229 {offsets = [3, 0], sizes = [3, 64], strides = [1, 1]} : vector<15x64xf32> to vector<3x64xf32>
    %cst_110 = arith.constant dense<0xFF800000> : vector<64xf32>
    %235 = vector.multi_reduction <maximumf>, %234, %cst_110 [0] : vector<3x64xf32> to vector<64xf32>
    %236 = vector.shape_cast %235 : vector<64xf32> to vector<1x64xf32>
    %c36 = arith.constant 36 : index
    %c0_111 = arith.constant 0 : index
    %237 = vector.load %arg11[%c36, %c0_111] : memref<90x64xf32, #tpu.memory_space<vmem>>, vector<1x64xf32>
    tpu.vector_store %arg11[%c36, %c0_111], %236 {strides = array<i32>} : memref<90x64xf32, #tpu.memory_space<vmem>>, vector<1x64xf32>,
    %238 = vector.extract_strided_slice %229 {offsets = [6, 0], sizes = [3, 64], strides = [1, 1]} : vector<15x64xf32> to vector<3x64xf32>
    %cst_112 = arith.constant dense<0xFF800000> : vector<64xf32>
    %239 = vector.multi_reduction <maximumf>, %238, %cst_112 [0] : vector<3x64xf32> to vector<64xf32>
    %240 = vector.shape_cast %239 : vector<64xf32> to vector<1x64xf32>
    %c37 = arith.constant 37 : index
    %c0_113 = arith.constant 0 : index
    %241 = vector.load %arg11[%c37, %c0_113] : memref<90x64xf32, #tpu.memory_space<vmem>>, vector<1x64xf32>
    tpu.vector_store %arg11[%c37, %c0_113], %240 {strides = array<i32>} : memref<90x64xf32, #tpu.memory_space<vmem>>, vector<1x64xf32>,
    %242 = vector.extract_strided_slice %229 {offsets = [9, 0], sizes = [3, 64], strides = [1, 1]} : vector<15x64xf32> to vector<3x64xf32>
    %cst_114 = arith.constant dense<0xFF800000> : vector<64xf32>
    %243 = vector.multi_reduction <maximumf>, %242, %cst_114 [0] : vector<3x64xf32> to vector<64xf32>
    %244 = vector.shape_cast %243 : vector<64xf32> to vector<1x64xf32>
    %c38 = arith.constant 38 : index
    %c0_115 = arith.constant 0 : index
    %245 = vector.load %arg11[%c38, %c0_115] : memref<90x64xf32, #tpu.memory_space<vmem>>, vector<1x64xf32>
    tpu.vector_store %arg11[%c38, %c0_115], %244 {strides = array<i32>} : memref<90x64xf32, #tpu.memory_space<vmem>>, vector<1x64xf32>,
    %246 = vector.extract_strided_slice %229 {offsets = [12, 0], sizes = [3, 64], strides = [1, 1]} : vector<15x64xf32> to vector<3x64xf32>
    %cst_116 = arith.constant dense<0xFF800000> : vector<64xf32>
    %247 = vector.multi_reduction <maximumf>, %246, %cst_116 [0] : vector<3x64xf32> to vector<64xf32>
    %248 = vector.shape_cast %247 : vector<64xf32> to vector<1x64xf32>
    %c39 = arith.constant 39 : index
    %c0_117 = arith.constant 0 : index
    %249 = vector.load %arg11[%c39, %c0_117] : memref<90x64xf32, #tpu.memory_space<vmem>>, vector<1x64xf32>
    tpu.vector_store %arg11[%c39, %c0_117], %248 {strides = array<i32>} : memref<90x64xf32, #tpu.memory_space<vmem>>, vector<1x64xf32>,
    %250 = vector.extract_strided_slice %49 {offsets = [360, 0], sizes = [15, 64], strides = [1, 1]} : vector<810x64xf32> to vector<15x64xf32>
    %251 = vector.extract_strided_slice %49 {offsets = [375, 0], sizes = [15, 64], strides = [1, 1]} : vector<810x64xf32> to vector<15x64xf32>
    %252 = arith.maximumf %250, %251 : vector<15x64xf32>
    %253 = vector.extract_strided_slice %49 {offsets = [390, 0], sizes = [15, 64], strides = [1, 1]} : vector<810x64xf32> to vector<15x64xf32>
    %254 = arith.maximumf %252, %253 : vector<15x64xf32>
    %255 = vector.extract_strided_slice %254 {offsets = [0, 0], sizes = [3, 64], strides = [1, 1]} : vector<15x64xf32> to vector<3x64xf32>
    %cst_118 = arith.constant dense<0xFF800000> : vector<64xf32>
    %256 = vector.multi_reduction <maximumf>, %255, %cst_118 [0] : vector<3x64xf32> to vector<64xf32>
    %257 = vector.shape_cast %256 : vector<64xf32> to vector<1x64xf32>
    %c40 = arith.constant 40 : index
    %c0_119 = arith.constant 0 : index
    %258 = vector.load %arg11[%c40, %c0_119] : memref<90x64xf32, #tpu.memory_space<vmem>>, vector<1x64xf32>
    tpu.vector_store %arg11[%c40, %c0_119], %257 {strides = array<i32>} : memref<90x64xf32, #tpu.memory_space<vmem>>, vector<1x64xf32>,
    %259 = vector.extract_strided_slice %254 {offsets = [3, 0], sizes = [3, 64], strides = [1, 1]} : vector<15x64xf32> to vector<3x64xf32>
    %cst_120 = arith.constant dense<0xFF800000> : vector<64xf32>
    %260 = vector.multi_reduction <maximumf>, %259, %cst_120 [0] : vector<3x64xf32> to vector<64xf32>
    %261 = vector.shape_cast %260 : vector<64xf32> to vector<1x64xf32>
    %c41 = arith.constant 41 : index
    %c0_121 = arith.constant 0 : index
    %262 = vector.load %arg11[%c41, %c0_121] : memref<90x64xf32, #tpu.memory_space<vmem>>, vector<1x64xf32>
    tpu.vector_store %arg11[%c41, %c0_121], %261 {strides = array<i32>} : memref<90x64xf32, #tpu.memory_space<vmem>>, vector<1x64xf32>,
    %263 = vector.extract_strided_slice %254 {offsets = [6, 0], sizes = [3, 64], strides = [1, 1]} : vector<15x64xf32> to vector<3x64xf32>
    %cst_122 = arith.constant dense<0xFF800000> : vector<64xf32>
    %264 = vector.multi_reduction <maximumf>, %263, %cst_122 [0] : vector<3x64xf32> to vector<64xf32>
    %265 = vector.shape_cast %264 : vector<64xf32> to vector<1x64xf32>
    %c42 = arith.constant 42 : index
    %c0_123 = arith.constant 0 : index
    %266 = vector.load %arg11[%c42, %c0_123] : memref<90x64xf32, #tpu.memory_space<vmem>>, vector<1x64xf32>
    tpu.vector_store %arg11[%c42, %c0_123], %265 {strides = array<i32>} : memref<90x64xf32, #tpu.memory_space<vmem>>, vector<1x64xf32>,
    %267 = vector.extract_strided_slice %254 {offsets = [9, 0], sizes = [3, 64], strides = [1, 1]} : vector<15x64xf32> to vector<3x64xf32>
    %cst_124 = arith.constant dense<0xFF800000> : vector<64xf32>
    %268 = vector.multi_reduction <maximumf>, %267, %cst_124 [0] : vector<3x64xf32> to vector<64xf32>
    %269 = vector.shape_cast %268 : vector<64xf32> to vector<1x64xf32>
    %c43 = arith.constant 43 : index
    %c0_125 = arith.constant 0 : index
    %270 = vector.load %arg11[%c43, %c0_125] : memref<90x64xf32, #tpu.memory_space<vmem>>, vector<1x64xf32>
    tpu.vector_store %arg11[%c43, %c0_125], %269 {strides = array<i32>} : memref<90x64xf32, #tpu.memory_space<vmem>>, vector<1x64xf32>,
    %271 = vector.extract_strided_slice %254 {offsets = [12, 0], sizes = [3, 64], strides = [1, 1]} : vector<15x64xf32> to vector<3x64xf32>
    %cst_126 = arith.constant dense<0xFF800000> : vector<64xf32>
    %272 = vector.multi_reduction <maximumf>, %271, %cst_126 [0] : vector<3x64xf32> to vector<64xf32>
    %273 = vector.shape_cast %272 : vector<64xf32> to vector<1x64xf32>
    %c44 = arith.constant 44 : index
    %c0_127 = arith.constant 0 : index
    %274 = vector.load %arg11[%c44, %c0_127] : memref<90x64xf32, #tpu.memory_space<vmem>>, vector<1x64xf32>
    tpu.vector_store %arg11[%c44, %c0_127], %273 {strides = array<i32>} : memref<90x64xf32, #tpu.memory_space<vmem>>, vector<1x64xf32>,
    %275 = vector.extract_strided_slice %49 {offsets = [405, 0], sizes = [15, 64], strides = [1, 1]} : vector<810x64xf32> to vector<15x64xf32>
    %276 = vector.extract_strided_slice %49 {offsets = [420, 0], sizes = [15, 64], strides = [1, 1]} : vector<810x64xf32> to vector<15x64xf32>
    %277 = arith.maximumf %275, %276 : vector<15x64xf32>
    %278 = vector.extract_strided_slice %49 {offsets = [435, 0], sizes = [15, 64], strides = [1, 1]} : vector<810x64xf32> to vector<15x64xf32>
    %279 = arith.maximumf %277, %278 : vector<15x64xf32>
    %280 = vector.extract_strided_slice %279 {offsets = [0, 0], sizes = [3, 64], strides = [1, 1]} : vector<15x64xf32> to vector<3x64xf32>
    %cst_128 = arith.constant dense<0xFF800000> : vector<64xf32>
    %281 = vector.multi_reduction <maximumf>, %280, %cst_128 [0] : vector<3x64xf32> to vector<64xf32>
    %282 = vector.shape_cast %281 : vector<64xf32> to vector<1x64xf32>
    %c45 = arith.constant 45 : index
    %c0_129 = arith.constant 0 : index
    %283 = vector.load %arg11[%c45, %c0_129] : memref<90x64xf32, #tpu.memory_space<vmem>>, vector<1x64xf32>
    tpu.vector_store %arg11[%c45, %c0_129], %282 {strides = array<i32>} : memref<90x64xf32, #tpu.memory_space<vmem>>, vector<1x64xf32>,
    %284 = vector.extract_strided_slice %279 {offsets = [3, 0], sizes = [3, 64], strides = [1, 1]} : vector<15x64xf32> to vector<3x64xf32>
    %cst_130 = arith.constant dense<0xFF800000> : vector<64xf32>
    %285 = vector.multi_reduction <maximumf>, %284, %cst_130 [0] : vector<3x64xf32> to vector<64xf32>
    %286 = vector.shape_cast %285 : vector<64xf32> to vector<1x64xf32>
    %c46 = arith.constant 46 : index
    %c0_131 = arith.constant 0 : index
    %287 = vector.load %arg11[%c46, %c0_131] : memref<90x64xf32, #tpu.memory_space<vmem>>, vector<1x64xf32>
    tpu.vector_store %arg11[%c46, %c0_131], %286 {strides = array<i32>} : memref<90x64xf32, #tpu.memory_space<vmem>>, vector<1x64xf32>,
    %288 = vector.extract_strided_slice %279 {offsets = [6, 0], sizes = [3, 64], strides = [1, 1]} : vector<15x64xf32> to vector<3x64xf32>
    %cst_132 = arith.constant dense<0xFF800000> : vector<64xf32>
    %289 = vector.multi_reduction <maximumf>, %288, %cst_132 [0] : vector<3x64xf32> to vector<64xf32>
    %290 = vector.shape_cast %289 : vector<64xf32> to vector<1x64xf32>
    %c47 = arith.constant 47 : index
    %c0_133 = arith.constant 0 : index
    %291 = vector.load %arg11[%c47, %c0_133] : memref<90x64xf32, #tpu.memory_space<vmem>>, vector<1x64xf32>
    tpu.vector_store %arg11[%c47, %c0_133], %290 {strides = array<i32>} : memref<90x64xf32, #tpu.memory_space<vmem>>, vector<1x64xf32>,
    %292 = vector.extract_strided_slice %279 {offsets = [9, 0], sizes = [3, 64], strides = [1, 1]} : vector<15x64xf32> to vector<3x64xf32>
    %cst_134 = arith.constant dense<0xFF800000> : vector<64xf32>
    %293 = vector.multi_reduction <maximumf>, %292, %cst_134 [0] : vector<3x64xf32> to vector<64xf32>
    %294 = vector.shape_cast %293 : vector<64xf32> to vector<1x64xf32>
    %c48 = arith.constant 48 : index
    %c0_135 = arith.constant 0 : index
    %295 = vector.load %arg11[%c48, %c0_135] : memref<90x64xf32, #tpu.memory_space<vmem>>, vector<1x64xf32>
    tpu.vector_store %arg11[%c48, %c0_135], %294 {strides = array<i32>} : memref<90x64xf32, #tpu.memory_space<vmem>>, vector<1x64xf32>,
    %296 = vector.extract_strided_slice %279 {offsets = [12, 0], sizes = [3, 64], strides = [1, 1]} : vector<15x64xf32> to vector<3x64xf32>
    %cst_136 = arith.constant dense<0xFF800000> : vector<64xf32>
    %297 = vector.multi_reduction <maximumf>, %296, %cst_136 [0] : vector<3x64xf32> to vector<64xf32>
    %298 = vector.shape_cast %297 : vector<64xf32> to vector<1x64xf32>
    %c49 = arith.constant 49 : index
    %c0_137 = arith.constant 0 : index
    %299 = vector.load %arg11[%c49, %c0_137] : memref<90x64xf32, #tpu.memory_space<vmem>>, vector<1x64xf32>
    tpu.vector_store %arg11[%c49, %c0_137], %298 {strides = array<i32>} : memref<90x64xf32, #tpu.memory_space<vmem>>, vector<1x64xf32>,
    %300 = vector.extract_strided_slice %49 {offsets = [450, 0], sizes = [15, 64], strides = [1, 1]} : vector<810x64xf32> to vector<15x64xf32>
    %301 = vector.extract_strided_slice %49 {offsets = [465, 0], sizes = [15, 64], strides = [1, 1]} : vector<810x64xf32> to vector<15x64xf32>
    %302 = arith.maximumf %300, %301 : vector<15x64xf32>
    %303 = vector.extract_strided_slice %49 {offsets = [480, 0], sizes = [15, 64], strides = [1, 1]} : vector<810x64xf32> to vector<15x64xf32>
    %304 = arith.maximumf %302, %303 : vector<15x64xf32>
    %305 = vector.extract_strided_slice %304 {offsets = [0, 0], sizes = [3, 64], strides = [1, 1]} : vector<15x64xf32> to vector<3x64xf32>
    %cst_138 = arith.constant dense<0xFF800000> : vector<64xf32>
    %306 = vector.multi_reduction <maximumf>, %305, %cst_138 [0] : vector<3x64xf32> to vector<64xf32>
    %307 = vector.shape_cast %306 : vector<64xf32> to vector<1x64xf32>
    %c50 = arith.constant 50 : index
    %c0_139 = arith.constant 0 : index
    %308 = vector.load %arg11[%c50, %c0_139] : memref<90x64xf32, #tpu.memory_space<vmem>>, vector<1x64xf32>
    tpu.vector_store %arg11[%c50, %c0_139], %307 {strides = array<i32>} : memref<90x64xf32, #tpu.memory_space<vmem>>, vector<1x64xf32>,
    %309 = vector.extract_strided_slice %304 {offsets = [3, 0], sizes = [3, 64], strides = [1, 1]} : vector<15x64xf32> to vector<3x64xf32>
    %cst_140 = arith.constant dense<0xFF800000> : vector<64xf32>
    %310 = vector.multi_reduction <maximumf>, %309, %cst_140 [0] : vector<3x64xf32> to vector<64xf32>
    %311 = vector.shape_cast %310 : vector<64xf32> to vector<1x64xf32>
    %c51 = arith.constant 51 : index
    %c0_141 = arith.constant 0 : index
    %312 = vector.load %arg11[%c51, %c0_141] : memref<90x64xf32, #tpu.memory_space<vmem>>, vector<1x64xf32>
    tpu.vector_store %arg11[%c51, %c0_141], %311 {strides = array<i32>} : memref<90x64xf32, #tpu.memory_space<vmem>>, vector<1x64xf32>,
    %313 = vector.extract_strided_slice %304 {offsets = [6, 0], sizes = [3, 64], strides = [1, 1]} : vector<15x64xf32> to vector<3x64xf32>
    %cst_142 = arith.constant dense<0xFF800000> : vector<64xf32>
    %314 = vector.multi_reduction <maximumf>, %313, %cst_142 [0] : vector<3x64xf32> to vector<64xf32>
    %315 = vector.shape_cast %314 : vector<64xf32> to vector<1x64xf32>
    %c52 = arith.constant 52 : index
    %c0_143 = arith.constant 0 : index
    %316 = vector.load %arg11[%c52, %c0_143] : memref<90x64xf32, #tpu.memory_space<vmem>>, vector<1x64xf32>
    tpu.vector_store %arg11[%c52, %c0_143], %315 {strides = array<i32>} : memref<90x64xf32, #tpu.memory_space<vmem>>, vector<1x64xf32>,
    %317 = vector.extract_strided_slice %304 {offsets = [9, 0], sizes = [3, 64], strides = [1, 1]} : vector<15x64xf32> to vector<3x64xf32>
    %cst_144 = arith.constant dense<0xFF800000> : vector<64xf32>
    %318 = vector.multi_reduction <maximumf>, %317, %cst_144 [0] : vector<3x64xf32> to vector<64xf32>
    %319 = vector.shape_cast %318 : vector<64xf32> to vector<1x64xf32>
    %c53 = arith.constant 53 : index
    %c0_145 = arith.constant 0 : index
    %320 = vector.load %arg11[%c53, %c0_145] : memref<90x64xf32, #tpu.memory_space<vmem>>, vector<1x64xf32>
    tpu.vector_store %arg11[%c53, %c0_145], %319 {strides = array<i32>} : memref<90x64xf32, #tpu.memory_space<vmem>>, vector<1x64xf32>,
    %321 = vector.extract_strided_slice %304 {offsets = [12, 0], sizes = [3, 64], strides = [1, 1]} : vector<15x64xf32> to vector<3x64xf32>
    %cst_146 = arith.constant dense<0xFF800000> : vector<64xf32>
    %322 = vector.multi_reduction <maximumf>, %321, %cst_146 [0] : vector<3x64xf32> to vector<64xf32>
    %323 = vector.shape_cast %322 : vector<64xf32> to vector<1x64xf32>
    %c54 = arith.constant 54 : index
    %c0_147 = arith.constant 0 : index
    %324 = vector.load %arg11[%c54, %c0_147] : memref<90x64xf32, #tpu.memory_space<vmem>>, vector<1x64xf32>
    tpu.vector_store %arg11[%c54, %c0_147], %323 {strides = array<i32>} : memref<90x64xf32, #tpu.memory_space<vmem>>, vector<1x64xf32>,
    %325 = vector.extract_strided_slice %49 {offsets = [495, 0], sizes = [15, 64], strides = [1, 1]} : vector<810x64xf32> to vector<15x64xf32>
    %326 = vector.extract_strided_slice %49 {offsets = [510, 0], sizes = [15, 64], strides = [1, 1]} : vector<810x64xf32> to vector<15x64xf32>
    %327 = arith.maximumf %325, %326 : vector<15x64xf32>
    %328 = vector.extract_strided_slice %49 {offsets = [525, 0], sizes = [15, 64], strides = [1, 1]} : vector<810x64xf32> to vector<15x64xf32>
    %329 = arith.maximumf %327, %328 : vector<15x64xf32>
    %330 = vector.extract_strided_slice %329 {offsets = [0, 0], sizes = [3, 64], strides = [1, 1]} : vector<15x64xf32> to vector<3x64xf32>
    %cst_148 = arith.constant dense<0xFF800000> : vector<64xf32>
    %331 = vector.multi_reduction <maximumf>, %330, %cst_148 [0] : vector<3x64xf32> to vector<64xf32>
    %332 = vector.shape_cast %331 : vector<64xf32> to vector<1x64xf32>
    %c55 = arith.constant 55 : index
    %c0_149 = arith.constant 0 : index
    %333 = vector.load %arg11[%c55, %c0_149] : memref<90x64xf32, #tpu.memory_space<vmem>>, vector<1x64xf32>
    tpu.vector_store %arg11[%c55, %c0_149], %332 {strides = array<i32>} : memref<90x64xf32, #tpu.memory_space<vmem>>, vector<1x64xf32>,
    %334 = vector.extract_strided_slice %329 {offsets = [3, 0], sizes = [3, 64], strides = [1, 1]} : vector<15x64xf32> to vector<3x64xf32>
    %cst_150 = arith.constant dense<0xFF800000> : vector<64xf32>
    %335 = vector.multi_reduction <maximumf>, %334, %cst_150 [0] : vector<3x64xf32> to vector<64xf32>
    %336 = vector.shape_cast %335 : vector<64xf32> to vector<1x64xf32>
    %c56 = arith.constant 56 : index
    %c0_151 = arith.constant 0 : index
    %337 = vector.load %arg11[%c56, %c0_151] : memref<90x64xf32, #tpu.memory_space<vmem>>, vector<1x64xf32>
    tpu.vector_store %arg11[%c56, %c0_151], %336 {strides = array<i32>} : memref<90x64xf32, #tpu.memory_space<vmem>>, vector<1x64xf32>,
    %338 = vector.extract_strided_slice %329 {offsets = [6, 0], sizes = [3, 64], strides = [1, 1]} : vector<15x64xf32> to vector<3x64xf32>
    %cst_152 = arith.constant dense<0xFF800000> : vector<64xf32>
    %339 = vector.multi_reduction <maximumf>, %338, %cst_152 [0] : vector<3x64xf32> to vector<64xf32>
    %340 = vector.shape_cast %339 : vector<64xf32> to vector<1x64xf32>
    %c57 = arith.constant 57 : index
    %c0_153 = arith.constant 0 : index
    %341 = vector.load %arg11[%c57, %c0_153] : memref<90x64xf32, #tpu.memory_space<vmem>>, vector<1x64xf32>
    tpu.vector_store %arg11[%c57, %c0_153], %340 {strides = array<i32>} : memref<90x64xf32, #tpu.memory_space<vmem>>, vector<1x64xf32>,
    %342 = vector.extract_strided_slice %329 {offsets = [9, 0], sizes = [3, 64], strides = [1, 1]} : vector<15x64xf32> to vector<3x64xf32>
    %cst_154 = arith.constant dense<0xFF800000> : vector<64xf32>
    %343 = vector.multi_reduction <maximumf>, %342, %cst_154 [0] : vector<3x64xf32> to vector<64xf32>
    %344 = vector.shape_cast %343 : vector<64xf32> to vector<1x64xf32>
    %c58 = arith.constant 58 : index
    %c0_155 = arith.constant 0 : index
    %345 = vector.load %arg11[%c58, %c0_155] : memref<90x64xf32, #tpu.memory_space<vmem>>, vector<1x64xf32>
    tpu.vector_store %arg11[%c58, %c0_155], %344 {strides = array<i32>} : memref<90x64xf32, #tpu.memory_space<vmem>>, vector<1x64xf32>,
    %346 = vector.extract_strided_slice %329 {offsets = [12, 0], sizes = [3, 64], strides = [1, 1]} : vector<15x64xf32> to vector<3x64xf32>
    %cst_156 = arith.constant dense<0xFF800000> : vector<64xf32>
    %347 = vector.multi_reduction <maximumf>, %346, %cst_156 [0] : vector<3x64xf32> to vector<64xf32>
    %348 = vector.shape_cast %347 : vector<64xf32> to vector<1x64xf32>
    %c59 = arith.constant 59 : index
    %c0_157 = arith.constant 0 : index
    %349 = vector.load %arg11[%c59, %c0_157] : memref<90x64xf32, #tpu.memory_space<vmem>>, vector<1x64xf32>
    tpu.vector_store %arg11[%c59, %c0_157], %348 {strides = array<i32>} : memref<90x64xf32, #tpu.memory_space<vmem>>, vector<1x64xf32>,
    %350 = vector.extract_strided_slice %49 {offsets = [540, 0], sizes = [15, 64], strides = [1, 1]} : vector<810x64xf32> to vector<15x64xf32>
    %351 = vector.extract_strided_slice %49 {offsets = [555, 0], sizes = [15, 64], strides = [1, 1]} : vector<810x64xf32> to vector<15x64xf32>
    %352 = arith.maximumf %350, %351 : vector<15x64xf32>
    %353 = vector.extract_strided_slice %49 {offsets = [570, 0], sizes = [15, 64], strides = [1, 1]} : vector<810x64xf32> to vector<15x64xf32>
    %354 = arith.maximumf %352, %353 : vector<15x64xf32>
    %355 = vector.extract_strided_slice %354 {offsets = [0, 0], sizes = [3, 64], strides = [1, 1]} : vector<15x64xf32> to vector<3x64xf32>
    %cst_158 = arith.constant dense<0xFF800000> : vector<64xf32>
    %356 = vector.multi_reduction <maximumf>, %355, %cst_158 [0] : vector<3x64xf32> to vector<64xf32>
    %357 = vector.shape_cast %356 : vector<64xf32> to vector<1x64xf32>
    %c60 = arith.constant 60 : index
    %c0_159 = arith.constant 0 : index
    %358 = vector.load %arg11[%c60, %c0_159] : memref<90x64xf32, #tpu.memory_space<vmem>>, vector<1x64xf32>
    tpu.vector_store %arg11[%c60, %c0_159], %357 {strides = array<i32>} : memref<90x64xf32, #tpu.memory_space<vmem>>, vector<1x64xf32>,
    %359 = vector.extract_strided_slice %354 {offsets = [3, 0], sizes = [3, 64], strides = [1, 1]} : vector<15x64xf32> to vector<3x64xf32>
    %cst_160 = arith.constant dense<0xFF800000> : vector<64xf32>
    %360 = vector.multi_reduction <maximumf>, %359, %cst_160 [0] : vector<3x64xf32> to vector<64xf32>
    %361 = vector.shape_cast %360 : vector<64xf32> to vector<1x64xf32>
    %c61 = arith.constant 61 : index
    %c0_161 = arith.constant 0 : index
    %362 = vector.load %arg11[%c61, %c0_161] : memref<90x64xf32, #tpu.memory_space<vmem>>, vector<1x64xf32>
    tpu.vector_store %arg11[%c61, %c0_161], %361 {strides = array<i32>} : memref<90x64xf32, #tpu.memory_space<vmem>>, vector<1x64xf32>,
    %363 = vector.extract_strided_slice %354 {offsets = [6, 0], sizes = [3, 64], strides = [1, 1]} : vector<15x64xf32> to vector<3x64xf32>
    %cst_162 = arith.constant dense<0xFF800000> : vector<64xf32>
    %364 = vector.multi_reduction <maximumf>, %363, %cst_162 [0] : vector<3x64xf32> to vector<64xf32>
    %365 = vector.shape_cast %364 : vector<64xf32> to vector<1x64xf32>
    %c62 = arith.constant 62 : index
    %c0_163 = arith.constant 0 : index
    %366 = vector.load %arg11[%c62, %c0_163] : memref<90x64xf32, #tpu.memory_space<vmem>>, vector<1x64xf32>
    tpu.vector_store %arg11[%c62, %c0_163], %365 {strides = array<i32>} : memref<90x64xf32, #tpu.memory_space<vmem>>, vector<1x64xf32>,
    %367 = vector.extract_strided_slice %354 {offsets = [9, 0], sizes = [3, 64], strides = [1, 1]} : vector<15x64xf32> to vector<3x64xf32>
    %cst_164 = arith.constant dense<0xFF800000> : vector<64xf32>
    %368 = vector.multi_reduction <maximumf>, %367, %cst_164 [0] : vector<3x64xf32> to vector<64xf32>
    %369 = vector.shape_cast %368 : vector<64xf32> to vector<1x64xf32>
    %c63 = arith.constant 63 : index
    %c0_165 = arith.constant 0 : index
    %370 = vector.load %arg11[%c63, %c0_165] : memref<90x64xf32, #tpu.memory_space<vmem>>, vector<1x64xf32>
    tpu.vector_store %arg11[%c63, %c0_165], %369 {strides = array<i32>} : memref<90x64xf32, #tpu.memory_space<vmem>>, vector<1x64xf32>,
    %371 = vector.extract_strided_slice %354 {offsets = [12, 0], sizes = [3, 64], strides = [1, 1]} : vector<15x64xf32> to vector<3x64xf32>
    %cst_166 = arith.constant dense<0xFF800000> : vector<64xf32>
    %372 = vector.multi_reduction <maximumf>, %371, %cst_166 [0] : vector<3x64xf32> to vector<64xf32>
    %373 = vector.shape_cast %372 : vector<64xf32> to vector<1x64xf32>
    %c64 = arith.constant 64 : index
    %c0_167 = arith.constant 0 : index
    %374 = vector.load %arg11[%c64, %c0_167] : memref<90x64xf32, #tpu.memory_space<vmem>>, vector<1x64xf32>
    tpu.vector_store %arg11[%c64, %c0_167], %373 {strides = array<i32>} : memref<90x64xf32, #tpu.memory_space<vmem>>, vector<1x64xf32>,
    %375 = vector.extract_strided_slice %49 {offsets = [585, 0], sizes = [15, 64], strides = [1, 1]} : vector<810x64xf32> to vector<15x64xf32>
    %376 = vector.extract_strided_slice %49 {offsets = [600, 0], sizes = [15, 64], strides = [1, 1]} : vector<810x64xf32> to vector<15x64xf32>
    %377 = arith.maximumf %375, %376 : vector<15x64xf32>
    %378 = vector.extract_strided_slice %49 {offsets = [615, 0], sizes = [15, 64], strides = [1, 1]} : vector<810x64xf32> to vector<15x64xf32>
    %379 = arith.maximumf %377, %378 : vector<15x64xf32>
    %380 = vector.extract_strided_slice %379 {offsets = [0, 0], sizes = [3, 64], strides = [1, 1]} : vector<15x64xf32> to vector<3x64xf32>
    %cst_168 = arith.constant dense<0xFF800000> : vector<64xf32>
    %381 = vector.multi_reduction <maximumf>, %380, %cst_168 [0] : vector<3x64xf32> to vector<64xf32>
    %382 = vector.shape_cast %381 : vector<64xf32> to vector<1x64xf32>
    %c65 = arith.constant 65 : index
    %c0_169 = arith.constant 0 : index
    %383 = vector.load %arg11[%c65, %c0_169] : memref<90x64xf32, #tpu.memory_space<vmem>>, vector<1x64xf32>
    tpu.vector_store %arg11[%c65, %c0_169], %382 {strides = array<i32>} : memref<90x64xf32, #tpu.memory_space<vmem>>, vector<1x64xf32>,
    %384 = vector.extract_strided_slice %379 {offsets = [3, 0], sizes = [3, 64], strides = [1, 1]} : vector<15x64xf32> to vector<3x64xf32>
    %cst_170 = arith.constant dense<0xFF800000> : vector<64xf32>
    %385 = vector.multi_reduction <maximumf>, %384, %cst_170 [0] : vector<3x64xf32> to vector<64xf32>
    %386 = vector.shape_cast %385 : vector<64xf32> to vector<1x64xf32>
    %c66 = arith.constant 66 : index
    %c0_171 = arith.constant 0 : index
    %387 = vector.load %arg11[%c66, %c0_171] : memref<90x64xf32, #tpu.memory_space<vmem>>, vector<1x64xf32>
    tpu.vector_store %arg11[%c66, %c0_171], %386 {strides = array<i32>} : memref<90x64xf32, #tpu.memory_space<vmem>>, vector<1x64xf32>,
    %388 = vector.extract_strided_slice %379 {offsets = [6, 0], sizes = [3, 64], strides = [1, 1]} : vector<15x64xf32> to vector<3x64xf32>
    %cst_172 = arith.constant dense<0xFF800000> : vector<64xf32>
    %389 = vector.multi_reduction <maximumf>, %388, %cst_172 [0] : vector<3x64xf32> to vector<64xf32>
    %390 = vector.shape_cast %389 : vector<64xf32> to vector<1x64xf32>
    %c67 = arith.constant 67 : index
    %c0_173 = arith.constant 0 : index
    %391 = vector.load %arg11[%c67, %c0_173] : memref<90x64xf32, #tpu.memory_space<vmem>>, vector<1x64xf32>
    tpu.vector_store %arg11[%c67, %c0_173], %390 {strides = array<i32>} : memref<90x64xf32, #tpu.memory_space<vmem>>, vector<1x64xf32>,
    %392 = vector.extract_strided_slice %379 {offsets = [9, 0], sizes = [3, 64], strides = [1, 1]} : vector<15x64xf32> to vector<3x64xf32>
    %cst_174 = arith.constant dense<0xFF800000> : vector<64xf32>
    %393 = vector.multi_reduction <maximumf>, %392, %cst_174 [0] : vector<3x64xf32> to vector<64xf32>
    %394 = vector.shape_cast %393 : vector<64xf32> to vector<1x64xf32>
    %c68 = arith.constant 68 : index
    %c0_175 = arith.constant 0 : index
    %395 = vector.load %arg11[%c68, %c0_175] : memref<90x64xf32, #tpu.memory_space<vmem>>, vector<1x64xf32>
    tpu.vector_store %arg11[%c68, %c0_175], %394 {strides = array<i32>} : memref<90x64xf32, #tpu.memory_space<vmem>>, vector<1x64xf32>,
    %396 = vector.extract_strided_slice %379 {offsets = [12, 0], sizes = [3, 64], strides = [1, 1]} : vector<15x64xf32> to vector<3x64xf32>
    %cst_176 = arith.constant dense<0xFF800000> : vector<64xf32>
    %397 = vector.multi_reduction <maximumf>, %396, %cst_176 [0] : vector<3x64xf32> to vector<64xf32>
    %398 = vector.shape_cast %397 : vector<64xf32> to vector<1x64xf32>
    %c69 = arith.constant 69 : index
    %c0_177 = arith.constant 0 : index
    %399 = vector.load %arg11[%c69, %c0_177] : memref<90x64xf32, #tpu.memory_space<vmem>>, vector<1x64xf32>
    tpu.vector_store %arg11[%c69, %c0_177], %398 {strides = array<i32>} : memref<90x64xf32, #tpu.memory_space<vmem>>, vector<1x64xf32>,
    %400 = vector.extract_strided_slice %49 {offsets = [630, 0], sizes = [15, 64], strides = [1, 1]} : vector<810x64xf32> to vector<15x64xf32>
    %401 = vector.extract_strided_slice %49 {offsets = [645, 0], sizes = [15, 64], strides = [1, 1]} : vector<810x64xf32> to vector<15x64xf32>
    %402 = arith.maximumf %400, %401 : vector<15x64xf32>
    %403 = vector.extract_strided_slice %49 {offsets = [660, 0], sizes = [15, 64], strides = [1, 1]} : vector<810x64xf32> to vector<15x64xf32>
    %404 = arith.maximumf %402, %403 : vector<15x64xf32>
    %405 = vector.extract_strided_slice %404 {offsets = [0, 0], sizes = [3, 64], strides = [1, 1]} : vector<15x64xf32> to vector<3x64xf32>
    %cst_178 = arith.constant dense<0xFF800000> : vector<64xf32>
    %406 = vector.multi_reduction <maximumf>, %405, %cst_178 [0] : vector<3x64xf32> to vector<64xf32>
    %407 = vector.shape_cast %406 : vector<64xf32> to vector<1x64xf32>
    %c70 = arith.constant 70 : index
    %c0_179 = arith.constant 0 : index
    %408 = vector.load %arg11[%c70, %c0_179] : memref<90x64xf32, #tpu.memory_space<vmem>>, vector<1x64xf32>
    tpu.vector_store %arg11[%c70, %c0_179], %407 {strides = array<i32>} : memref<90x64xf32, #tpu.memory_space<vmem>>, vector<1x64xf32>,
    %409 = vector.extract_strided_slice %404 {offsets = [3, 0], sizes = [3, 64], strides = [1, 1]} : vector<15x64xf32> to vector<3x64xf32>
    %cst_180 = arith.constant dense<0xFF800000> : vector<64xf32>
    %410 = vector.multi_reduction <maximumf>, %409, %cst_180 [0] : vector<3x64xf32> to vector<64xf32>
    %411 = vector.shape_cast %410 : vector<64xf32> to vector<1x64xf32>
    %c71 = arith.constant 71 : index
    %c0_181 = arith.constant 0 : index
    %412 = vector.load %arg11[%c71, %c0_181] : memref<90x64xf32, #tpu.memory_space<vmem>>, vector<1x64xf32>
    tpu.vector_store %arg11[%c71, %c0_181], %411 {strides = array<i32>} : memref<90x64xf32, #tpu.memory_space<vmem>>, vector<1x64xf32>,
    %413 = vector.extract_strided_slice %404 {offsets = [6, 0], sizes = [3, 64], strides = [1, 1]} : vector<15x64xf32> to vector<3x64xf32>
    %cst_182 = arith.constant dense<0xFF800000> : vector<64xf32>
    %414 = vector.multi_reduction <maximumf>, %413, %cst_182 [0] : vector<3x64xf32> to vector<64xf32>
    %415 = vector.shape_cast %414 : vector<64xf32> to vector<1x64xf32>
    %c72 = arith.constant 72 : index
    %c0_183 = arith.constant 0 : index
    %416 = vector.load %arg11[%c72, %c0_183] : memref<90x64xf32, #tpu.memory_space<vmem>>, vector<1x64xf32>
    tpu.vector_store %arg11[%c72, %c0_183], %415 {strides = array<i32>} : memref<90x64xf32, #tpu.memory_space<vmem>>, vector<1x64xf32>,
    %417 = vector.extract_strided_slice %404 {offsets = [9, 0], sizes = [3, 64], strides = [1, 1]} : vector<15x64xf32> to vector<3x64xf32>
    %cst_184 = arith.constant dense<0xFF800000> : vector<64xf32>
    %418 = vector.multi_reduction <maximumf>, %417, %cst_184 [0] : vector<3x64xf32> to vector<64xf32>
    %419 = vector.shape_cast %418 : vector<64xf32> to vector<1x64xf32>
    %c73 = arith.constant 73 : index
    %c0_185 = arith.constant 0 : index
    %420 = vector.load %arg11[%c73, %c0_185] : memref<90x64xf32, #tpu.memory_space<vmem>>, vector<1x64xf32>
    tpu.vector_store %arg11[%c73, %c0_185], %419 {strides = array<i32>} : memref<90x64xf32, #tpu.memory_space<vmem>>, vector<1x64xf32>,
    %421 = vector.extract_strided_slice %404 {offsets = [12, 0], sizes = [3, 64], strides = [1, 1]} : vector<15x64xf32> to vector<3x64xf32>
    %cst_186 = arith.constant dense<0xFF800000> : vector<64xf32>
    %422 = vector.multi_reduction <maximumf>, %421, %cst_186 [0] : vector<3x64xf32> to vector<64xf32>
    %423 = vector.shape_cast %422 : vector<64xf32> to vector<1x64xf32>
    %c74 = arith.constant 74 : index
    %c0_187 = arith.constant 0 : index
    %424 = vector.load %arg11[%c74, %c0_187] : memref<90x64xf32, #tpu.memory_space<vmem>>, vector<1x64xf32>
    tpu.vector_store %arg11[%c74, %c0_187], %423 {strides = array<i32>} : memref<90x64xf32, #tpu.memory_space<vmem>>, vector<1x64xf32>,
    %425 = vector.extract_strided_slice %49 {offsets = [675, 0], sizes = [15, 64], strides = [1, 1]} : vector<810x64xf32> to vector<15x64xf32>
    %426 = vector.extract_strided_slice %49 {offsets = [690, 0], sizes = [15, 64], strides = [1, 1]} : vector<810x64xf32> to vector<15x64xf32>
    %427 = arith.maximumf %425, %426 : vector<15x64xf32>
    %428 = vector.extract_strided_slice %49 {offsets = [705, 0], sizes = [15, 64], strides = [1, 1]} : vector<810x64xf32> to vector<15x64xf32>
    %429 = arith.maximumf %427, %428 : vector<15x64xf32>
    %430 = vector.extract_strided_slice %429 {offsets = [0, 0], sizes = [3, 64], strides = [1, 1]} : vector<15x64xf32> to vector<3x64xf32>
    %cst_188 = arith.constant dense<0xFF800000> : vector<64xf32>
    %431 = vector.multi_reduction <maximumf>, %430, %cst_188 [0] : vector<3x64xf32> to vector<64xf32>
    %432 = vector.shape_cast %431 : vector<64xf32> to vector<1x64xf32>
    %c75 = arith.constant 75 : index
    %c0_189 = arith.constant 0 : index
    %433 = vector.load %arg11[%c75, %c0_189] : memref<90x64xf32, #tpu.memory_space<vmem>>, vector<1x64xf32>
    tpu.vector_store %arg11[%c75, %c0_189], %432 {strides = array<i32>} : memref<90x64xf32, #tpu.memory_space<vmem>>, vector<1x64xf32>,
    %434 = vector.extract_strided_slice %429 {offsets = [3, 0], sizes = [3, 64], strides = [1, 1]} : vector<15x64xf32> to vector<3x64xf32>
    %cst_190 = arith.constant dense<0xFF800000> : vector<64xf32>
    %435 = vector.multi_reduction <maximumf>, %434, %cst_190 [0] : vector<3x64xf32> to vector<64xf32>
    %436 = vector.shape_cast %435 : vector<64xf32> to vector<1x64xf32>
    %c76 = arith.constant 76 : index
    %c0_191 = arith.constant 0 : index
    %437 = vector.load %arg11[%c76, %c0_191] : memref<90x64xf32, #tpu.memory_space<vmem>>, vector<1x64xf32>
    tpu.vector_store %arg11[%c76, %c0_191], %436 {strides = array<i32>} : memref<90x64xf32, #tpu.memory_space<vmem>>, vector<1x64xf32>,
    %438 = vector.extract_strided_slice %429 {offsets = [6, 0], sizes = [3, 64], strides = [1, 1]} : vector<15x64xf32> to vector<3x64xf32>
    %cst_192 = arith.constant dense<0xFF800000> : vector<64xf32>
    %439 = vector.multi_reduction <maximumf>, %438, %cst_192 [0] : vector<3x64xf32> to vector<64xf32>
    %440 = vector.shape_cast %439 : vector<64xf32> to vector<1x64xf32>
    %c77 = arith.constant 77 : index
    %c0_193 = arith.constant 0 : index
    %441 = vector.load %arg11[%c77, %c0_193] : memref<90x64xf32, #tpu.memory_space<vmem>>, vector<1x64xf32>
    tpu.vector_store %arg11[%c77, %c0_193], %440 {strides = array<i32>} : memref<90x64xf32, #tpu.memory_space<vmem>>, vector<1x64xf32>,
    %442 = vector.extract_strided_slice %429 {offsets = [9, 0], sizes = [3, 64], strides = [1, 1]} : vector<15x64xf32> to vector<3x64xf32>
    %cst_194 = arith.constant dense<0xFF800000> : vector<64xf32>
    %443 = vector.multi_reduction <maximumf>, %442, %cst_194 [0] : vector<3x64xf32> to vector<64xf32>
    %444 = vector.shape_cast %443 : vector<64xf32> to vector<1x64xf32>
    %c78 = arith.constant 78 : index
    %c0_195 = arith.constant 0 : index
    %445 = vector.load %arg11[%c78, %c0_195] : memref<90x64xf32, #tpu.memory_space<vmem>>, vector<1x64xf32>
    tpu.vector_store %arg11[%c78, %c0_195], %444 {strides = array<i32>} : memref<90x64xf32, #tpu.memory_space<vmem>>, vector<1x64xf32>,
    %446 = vector.extract_strided_slice %429 {offsets = [12, 0], sizes = [3, 64], strides = [1, 1]} : vector<15x64xf32> to vector<3x64xf32>
    %cst_196 = arith.constant dense<0xFF800000> : vector<64xf32>
    %447 = vector.multi_reduction <maximumf>, %446, %cst_196 [0] : vector<3x64xf32> to vector<64xf32>
    %448 = vector.shape_cast %447 : vector<64xf32> to vector<1x64xf32>
    %c79 = arith.constant 79 : index
    %c0_197 = arith.constant 0 : index
    %449 = vector.load %arg11[%c79, %c0_197] : memref<90x64xf32, #tpu.memory_space<vmem>>, vector<1x64xf32>
    tpu.vector_store %arg11[%c79, %c0_197], %448 {strides = array<i32>} : memref<90x64xf32, #tpu.memory_space<vmem>>, vector<1x64xf32>,
    %450 = vector.extract_strided_slice %49 {offsets = [720, 0], sizes = [15, 64], strides = [1, 1]} : vector<810x64xf32> to vector<15x64xf32>
    %451 = vector.extract_strided_slice %49 {offsets = [735, 0], sizes = [15, 64], strides = [1, 1]} : vector<810x64xf32> to vector<15x64xf32>
    %452 = arith.maximumf %450, %451 : vector<15x64xf32>
    %453 = vector.extract_strided_slice %49 {offsets = [750, 0], sizes = [15, 64], strides = [1, 1]} : vector<810x64xf32> to vector<15x64xf32>
    %454 = arith.maximumf %452, %453 : vector<15x64xf32>
    %455 = vector.extract_strided_slice %454 {offsets = [0, 0], sizes = [3, 64], strides = [1, 1]} : vector<15x64xf32> to vector<3x64xf32>
    %cst_198 = arith.constant dense<0xFF800000> : vector<64xf32>
    %456 = vector.multi_reduction <maximumf>, %455, %cst_198 [0] : vector<3x64xf32> to vector<64xf32>
    %457 = vector.shape_cast %456 : vector<64xf32> to vector<1x64xf32>
    %c80 = arith.constant 80 : index
    %c0_199 = arith.constant 0 : index
    %458 = vector.load %arg11[%c80, %c0_199] : memref<90x64xf32, #tpu.memory_space<vmem>>, vector<1x64xf32>
    tpu.vector_store %arg11[%c80, %c0_199], %457 {strides = array<i32>} : memref<90x64xf32, #tpu.memory_space<vmem>>, vector<1x64xf32>,
    %459 = vector.extract_strided_slice %454 {offsets = [3, 0], sizes = [3, 64], strides = [1, 1]} : vector<15x64xf32> to vector<3x64xf32>
    %cst_200 = arith.constant dense<0xFF800000> : vector<64xf32>
    %460 = vector.multi_reduction <maximumf>, %459, %cst_200 [0] : vector<3x64xf32> to vector<64xf32>
    %461 = vector.shape_cast %460 : vector<64xf32> to vector<1x64xf32>
    %c81 = arith.constant 81 : index
    %c0_201 = arith.constant 0 : index
    %462 = vector.load %arg11[%c81, %c0_201] : memref<90x64xf32, #tpu.memory_space<vmem>>, vector<1x64xf32>
    tpu.vector_store %arg11[%c81, %c0_201], %461 {strides = array<i32>} : memref<90x64xf32, #tpu.memory_space<vmem>>, vector<1x64xf32>,
    %463 = vector.extract_strided_slice %454 {offsets = [6, 0], sizes = [3, 64], strides = [1, 1]} : vector<15x64xf32> to vector<3x64xf32>
    %cst_202 = arith.constant dense<0xFF800000> : vector<64xf32>
    %464 = vector.multi_reduction <maximumf>, %463, %cst_202 [0] : vector<3x64xf32> to vector<64xf32>
    %465 = vector.shape_cast %464 : vector<64xf32> to vector<1x64xf32>
    %c82 = arith.constant 82 : index
    %c0_203 = arith.constant 0 : index
    %466 = vector.load %arg11[%c82, %c0_203] : memref<90x64xf32, #tpu.memory_space<vmem>>, vector<1x64xf32>
    tpu.vector_store %arg11[%c82, %c0_203], %465 {strides = array<i32>} : memref<90x64xf32, #tpu.memory_space<vmem>>, vector<1x64xf32>,
    %467 = vector.extract_strided_slice %454 {offsets = [9, 0], sizes = [3, 64], strides = [1, 1]} : vector<15x64xf32> to vector<3x64xf32>
    %cst_204 = arith.constant dense<0xFF800000> : vector<64xf32>
    %468 = vector.multi_reduction <maximumf>, %467, %cst_204 [0] : vector<3x64xf32> to vector<64xf32>
    %469 = vector.shape_cast %468 : vector<64xf32> to vector<1x64xf32>
    %c83 = arith.constant 83 : index
    %c0_205 = arith.constant 0 : index
    %470 = vector.load %arg11[%c83, %c0_205] : memref<90x64xf32, #tpu.memory_space<vmem>>, vector<1x64xf32>
    tpu.vector_store %arg11[%c83, %c0_205], %469 {strides = array<i32>} : memref<90x64xf32, #tpu.memory_space<vmem>>, vector<1x64xf32>,
    %471 = vector.extract_strided_slice %454 {offsets = [12, 0], sizes = [3, 64], strides = [1, 1]} : vector<15x64xf32> to vector<3x64xf32>
    %cst_206 = arith.constant dense<0xFF800000> : vector<64xf32>
    %472 = vector.multi_reduction <maximumf>, %471, %cst_206 [0] : vector<3x64xf32> to vector<64xf32>
    %473 = vector.shape_cast %472 : vector<64xf32> to vector<1x64xf32>
    %c84 = arith.constant 84 : index
    %c0_207 = arith.constant 0 : index
    %474 = vector.load %arg11[%c84, %c0_207] : memref<90x64xf32, #tpu.memory_space<vmem>>, vector<1x64xf32>
    tpu.vector_store %arg11[%c84, %c0_207], %473 {strides = array<i32>} : memref<90x64xf32, #tpu.memory_space<vmem>>, vector<1x64xf32>,
    %475 = vector.extract_strided_slice %49 {offsets = [765, 0], sizes = [15, 64], strides = [1, 1]} : vector<810x64xf32> to vector<15x64xf32>
    %476 = vector.extract_strided_slice %49 {offsets = [780, 0], sizes = [15, 64], strides = [1, 1]} : vector<810x64xf32> to vector<15x64xf32>
    %477 = arith.maximumf %475, %476 : vector<15x64xf32>
    %478 = vector.extract_strided_slice %49 {offsets = [795, 0], sizes = [15, 64], strides = [1, 1]} : vector<810x64xf32> to vector<15x64xf32>
    %479 = arith.maximumf %477, %478 : vector<15x64xf32>
    %480 = vector.extract_strided_slice %479 {offsets = [0, 0], sizes = [3, 64], strides = [1, 1]} : vector<15x64xf32> to vector<3x64xf32>
    %cst_208 = arith.constant dense<0xFF800000> : vector<64xf32>
    %481 = vector.multi_reduction <maximumf>, %480, %cst_208 [0] : vector<3x64xf32> to vector<64xf32>
    %482 = vector.shape_cast %481 : vector<64xf32> to vector<1x64xf32>
    %c85 = arith.constant 85 : index
    %c0_209 = arith.constant 0 : index
    %483 = vector.load %arg11[%c85, %c0_209] : memref<90x64xf32, #tpu.memory_space<vmem>>, vector<1x64xf32>
    tpu.vector_store %arg11[%c85, %c0_209], %482 {strides = array<i32>} : memref<90x64xf32, #tpu.memory_space<vmem>>, vector<1x64xf32>,
    %484 = vector.extract_strided_slice %479 {offsets = [3, 0], sizes = [3, 64], strides = [1, 1]} : vector<15x64xf32> to vector<3x64xf32>
    %cst_210 = arith.constant dense<0xFF800000> : vector<64xf32>
    %485 = vector.multi_reduction <maximumf>, %484, %cst_210 [0] : vector<3x64xf32> to vector<64xf32>
    %486 = vector.shape_cast %485 : vector<64xf32> to vector<1x64xf32>
    %c86 = arith.constant 86 : index
    %c0_211 = arith.constant 0 : index
    %487 = vector.load %arg11[%c86, %c0_211] : memref<90x64xf32, #tpu.memory_space<vmem>>, vector<1x64xf32>
    tpu.vector_store %arg11[%c86, %c0_211], %486 {strides = array<i32>} : memref<90x64xf32, #tpu.memory_space<vmem>>, vector<1x64xf32>,
    %488 = vector.extract_strided_slice %479 {offsets = [6, 0], sizes = [3, 64], strides = [1, 1]} : vector<15x64xf32> to vector<3x64xf32>
    %cst_212 = arith.constant dense<0xFF800000> : vector<64xf32>
    %489 = vector.multi_reduction <maximumf>, %488, %cst_212 [0] : vector<3x64xf32> to vector<64xf32>
    %490 = vector.shape_cast %489 : vector<64xf32> to vector<1x64xf32>
    %c87 = arith.constant 87 : index
    %c0_213 = arith.constant 0 : index
    %491 = vector.load %arg11[%c87, %c0_213] : memref<90x64xf32, #tpu.memory_space<vmem>>, vector<1x64xf32>
    tpu.vector_store %arg11[%c87, %c0_213], %490 {strides = array<i32>} : memref<90x64xf32, #tpu.memory_space<vmem>>, vector<1x64xf32>,
    %492 = vector.extract_strided_slice %479 {offsets = [9, 0], sizes = [3, 64], strides = [1, 1]} : vector<15x64xf32> to vector<3x64xf32>
    %cst_214 = arith.constant dense<0xFF800000> : vector<64xf32>
    %493 = vector.multi_reduction <maximumf>, %492, %cst_214 [0] : vector<3x64xf32> to vector<64xf32>
    %494 = vector.shape_cast %493 : vector<64xf32> to vector<1x64xf32>
    %c88 = arith.constant 88 : index
    %c0_215 = arith.constant 0 : index
    %495 = vector.load %arg11[%c88, %c0_215] : memref<90x64xf32, #tpu.memory_space<vmem>>, vector<1x64xf32>
    tpu.vector_store %arg11[%c88, %c0_215], %494 {strides = array<i32>} : memref<90x64xf32, #tpu.memory_space<vmem>>, vector<1x64xf32>,
    %496 = vector.extract_strided_slice %479 {offsets = [12, 0], sizes = [3, 64], strides = [1, 1]} : vector<15x64xf32> to vector<3x64xf32>
    %cst_216 = arith.constant dense<0xFF800000> : vector<64xf32>
    %497 = vector.multi_reduction <maximumf>, %496, %cst_216 [0] : vector<3x64xf32> to vector<64xf32>
    %498 = vector.shape_cast %497 : vector<64xf32> to vector<1x64xf32>
    %c89 = arith.constant 89 : index
    %c0_217 = arith.constant 0 : index
    %499 = vector.load %arg11[%c89, %c0_217] : memref<90x64xf32, #tpu.memory_space<vmem>>, vector<1x64xf32>
    tpu.vector_store %arg11[%c89, %c0_217], %498 {strides = array<i32>} : memref<90x64xf32, #tpu.memory_space<vmem>>, vector<1x64xf32>,
    %c0_218 = arith.constant 0 : index
    %c0_219 = arith.constant 0 : index
    %500 = vector.load %arg11[%c0_218, %c0_219] : memref<90x64xf32, #tpu.memory_space<vmem>>, vector<90x64xf32>
    %501 = tpu.iota {dimensions = array<i32: 1>} : vector<1x4xi32>
    %c0_220 = arith.constant 0 : index
    %c0_221 = arith.constant 0 : index
    %502 = vector.load %arg9[%c0_220, %c0_221] : memref<1x4xf32, #tpu.memory_space<vmem>>, vector<1x4xf32>
    %c0_222 = arith.constant 0 : index
    %c0_223 = arith.constant 0 : index
    %c0_224 = arith.constant 0 : index
    %503 = vector.load %arg8[%c0_222, %c0_223, %c0_224] : memref<4x90x64xf32, #tpu.memory_space<vmem>>, vector<1x90x64xf32>
    %504 = vector.shape_cast %503 : vector<1x90x64xf32> to vector<90x64xf32>
    %505 = arith.mulf %500, %504 : vector<90x64xf32>
    %cst_225 = arith.constant dense<0.000000e+00> : vector<64xf32>
    %506 = vector.multi_reduction <add>, %505, %cst_225 [0] : vector<90x64xf32> to vector<64xf32>
    %507 = vector.shape_cast %506 : vector<64xf32> to vector<1x64xf32>
    %cst_226 = arith.constant dense<0.000000e+00> : vector<1xf32>
    %508 = vector.multi_reduction <add>, %507, %cst_226 [1] : vector<1x64xf32> to vector<1xf32>
    %509 = vector.shape_cast %508 : vector<1xf32> to vector<1x1xf32>
    %c0_i32 = arith.constant 0 : i32
    %510 = vector.broadcast %c0_i32 : i32 to vector<1x4xi32>
    %511 = arith.cmpi eq, %501, %510 : vector<1x4xi32>
    %cst_227 = arith.constant 0.000000e+00 : f32
    %512 = vector.shape_cast %509 : vector<1x1xf32> to vector<1x1xf32>
    %513 = vector.broadcast %512 : vector<1x1xf32> to vector<1x4xf32>
    %514 = vector.broadcast %cst_227 : f32 to vector<1x4xf32>
    %515 = arith.select %511, %513, %514 : vector<1x4xi1>, vector<1x4xf32>
    %516 = arith.addf %502, %515 : vector<1x4xf32>
    %c1_228 = arith.constant 1 : index
    %c0_229 = arith.constant 0 : index
    %c0_230 = arith.constant 0 : index
    %517 = vector.load %arg8[%c1_228, %c0_229, %c0_230] : memref<4x90x64xf32, #tpu.memory_space<vmem>>, vector<1x90x64xf32>
    %518 = vector.shape_cast %517 : vector<1x90x64xf32> to vector<90x64xf32>
    %519 = arith.mulf %500, %518 : vector<90x64xf32>
    %cst_231 = arith.constant dense<0.000000e+00> : vector<64xf32>
    %520 = vector.multi_reduction <add>, %519, %cst_231 [0] : vector<90x64xf32> to vector<64xf32>
    %521 = vector.shape_cast %520 : vector<64xf32> to vector<1x64xf32>
    %cst_232 = arith.constant dense<0.000000e+00> : vector<1xf32>
    %522 = vector.multi_reduction <add>, %521, %cst_232 [1] : vector<1x64xf32> to vector<1xf32>
    %523 = vector.shape_cast %522 : vector<1xf32> to vector<1x1xf32>
    %c1_i32 = arith.constant 1 : i32
    %524 = vector.broadcast %c1_i32 : i32 to vector<1x4xi32>
    %525 = arith.cmpi eq, %501, %524 : vector<1x4xi32>
    %cst_233 = arith.constant 0.000000e+00 : f32
    %526 = vector.shape_cast %523 : vector<1x1xf32> to vector<1x1xf32>
    %527 = vector.broadcast %526 : vector<1x1xf32> to vector<1x4xf32>
    %528 = vector.broadcast %cst_233 : f32 to vector<1x4xf32>
    %529 = arith.select %525, %527, %528 : vector<1x4xi1>, vector<1x4xf32>
    %530 = arith.addf %516, %529 : vector<1x4xf32>
    %c2_234 = arith.constant 2 : index
    %c0_235 = arith.constant 0 : index
    %c0_236 = arith.constant 0 : index
    %531 = vector.load %arg8[%c2_234, %c0_235, %c0_236] : memref<4x90x64xf32, #tpu.memory_space<vmem>>, vector<1x90x64xf32>
    %532 = vector.shape_cast %531 : vector<1x90x64xf32> to vector<90x64xf32>
    %533 = arith.mulf %500, %532 : vector<90x64xf32>
    %cst_237 = arith.constant dense<0.000000e+00> : vector<64xf32>
    %534 = vector.multi_reduction <add>, %533, %cst_237 [0] : vector<90x64xf32> to vector<64xf32>
    %535 = vector.shape_cast %534 : vector<64xf32> to vector<1x64xf32>
    %cst_238 = arith.constant dense<0.000000e+00> : vector<1xf32>
    %536 = vector.multi_reduction <add>, %535, %cst_238 [1] : vector<1x64xf32> to vector<1xf32>
    %537 = vector.shape_cast %536 : vector<1xf32> to vector<1x1xf32>
    %c2_i32 = arith.constant 2 : i32
    %538 = vector.broadcast %c2_i32 : i32 to vector<1x4xi32>
    %539 = arith.cmpi eq, %501, %538 : vector<1x4xi32>
    %cst_239 = arith.constant 0.000000e+00 : f32
    %540 = vector.shape_cast %537 : vector<1x1xf32> to vector<1x1xf32>
    %541 = vector.broadcast %540 : vector<1x1xf32> to vector<1x4xf32>
    %542 = vector.broadcast %cst_239 : f32 to vector<1x4xf32>
    %543 = arith.select %539, %541, %542 : vector<1x4xi1>, vector<1x4xf32>
    %544 = arith.addf %530, %543 : vector<1x4xf32>
    %c3_240 = arith.constant 3 : index
    %c0_241 = arith.constant 0 : index
    %c0_242 = arith.constant 0 : index
    %545 = vector.load %arg8[%c3_240, %c0_241, %c0_242] : memref<4x90x64xf32, #tpu.memory_space<vmem>>, vector<1x90x64xf32>
    %546 = vector.shape_cast %545 : vector<1x90x64xf32> to vector<90x64xf32>
    %547 = arith.mulf %500, %546 : vector<90x64xf32>
    %cst_243 = arith.constant dense<0.000000e+00> : vector<64xf32>
    %548 = vector.multi_reduction <add>, %547, %cst_243 [0] : vector<90x64xf32> to vector<64xf32>
    %549 = vector.shape_cast %548 : vector<64xf32> to vector<1x64xf32>
    %cst_244 = arith.constant dense<0.000000e+00> : vector<1xf32>
    %550 = vector.multi_reduction <add>, %549, %cst_244 [1] : vector<1x64xf32> to vector<1xf32>
    %551 = vector.shape_cast %550 : vector<1xf32> to vector<1x1xf32>
    %c3_i32 = arith.constant 3 : i32
    %552 = vector.broadcast %c3_i32 : i32 to vector<1x4xi32>
    %553 = arith.cmpi eq, %501, %552 : vector<1x4xi32>
    %cst_245 = arith.constant 0.000000e+00 : f32
    %554 = vector.shape_cast %551 : vector<1x1xf32> to vector<1x1xf32>
    %555 = vector.broadcast %554 : vector<1x1xf32> to vector<1x4xf32>
    %556 = vector.broadcast %cst_245 : f32 to vector<1x4xf32>
    %557 = arith.select %553, %555, %556 : vector<1x4xi1>, vector<1x4xf32>
    %558 = arith.addf %544, %557 : vector<1x4xf32>
    %cst_246 = arith.constant dense<0xFF800000> : vector<1xf32>
    %559 = vector.multi_reduction <maximumf>, %558, %cst_246 [1] : vector<1x4xf32> to vector<1xf32>
    %560 = vector.shape_cast %559 : vector<1xf32> to vector<1x1xf32>
    %561 = vector.broadcast %560 : vector<1x1xf32> to vector<1x4xf32>
    %562 = arith.subf %558, %561 : vector<1x4xf32>
    %563 = math.exp %562 : vector<1x4xf32>
    %cst_247 = arith.constant dense<0.000000e+00> : vector<1xf32>
    %564 = vector.multi_reduction <add>, %563, %cst_247 [1] : vector<1x4xf32> to vector<1xf32>
    %565 = vector.shape_cast %564 : vector<1xf32> to vector<1x1xf32>
    %566 = vector.broadcast %565 : vector<1x1xf32> to vector<1x4xf32>
    %567 = arith.divf %563, %566 : vector<1x4xf32>
    %c0_248 = arith.constant 0 : index
    %c0_249 = arith.constant 0 : index
    %c0_250 = arith.constant 0 : index
    %568 = vector.load %arg10[%c0_248, %c0_249, %c0_250] : memref<1x1x4xf32, #tpu.memory_space<vmem>>, vector<1x1x4xf32>
    %569 = vector.shape_cast %568 : vector<1x1x4xf32> to vector<1x4xf32>
    %570 = vector.shape_cast %567 : vector<1x4xf32> to vector<1x1x4xf32>
    tpu.vector_store %arg10[%c0_248, %c0_249, %c0_250], %570 {strides = array<i32>} : memref<1x1x4xf32, #tpu.memory_space<vmem>>, vector<1x1x4xf32>,
    return
  }
  func.func @transform_0(%arg0: i32) -> (i32, i32, i32) {
    %c0_i32 = arith.constant 0 : i32
    %c0_i32_0 = arith.constant 0 : i32
    %c0_i32_1 = arith.constant 0 : i32
    return %arg0, %c0_i32, %c0_i32_0 : i32, i32, i32
  }
  func.func @transform_1(%arg0: i32) -> (i32, i32, i32) {
    %c0_i32 = arith.constant 0 : i32
    %c0_i32_0 = arith.constant 0 : i32
    %c0_i32_1 = arith.constant 0 : i32
    %c0_i32_2 = arith.constant 0 : i32
    return %c0_i32, %c0_i32_0, %c0_i32_1 : i32, i32, i32
  }
  func.func @transform_2(%arg0: i32) -> (i32, i32) {
    %c0_i32 = arith.constant 0 : i32
    %c0_i32_0 = arith.constant 0 : i32
    %c0_i32_1 = arith.constant 0 : i32
    return %c0_i32, %c0_i32_0 : i32, i32
  }
  func.func @transform_3(%arg0: i32) -> (i32, i32, i32) {
    %c0_i32 = arith.constant 0 : i32
    %c0_i32_0 = arith.constant 0 : i32
    %c0_i32_1 = arith.constant 0 : i32
    return %arg0, %c0_i32, %c0_i32_0 : i32, i32, i32
  }
  func.func @transform_4(%arg0: i32) -> (i32, i32, i32) {
    %c0_i32 = arith.constant 0 : i32
    %c0_i32_0 = arith.constant 0 : i32
    %c0_i32_1 = arith.constant 0 : i32
    %c0_i32_2 = arith.constant 0 : i32
    return %c0_i32, %c0_i32_0, %c0_i32_1 : i32, i32, i32
  }
  func.func @transform_5(%arg0: i32) -> (i32, i32) {
    %c0_i32 = arith.constant 0 : i32
    %c0_i32_0 = arith.constant 0 : i32
    %c0_i32_1 = arith.constant 0 : i32
    return %c0_i32, %c0_i32_0 : i32, i32
  }
  func.func @transform_6(%arg0: i32) -> (i32, i32, i32) {
    %c0_i32 = arith.constant 0 : i32
    %c0_i32_0 = arith.constant 0 : i32
    %c0_i32_1 = arith.constant 0 : i32
    return %arg0, %c0_i32, %c0_i32_0 : i32, i32, i32
  }
  func.func @transform_7(%arg0: i32) -> (i32, i32, i32) {
    %c0_i32 = arith.constant 0 : i32
    %c0_i32_0 = arith.constant 0 : i32
    %c0_i32_1 = arith.constant 0 : i32
    %c0_i32_2 = arith.constant 0 : i32
    return %c0_i32, %c0_i32_0, %c0_i32_1 : i32, i32, i32
  }
  func.func @transform_8(%arg0: i32) -> (i32, i32) {
    %c0_i32 = arith.constant 0 : i32
    %c0_i32_0 = arith.constant 0 : i32
    %c0_i32_1 = arith.constant 0 : i32
    return %c0_i32, %c0_i32_0 : i32, i32
  }
  func.func @transform_9(%arg0: i32) -> (i32, i32, i32) {
    %c0_i32 = arith.constant 0 : i32
    %c0_i32_0 = arith.constant 0 : i32
    %c0_i32_1 = arith.constant 0 : i32
    return %arg0, %c0_i32, %c0_i32_0 : i32, i32, i32
  }
}

</mosaic_0001>

<bundles_post_ra>
// kernel: conv_forward.3
= control target key start
LH: loop header
LB: loop body
LE: loop exit
PB: predicated region body
PF: predicated region fallthrough
CT: control target
= control target key end

     0   :  { %14 = vsyncpa [#allocation4], 0  ;;  %s14850_s0 = inlined_call_operand.vmem [shape: f32[2,870,4], index: 0, kind: input, shape index: {}]   ;;  %s14851_s1 = inlined_call_operand.vmem [shape: bf16[3,4,32], index: 1, kind: input, shape index: {}]   ;;  %s14852_s2 = inlined_call_operand.vmem [shape: f32[1,32], index: 2, kind: input, shape index: {}]   ;;  %s14853_s3 = inlined_call_operand.vmem [shape: f32[2,840,32], index: 3, kind: input, shape index: {}]   ;;  %s14854_s4 = inlined_call_operand.vmem [shape: bf16[3,32,64], index: 4, kind: input, shape index: {}]   ;;  %s14855_s5 = inlined_call_operand.vmem [shape: f32[1,64], index: 5, kind: input, shape index: {}]   ;;  %s14856_s6 = inlined_call_operand.vmem [shape: f32[2,810,64], index: 6, kind: input, shape index: {}]   ;;  %s14857_s7 = inlined_call_operand.vmem [shape: f32[4,90,64], index: 7, kind: input, shape index: {}]   ;;  %s14858_s8 = inlined_call_operand.vmem [shape: f32[1,4], index: 8, kind: input, shape index: {}]   ;;  %s14859_s9 = inlined_call_operand.hbm [shape: f32[2,1,4], index: 9, kind: output, shape index: {}]  }
   0x1   :  { %16 = vsyncpa [#allocation4 + $0x1], 0  ;;  %s10257_s30 = smov 0   ;;  %s10259_s10 = smov 0  }
   0x2   :  { %s10261_s11 = smov 0   ;;  %s10263_s12 = smov 0  }
   0x3 LB: > { %s10278_s13 = sadd.s32 4294967295, %s10202_s12   ;;  %s8116_s14 = sadd.s32 4294967294, %s10202_s12   ;;  %s10202_s12 = sphi %s10263_s12, %s15489_s12   ;;  %s10198_s11 = sphi %s10261_s11, %s15488_s11   ;;  %s10194_s10 = sphi %s10259_s10, %s15487_s10   ;;  %s10190_s30 = sphi %s10257_s30, %s15486_s30  }
   0x4   : > { %s10282_s15 = sadd.s32 1, %s10202_s12   ;;  %s233_s16 = sadd.s32 1, %s10198_s11 }
   0x5   : > { %s230_s17 = ssub.s32 %s10202_s12, %s10282_s15  ;;  %p243_p0 = scmp.ne.s32.totalorder %s10198_s11, %s10194_s10 }
   0x6   : > { %p231_p1 = scmp.eq.s32.totalorder %s230_s17, 0  ;;  %p244_p2 = scmp.eq.s32.totalorder %s10278_s13, 1 }
   0x7   : > { %p249_p3 = scmp.ne.s32.totalorder %s10194_s10, %s10190_s30  ;;  %p250_p4 = scmp.eq.s32.totalorder %s8116_s14, 1 }
   0x8   : > { %s10293_s18 = scalar_select %p231_p1, %s10198_s11, %s233_s16  }
   0x9   : > { %p10295_p5 = por %p244_p2, %p243_p0  ;;  %p10299_p6 = por %p250_p4, %p249_p3 }
   0xa   : > { %p8119_p7 = scmp.ge.s32.totalorder %s10202_s12, 1  ;;  %p310_p8 = scmp.lt.s32.totalorder %s10202_s12, 3 }
   0xc   : > { %p311_p9 = pnand %p8119_p7, %p310_p8 }
   0xe   : > { %314 = sbr.rel (%p311_p9) target bundleno = 2258 (0x8d2), region = 56 }
  0x15   : > { %v8123_v0 = vld [vmem:[%s14851_s1 + $0x2] sm:$0x3]  ;;  %vm1226_vm0 = vcmask 1041408   ;;  %p355_p10 = scmp.lt.s32.totalorder %s10278_s13, 1  ;;  %v14860_v1 = vmov 0.0   ;;  %vm10205_vm1 = vmmov 0  }
  0x16   : > { %8813 = vmatprep.subr.bf16.mxu0 %v14860_v1  ;;  %10079 = vmatprep.subr.bf16.mxu1 %v14860_v1  ;;  %v1228_v2 = vsel %vm1226_vm0, %v8123_v0, 0  ;;  %vm1066_vm2 = vcmask 31744   ;;  %v533_v20 = vld [vmem:[%s14851_s1] sm:$0x3]  ;;  %vm589_vm3 = vsmask.f32 4352 }
  0x17   : > { %8814 = vmatpush3.bf16.msra.mxu0 %v1228_v2  ;;  %10080 = vmatpush3.bf16.msra.mxu1 %v1228_v2  ;;  %s10313_s23 = scalar_select %p355_p10, %s10278_s13, 1  ;;  %v8230_v30 = vld [vmem:[%s14851_s1 + $0x4] sm:$0x3]  ;;  %v1846_v32 = vsel %vm1226_vm0, %v533_v20, 0  ;;  %vm2360_vm4 = vcmask 1044480   ;;  %vm4103_vm6 = vcmask 261120  }
  0x18   : > { %9023 = vmatprep.mubr.msk.bf16.mxu1 %vm10205_vm1, %v14860_v1  ;;  %8815 = vmatprep.mubr.msk.bf16.mxu0 %vm10205_vm1, %v14860_v1  ;;  %v2626_v38 = vsel %vm1226_vm0, %v8230_v30, 0  ;;  %vm3678_vm5 = vsmask.f32 256  ;;  %vm5310_vm7 = vcmask 1040384   ;;  %vm6561_vm8 = vcmask 518144   ;;  %s8489_s29 = sshll.u32 %s10278_s13, 4 }
  0x19   : > { %s10081_s24 = smul.u32 872, %s10313_s23  ;;  %9241 = vmatprep.subr.bf16.mxu0 %v14860_v1  ;;  %9027 = vmatprep.subr.bf16.mxu1 %v14860_v1  ;;  %vm6571_vm9 = vcmask 521219   ;;  %vm6569_vm10 = vcmask 516096   ;;  %vm6580_vm11 = vcmask 523270   ;;  %vm6591_vm12 = vcmask 519169   ;;  %s14807_s17 = scalar_lea.hbm %s14859_s9, %s8489_s29 }
  0x1a   : > { %s10082_s28 = smul.u32 840, %s10313_s23  ;;  %vm6600_vm13 = vcmask 522244   ;;  %vm6636_vm14 = vcmask 523269   ;;  %vm6701_vm15 = vcmask 520194   ;;  %s10206_s13 = smov [#allocation3]  }
  0x1b   : > { %s10325_s27 = scalar_lea.vmem %s14850_s0, %s10081_s24  ;;  %s10144_s24 = sshll.u32 %s10206_s13, 4  ;;  %s10145_s24 = int_to_ptr.vmem [resolvable:$false] %s10144_s24 }
  0x1c   : > { %v476_v3 = vld [vmem:[%s10325_s27 + $0x348] sm:$0xff]  ;;  %v477_v4 = vld [vmem:[%s10325_s27 + $0x350] sm:$0xff]  ;;  %v10336_v8 = vld [vmem:[%s10325_s27 + $0x18] sm:$0xff]  ;;  %s11915_s21 = scalar_lea.vmem %s14853_s3, %s10082_s28  ;;  %s353_s28 = sand.u32 1, %s10194_s10  }
  0x1d   : > { %v372_v5 = vld [vmem:[%s10325_s27 + $0x8] sm:$0xff]  ;;  %v10330_v6 = vpack.c.bf16 %v477_v4, %v476_v3  ;;  %v10333_v7 = vld [vmem:[%s10325_s27 + $0x10] sm:$0xff]  ;;  %v10339_v9 = vld [vmem:[%s10325_s27 + $0x20] sm:$0xff]  ;;  %s354_s14 = scalar_lea.vmem [#allocation3], %s353_s28  ;;  %s10146_s25 = scalar_lea.vmem %s10145_s24, 32 }
  0x1e   : > { %v534_v10 = vpack.c.bf16 %v10333_v7, %v372_v5  ;;  %v10344_v11 = vpack.c.bf16 %v10339_v9, %v10336_v8  ;;  %v10347_v12 = vld [vmem:[%s10325_s27 + $0x28] sm:$0xff]  ;;  %v10350_v13 = vld [vmem:[%s10325_s27 + $0x30] sm:$0xff]  ;;  %v10364_v24 = vld [vmem:[%s10325_s27 + $0x38] sm:$0xff]  ;;  %v481_v56 = vpack.c.bf16 %v10336_v8, %v10333_v7  ;;  %s8037_s16 = sshll.u32 %s354_s14, 4  ;;  %s14809_s16 = int_to_ptr.vmem [resolvable:$true] %s8037_s16 }
  0x1f   : > { %14914 = vst [vmem:[#allocation6_spill] sm:$0xff] %v10330_v6  ;;  %v1058_v14 = vshrl.u32 %v10330_v6, 16  ;;  %v1061_v15 = vshll.u32 %v10330_v6, 16  ;;  %v10361_v23 = vpack.c.bf16 %v10350_v13, %v10347_v12  ;;  %v10367_v25 = vld [vmem:[%s10325_s27 + $0x40] sm:$0xff]  ;;  %v10395_v47 = vld [vmem:[%s10325_s27 + $0x48] sm:$0xff]  ;;  %v10398_v48 = vld [vmem:[%s10325_s27 + $0x50] sm:$0xff]  ;;  %v482_v3 = vpack.c.bf16 %v10347_v12, %v10339_v9  ;;  %p10147_p0 = scmp.lt.s32.totalorder %s14809_s16, %s10145_s24 }
  0x20   : > { %v591_v16 = vshrl.u32 %v534_v10, 16  ;;  %v594_v17 = vshll.u32 %v534_v10, 16  ;;  %v599_v18 = vshrl.u32 %v10344_v11, 16  ;;  %v602_v19 = vshll.u32 %v10344_v11, 16  ;;  %v371_v42 = vld [vmem:[%s10325_s27] sm:$0xff]  ;;  %v10417_v57 = vld [vmem:[%s10325_s27 + $0x58] sm:$0xff] }
  0x21   : > { %v1060_v21 = vrot.slane %v1058_v14, 3  ;;  %v1063_v22 = vrot.slane %v1061_v15, 4  ;;  %v608_v33 = vshrl.u32 %v10361_v23, 16  ;;  %v611_v34 = vshll.u32 %v10361_v23, 16  ;;  %v10420_v58 = vld [vmem:[%s10325_s27 + $0x60] sm:$0xff]  ;;  %v10438_v4 = vld [vmem:[%s10325_s27 + $0x68] sm:$0xff] }
  0x22   : > { %v593_v26 = vrot.slane %v591_v16, 3  ;;  %v596_v27 = vrot.slane %v594_v17, 4  ;;  %v601_v28 = vrot.slane %v599_v18, 3  ;;  %v604_v29 = vrot.slane %v602_v19, 4  ;;  %v10459_v17 = vld [vmem:[%s10325_s27 + $0x78] sm:$0xff]  ;;  %v10462_v18 = vld [vmem:[%s10325_s27 + $0x80] sm:$0xff] }
  0x23   : > { %v10372_v31 = vor.u32 %v1063_v22, %v1060_v21  ;;  %v10379_v37 = vpack.c.bf16 %v10367_v25, %v10364_v24  ;;  %v610_v39 = vrot.slane %v608_v33, 3  ;;  %v613_v40 = vrot.slane %v611_v34, 4  ;;  %s10140_s22 = scalar_lea.vmem %s14809_s16, 16 }
  0x24   : > { %v597_v35 = vor.u32 %v596_v27, %v593_v26  ;;  %v605_v36 = vor.u32 %v604_v29, %v601_v28  ;;  %v480_v46 = vpack.c.bf16 %v372_v5, %v371_v42  ;;  %v10404_v52 = vpack.c.bf16 %v10398_v48, %v10395_v47  ;;  %v10441_v5 = vld [vmem:[%s10325_s27 + $0x70] sm:$0xff]  ;;  %v10480_v28 = vld [vmem:[%s10325_s27 + $0x88] sm:$0xff]  ;;  %p10141_p11 = scmp.ne.s32.totalorder %s14809_s16, %s10140_s22  ;;  %p10148_p1 = scmp.lt.s32.totalorder %s10146_s25, %s10140_s22 }
  0x25   : > { %9024 = vmatmul.mubr.msk.bf16.vlgmr.msra.gmra.mrb[0].mxu1 %vm1066_vm2, %v10372_v31  ;;  %v614_v43 = vor.u32 %v613_v40, %v610_v39  ;;  %v617_v44 = vshrl.u32 %v10379_v37, 16  ;;  %v620_v45 = vshll.u32 %v10379_v37, 16  ;;  %v10425_v62 = vpack.c.bf16 %v10420_v58, %v10417_v57  ;;  %v10483_v29 = vld [vmem:[%s10325_s27 + $0x90] sm:$0xff]  ;;  %v10501_v39 = vld [vmem:[%s10325_s27 + $0x98] sm:$0xff]  ;;  %v10504_v40 = vld [vmem:[%s10325_s27 + $0xa0] sm:$0xff] }
  0x26   : > { %v606_v41 = vsel %vm589_vm3, %v597_v35, %v605_v36  ;;  %9028 = vmatpush3.bf16.msra.mxu1 %v1846_v32  ;;  %9029 = vmatprep.mubr.msk.bf16.mxu1 %vm10205_vm1, %v14860_v1  ;;  %v626_v54 = vshrl.u32 %v10404_v52, 16  ;;  %v629_v55 = vshll.u32 %v10404_v52, 16  ;;  %v10446_v14 = vpack.c.bf16 %v10441_v5, %v10438_v4  ;;  %p10142_p12 = pnand %p10141_p11, %p10295_p5  ;;  %p10149_p2 = por %p10148_p1, %p10147_p0 }
  0x27   : > { %8816 = vmatmul.mubr.msk.bf16.vlgmr.msra.gmra.mrb[0].mxu0 %vm1066_vm2, %v606_v41  ;;  %9455 = vmatprep.subr.bf16.mxu1 %v14860_v1  ;;  %v615_v49 = vsel %vm589_vm3, %v605_v36, %v614_v43  ;;  %v619_v50 = vrot.slane %v617_v44, 3  ;;  %v622_v51 = vrot.slane %v620_v45, 4  ;;  %v635_v0 = vshrl.u32 %v10425_v62, 16 }
  0x28   : > { %9242 = vmatpush3.bf16.msra.mxu0 %v2626_v38  ;;  %8819 = vmatprep.mubr.msk.bf16.mxu0 %vm10205_vm1, %v14860_v1  ;;  %v628_v60 = vrot.slane %v626_v54, 3  ;;  %v631_v61 = vrot.slane %v629_v55, 4  ;;  %v638_v2 = vshll.u32 %v10425_v62, 16  ;;  %v644_v12 = vshrl.u32 %v10446_v14, 16  ;;  %p10143_p13 = pneg %p10142_p12 }
  0x29   : > { %9871 = vmatprep.subr.bf16.mxu0 %v14860_v1  ;;  %v623_v53 = vor.u32 %v622_v51, %v619_v50  ;;  %v637_v8 = vrot.slane %v635_v0, 3  ;;  %v647_v15 = vshll.u32 %v10446_v14, 16  ;;  %v483_v16 = vpack.c.bf16 %v10364_v24, %v10350_v13  ;;  %v10525_v50 = vld [vmem:[%s10325_s27 + $0xb0] sm:$0xff] }
  0x2a   : > { %v632_v63 = vor.u32 %v631_v61, %v628_v60  ;;  %v640_v10 = vrot.slane %v638_v2, 4  ;;  %v646_v20 = vrot.slane %v644_v12, 3  ;;  %v10467_v22 = vpack.c.bf16 %v10462_v18, %v10459_v17  ;;  %v10543_v60 = vld [vmem:[%s10325_s27 + $0xb8] sm:$0xff]  ;;  %v10546_v61 = vld [vmem:[%s10325_s27 + $0xc0] sm:$0xff]  ;;  %p10150_p3 = pnand %p10149_p2, %p10143_p13 }
  0x2b   : > { %v624_v59 = vsel %vm589_vm3, %v614_v43, %v623_v53  ;;  %v649_v21 = vrot.slane %v647_v15, 4  ;;  %v484_v27 = vpack.c.bf16 %v10395_v47, %v10367_v25  ;;  %v10488_v34 = vpack.c.bf16 %v10483_v29, %v10480_v28 }
  0x2c   : > { %v633_v7 = vsel %vm589_vm3, %v623_v53, %v632_v63  ;;  %v641_v9 = vor.u32 %v640_v10, %v637_v8  ;;  %v653_v24 = vshrl.u32 %v10467_v22, 16  ;;  %v656_v26 = vshll.u32 %v10467_v22, 16  ;;  %v10564_v10 = vld [vmem:[%s10325_s27 + $0xc8] sm:$0xff] }
  0x2d   : > { %9030 = vmatmul.mubr.msk.bf16.vlgmr.msra.gmra.mrb[4].mxu1 %vm1066_vm2, %v480_v46  ;;  %v650_v13 = vor.u32 %v649_v21, %v646_v20  ;;  %v662_v35 = vshrl.u32 %v10488_v34, 16  ;;  %v665_v36 = vshll.u32 %v10488_v34, 16  ;;  %v485_v38 = vpack.c.bf16 %v10417_v57, %v10398_v48 }
  0x2e   : > { %9033 = vmatprep.mubr.msk.bf16.mxu1 %vm10205_vm1, %v14860_v1  ;;  %v642_v19 = vsel %vm589_vm3, %v632_v63, %v641_v9  ;;  %v655_v32 = vrot.slane %v653_v24, 3  ;;  %v658_v33 = vrot.slane %v656_v26, 4  ;;  %v10509_v44 = vpack.c.bf16 %v10504_v40, %v10501_v39  ;;  %v10588_v24 = vld [vmem:[%s10325_s27 + $0xe0] sm:$0xff] }
  0x2f   : > { %8820 = vmatmul.mubr.msk.bf16.gmra.mrb[4].mxu0 %vm1066_vm2, %v615_v49  ;;  %v651_v30 = vsel %vm589_vm3, %v641_v9, %v650_v13  ;;  %v664_v42 = vrot.slane %v662_v35, 3  ;;  %v667_v43 = vrot.slane %v665_v36, 4  ;;  %v486_v48 = vpack.c.bf16 %v10438_v4, %v10420_v58  ;;  %v10522_v49 = vld [vmem:[%s10325_s27 + $0xa8] sm:$0xff]  ;;  %v10567_v9 = vld [vmem:[%s10325_s27 + $0xd0] sm:$0xff] }
  0x30   : > { %8823 = vmatprep.mubr.msk.bf16.mxu0 %vm10205_vm1, %v14860_v1  ;;  %v659_v25 = vor.u32 %v658_v33, %v655_v32  ;;  %v671_v46 = vshrl.u32 %v10509_v44, 16  ;;  %v674_v47 = vshll.u32 %v10509_v44, 16  ;;  %v10530_v55 = vpack.c.bf16 %v10525_v50, %v10522_v49  ;;  %v10606_v35 = vld [vmem:[%s10325_s27 + $0xe8] sm:$0xff]  ;;  %v10609_v36 = vld [vmem:[%s10325_s27 + $0xf0] sm:$0xff] }
  0x31   : > { %v668_v45 = vor.u32 %v667_v43, %v664_v42  ;;  %v488_v8 = vpack.c.bf16 %v10480_v28, %v10462_v18  ;;  %v489_v21 = vpack.c.bf16 %v10501_v39, %v10483_v29  ;;  %v10614_v42 = vpack.c.bf16 %v10609_v36, %v10606_v35 }
  0x32   : > { %v660_v41 = vsel %vm589_vm3, %v650_v13, %v659_v25  ;;  %v673_v53 = vrot.slane %v671_v46, 3  ;;  %v676_v54 = vrot.slane %v674_v47, 4  ;;  %v680_v57 = vshrl.u32 %v10530_v55, 16  ;;  %v10585_v13 = vld [vmem:[%s10325_s27 + $0xd8] sm:$0xff] }
  0x33   : > { %v669_v51 = vsel %vm589_vm3, %v659_v25, %v668_v45  ;;  %v683_v58 = vshll.u32 %v10530_v55, 16  ;;  %v490_v25 = vpack.c.bf16 %v10522_v49, %v10504_v40  ;;  %v716_v43 = vshrl.u32 %v10614_v42, 16  ;;  %v10627_v47 = vld [vmem:[%s10325_s27 + $0xf8] sm:$0xff] }
  0x34   : > { %v682_v0 = vrot.slane %v680_v57, 3  ;;  %v491_v46 = vpack.c.bf16 %v10543_v60, %v10525_v50 }
  0x35   : > { %9034 = vmatmul.mubr.msk.bf16.gmra.mrb[8].mxu1 %vm1066_vm2, %v481_v56  ;;  %v677_v56 = vor.u32 %v676_v54, %v673_v53  ;;  %v685_v2 = vrot.slane %v683_v58, 4  ;;  %v492_v58 = vpack.c.bf16 %v10564_v10, %v10546_v61 }
  0x36   : > { %9037 = vmatprep.mubr.msk.bf16.mxu1 %vm10205_vm1, %v14860_v1 }
  0x37   : > { %8824 = vmatmul.mubr.msk.bf16.gmra.mrb[8].mxu0 %vm1066_vm2, %v624_v59  ;;  %v487_v59 = vpack.c.bf16 %v10459_v17, %v10441_v5  ;;  %v678_v63 = vsel %vm589_vm3, %v668_v45, %v677_v56  ;;  %v686_v4 = vor.u32 %v685_v2, %v682_v0  ;;  %v10572_v17 = vpack.c.bf16 %v10567_v9, %v10564_v10 }
  0x38   : > { %8827 = vmatprep.mubr.msk.bf16.mxu0 %vm10205_vm1, %v14860_v1  ;;  %v719_v45 = vshll.u32 %v10614_v42, 16  ;;  %v493_v10 = vpack.c.bf16 %v10585_v13, %v10567_v9 }
  0x39   : > { %v687_v12 = vsel %vm589_vm3, %v677_v56, %v686_v4  ;;  %v701_v20 = vshll.u32 %v10572_v17, 16 }
  0x3a   : > { %v721_v53 = vrot.slane %v719_v45, 4 }
  0x3b   : > { %v703_v28 = vrot.slane %v701_v20, 4 }
  0x3d   : > { %9038 = vmatmul.mubr.msk.bf16.gmra.mrb[12].mxu1 %vm1066_vm2, %v482_v3  ;;  %v10551_v3 = vpack.c.bf16 %v10546_v61, %v10543_v60  ;;  %v10651_v60 = vld [vmem:[%s10325_s27 + $0x110] sm:$0xff] }
  0x3e   : > { %9041 = vmatprep.mubr.msk.bf16.mxu1 %vm10205_vm1, %v14860_v1  ;;  %v10125_v61 = vld [vmem:[%s14854_s4 + $0x10] sm:$0xff]  }
  0x3f   : > { %8828 = vmatmul.mubr.msk.bf16.gmra.mrb[12].mxu0 %vm1066_vm2, %v633_v7  ;;  %v689_v5 = vshrl.u32 %v10551_v3, 16  ;;  %v692_v7 = vshll.u32 %v10551_v3, 16  ;;  %9456 = vmatpush3.bf16.msra.mxu1 %v10125_v61 }
  0x40   : > { %8831 = vmatprep.mubr.msk.bf16.mxu0 %vm10205_vm1, %v14860_v1  ;;  %9457 = vmatprep.subr.bf16.mxu1 %v14860_v1 }
  0x41   : > { %v691_v15 = vrot.slane %v689_v5, 3 }
  0x45   : > { %9042 = vmatmul.mubr.msk.bf16.gmra.mrb[16].mxu1 %vm1066_vm2, %v483_v16  ;;  %v694_v16 = vrot.slane %v692_v7, 4 }
  0x46   : > { %9045 = vmatprep.mubr.msk.bf16.mxu1 %vm10205_vm1, %v14860_v1 }
  0x47   : > { %8832 = vmatmul.mubr.msk.bf16.gmra.mrb[16].mxu0 %vm1066_vm2, %v642_v19  ;;  %v695_v18 = vor.u32 %v694_v16, %v691_v15  ;;  %v698_v19 = vshrl.u32 %v10572_v17, 16  ;;  %v10676_v15 = vld [vmem:[%s10325_s27 + $0x120] sm:$0xff] }
  0x48   : > { %8835 = vmatprep.mubr.msk.bf16.mxu0 %vm10205_vm1, %v14860_v1 }
  0x49   : > { %v696_v26 = vsel %vm589_vm3, %v686_v4, %v695_v18 }
  0x4d   : > { %9046 = vmatmul.mubr.msk.bf16.gmra.mrb[20].mxu1 %vm1066_vm2, %v484_v27  ;;  %v700_v27 = vrot.slane %v698_v19, 3 }
  0x4e   : > { %9049 = vmatprep.mubr.msk.bf16.mxu1 %vm10205_vm1, %v14860_v1 }
  0x4f   : > { %8836 = vmatmul.mubr.msk.bf16.gmra.mrb[20].mxu0 %vm1066_vm2, %v651_v30  ;;  %v10593_v30 = vpack.c.bf16 %v10588_v24, %v10585_v13  ;;  %v704_v29 = vor.u32 %v703_v28, %v700_v27  ;;  %v10694_v27 = vld [vmem:[%s10325_s27 + $0x128] sm:$0xff]  ;;  %v10697_v28 = vld [vmem:[%s10325_s27 + $0x130] sm:$0xff] }
  0x50   : > { %8839 = vmatprep.mubr.msk.bf16.mxu0 %vm10205_vm1, %v14860_v1 }
  0x51   : > { %v707_v32 = vshrl.u32 %v10593_v30, 16  ;;  %v710_v33 = vshll.u32 %v10593_v30, 16 }
  0x53   : > { %v709_v39 = vrot.slane %v707_v32, 3 }
  0x55   : > { %9050 = vmatmul.mubr.msk.bf16.gmra.mrb[24].mxu1 %vm1066_vm2, %v485_v38  ;;  %v705_v38 = vsel %vm589_vm3, %v695_v18, %v704_v29 }
  0x56   : > { %9053 = vmatprep.mubr.msk.bf16.mxu1 %vm10205_vm1, %v14860_v1 }
  0x57   : > { %8840 = vmatmul.mubr.msk.bf16.gmra.mrb[24].mxu0 %vm1066_vm2, %v660_v41  ;;  %v712_v41 = vrot.slane %v710_v33, 4 }
  0x58   : > { %8843 = vmatprep.mubr.msk.bf16.mxu0 %vm10205_vm1, %v14860_v1 }
  0x59   : > { %v713_v40 = vor.u32 %v712_v41, %v709_v39  ;;  %v495_v39 = vpack.c.bf16 %v10627_v47, %v10609_v36  ;;  %v10715_v41 = vld [vmem:[%s10325_s27 + $0x138] sm:$0xff] }
  0x5b   : > { %v714_v49 = vsel %vm589_vm3, %v704_v29, %v713_v40 }
  0x5d   : > { %9054 = vmatmul.mubr.msk.bf16.gmra.mrb[28].mxu1 %vm1066_vm2, %v486_v48  ;;  %v10630_v48 = vld [vmem:[%s10325_s27 + $0x100] sm:$0xff] }
  0x5e   : > { %9057 = vmatprep.mubr.msk.bf16.mxu1 %vm10205_vm1, %v14860_v1  ;;  %v10635_v54 = vpack.c.bf16 %v10630_v48, %v10627_v47 }
  0x5f   : > { %8844 = vmatmul.mubr.msk.bf16.gmra.mrb[28].mxu0 %vm1066_vm2, %v669_v51  ;;  %v718_v51 = vrot.slane %v716_v43, 3 }
  0x60   : > { %8847 = vmatprep.mubr.msk.bf16.mxu0 %vm10205_vm1, %v14860_v1  ;;  %v725_v56 = vshrl.u32 %v10635_v54, 16  ;;  %v728_v57 = vshll.u32 %v10635_v54, 16 }
  0x61   : > { %v722_v50 = vor.u32 %v721_v53, %v718_v51 }
  0x62   : > { %v727_v0 = vrot.slane %v725_v56, 3  ;;  %v730_v2 = vrot.slane %v728_v57, 4  ;;  %v10739_v56 = vld [vmem:[%s10325_s27 + $0x150] sm:$0xff] }
  0x64   : > { %v731_v5 = vor.u32 %v730_v2, %v727_v0 }
  0x65   : > { %9058 = vmatmul.mubr.msk.bf16.gmra.mrb[32].mxu1 %vm1066_vm2, %v487_v59  ;;  %v10648_v59 = vld [vmem:[%s10325_s27 + $0x108] sm:$0xff] }
  0x66   : > { %9061 = vmatprep.mubr.msk.bf16.mxu1 %vm10205_vm1, %v14860_v1  ;;  %v10656_v4 = vpack.c.bf16 %v10651_v60, %v10648_v59  ;;  %v732_v16 = vsel %vm589_vm3, %v722_v50, %v731_v5  ;;  %v496_v53 = vpack.c.bf16 %v10648_v59, %v10630_v48 }
  0x67   : > { %8848 = vmatmul.mubr.msk.bf16.gmra.mrb[32].mxu0 %vm1066_vm2, %v678_v63  ;;  %v723_v63 = vsel %vm589_vm3, %v713_v40, %v722_v50  ;;  %v10718_v40 = vld [vmem:[%s10325_s27 + $0x140] sm:$0xff]  ;;  %v10736_v50 = vld [vmem:[%s10325_s27 + $0x148] sm:$0xff] }
  0x68   : > { %8851 = vmatprep.mubr.msk.bf16.mxu0 %vm10205_vm1, %v14860_v1  ;;  %v734_v7 = vshrl.u32 %v10656_v4, 16  ;;  %v10744_v0 = vpack.c.bf16 %v10739_v56, %v10736_v50 }
  0x6a   : > { %v736_v18 = vrot.slane %v734_v7, 3  ;;  %v770_v59 = vshrl.u32 %v10744_v0, 16  ;;  %v773_v2 = vshll.u32 %v10744_v0, 16  ;;  %v10760_v7 = vld [vmem:[%s10325_s27 + $0x160] sm:$0xff] }
  0x6d   : > { %9062 = vmatmul.mubr.msk.bf16.gmra.mrb[36].mxu1 %vm1066_vm2, %v488_v8  ;;  %v737_v8 = vshll.u32 %v10656_v4, 16 }
  0x6e   : > { %9065 = vmatprep.mubr.msk.bf16.mxu1 %vm10205_vm1, %v14860_v1 }
  0x6f   : > { %8852 = vmatmul.mubr.msk.bf16.gmra.mrb[36].mxu0 %vm1066_vm2, %v687_v12  ;;  %v10673_v12 = vld [vmem:[%s10325_s27 + $0x118] sm:$0xff]  ;;  %v739_v19 = vrot.slane %v737_v8, 4 }
  0x70   : > { %8855 = vmatprep.mubr.msk.bf16.mxu0 %vm10205_vm1, %v14860_v1  ;;  %v10681_v20 = vpack.c.bf16 %v10676_v15, %v10673_v12  ;;  %v497_v61 = vpack.c.bf16 %v10673_v12, %v10651_v60 }
  0x71   : > { %v740_v9 = vor.u32 %v739_v19, %v736_v18 }
  0x72   : > { %v746_v13 = vshll.u32 %v10681_v20, 16 }
  0x73   : > { %v741_v29 = vsel %vm589_vm3, %v731_v5, %v740_v9  ;;  %v10757_v5 = vld [vmem:[%s10325_s27 + $0x158] sm:$0xff] }
  0x74   : > { %v748_v33 = vrot.slane %v746_v13, 4  ;;  %v10765_v18 = vpack.c.bf16 %v10760_v7, %v10757_v5  ;;  %v10781_v13 = vld [vmem:[%s10325_s27 + $0x170] sm:$0xff] }
  0x75   : > { %9066 = vmatmul.mubr.msk.bf16.gmra.mrb[40].mxu1 %vm1066_vm2, %v489_v21  ;;  %v743_v21 = vshrl.u32 %v10681_v20, 16 }
  0x76   : > { %9069 = vmatprep.mubr.msk.bf16.mxu1 %vm10205_vm1, %v14860_v1  ;;  %v779_v12 = vshrl.u32 %v10765_v18, 16  ;;  %v782_v19 = vshll.u32 %v10765_v18, 16 }
  0x77   : > { %8856 = vmatmul.mubr.msk.bf16.gmra.mrb[40].mxu0 %vm1066_vm2, %v696_v26  ;;  %v494_v26 = vpack.c.bf16 %v10606_v35, %v10588_v24  ;;  %v745_v32 = vrot.slane %v743_v21, 3  ;;  %v10778_v21 = vld [vmem:[%s10325_s27 + $0x168] sm:$0xff] }
  0x78   : > { %8859 = vmatprep.mubr.msk.bf16.mxu0 %vm10205_vm1, %v14860_v1 }
  0x79   : > { %v749_v24 = vor.u32 %v748_v33, %v745_v32  ;;  %v784_v32 = vrot.slane %v782_v19, 4  ;;  %v10786_v33 = vpack.c.bf16 %v10781_v13, %v10778_v21 }
  0x7b   : > { %v750_v43 = vsel %vm589_vm3, %v740_v9, %v749_v24  ;;  %v498_v9 = vpack.c.bf16 %v10694_v27, %v10676_v15 }
  0x7d   : > { %9070 = vmatmul.mubr.msk.bf16.gmra.mrb[44].mxu1 %vm1066_vm2, %v490_v25  ;;  %v10702_v25 = vpack.c.bf16 %v10697_v28, %v10694_v27  ;;  %v788_v27 = vshrl.u32 %v10786_v33, 16 }
  0x7e   : > { %9073 = vmatprep.mubr.msk.bf16.mxu1 %vm10205_vm1, %v14860_v1 }
  0x7f   : > { %8860 = vmatmul.mubr.msk.bf16.gmra.mrb[44].mxu0 %vm1066_vm2, %v705_v38  ;;  %v752_v35 = vshrl.u32 %v10702_v25, 16  ;;  %v755_v38 = vshll.u32 %v10702_v25, 16 }
  0x80   : > { %8863 = vmatprep.mubr.msk.bf16.mxu0 %vm10205_vm1, %v14860_v1 }
  0x81   : > { %v754_v45 = vrot.slane %v752_v35, 3  ;;  %v499_v35 = vpack.c.bf16 %v10715_v41, %v10697_v28 }
  0x85   : > { %9074 = vmatmul.mubr.msk.bf16.gmra.mrb[48].mxu1 %vm1066_vm2, %v491_v46  ;;  %v757_v46 = vrot.slane %v755_v38, 4  ;;  %v10799_v38 = vld [vmem:[%s10325_s27 + $0x178] sm:$0xff] }
  0x86   : > { %9077 = vmatprep.mubr.msk.bf16.mxu1 %vm10205_vm1, %v14860_v1 }
  0x87   : > { %8864 = vmatmul.mubr.msk.bf16.gmra.mrb[48].mxu0 %vm1066_vm2, %v714_v49  ;;  %v10723_v49 = vpack.c.bf16 %v10718_v40, %v10715_v41  ;;  %v758_v36 = vor.u32 %v757_v46, %v754_v45  ;;  %v790_v45 = vrot.slane %v788_v27, 3 }
  0x88   : > { %8867 = vmatprep.mubr.msk.bf16.mxu0 %vm10205_vm1, %v14860_v1 }
  0x89   : > { %v761_v47 = vshrl.u32 %v10723_v49, 16  ;;  %v764_v51 = vshll.u32 %v10723_v49, 16  ;;  %v759_v57 = vsel %vm589_vm3, %v749_v24, %v758_v36  ;;  %v791_v24 = vshll.u32 %v10786_v33, 16 }
  0x8b   : > { %v793_v46 = vrot.slane %v791_v24, 4 }
  0x8d   : > { %9078 = vmatmul.mubr.msk.bf16.gmra.mrb[52].mxu1 %vm1066_vm2, %v492_v58  ;;  %v763_v58 = vrot.slane %v761_v47, 3  ;;  %v794_v28 = vor.u32 %v793_v46, %v790_v45  ;;  %v503_v45 = vpack.c.bf16 %v10799_v38, %v10781_v13  ;;  %v10883_v46 = vld [vmem:[%s10325_s27 + $0x1b8] sm:$0xff] }
  0x8e   : > { %9081 = vmatprep.mubr.msk.bf16.mxu1 %vm10205_vm1, %v14860_v1 }
  0x8f   : > { %8868 = vmatmul.mubr.msk.bf16.gmra.mrb[52].mxu0 %vm1066_vm2, %v723_v63  ;;  %v766_v63 = vrot.slane %v764_v51, 4  ;;  %v500_v51 = vpack.c.bf16 %v10736_v50, %v10718_v40 }
  0x90   : > { %8871 = vmatprep.mubr.msk.bf16.mxu0 %vm10205_vm1, %v14860_v1 }
  0x91   : > { %v767_v48 = vor.u32 %v766_v63, %v763_v58 }
  0x93   : > { %v768_v8 = vsel %vm589_vm3, %v758_v36, %v767_v48 }
  0x95   : > { %9082 = vmatmul.mubr.msk.bf16.gmra.mrb[56].mxu1 %vm1066_vm2, %v493_v10  ;;  %v772_v10 = vrot.slane %v770_v59, 3 }
  0x96   : > { %9085 = vmatprep.mubr.msk.bf16.mxu1 %vm10205_vm1, %v14860_v1 }
  0x97   : > { %8872 = vmatmul.mubr.msk.bf16.gmra.mrb[56].mxu0 %vm1066_vm2, %v732_v16  ;;  %v775_v16 = vrot.slane %v773_v2, 4 }
  0x98   : > { %8875 = vmatprep.mubr.msk.bf16.mxu0 %vm10205_vm1, %v14860_v1 }
  0x99   : > { %v776_v60 = vor.u32 %v775_v16, %v772_v10  ;;  %v10844_v10 = vld [vmem:[%s10325_s27 + $0x1a0] sm:$0xff] }
  0x9d   : > { %9086 = vmatmul.mubr.msk.bf16.gmra.mrb[60].mxu1 %vm1066_vm2, %v494_v26  ;;  %v777_v26 = vsel %vm589_vm3, %v767_v48, %v776_v60 }
  0x9e   : > { %9089 = vmatprep.mubr.msk.bf16.mxu1 %vm10205_vm1, %v14860_v1 }
  0x9f   : > { %8876 = vmatmul.mubr.msk.bf16.gmra.mrb[60].mxu0 %vm1066_vm2, %v741_v29  ;;  %v781_v29 = vrot.slane %v779_v12, 3 }
  0xa0   : > { %8879 = vmatprep.mubr.msk.bf16.mxu0 %vm10205_vm1, %v14860_v1 }
  0xa1   : > { %v785_v15 = vor.u32 %v784_v32, %v781_v29  ;;  %v10862_v29 = vld [vmem:[%s10325_s27 + $0x1a8] sm:$0xff]  ;;  %v10865_v32 = vld [vmem:[%s10325_s27 + $0x1b0] sm:$0xff] }
  0xa3   : > { %v795_v58 = vsel %vm589_vm3, %v785_v15, %v794_v28 }
  0xa5   : > { %9090 = vmatmul.mubr.msk.bf16.gmra.mrb[64].mxu1 %vm1066_vm2, %v495_v39  ;;  %v10802_v39 = vld [vmem:[%s10325_s27 + $0x180] sm:$0xff] }
  0xa6   : > { %9093 = vmatprep.mubr.msk.bf16.mxu1 %vm10205_vm1, %v14860_v1  ;;  %v10807_v36 = vpack.c.bf16 %v10802_v39, %v10799_v38 }
  0xa7   : > { %8880 = vmatmul.mubr.msk.bf16.gmra.mrb[64].mxu0 %vm1066_vm2, %v750_v43  ;;  %v786_v43 = vsel %vm589_vm3, %v776_v60, %v785_v15 }
  0xa8   : > { %8883 = vmatprep.mubr.msk.bf16.mxu0 %vm10205_vm1, %v14860_v1  ;;  %v797_v41 = vshrl.u32 %v10807_v36, 16  ;;  %v800_v47 = vshll.u32 %v10807_v36, 16 }
  0xaa   : > { %v799_v63 = vrot.slane %v797_v41, 3  ;;  %v802_v48 = vrot.slane %v800_v47, 4 }
  0xac   : > { %v803_v40 = vor.u32 %v802_v48, %v799_v63 }
  0xad   : > { %9094 = vmatmul.mubr.msk.bf16.gmra.mrb[68].mxu1 %vm1066_vm2, %v496_v53  ;;  %v10820_v53 = vld [vmem:[%s10325_s27 + $0x188] sm:$0xff] }
  0xae   : > { %9097 = vmatprep.mubr.msk.bf16.mxu1 %vm10205_vm1, %v14860_v1  ;;  %v804_v16 = vsel %vm589_vm3, %v794_v28, %v803_v40  ;;  %v10886_v28 = vld [vmem:[%s10325_s27 + $0x1c0] sm:$0xff]  ;;  %v504_v48 = vpack.c.bf16 %v10820_v53, %v10802_v39 }
  0xaf   : > { %8884 = vmatmul.mubr.msk.bf16.gmra.mrb[68].mxu0 %vm1066_vm2, %v759_v57  ;;  %v10823_v57 = vld [vmem:[%s10325_s27 + $0x190] sm:$0xff] }
  0xb0   : > { %8887 = vmatprep.mubr.msk.bf16.mxu0 %vm10205_vm1, %v14860_v1  ;;  %v10828_v59 = vpack.c.bf16 %v10823_v57, %v10820_v53 }
  0xb2   : > { %v806_v50 = vshrl.u32 %v10828_v59, 16  ;;  %v809_v2 = vshll.u32 %v10828_v59, 16 }
  0xb4   : > { %v808_v60 = vrot.slane %v806_v50, 3  ;;  %v811_v12 = vrot.slane %v809_v2, 4  ;;  %v10907_v50 = vld [vmem:[%s10325_s27 + $0x1d0] sm:$0xff] }
  0xb5   : > { %9098 = vmatmul.mubr.msk.bf16.gmra.mrb[72].mxu1 %vm1066_vm2, %v497_v61  ;;  %v501_v61 = vpack.c.bf16 %v10757_v5, %v10739_v56 }
  0xb6   : > { %9101 = vmatprep.mubr.msk.bf16.mxu1 %vm10205_vm1, %v14860_v1  ;;  %v812_v56 = vor.u32 %v811_v12, %v808_v60 }
  0xb7   : > { %8888 = vmatmul.mubr.msk.bf16.gmra.mrb[72].mxu0 %vm1066_vm2, %v768_v8  ;;  %v10841_v8 = vld [vmem:[%s10325_s27 + $0x198] sm:$0xff] }
  0xb8   : > { %8891 = vmatprep.mubr.msk.bf16.mxu0 %vm10205_vm1, %v14860_v1  ;;  %v10849_v19 = vpack.c.bf16 %v10844_v10, %v10841_v8  ;;  %v813_v15 = vsel %vm589_vm3, %v803_v40, %v812_v56  ;;  %v10904_v40 = vld [vmem:[%s10325_s27 + $0x1c8] sm:$0xff] }
  0xb9   : > { %v10912_v60 = vpack.c.bf16 %v10907_v50, %v10904_v40 }
  0xba   : > { %v815_v5 = vshrl.u32 %v10849_v19, 16 }
  0xbb   : > { %v842_v53 = vshrl.u32 %v10912_v60, 16  ;;  %v845_v12 = vshll.u32 %v10912_v60, 16 }
  0xbc   : > { %v817_v27 = vrot.slane %v815_v5, 3  ;;  %v10925_v5 = vld [vmem:[%s10325_s27 + $0x1d8] sm:$0xff] }
  0xbd   : > { %9102 = vmatmul.mubr.msk.bf16.gmra.mrb[76].mxu1 %vm1066_vm2, %v498_v9  ;;  %v818_v9 = vshll.u32 %v10849_v19, 16 }
  0xbe   : > { %9105 = vmatprep.mubr.msk.bf16.mxu1 %vm10205_vm1, %v14860_v1 }
  0xbf   : > { %8892 = vmatmul.mubr.msk.bf16.gmra.mrb[76].mxu0 %vm1066_vm2, %v777_v26  ;;  %v502_v26 = vpack.c.bf16 %v10778_v21, %v10760_v7  ;;  %v820_v24 = vrot.slane %v818_v9, 4  ;;  %v10928_v9 = vld [vmem:[%s10325_s27 + $0x1e0] sm:$0xff] }
  0xc0   : > { %8895 = vmatprep.mubr.msk.bf16.mxu0 %vm10205_vm1, %v14860_v1 }
  0xc1   : > { %v821_v7 = vor.u32 %v820_v24, %v817_v27  ;;  %v847_v27 = vrot.slane %v845_v12, 4  ;;  %v10933_v24 = vpack.c.bf16 %v10928_v9, %v10925_v5 }
  0xc3   : > { %v822_v41 = vsel %vm589_vm3, %v812_v56, %v821_v7  ;;  %v505_v56 = vpack.c.bf16 %v10841_v8, %v10823_v57 }
  0xc5   : > { %9106 = vmatmul.mubr.msk.bf16.gmra.mrb[80].mxu1 %vm1066_vm2, %v499_v35  ;;  %v10870_v35 = vpack.c.bf16 %v10865_v32, %v10862_v29 }
  0xc6   : > { %9109 = vmatprep.mubr.msk.bf16.mxu1 %vm10205_vm1, %v14860_v1 }
  0xc7   : > { %8896 = vmatmul.mubr.msk.bf16.gmra.mrb[80].mxu0 %vm1066_vm2, %v786_v43  ;;  %v824_v21 = vshrl.u32 %v10870_v35, 16  ;;  %v827_v43 = vshll.u32 %v10870_v35, 16 }
  0xc8   : > { %8899 = vmatprep.mubr.msk.bf16.mxu0 %vm10205_vm1, %v14860_v1 }
  0xc9   : > { %v826_v47 = vrot.slane %v824_v21, 3  ;;  %v854_v21 = vshll.u32 %v10933_v24, 16 }
  0xcd   : > { %9110 = vmatmul.mubr.msk.bf16.gmra.mrb[84].mxu1 %vm1066_vm2, %v500_v51  ;;  %v829_v51 = vrot.slane %v827_v43, 4 }
  0xce   : > { %9113 = vmatprep.mubr.msk.bf16.mxu1 %vm10205_vm1, %v14860_v1 }
  0xcf   : > { %8900 = vmatmul.mubr.msk.bf16.gmra.mrb[84].mxu0 %vm1066_vm2, %v795_v58  ;;  %v10891_v58 = vpack.c.bf16 %v10886_v28, %v10883_v46  ;;  %v830_v13 = vor.u32 %v829_v51, %v826_v47  ;;  %v10951_v47 = vld [vmem:[%s10325_s27 + $0x1f0] sm:$0xff] }
  0xd0   : > { %8903 = vmatprep.mubr.msk.bf16.mxu0 %vm10205_vm1, %v14860_v1 }
  0xd1   : > { %v833_v38 = vshrl.u32 %v10891_v58, 16  ;;  %v836_v63 = vshll.u32 %v10891_v58, 16  ;;  %v831_v2 = vsel %vm589_vm3, %v821_v7, %v830_v13  ;;  %v851_v7 = vshrl.u32 %v10933_v24, 16 }
  0xd5   : > { %9114 = vmatmul.mubr.msk.bf16.gmra.mrb[88].mxu1 %vm1066_vm2, %v501_v61  ;;  %v835_v61 = vrot.slane %v833_v38, 3 }
  0xd6   : > { %9117 = vmatprep.mubr.msk.bf16.mxu1 %vm10205_vm1, %v14860_v1 }
  0xd7   : > { %8904 = vmatmul.mubr.msk.bf16.gmra.mrb[88].mxu0 %vm1066_vm2, %v804_v16  ;;  %v838_v16 = vrot.slane %v836_v63, 4 }
  0xd8   : > { %8907 = vmatprep.mubr.msk.bf16.mxu0 %vm10205_vm1, %v14860_v1 }
  0xd9   : > { %v839_v39 = vor.u32 %v838_v16, %v835_v61  ;;  %v853_v61 = vrot.slane %v851_v7, 3  ;;  %v856_v16 = vrot.slane %v854_v21, 4  ;;  %v10971_v7 = vld [vmem:[%s10325_s27 + $0x1f8] sm:$0xff]  ;;  %v10974_v21 = vld [vmem:[%s10325_s27 + $0x200] sm:$0xff] }
  0xdd   : > { %9118 = vmatmul.mubr.msk.bf16.gmra.mrb[92].mxu1 %vm1066_vm2, %v502_v26  ;;  %v840_v26 = vsel %vm589_vm3, %v830_v13, %v839_v39 }
  0xde   : > { %9121 = vmatprep.mubr.msk.bf16.mxu1 %vm10205_vm1, %v14860_v1 }
  0xdf   : > { %8908 = vmatmul.mubr.msk.bf16.gmra.mrb[92].mxu0 %vm1066_vm2, %v813_v15  ;;  %v844_v15 = vrot.slane %v842_v53, 3 }
  0xe0   : > { %8911 = vmatprep.mubr.msk.bf16.mxu0 %vm10205_vm1, %v14860_v1 }
  0xe1   : > { %v848_v8 = vor.u32 %v847_v27, %v844_v15  ;;  %v507_v27 = vpack.c.bf16 %v10883_v46, %v10865_v32  ;;  %v10981_v32 = vpack.c.bf16 %v10974_v21, %v10971_v7 }
  0xe5   : > { %9122 = vmatmul.mubr.msk.bf16.gmra.mrb[96].mxu1 %vm1066_vm2, %v503_v45  ;;  %v506_v45 = vpack.c.bf16 %v10862_v29, %v10844_v10 }
  0xe6   : > { %9125 = vmatprep.mubr.msk.bf16.mxu1 %vm10205_vm1, %v14860_v1 }
  0xe7   : > { %8912 = vmatmul.mubr.msk.bf16.gmra.mrb[96].mxu0 %vm1066_vm2, %v822_v41  ;;  %v10948_v41 = vld [vmem:[%s10325_s27 + $0x1e8] sm:$0xff] }
  0xe8   : > { %8915 = vmatprep.mubr.msk.bf16.mxu0 %vm10205_vm1, %v14860_v1  ;;  %v10956_v53 = vpack.c.bf16 %v10951_v47, %v10948_v41 }
  0xea   : > { %v860_v12 = vshrl.u32 %v10956_v53, 16 }
  0xed   : > { %9126 = vmatmul.mubr.msk.bf16.gmra.mrb[100].mxu1 %vm1066_vm2, %v504_v48 }
  0xee   : > { %9129 = vmatprep.mubr.msk.bf16.mxu1 %vm10205_vm1, %v14860_v1 }
  0xef   : > { %8916 = vmatmul.mubr.msk.bf16.gmra.mrb[100].mxu0 %vm1066_vm2, %v831_v2  ;;  %v849_v2 = vsel %vm589_vm3, %v839_v39, %v848_v8  ;;  %v857_v39 = vor.u32 %v856_v16, %v853_v61 }
  0xf0   : > { %8919 = vmatprep.mubr.msk.bf16.mxu0 %vm10205_vm1, %v14860_v1 }
  0xf1   : > { %v858_v61 = vsel %vm589_vm3, %v848_v8, %v857_v39 }
  0xf5   : > { %9130 = vmatmul.mubr.msk.bf16.gmra.mrb[104].mxu1 %vm1066_vm2, %v505_v56  ;;  %v863_v56 = vshll.u32 %v10956_v53, 16 }
  0xf6   : > { %9133 = vmatprep.mubr.msk.bf16.mxu1 %vm10205_vm1, %v14860_v1 }
  0xf7   : > { %8920 = vmatmul.mubr.msk.bf16.gmra.mrb[104].mxu0 %vm1066_vm2, %v840_v26  ;;  %v865_v16 = vrot.slane %v863_v56, 4 }
  0xf8   : > { %v10939_v57 = vpop.f32.mrb[0].mxu1  ;;  %8923 = vmatprep.mubr.msk.bf16.mxu0 %vm10205_vm1, %v14860_v1 }
  0xf9   : > { %14915 = vst [vmem:[#allocation7_spill] sm:$0xff] %v10939_v57  ;;  %v9025_v43 = vpop.f32.mrb[1].mxu1 }
  0xfa   : > { %v1264_v51 = vpop.f32.mrb[0].mxu0  ;;  %v1683_v13 = vpop.f32.mrb[2].mxu1 }
  0xfb   : > { %v8817_v38 = vpop.f32.mrb[1].mxu0  ;;  %v9026_v63 = vpop.f32.mrb[3].mxu1 }
  0xfc   : > { %v1267_v48 = vpop.f32.mrb[2].mxu0 }
  0xfd   : > { %v8818_v10 = vpop.f32.mrb[3].mxu0  ;;  %9134 = vmatmul.mubr.msk.bf16.gmra.mrb[108].mxu1 %vm1066_vm2, %v506_v45 }
  0xfe   : > { %9137 = vmatprep.mubr.msk.bf16.mxu1 %vm10205_vm1, %v14860_v1  ;;  %v869_v10 = vshrl.u32 %v10981_v32, 16 }
  0xff   : > { %8924 = vmatmul.mubr.msk.bf16.gmra.mrb[108].mxu0 %vm1066_vm2, %v849_v2 }
 0x100   : > { %v1882_v29 = vpop.f32.mrb[4].mxu1  ;;  %8927 = vmatprep.mubr.msk.bf16.mxu0 %vm10205_vm1, %v14860_v1 }
 0x101   : > { %v10966_v26 = vadd.f32 %v1882_v29, %v1264_v51  ;;  %v9031_v15 = vpop.f32.mrb[5].mxu1  ;;  %v862_v51 = vrot.slane %v860_v12, 3  ;;  %v872_v29 = vshll.u32 %v10981_v32, 16 }
 0x102   : > { %v1272_v43 = vpop.f32.mrb[4].mxu0  ;;  %v1885_v45 = vpop.f32.mrb[6].mxu1  ;;  %v508_v15 = vpack.c.bf16 %v10904_v40, %v10886_v28 }
 0x103   : > { %14916 = vst [vmem:[#allocation8_spill] sm:$0xff] %v10966_v26  ;;  %v8821_v13 = vpop.f32.mrb[5].mxu0  ;;  %v10976_v38 = vadd.f32 %v1885_v45, %v1267_v48  ;;  %v9032_v63 = vpop.f32.mrb[7].mxu1  ;;  %v866_v8 = vor.u32 %v865_v16, %v862_v51  ;;  %v10999_v45 = vld [vmem:[%s10325_s27 + $0x210] sm:$0xff] }
 0x104   : > { %v1275_v2 = vpop.f32.mrb[6].mxu0 }
 0x105   : > { %14917 = vst [vmem:[#allocation9_spill] sm:$0xff] %v10976_v38  ;;  %v8822_v46 = vpop.f32.mrb[7].mxu0  ;;  %9138 = vmatmul.mubr.msk.bf16.gmra.mrb[112].mxu1 %vm1066_vm2, %v507_v27  ;;  %v10996_v27 = vld [vmem:[%s10325_s27 + $0x208] sm:$0xff] }
 0x106   : > { %9141 = vmatprep.mubr.msk.bf16.mxu1 %vm10205_vm1, %v14860_v1  ;;  %v11006_v28 = vpack.c.bf16 %v10999_v45, %v10996_v27 }
 0x107   : > { %8928 = vmatmul.mubr.msk.bf16.gmra.mrb[112].mxu0 %vm1066_vm2, %v858_v61 }
 0x108   : > { %v1890_v48 = vpop.f32.mrb[8].mxu1  ;;  %8931 = vmatprep.mubr.msk.bf16.mxu0 %vm10205_vm1, %v14860_v1  ;;  %v867_v1 = vsel %vm589_vm3, %v857_v39, %v866_v8 }
 0x109   : > { %v10991_v12 = vadd.f32 %v1890_v48, %v1272_v43  ;;  %v9035_v56 = vpop.f32.mrb[9].mxu1  ;;  %v871_v43 = vrot.slane %v869_v10, 3  ;;  %v874_v48 = vrot.slane %v872_v29, 4  ;;  %v878_v10 = vshrl.u32 %v11006_v28, 16 }
 0x10a   : > { %v1280_v13 = vpop.f32.mrb[8].mxu0  ;;  %v1893_v63 = vpop.f32.mrb[10].mxu1  ;;  %v14920_v56 = vmov 0.0   ;;  %v881_v29 = vshll.u32 %v11006_v28, 16 }
 0x10b   : > { %14918 = vst [vmem:[#allocation10_spill] sm:$0xff] %v10991_v12  ;;  %v8825_v61 = vpop.f32.mrb[9].mxu0  ;;  %v11001_v46 = vadd.f32 %v1893_v63, %v1275_v2  ;;  %v9036_v51 = vpop.f32.mrb[11].mxu1  ;;  %v875_v39 = vor.u32 %v874_v48, %v871_v43 }
 0x10c   : > { %v1283_v16 = vpop.f32.mrb[10].mxu0  ;;  %v11021_v51 = vld [vmem:[%s10325_s27 + $0x218] sm:$0xff] }
 0x10d   : > { %14919 = vst [vmem:[#allocation11_spill] sm:$0xff] %v11001_v46  ;;  %v8826_v40 = vpop.f32.mrb[11].mxu0  ;;  %9142 = vmatmul.mubr.msk.bf16.gmra.mrb[116].mxu1 %vm1066_vm2, %v508_v15  ;;  %v509_v15 = vpack.c.bf16 %v10925_v5, %v10907_v50  ;;  %v876_v57 = vsel %vm589_vm3, %v866_v8, %v875_v39 }
 0x10e   : > { %9145 = vmatprep.mubr.msk.bf16.mxu1 %vm10205_vm1, %v14920_v56  ;;  %v11024_v40 = vld [vmem:[%s10325_s27 + $0x220] sm:$0xff] }
 0x10f   : > { %8932 = vmatmul.mubr.msk.bf16.gmra.mrb[116].mxu0 %vm1066_vm2, %v867_v1  ;;  %v11031_v50 = vpack.c.bf16 %v11024_v40, %v11021_v51 }
 0x110   : > { %v1898_v2 = vpop.f32.mrb[12].mxu1  ;;  %8935 = vmatprep.mubr.msk.bf16.mxu0 %vm10205_vm1, %v14920_v56 }
 0x111   : > { %v11016_v63 = vadd.f32 %v1898_v2, %v1280_v13  ;;  %v9039_v61 = vpop.f32.mrb[13].mxu1  ;;  %v880_v13 = vrot.slane %v878_v10, 3  ;;  %v883_v2 = vrot.slane %v881_v29, 4  ;;  %14923 = vst [vmem:[#allocation14_spill] sm:$0xff] %v11031_v50 }
 0x112   : > { %v1288_v1 = vpop.f32.mrb[12].mxu0  ;;  %v1901_v6 = vpop.f32.mrb[14].mxu1  ;;  %v510_v61 = vpack.c.bf16 %v10948_v41, %v10928_v9 }
 0x113   : > { %14921 = vst [vmem:[#allocation12_spill] sm:$0xff] %v11016_v63  ;;  %v8829_v46 = vpop.f32.mrb[13].mxu0  ;;  %v11026_v12 = vadd.f32 %v1901_v6, %v1283_v16  ;;  %v9040_v43 = vpop.f32.mrb[15].mxu1  ;;  %v884_v8 = vor.u32 %v883_v2, %v880_v13  ;;  %v890_v16 = vshll.u32 %v11031_v50, 16 }
 0x114   : > { %v1291_v48 = vpop.f32.mrb[14].mxu0  ;;  %v887_v46 = vshrl.u32 %v11031_v50, 16  ;;  %v11049_v43 = vld [vmem:[%s10325_s27 + $0x230] sm:$0xff] }
 0x115   : > { %14922 = vst [vmem:[#allocation13_spill] sm:$0xff] %v11026_v12  ;;  %v8830_v5 = vpop.f32.mrb[15].mxu0  ;;  %9146 = vmatmul.mubr.msk.bf16.gmra.mrb[120].mxu1 %vm1066_vm2, %v509_v15  ;;  %v11046_v15 = vld [vmem:[%s10325_s27 + $0x228] sm:$0xff]  ;;  %v885_v38 = vsel %vm589_vm3, %v875_v39, %v884_v8 }
 0x116   : > { %9149 = vmatprep.mubr.msk.bf16.mxu1 %vm10205_vm1, %v14920_v56  ;;  %v11056_v9 = vpack.c.bf16 %v11049_v43, %v11046_v15 }
 0x117   : > { %8936 = vmatmul.mubr.msk.bf16.gmra.mrb[120].mxu0 %vm1066_vm2, %v876_v57 }
 0x118   : > { %v1906_v6 = vpop.f32.mrb[16].mxu1  ;;  %8939 = vmatprep.mubr.msk.bf16.mxu0 %vm10205_vm1, %v14920_v56  ;;  %14926 = vst [vmem:[#allocation17_spill] sm:$0xff] %v11056_v9 }
 0x119   : > { %v11041_v10 = vadd.f32 %v1906_v6, %v1288_v1  ;;  %v9043_v29 = vpop.f32.mrb[17].mxu1  ;;  %v889_v1 = vrot.slane %v887_v46, 3  ;;  %v892_v6 = vrot.slane %v890_v16, 4  ;;  %v899_v46 = vshll.u32 %v11056_v9, 16 }
 0x11a   : > { %v1296_v57 = vpop.f32.mrb[16].mxu0  ;;  %v1909_v5 = vpop.f32.mrb[18].mxu1 }
 0x11b   : > { %14924 = vst [vmem:[#allocation15_spill] sm:$0xff] %v11041_v10  ;;  %v8833_v12 = vpop.f32.mrb[17].mxu0  ;;  %v11051_v63 = vadd.f32 %v1909_v5, %v1291_v48  ;;  %v9044_v13 = vpop.f32.mrb[19].mxu1  ;;  %v893_v39 = vor.u32 %v892_v6, %v889_v1  ;;  %v896_v48 = vshrl.u32 %v11056_v9, 16  ;;  %v11071_v5 = vld [vmem:[%s10325_s27 + $0x238] sm:$0xff] }
 0x11c   : > { %v1299_v2 = vpop.f32.mrb[18].mxu0  ;;  %v11074_v13 = vld [vmem:[%s10325_s27 + $0x240] sm:$0xff] }
 0x11d   : > { %14925 = vst [vmem:[#allocation16_spill] sm:$0xff] %v11051_v63  ;;  %v8834_v41 = vpop.f32.mrb[19].mxu0  ;;  %9150 = vmatmul.mubr.msk.bf16.gmra.mrb[124].mxu1 %vm1066_vm2, %v510_v61  ;;  %v511_v61 = vpack.c.bf16 %v10971_v7, %v10951_v47  ;;  %v894_v26 = vsel %vm589_vm3, %v884_v8, %v893_v39  ;;  %v11081_v47 = vpack.c.bf16 %v11074_v13, %v11071_v5 }
 0x11e   : > { %9153 = vmatprep.mubr.msk.bf16.mxu1 %vm10205_vm1, %v14920_v56 }
 0x11f   : > { %8940 = vmatmul.mubr.msk.bf16.gmra.mrb[124].mxu0 %vm1066_vm2, %v885_v38  ;;  %14929 = vst [vmem:[#allocation20_spill] sm:$0xff] %v11081_v47 }
 0x120   : > { %v1914_v12 = vpop.f32.mrb[20].mxu1  ;;  %8943 = vmatprep.mubr.msk.bf16.mxu0 %vm10205_vm1, %v14920_v56 }
 0x121   : > { %v11066_v16 = vadd.f32 %v1914_v12, %v1296_v57  ;;  %v9047_v29 = vpop.f32.mrb[21].mxu1  ;;  %v898_v57 = vrot.slane %v896_v48, 3  ;;  %v901_v12 = vrot.slane %v899_v46, 4  ;;  %v908_v48 = vshll.u32 %v11081_v47, 16 }
 0x122   : > { %v1304_v38 = vpop.f32.mrb[20].mxu0  ;;  %v1917_v41 = vpop.f32.mrb[22].mxu1 }
 0x123   : > { %14927 = vst [vmem:[#allocation18_spill] sm:$0xff] %v11066_v16  ;;  %v8837_v63 = vpop.f32.mrb[21].mxu0  ;;  %v11076_v10 = vadd.f32 %v1917_v41, %v1299_v2  ;;  %v9048_v1 = vpop.f32.mrb[23].mxu1  ;;  %v902_v8 = vor.u32 %v901_v12, %v898_v57  ;;  %v905_v2 = vshrl.u32 %v11081_v47, 16  ;;  %v11096_v41 = vld [vmem:[%s10325_s27 + $0x248] sm:$0xff] }
 0x124   : > { %v1307_v6 = vpop.f32.mrb[22].mxu0  ;;  %v11099_v1 = vld [vmem:[%s10325_s27 + $0x250] sm:$0xff] }
 0x125   : > { %14928 = vst [vmem:[#allocation19_spill] sm:$0xff] %v11076_v10  ;;  %v8838_v7 = vpop.f32.mrb[23].mxu0  ;;  %9154 = vmatmul.mubr.msk.bf16.gmra.mrb[128].mxu1 %vm1066_vm2, %v511_v61  ;;  %v512_v61 = vpack.c.bf16 %v10996_v27, %v10974_v21  ;;  %v903_v9 = vsel %vm589_vm3, %v893_v39, %v902_v8  ;;  %v11106_v21 = vpack.c.bf16 %v11099_v1, %v11096_v41 }
 0x126   : > { %9157 = vmatprep.mubr.msk.bf16.mxu1 %vm10205_vm1, %v14920_v56 }
 0x127   : > { %8944 = vmatmul.mubr.msk.bf16.gmra.mrb[128].mxu0 %vm1066_vm2, %v894_v26  ;;  %14932 = vst [vmem:[#allocation23_spill] sm:$0xff] %v11106_v21 }
 0x128   : > { %v1922_v63 = vpop.f32.mrb[24].mxu1  ;;  %8947 = vmatprep.mubr.msk.bf16.mxu0 %vm10205_vm1, %v14920_v56 }
 0x129   : > { %v11091_v46 = vadd.f32 %v1922_v63, %v1304_v38  ;;  %v9051_v29 = vpop.f32.mrb[25].mxu1  ;;  %v907_v38 = vrot.slane %v905_v2, 3  ;;  %v910_v63 = vrot.slane %v908_v48, 4  ;;  %v917_v2 = vshll.u32 %v11106_v21, 16 }
 0x12a   : > { %v1312_v26 = vpop.f32.mrb[24].mxu0  ;;  %v1925_v7 = vpop.f32.mrb[26].mxu1 }
 0x12b   : > { %14930 = vst [vmem:[#allocation21_spill] sm:$0xff] %v11091_v46  ;;  %v8841_v10 = vpop.f32.mrb[25].mxu0  ;;  %v11101_v16 = vadd.f32 %v1925_v7, %v1307_v6  ;;  %v9052_v57 = vpop.f32.mrb[27].mxu1  ;;  %v911_v39 = vor.u32 %v910_v63, %v907_v38  ;;  %v914_v6 = vshrl.u32 %v11106_v21, 16  ;;  %v11121_v7 = vld [vmem:[%s10325_s27 + $0x258] sm:$0xff] }
 0x12c   : > { %v1315_v12 = vpop.f32.mrb[26].mxu0  ;;  %v11124_v57 = vld [vmem:[%s10325_s27 + $0x260] sm:$0xff] }
 0x12d   : > { %14931 = vst [vmem:[#allocation22_spill] sm:$0xff] %v11101_v16  ;;  %v8842_v27 = vpop.f32.mrb[27].mxu0  ;;  %9158 = vmatmul.mubr.msk.bf16.gmra.mrb[132].mxu1 %vm1066_vm2, %v512_v61  ;;  %v513_v61 = vpack.c.bf16 %v11021_v51, %v10999_v45  ;;  %v912_v47 = vsel %vm589_vm3, %v902_v8, %v911_v39  ;;  %v11131_v45 = vpack.c.bf16 %v11124_v57, %v11121_v7 }
 0x12e   : > { %9161 = vmatprep.mubr.msk.bf16.mxu1 %vm10205_vm1, %v14920_v56 }
 0x12f   : > { %8948 = vmatmul.mubr.msk.bf16.gmra.mrb[132].mxu0 %vm1066_vm2, %v903_v9  ;;  %14935 = vst [vmem:[#allocation26_spill] sm:$0xff] %v11131_v45 }
 0x130   : > { %v1930_v10 = vpop.f32.mrb[28].mxu1  ;;  %8951 = vmatprep.mubr.msk.bf16.mxu0 %vm10205_vm1, %v14920_v56 }
 0x131   : > { %v11116_v48 = vadd.f32 %v1930_v10, %v1312_v26  ;;  %v9055_v29 = vpop.f32.mrb[29].mxu1  ;;  %v916_v26 = vrot.slane %v914_v6, 3  ;;  %v919_v10 = vrot.slane %v917_v2, 4  ;;  %v926_v6 = vshll.u32 %v11131_v45, 16 }
 0x132   : > { %v1320_v9 = vpop.f32.mrb[28].mxu0  ;;  %v1933_v27 = vpop.f32.mrb[30].mxu1 }
 0x133   : > { %14933 = vst [vmem:[#allocation24_spill] sm:$0xff] %v11116_v48  ;;  %v8845_v16 = vpop.f32.mrb[29].mxu0  ;;  %v11126_v46 = vadd.f32 %v1933_v27, %v1315_v12  ;;  %v9056_v38 = vpop.f32.mrb[31].mxu1  ;;  %v920_v8 = vor.u32 %v919_v10, %v916_v26  ;;  %v923_v12 = vshrl.u32 %v11131_v45, 16  ;;  %v11146_v27 = vld [vmem:[%s10325_s27 + $0x268] sm:$0xff] }
 0x134   : > { %v1323_v63 = vpop.f32.mrb[30].mxu0  ;;  %v11149_v38 = vld [vmem:[%s10325_s27 + $0x270] sm:$0xff] }
 0x135   : > { %14934 = vst [vmem:[#allocation25_spill] sm:$0xff] %v11126_v46  ;;  %v8846_v51 = vpop.f32.mrb[31].mxu0  ;;  %9162 = vmatmul.mubr.msk.bf16.gmra.mrb[136].mxu1 %vm1066_vm2, %v513_v61  ;;  %v514_v61 = vpack.c.bf16 %v11046_v15, %v11024_v40  ;;  %v921_v21 = vsel %vm589_vm3, %v911_v39, %v920_v8  ;;  %v11156_v40 = vpack.c.bf16 %v11149_v38, %v11146_v27 }
 0x136   : > { %9165 = vmatprep.mubr.msk.bf16.mxu1 %vm10205_vm1, %v14920_v56 }
 0x137   : > { %8952 = vmatmul.mubr.msk.bf16.gmra.mrb[136].mxu0 %vm1066_vm2, %v912_v47  ;;  %14938 = vst [vmem:[#allocation29_spill] sm:$0xff] %v11156_v40 }
 0x138   : > { %v1938_v16 = vpop.f32.mrb[32].mxu1  ;;  %8955 = vmatprep.mubr.msk.bf16.mxu0 %vm10205_vm1, %v14920_v56 }
 0x139   : > { %v11141_v2 = vadd.f32 %v1938_v16, %v1320_v9  ;;  %v9059_v29 = vpop.f32.mrb[33].mxu1  ;;  %v925_v9 = vrot.slane %v923_v12, 3  ;;  %v928_v16 = vrot.slane %v926_v6, 4  ;;  %v935_v12 = vshll.u32 %v11156_v40, 16 }
 0x13a   : > { %v1328_v47 = vpop.f32.mrb[32].mxu0  ;;  %v1941_v51 = vpop.f32.mrb[34].mxu1 }
 0x13b   : > { %14936 = vst [vmem:[#allocation27_spill] sm:$0xff] %v11141_v2  ;;  %v8849_v46 = vpop.f32.mrb[33].mxu0  ;;  %v11151_v48 = vadd.f32 %v1941_v51, %v1323_v63  ;;  %v9060_v26 = vpop.f32.mrb[35].mxu1  ;;  %v929_v39 = vor.u32 %v928_v16, %v925_v9  ;;  %v932_v63 = vshrl.u32 %v11156_v40, 16  ;;  %v11171_v51 = vld [vmem:[%s10325_s27 + $0x278] sm:$0xff] }
 0x13c   : > { %v1331_v10 = vpop.f32.mrb[34].mxu0  ;;  %v11174_v26 = vld [vmem:[%s10325_s27 + $0x280] sm:$0xff] }
 0x13d   : > { %14937 = vst [vmem:[#allocation28_spill] sm:$0xff] %v11151_v48  ;;  %v8850_v15 = vpop.f32.mrb[35].mxu0  ;;  %9166 = vmatmul.mubr.msk.bf16.gmra.mrb[140].mxu1 %vm1066_vm2, %v514_v61  ;;  %v515_v61 = vpack.c.bf16 %v11071_v5, %v11049_v43  ;;  %v930_v45 = vsel %vm589_vm3, %v920_v8, %v929_v39  ;;  %v11181_v43 = vpack.c.bf16 %v11174_v26, %v11171_v51 }
 0x13e   : > { %9169 = vmatprep.mubr.msk.bf16.mxu1 %vm10205_vm1, %v14920_v56 }
 0x13f   : > { %8956 = vmatmul.mubr.msk.bf16.gmra.mrb[140].mxu0 %vm1066_vm2, %v921_v21  ;;  %14941 = vst [vmem:[#allocation32_spill] sm:$0xff] %v11181_v43 }
 0x140   : > { %v1946_v46 = vpop.f32.mrb[36].mxu1  ;;  %8959 = vmatprep.mubr.msk.bf16.mxu0 %vm10205_vm1, %v14920_v56 }
 0x141   : > { %v11166_v6 = vadd.f32 %v1946_v46, %v1328_v47  ;;  %v9063_v29 = vpop.f32.mrb[37].mxu1  ;;  %v934_v47 = vrot.slane %v932_v63, 3  ;;  %v937_v46 = vrot.slane %v935_v12, 4  ;;  %v944_v63 = vshll.u32 %v11181_v43, 16 }
 0x142   : > { %v1336_v21 = vpop.f32.mrb[36].mxu0  ;;  %v1949_v15 = vpop.f32.mrb[38].mxu1 }
 0x143   : > { %14939 = vst [vmem:[#allocation30_spill] sm:$0xff] %v11166_v6  ;;  %v8853_v48 = vpop.f32.mrb[37].mxu0  ;;  %v11176_v2 = vadd.f32 %v1949_v15, %v1331_v10  ;;  %v9064_v9 = vpop.f32.mrb[39].mxu1  ;;  %v938_v8 = vor.u32 %v937_v46, %v934_v47  ;;  %v941_v10 = vshrl.u32 %v11181_v43, 16  ;;  %v11196_v15 = vld [vmem:[%s10325_s27 + $0x288] sm:$0xff] }
 0x144   : > { %v1339_v16 = vpop.f32.mrb[38].mxu0  ;;  %v11199_v9 = vld [vmem:[%s10325_s27 + $0x290] sm:$0xff] }
 0x145   : > { %14940 = vst [vmem:[#allocation31_spill] sm:$0xff] %v11176_v2  ;;  %v8854_v5 = vpop.f32.mrb[39].mxu0  ;;  %9170 = vmatmul.mubr.msk.bf16.gmra.mrb[144].mxu1 %vm1066_vm2, %v515_v61  ;;  %v516_v61 = vpack.c.bf16 %v11096_v41, %v11074_v13  ;;  %v939_v40 = vsel %vm589_vm3, %v929_v39, %v938_v8  ;;  %v11206_v13 = vpack.c.bf16 %v11199_v9, %v11196_v15 }
 0x146   : > { %9173 = vmatprep.mubr.msk.bf16.mxu1 %vm10205_vm1, %v14920_v56 }
 0x147   : > { %8960 = vmatmul.mubr.msk.bf16.gmra.mrb[144].mxu0 %vm1066_vm2, %v930_v45  ;;  %14944 = vst [vmem:[#allocation35_spill] sm:$0xff] %v11206_v13 }
 0x148   : > { %v1954_v48 = vpop.f32.mrb[40].mxu1  ;;  %8963 = vmatprep.mubr.msk.bf16.mxu0 %vm10205_vm1, %v14920_v56 }
 0x149   : > { %v11191_v12 = vadd.f32 %v1954_v48, %v1336_v21  ;;  %v9067_v29 = vpop.f32.mrb[41].mxu1  ;;  %v943_v21 = vrot.slane %v941_v10, 3  ;;  %v946_v48 = vrot.slane %v944_v63, 4  ;;  %v953_v10 = vshll.u32 %v11206_v13, 16 }
 0x14a   : > { %v1344_v45 = vpop.f32.mrb[40].mxu0  ;;  %v1957_v5 = vpop.f32.mrb[42].mxu1 }
 0x14b   : > { %14942 = vst [vmem:[#allocation33_spill] sm:$0xff] %v11191_v12  ;;  %v8857_v2 = vpop.f32.mrb[41].mxu0  ;;  %v11201_v6 = vadd.f32 %v1957_v5, %v1339_v16  ;;  %v9068_v47 = vpop.f32.mrb[43].mxu1  ;;  %v947_v39 = vor.u32 %v946_v48, %v943_v21  ;;  %v950_v16 = vshrl.u32 %v11206_v13, 16  ;;  %v11221_v5 = vld [vmem:[%s10325_s27 + $0x298] sm:$0xff] }
 0x14c   : > { %v1347_v46 = vpop.f32.mrb[42].mxu0  ;;  %v11224_v47 = vld [vmem:[%s10325_s27 + $0x2a0] sm:$0xff] }
 0x14d   : > { %14943 = vst [vmem:[#allocation34_spill] sm:$0xff] %v11201_v6  ;;  %v8858_v41 = vpop.f32.mrb[43].mxu0  ;;  %9174 = vmatmul.mubr.msk.bf16.gmra.mrb[148].mxu1 %vm1066_vm2, %v516_v61  ;;  %v517_v61 = vpack.c.bf16 %v11121_v7, %v11099_v1  ;;  %v948_v43 = vsel %vm589_vm3, %v938_v8, %v947_v39  ;;  %v11231_v1 = vpack.c.bf16 %v11224_v47, %v11221_v5 }
 0x14e   : > { %9177 = vmatprep.mubr.msk.bf16.mxu1 %vm10205_vm1, %v14920_v56 }
 0x14f   : > { %8964 = vmatmul.mubr.msk.bf16.gmra.mrb[148].mxu0 %vm1066_vm2, %v939_v40  ;;  %14947 = vst [vmem:[#allocation38_spill] sm:$0xff] %v11231_v1 }
 0x150   : > { %v1962_v2 = vpop.f32.mrb[44].mxu1  ;;  %8967 = vmatprep.mubr.msk.bf16.mxu0 %vm10205_vm1, %v14920_v56 }
 0x151   : > { %v11216_v63 = vadd.f32 %v1962_v2, %v1344_v45  ;;  %v9071_v29 = vpop.f32.mrb[45].mxu1  ;;  %v952_v45 = vrot.slane %v950_v16, 3  ;;  %v955_v2 = vrot.slane %v953_v10, 4  ;;  %v962_v16 = vshll.u32 %v11231_v1, 16 }
 0x152   : > { %v1352_v40 = vpop.f32.mrb[44].mxu0  ;;  %v1965_v41 = vpop.f32.mrb[46].mxu1 }
 0x153   : > { %14945 = vst [vmem:[#allocation36_spill] sm:$0xff] %v11216_v63  ;;  %v8861_v6 = vpop.f32.mrb[45].mxu0  ;;  %v11226_v12 = vadd.f32 %v1965_v41, %v1347_v46  ;;  %v9072_v21 = vpop.f32.mrb[47].mxu1  ;;  %v956_v8 = vor.u32 %v955_v2, %v952_v45  ;;  %v959_v46 = vshrl.u32 %v11231_v1, 16  ;;  %v11246_v41 = vld [vmem:[%s10325_s27 + $0x2a8] sm:$0xff] }
 0x154   : > { %v1355_v48 = vpop.f32.mrb[46].mxu0  ;;  %v11249_v21 = vld [vmem:[%s10325_s27 + $0x2b0] sm:$0xff] }
 0x155   : > { %14946 = vst [vmem:[#allocation37_spill] sm:$0xff] %v11226_v12  ;;  %v8862_v7 = vpop.f32.mrb[47].mxu0  ;;  %9178 = vmatmul.mubr.msk.bf16.gmra.mrb[152].mxu1 %vm1066_vm2, %v517_v61  ;;  %v518_v61 = vpack.c.bf16 %v11146_v27, %v11124_v57  ;;  %v957_v13 = vsel %vm589_vm3, %v947_v39, %v956_v8  ;;  %v11256_v57 = vpack.c.bf16 %v11249_v21, %v11246_v41 }
 0x156   : > { %9181 = vmatprep.mubr.msk.bf16.mxu1 %vm10205_vm1, %v14920_v56 }
 0x157   : > { %8968 = vmatmul.mubr.msk.bf16.gmra.mrb[152].mxu0 %vm1066_vm2, %v948_v43  ;;  %14950 = vst [vmem:[#allocation41_spill] sm:$0xff] %v11256_v57 }
 0x158   : > { %v1970_v6 = vpop.f32.mrb[48].mxu1  ;;  %8971 = vmatprep.mubr.msk.bf16.mxu0 %vm10205_vm1, %v14920_v56 }
 0x159   : > { %v11241_v10 = vadd.f32 %v1970_v6, %v1352_v40  ;;  %v9075_v29 = vpop.f32.mrb[49].mxu1  ;;  %v961_v40 = vrot.slane %v959_v46, 3  ;;  %v964_v6 = vrot.slane %v962_v16, 4  ;;  %v971_v46 = vshll.u32 %v11256_v57, 16 }
 0x15a   : > { %v1360_v43 = vpop.f32.mrb[48].mxu0  ;;  %v1973_v7 = vpop.f32.mrb[50].mxu1 }
 0x15b   : > { %14948 = vst [vmem:[#allocation39_spill] sm:$0xff] %v11241_v10  ;;  %v8865_v12 = vpop.f32.mrb[49].mxu0  ;;  %v11251_v63 = vadd.f32 %v1973_v7, %v1355_v48  ;;  %v9076_v45 = vpop.f32.mrb[51].mxu1  ;;  %v965_v39 = vor.u32 %v964_v6, %v961_v40  ;;  %v968_v48 = vshrl.u32 %v11256_v57, 16  ;;  %v11271_v7 = vld [vmem:[%s10325_s27 + $0x2b8] sm:$0xff] }
 0x15c   : > { %v1363_v2 = vpop.f32.mrb[50].mxu0  ;;  %v11274_v45 = vld [vmem:[%s10325_s27 + $0x2c0] sm:$0xff]  ;;  %v10126_v40 = vld [vmem:[%s14854_s4 + $0x18] sm:$0xff]  }
 0x15d   : > { %14949 = vst [vmem:[#allocation40_spill] sm:$0xff] %v11251_v63  ;;  %v8866_v27 = vpop.f32.mrb[51].mxu0  ;;  %9182 = vmatmul.mubr.msk.bf16.gmra.mrb[156].mxu1 %vm1066_vm2, %v518_v61  ;;  %v519_v61 = vpack.c.bf16 %v11171_v51, %v11149_v38  ;;  %v11284_v38 = vpack.c.bf16 %v11274_v45, %v11271_v7 }
 0x15e   : > { %9185 = vmatprep.mubr.msk.bf16.mxu1 %vm10205_vm1, %v14920_v56  ;;  %9458 = vmatpush3.bf16.msra.mxu1 %v10126_v40  ;;  %v11300_v40 = vld [vmem:[%s10325_s27 + $0x2c8] sm:$0xff] }
 0x15f   : > { %8972 = vmatmul.mubr.msk.bf16.gmra.mrb[156].mxu0 %vm1066_vm2, %v957_v13  ;;  %14953 = vst [vmem:[#allocation44_spill] sm:$0xff] %v11284_v38  ;;  %9663 = vmatprep.subr.bf16.mxu1 %v14920_v56 }
 0x160   : > { %v1978_v12 = vpop.f32.mrb[52].mxu1  ;;  %8975 = vmatprep.mubr.msk.bf16.mxu0 %vm10205_vm1, %v14920_v56 }
 0x161   : > { %v11266_v16 = vadd.f32 %v1978_v12, %v1360_v43  ;;  %v9079_v29 = vpop.f32.mrb[53].mxu1  ;;  %v966_v12 = vsel %vm589_vm3, %v956_v8, %v965_v39 }
 0x162   : > { %v1368_v13 = vpop.f32.mrb[52].mxu0  ;;  %v1981_v27 = vpop.f32.mrb[54].mxu1  ;;  %v970_v29 = vrot.slane %v968_v48, 3  ;;  %v980_v48 = vshll.u32 %v11284_v38, 16 }
 0x163   : > { %14951 = vst [vmem:[#allocation42_spill] sm:$0xff] %v11266_v16  ;;  %v8869_v6 = vpop.f32.mrb[53].mxu0  ;;  %v11279_v63 = vadd.f32 %v1981_v27, %v1363_v2  ;;  %v9080_v10 = vpop.f32.mrb[55].mxu1  ;;  %v973_v16 = vrot.slane %v971_v46, 4  ;;  %v977_v2 = vshrl.u32 %v11284_v38, 16 }
 0x164   : > { %v1371_v43 = vpop.f32.mrb[54].mxu0  ;;  %v11303_v6 = vld [vmem:[%s10325_s27 + $0x2d0] sm:$0xff] }
 0x165   : > { %14952 = vst [vmem:[#allocation43_spill] sm:$0xff] %v11279_v63  ;;  %v8870_v51 = vpop.f32.mrb[55].mxu0  ;;  %9186 = vmatmul.mubr.msk.bf16.gmra.mrb[160].mxu1 %vm1066_vm2, %v519_v61  ;;  %v974_v10 = vor.u32 %v973_v16, %v970_v29  ;;  %v520_v61 = vpack.c.bf16 %v11196_v15, %v11174_v26  ;;  %v11310_v26 = vpack.c.bf16 %v11303_v6, %v11300_v40 }
 0x166   : > { %9189 = vmatprep.mubr.msk.bf16.mxu1 %vm10205_vm1, %v14920_v56 }
 0x167   : > { %8976 = vmatmul.mubr.msk.bf16.gmra.mrb[160].mxu0 %vm1066_vm2, %v966_v12  ;;  %v975_v1 = vsel %vm589_vm3, %v965_v39, %v974_v10  ;;  %14956 = vst [vmem:[#allocation47_spill] sm:$0xff] %v11310_v26 }
 0x168   : > { %v1986_v8 = vpop.f32.mrb[56].mxu1  ;;  %8979 = vmatprep.mubr.msk.bf16.mxu0 %vm10205_vm1, %v14920_v56 }
 0x169   : > { %v11295_v46 = vadd.f32 %v1986_v8, %v1368_v13  ;;  %v9083_v27 = vpop.f32.mrb[57].mxu1  ;;  %v979_v13 = vrot.slane %v977_v2, 3  ;;  %v982_v8 = vrot.slane %v980_v48, 4  ;;  %v989_v2 = vshll.u32 %v11310_v26, 16 }
 0x16a   : > { %v1376_v12 = vpop.f32.mrb[56].mxu0  ;;  %v1989_v51 = vpop.f32.mrb[58].mxu1 }
 0x16b   : > { %14954 = vst [vmem:[#allocation45_spill] sm:$0xff] %v11295_v46  ;;  %v8873_v63 = vpop.f32.mrb[57].mxu0  ;;  %v11305_v57 = vadd.f32 %v1989_v51, %v1371_v43  ;;  %v9084_v16 = vpop.f32.mrb[59].mxu1  ;;  %v983_v39 = vor.u32 %v982_v8, %v979_v13  ;;  %v986_v43 = vshrl.u32 %v11310_v26, 16  ;;  %v11325_v51 = vld [vmem:[%s10325_s27 + $0x2d8] sm:$0xff] }
 0x16c   : > { %v1379_v29 = vpop.f32.mrb[58].mxu0  ;;  %v11328_v16 = vld [vmem:[%s10325_s27 + $0x2e0] sm:$0xff] }
 0x16d   : > { %14955 = vst [vmem:[#allocation46_spill] sm:$0xff] %v11305_v57  ;;  %v8874_v15 = vpop.f32.mrb[59].mxu0  ;;  %9190 = vmatmul.mubr.msk.bf16.gmra.mrb[164].mxu1 %vm1066_vm2, %v520_v61  ;;  %v521_v61 = vpack.c.bf16 %v11221_v5, %v11199_v9  ;;  %v984_v38 = vsel %vm589_vm3, %v974_v10, %v983_v39  ;;  %v11335_v9 = vpack.c.bf16 %v11328_v16, %v11325_v51 }
 0x16e   : > { %9193 = vmatprep.mubr.msk.bf16.mxu1 %vm10205_vm1, %v14920_v56 }
 0x16f   : > { %8980 = vmatmul.mubr.msk.bf16.gmra.mrb[164].mxu0 %vm1066_vm2, %v975_v1  ;;  %14959 = vst [vmem:[#allocation50_spill] sm:$0xff] %v11335_v9 }
 0x170   : > { %v1994_v63 = vpop.f32.mrb[60].mxu1  ;;  %8983 = vmatprep.mubr.msk.bf16.mxu0 %vm10205_vm1, %v14920_v56 }
 0x171   : > { %v11320_v48 = vadd.f32 %v1994_v63, %v1376_v12  ;;  %v9087_v27 = vpop.f32.mrb[61].mxu1  ;;  %v988_v12 = vrot.slane %v986_v43, 3  ;;  %v991_v63 = vrot.slane %v989_v2, 4  ;;  %v998_v43 = vshll.u32 %v11335_v9, 16 }
 0x172   : > { %v1384_v1 = vpop.f32.mrb[60].mxu0  ;;  %v1997_v15 = vpop.f32.mrb[62].mxu1 }
 0x173   : > { %14957 = vst [vmem:[#allocation48_spill] sm:$0xff] %v11320_v48  ;;  %v8877_v57 = vpop.f32.mrb[61].mxu0  ;;  %v11330_v46 = vadd.f32 %v1997_v15, %v1379_v29  ;;  %v9088_v13 = vpop.f32.mrb[63].mxu1  ;;  %v992_v10 = vor.u32 %v991_v63, %v988_v12  ;;  %v995_v29 = vshrl.u32 %v11335_v9, 16  ;;  %v11350_v15 = vld [vmem:[%s10325_s27 + $0x2e8] sm:$0xff] }
 0x174   : > { %v1387_v8 = vpop.f32.mrb[62].mxu0  ;;  %v11353_v13 = vld [vmem:[%s10325_s27 + $0x2f0] sm:$0xff] }
 0x175   : > { %14958 = vst [vmem:[#allocation49_spill] sm:$0xff] %v11330_v46  ;;  %v8878_v5 = vpop.f32.mrb[63].mxu0  ;;  %9194 = vmatmul.mubr.msk.bf16.gmra.mrb[168].mxu1 %vm1066_vm2, %v521_v61  ;;  %v522_v61 = vpack.c.bf16 %v11246_v41, %v11224_v47  ;;  %v993_v26 = vsel %vm589_vm3, %v983_v39, %v992_v10  ;;  %v11360_v47 = vpack.c.bf16 %v11353_v13, %v11350_v15 }
 0x176   : > { %9197 = vmatprep.mubr.msk.bf16.mxu1 %vm10205_vm1, %v14920_v56 }
 0x177   : > { %8984 = vmatmul.mubr.msk.bf16.gmra.mrb[168].mxu0 %vm1066_vm2, %v984_v38  ;;  %14962 = vst [vmem:[#allocation53_spill] sm:$0xff] %v11360_v47 }
 0x178   : > { %v2002_v57 = vpop.f32.mrb[64].mxu1  ;;  %8987 = vmatprep.mubr.msk.bf16.mxu0 %vm10205_vm1, %v14920_v56 }
 0x179   : > { %v11345_v2 = vadd.f32 %v2002_v57, %v1384_v1  ;;  %v9091_v27 = vpop.f32.mrb[65].mxu1  ;;  %v997_v1 = vrot.slane %v995_v29, 3  ;;  %v1000_v57 = vrot.slane %v998_v43, 4  ;;  %v1007_v29 = vshll.u32 %v11360_v47, 16 }
 0x17a   : > { %v1392_v38 = vpop.f32.mrb[64].mxu0  ;;  %v2005_v5 = vpop.f32.mrb[66].mxu1 }
 0x17b   : > { %14960 = vst [vmem:[#allocation51_spill] sm:$0xff] %v11345_v2  ;;  %v8881_v46 = vpop.f32.mrb[65].mxu0  ;;  %v11355_v48 = vadd.f32 %v2005_v5, %v1387_v8  ;;  %v9092_v12 = vpop.f32.mrb[67].mxu1  ;;  %v1001_v39 = vor.u32 %v1000_v57, %v997_v1  ;;  %v1004_v8 = vshrl.u32 %v11360_v47, 16  ;;  %v11375_v5 = vld [vmem:[%s10325_s27 + $0x2f8] sm:$0xff] }
 0x17c   : > { %v1395_v63 = vpop.f32.mrb[66].mxu0  ;;  %v11378_v12 = vld [vmem:[%s10325_s27 + $0x300] sm:$0xff] }
 0x17d   : > { %14961 = vst [vmem:[#allocation52_spill] sm:$0xff] %v11355_v48  ;;  %v8882_v41 = vpop.f32.mrb[67].mxu0  ;;  %9198 = vmatmul.mubr.msk.bf16.gmra.mrb[172].mxu1 %vm1066_vm2, %v522_v61  ;;  %v523_v61 = vpack.c.bf16 %v11271_v7, %v11249_v21  ;;  %v1002_v9 = vsel %vm589_vm3, %v992_v10, %v1001_v39  ;;  %v11385_v21 = vpack.c.bf16 %v11378_v12, %v11375_v5 }
 0x17e   : > { %9201 = vmatprep.mubr.msk.bf16.mxu1 %vm10205_vm1, %v14920_v56 }
 0x17f   : > { %8988 = vmatmul.mubr.msk.bf16.gmra.mrb[172].mxu0 %vm1066_vm2, %v993_v26  ;;  %14965 = vst [vmem:[#allocation56_spill] sm:$0xff] %v11385_v21 }
 0x180   : > { %v2010_v46 = vpop.f32.mrb[68].mxu1  ;;  %8991 = vmatprep.mubr.msk.bf16.mxu0 %vm10205_vm1, %v14920_v56 }
 0x181   : > { %v11370_v43 = vadd.f32 %v2010_v46, %v1392_v38  ;;  %v9095_v27 = vpop.f32.mrb[69].mxu1  ;;  %v1006_v38 = vrot.slane %v1004_v8, 3  ;;  %v1009_v46 = vrot.slane %v1007_v29, 4  ;;  %v1016_v8 = vshll.u32 %v11385_v21, 16 }
 0x182   : > { %v1400_v26 = vpop.f32.mrb[68].mxu0  ;;  %v2013_v41 = vpop.f32.mrb[70].mxu1 }
 0x183   : > { %14963 = vst [vmem:[#allocation54_spill] sm:$0xff] %v11370_v43  ;;  %v8885_v48 = vpop.f32.mrb[69].mxu0  ;;  %v11380_v2 = vadd.f32 %v2013_v41, %v1395_v63  ;;  %v9096_v1 = vpop.f32.mrb[71].mxu1  ;;  %v1010_v10 = vor.u32 %v1009_v46, %v1006_v38  ;;  %v1013_v63 = vshrl.u32 %v11385_v21, 16  ;;  %v11400_v41 = vld [vmem:[%s10325_s27 + $0x308] sm:$0xff] }
 0x184   : > { %v1403_v57 = vpop.f32.mrb[70].mxu0  ;;  %v11403_v1 = vld [vmem:[%s10325_s27 + $0x310] sm:$0xff] }
 0x185   : > { %14964 = vst [vmem:[#allocation55_spill] sm:$0xff] %v11380_v2  ;;  %v8886_v7 = vpop.f32.mrb[71].mxu0  ;;  %9202 = vmatmul.mubr.msk.bf16.gmra.mrb[176].mxu1 %vm1066_vm2, %v523_v61  ;;  %v524_v61 = vpack.c.bf16 %v11300_v40, %v11274_v45  ;;  %v1011_v47 = vsel %vm589_vm3, %v1001_v39, %v1010_v10  ;;  %v11410_v45 = vpack.c.bf16 %v11403_v1, %v11400_v41 }
 0x186   : > { %9205 = vmatprep.mubr.msk.bf16.mxu1 %vm10205_vm1, %v14920_v56 }
 0x187   : > { %8992 = vmatmul.mubr.msk.bf16.gmra.mrb[176].mxu0 %vm1066_vm2, %v1002_v9  ;;  %14968 = vst [vmem:[#allocation59_spill] sm:$0xff] %v11410_v45 }
 0x188   : > { %v2018_v48 = vpop.f32.mrb[72].mxu1  ;;  %8995 = vmatprep.mubr.msk.bf16.mxu0 %vm10205_vm1, %v14920_v56 }
 0x189   : > { %v11395_v29 = vadd.f32 %v2018_v48, %v1400_v26  ;;  %v9099_v27 = vpop.f32.mrb[73].mxu1  ;;  %v1015_v26 = vrot.slane %v1013_v63, 3  ;;  %v1018_v48 = vrot.slane %v1016_v8, 4  ;;  %v1025_v63 = vshll.u32 %v11410_v45, 16 }
 0x18a   : > { %v1408_v9 = vpop.f32.mrb[72].mxu0  ;;  %v2021_v7 = vpop.f32.mrb[74].mxu1 }
 0x18b   : > { %14966 = vst [vmem:[#allocation57_spill] sm:$0xff] %v11395_v29  ;;  %v8889_v2 = vpop.f32.mrb[73].mxu0  ;;  %v11405_v43 = vadd.f32 %v2021_v7, %v1403_v57  ;;  %v9100_v38 = vpop.f32.mrb[75].mxu1  ;;  %v1019_v39 = vor.u32 %v1018_v48, %v1015_v26  ;;  %v1022_v57 = vshrl.u32 %v11410_v45, 16  ;;  %v11425_v7 = vld [vmem:[%s10325_s27 + $0x318] sm:$0xff] }
 0x18c   : > { %v1411_v46 = vpop.f32.mrb[74].mxu0  ;;  %v11428_v38 = vld [vmem:[%s10325_s27 + $0x320] sm:$0xff] }
 0x18d   : > { %14967 = vst [vmem:[#allocation58_spill] sm:$0xff] %v11405_v43  ;;  %v8890_v40 = vpop.f32.mrb[75].mxu0  ;;  %9206 = vmatmul.mubr.msk.bf16.gmra.mrb[180].mxu1 %vm1066_vm2, %v524_v61  ;;  %v525_v61 = vpack.c.bf16 %v11325_v51, %v11303_v6  ;;  %v1020_v21 = vsel %vm589_vm3, %v1010_v10, %v1019_v39  ;;  %v11435_v6 = vpack.c.bf16 %v11428_v38, %v11425_v7 }
 0x18e   : > { %9209 = vmatprep.mubr.msk.bf16.mxu1 %vm10205_vm1, %v14920_v56 }
 0x18f   : > { %8996 = vmatmul.mubr.msk.bf16.gmra.mrb[180].mxu0 %vm1066_vm2, %v1011_v47  ;;  %14971 = vst [vmem:[#allocation62_spill] sm:$0xff] %v11435_v6 }
 0x190   : > { %v2026_v2 = vpop.f32.mrb[76].mxu1  ;;  %8999 = vmatprep.mubr.msk.bf16.mxu0 %vm10205_vm1, %v14920_v56 }
 0x191   : > { %v11420_v8 = vadd.f32 %v2026_v2, %v1408_v9  ;;  %v9103_v27 = vpop.f32.mrb[77].mxu1  ;;  %v1024_v9 = vrot.slane %v1022_v57, 3  ;;  %v1027_v2 = vrot.slane %v1025_v63, 4  ;;  %v1034_v57 = vshll.u32 %v11435_v6, 16 }
 0x192   : > { %v1416_v47 = vpop.f32.mrb[76].mxu0  ;;  %v2029_v40 = vpop.f32.mrb[78].mxu1 }
 0x193   : > { %14969 = vst [vmem:[#allocation60_spill] sm:$0xff] %v11420_v8  ;;  %v8893_v43 = vpop.f32.mrb[77].mxu0  ;;  %v11430_v29 = vadd.f32 %v2029_v40, %v1411_v46  ;;  %v9104_v26 = vpop.f32.mrb[79].mxu1  ;;  %v1028_v10 = vor.u32 %v1027_v2, %v1024_v9  ;;  %v1031_v46 = vshrl.u32 %v11435_v6, 16  ;;  %v11450_v40 = vld [vmem:[%s10325_s27 + $0x328] sm:$0xff] }
 0x194   : > { %v1419_v48 = vpop.f32.mrb[78].mxu0  ;;  %v11453_v26 = vld [vmem:[%s10325_s27 + $0x330] sm:$0xff] }
 0x195   : > { %14970 = vst [vmem:[#allocation61_spill] sm:$0xff] %v11430_v29  ;;  %v8894_v51 = vpop.f32.mrb[79].mxu0  ;;  %9210 = vmatmul.mubr.msk.bf16.gmra.mrb[184].mxu1 %vm1066_vm2, %v525_v61  ;;  %v526_v61 = vpack.c.bf16 %v11350_v15, %v11328_v16  ;;  %v1029_v45 = vsel %vm589_vm3, %v1019_v39, %v1028_v10  ;;  %v11460_v16 = vpack.c.bf16 %v11453_v26, %v11450_v40 }
 0x196   : > { %9213 = vmatprep.mubr.msk.bf16.mxu1 %vm10205_vm1, %v14920_v56 }
 0x197   : > { %9000 = vmatmul.mubr.msk.bf16.gmra.mrb[184].mxu0 %vm1066_vm2, %v1020_v21  ;;  %14974 = vst [vmem:[#allocation65_spill] sm:$0xff] %v11460_v16 }
 0x198   : > { %v2034_v43 = vpop.f32.mrb[80].mxu1  ;;  %9003 = vmatprep.mubr.msk.bf16.mxu0 %vm10205_vm1, %v14920_v56 }
 0x199   : > { %v11445_v63 = vadd.f32 %v2034_v43, %v1416_v47  ;;  %v9107_v27 = vpop.f32.mrb[81].mxu1  ;;  %v1033_v47 = vrot.slane %v1031_v46, 3  ;;  %v1036_v43 = vrot.slane %v1034_v57, 4  ;;  %v1043_v46 = vshll.u32 %v11460_v16, 16 }
 0x19a   : > { %v1424_v21 = vpop.f32.mrb[80].mxu0  ;;  %v2037_v51 = vpop.f32.mrb[82].mxu1 }
 0x19b   : > { %14972 = vst [vmem:[#allocation63_spill] sm:$0xff] %v11445_v63  ;;  %v8897_v29 = vpop.f32.mrb[81].mxu0  ;;  %v11455_v8 = vadd.f32 %v2037_v51, %v1419_v48  ;;  %v9108_v9 = vpop.f32.mrb[83].mxu1  ;;  %v1037_v39 = vor.u32 %v1036_v43, %v1033_v47  ;;  %v1040_v48 = vshrl.u32 %v11460_v16, 16  ;;  %v11475_v51 = vld [vmem:[%s10325_s27 + $0x338] sm:$0xff] }
 0x19c   : > { %v1427_v2 = vpop.f32.mrb[82].mxu0  ;;  %v11478_v9 = vld [vmem:[%s10325_s27 + $0x340] sm:$0xff] }
 0x19d   : > { %14973 = vst [vmem:[#allocation64_spill] sm:$0xff] %v11455_v8  ;;  %v8898_v15 = vpop.f32.mrb[83].mxu0  ;;  %9214 = vmatmul.mubr.msk.bf16.gmra.mrb[188].mxu1 %vm1066_vm2, %v526_v61  ;;  %v527_v61 = vpack.c.bf16 %v11375_v5, %v11353_v13  ;;  %v1038_v6 = vsel %vm589_vm3, %v1028_v10, %v1037_v39  ;;  %v1042_v16 = vrot.slane %v1040_v48, 3 }
 0x19e   : > { %9217 = vmatprep.mubr.msk.bf16.mxu1 %vm10205_vm1, %v14920_v56 }
 0x19f   : > { %9004 = vmatmul.mubr.msk.bf16.gmra.mrb[188].mxu0 %vm1066_vm2, %v1029_v45 }
 0x1a0   : > { %v2042_v29 = vpop.f32.mrb[84].mxu1  ;;  %9007 = vmatprep.mubr.msk.bf16.mxu0 %vm10205_vm1, %v14920_v56 }
 0x1a1   : > { %v11470_v57 = vadd.f32 %v2042_v29, %v1424_v21  ;;  %v9111_v27 = vpop.f32.mrb[85].mxu1  ;;  %v1045_v21 = vrot.slane %v1043_v46, 4  ;;  %v11485_v29 = vpack.c.bf16 %v11478_v9, %v11475_v51 }
 0x1a2   : > { %v1432_v45 = vpop.f32.mrb[84].mxu0  ;;  %v2045_v15 = vpop.f32.mrb[86].mxu1  ;;  %v528_v27 = vpack.c.bf16 %v11400_v41, %v11378_v12 }
 0x1a3   : > { %14975 = vst [vmem:[#allocation66_spill] sm:$0xff] %v11470_v57  ;;  %v8901_v8 = vpop.f32.mrb[85].mxu0  ;;  %v11480_v63 = vadd.f32 %v2045_v15, %v1427_v2  ;;  %v9112_v47 = vpop.f32.mrb[87].mxu1  ;;  %v1049_v10 = vshrl.u32 %v11485_v29, 16  ;;  %v1052_v2 = vshll.u32 %v11485_v29, 16 }
 0x1a4   : > { %v1435_v43 = vpop.f32.mrb[86].mxu0  ;;  %v1046_v8 = vor.u32 %v1045_v21, %v1042_v16 }
 0x1a5   : > { %14976 = vst [vmem:[#allocation67_spill] sm:$0xff] %v11480_v63  ;;  %v8902_v13 = vpop.f32.mrb[87].mxu0  ;;  %9218 = vmatmul.mubr.msk.bf16.gmra.mrb[192].mxu1 %vm1066_vm2, %v527_v61  ;;  %v1051_v16 = vrot.slane %v1049_v10, 3  ;;  %v1054_v21 = vrot.slane %v1052_v2, 4  ;;  %v14882_v2 = vrot.slane %v10635_v54, 3 }
 0x1a6   : > { %9221 = vmatprep.mubr.msk.bf16.mxu1 %vm10205_vm1, %v14920_v56  ;;  %v1047_v57 = vsel %vm589_vm3, %v1037_v39, %v1046_v8 }
 0x1a7   : > { %9008 = vmatmul.mubr.msk.bf16.gmra.mrb[192].mxu0 %vm1066_vm2, %v1038_v6  ;;  %v1055_v41 = vor.u32 %v1054_v21, %v1051_v16 }
 0x1a8   : > { %v2050_v5 = vpop.f32.mrb[88].mxu1  ;;  %9011 = vmatprep.mubr.msk.bf16.mxu0 %vm10205_vm1, %v14920_v56 }
 0x1a9   : > { %v11495_v48 = vadd.f32 %v2050_v5, %v1432_v45  ;;  %v9115_v46 = vpop.f32.mrb[89].mxu1  ;;  %v2390_v45 = vrot.slane %v10656_v4, 3 }
 0x1aa   : > { %v1440_v61 = vpop.f32.mrb[88].mxu0  ;;  %v2053_v15 = vpop.f32.mrb[90].mxu1 }
 0x1ab   : > { %v8905_v47 = vpop.f32.mrb[89].mxu0  ;;  %v11499_v13 = vadd.f32 %v2053_v15, %v1435_v43  ;;  %v9116_v6 = vpop.f32.mrb[91].mxu1  ;;  %v11521_v4 = vsel %vm2360_vm4, %v14882_v2, %v2390_v45 }
 0x1ac   : > { %v1443_v63 = vpop.f32.mrb[90].mxu0  ;;  %v1056_v47 = vsel %vm589_vm3, %v1046_v8, %v1055_v41 }
 0x1ad   : > { %v8906_v50 = vpop.f32.mrb[91].mxu0  ;;  %9222 = vmatmul.mubr.msk.bf16.gmra.mrb[196].mxu1 %vm1066_vm2, %v528_v27 }
 0x1ae   : > { %9225 = vmatprep.mubr.msk.bf16.mxu1 %vm10205_vm1, %v14920_v56  ;;  %v529_v50 = vpack.c.bf16 %v11425_v7, %v11403_v1  ;;  %v2392_v7 = vrot.slane %v10681_v20, 3 }
 0x1af   : > { %9012 = vmatmul.mubr.msk.bf16.gmra.mrb[196].mxu0 %vm1066_vm2, %v1047_v57 }
 0x1b0   : > { %v2058_v12 = vpop.f32.mrb[92].mxu1  ;;  %9015 = vmatprep.mubr.msk.bf16.mxu0 %vm10205_vm1, %v14920_v56  ;;  %v11539_v20 = vsel %vm2360_vm4, %v2390_v45, %v2392_v7  ;;  %v531_v45 = vpack.c.bf16 %v11475_v51, %v11453_v26  ;;  %v2364_v26 = vrot.slane %v10379_v37, 3  ;;  %v2396_v51 = vrot.slane %v10723_v49, 3 }
 0x1b1   : > { %v11509_v43 = vadd.f32 %v2058_v12, %v1440_v61  ;;  %v9119_v39 = vpop.f32.mrb[93].mxu1  ;;  %v530_v61 = vpack.c.bf16 %v11450_v40, %v11428_v38  ;;  %v2361_v40 = vrot.slane %v10344_v11, 3 }
 0x1b2   : > { %v1448_v5 = vpop.f32.mrb[92].mxu0  ;;  %v2061_v10 = vpop.f32.mrb[94].mxu1 }
 0x1b3   : > { %v8909_v46 = vpop.f32.mrb[93].mxu0  ;;  %v11514_v27 = vadd.f32 %v2061_v10, %v1443_v63  ;;  %v9120_v57 = vpop.f32.mrb[95].mxu1 }
 0x1b4   : > { %v1451_v15 = vpop.f32.mrb[94].mxu0  ;;  %v1065_v46 = vsel %vm589_vm3, %v1055_v41, %v10372_v31  ;;  %v2394_v31 = vrot.slane %v10702_v25, 3  ;;  %vm6773_vm3 = vcmask 517120  }
 0x1b5   : > { %v8910_v6 = vpop.f32.mrb[95].mxu0  ;;  %9226 = vmatmul.mubr.msk.bf16.gmra.mrb[200].mxu1 %vm1066_vm2, %v529_v50 }
 0x1b6   : > { %9229 = vmatprep.mubr.msk.bf16.mxu1 %vm10205_vm1, %v14920_v56  ;;  %v11576_v37 = vsel %vm2360_vm4, %v2394_v31, %v2396_v51 }
 0x1b7   : > { %9016 = vmatmul.mubr.msk.bf16.gmra.mrb[200].mxu0 %vm1066_vm2, %v1056_v47 }
 0x1b8   : > { %v2066_v1 = vpop.f32.mrb[96].mxu1  ;;  %9019 = vmatprep.mubr.msk.bf16.mxu0 %vm10205_vm1, %v14920_v56 }
 0x1b9   : > { %v11529_v63 = vadd.f32 %v2066_v1, %v1448_v5  ;;  %v9123_v8 = vpop.f32.mrb[97].mxu1  ;;  %v2362_v5 = vrot.slane %v10361_v23, 3  ;;  %v11558_v23 = vsel %vm2360_vm4, %v2392_v7, %v2394_v31  ;;  %v532_v7 = vpack.c.bf16 %v11478_v9, %v11478_v9 }
 0x1ba   : > { %v1456_v16 = vpop.f32.mrb[96].mxu0  ;;  %v2069_v21 = vpop.f32.mrb[98].mxu1  ;;  %v2366_v9 = vrot.slane %v10404_v52, 3 }
 0x1bb   : > { %v8913_v12 = vpop.f32.mrb[97].mxu0  ;;  %v11533_v39 = vadd.f32 %v2069_v21, %v1451_v15  ;;  %v9124_v50 = vpop.f32.mrb[99].mxu1 }
 0x1bc   : > { %v1459_v10 = vpop.f32.mrb[98].mxu0  ;;  %v2363_v12 = vsel %vm2360_vm4, %v2361_v40, %v2362_v5 }
 0x1bd   : > { %v8914_v57 = vpop.f32.mrb[99].mxu0  ;;  %9230 = vmatmul.mubr.msk.bf16.gmra.mrb[204].mxu1 %vm1066_vm2, %v530_v61 }
 0x1be   : > { %9233 = vmatprep.mubr.msk.bf16.mxu1 %vm10205_vm1, %v14920_v56 }
 0x1bf   : > { %9020 = vmatmul.mubr.msk.bf16.gmra.mrb[204].mxu0 %vm1066_vm2, %v1065_v46 }
 0x1c0   : > { %v2074_v38 = vpop.f32.mrb[100].mxu1  ;;  %9243 = vmatprep.mubr.msk.bf16.mxu0 %vm10205_vm1, %v14920_v56 }
 0x1c1   : > { %v11549_v41 = vadd.f32 %v2074_v38, %v1456_v16  ;;  %v9127_v15 = vpop.f32.mrb[101].mxu1 }
 0x1c2   : > { %v1464_v47 = vpop.f32.mrb[100].mxu0  ;;  %v2077_v6 = vpop.f32.mrb[102].mxu1 }
 0x1c3   : > { %v8917_v1 = vpop.f32.mrb[101].mxu0  ;;  %v11553_v8 = vadd.f32 %v2077_v6, %v1459_v10  ;;  %v9128_v61 = vpop.f32.mrb[103].mxu1 }
 0x1c4   : > { %v1467_v21 = vpop.f32.mrb[102].mxu0 }
 0x1c5   : > { %v8918_v11 = vpop.f32.mrb[103].mxu0  ;;  %9234 = vmatmul.mubr.msk.bf16.gmra.mrb[208].mxu1 %vm1066_vm2, %v531_v45  ;;  %v2365_v45 = vsel %vm2360_vm4, %v2362_v5, %v2364_v26 }
 0x1c6   : > { %9237 = vmatprep.mubr.msk.bf16.mxu1 %vm10205_vm1, %v14920_v56 }
 0x1c7   : > { %9244 = vmatmul.mubr.msk.bf16.vlgmr.msra.gmra.mrb[208].mxu0 %vm1066_vm2, %v2363_v12 }
 0x1c8   : > { %v2082_v25 = vpop.f32.mrb[104].mxu1  ;;  %9247 = vmatprep.mubr.msk.bf16.mxu0 %vm10205_vm1, %v14920_v56 }
 0x1c9   : > { %v11567_v16 = vadd.f32 %v2082_v25, %v1464_v47  ;;  %v9131_v50 = vpop.f32.mrb[105].mxu1  ;;  %v2398_v47 = vrot.slane %v10744_v0, 3  ;;  %v2368_v0 = vrot.slane %v10425_v62, 3 }
 0x1ca   : > { %v1472_v10 = vpop.f32.mrb[104].mxu0  ;;  %v2085_v46 = vpop.f32.mrb[106].mxu1  ;;  %v2367_v50 = vsel %vm2360_vm4, %v2364_v26, %v2366_v9 }
 0x1cb   : > { %v8921_v57 = vpop.f32.mrb[105].mxu0  ;;  %v11571_v38 = vadd.f32 %v2085_v46, %v1467_v21  ;;  %v9132_v40 = vpop.f32.mrb[107].mxu1  ;;  %v11591_v46 = vsel %vm2360_vm4, %v2396_v51, %v2398_v47 }
 0x1cc   : > { %v1475_v15 = vpop.f32.mrb[106].mxu0 }
 0x1cd   : > { %v8922_v6 = vpop.f32.mrb[107].mxu0  ;;  %9238 = vmatmul.mubr.msk.bf16.gmra.mrb[212].mxu1 %vm1066_vm2, %v532_v7 }
 0x1ce   : > { %9459 = vmatprep.mubr.msk.bf16.mxu1 %vm10205_vm1, %v14920_v56 }
 0x1cf   : > { %9248 = vmatmul.mubr.msk.bf16.gmra.mrb[212].mxu0 %vm1066_vm2, %v2365_v45 }
 0x1d0   : > { %v2090_v49 = vpop.f32.mrb[108].mxu1  ;;  %9251 = vmatprep.mubr.msk.bf16.mxu0 %vm10205_vm1, %v14920_v56 }
 0x1d1   : > { %v11585_v5 = vadd.f32 %v2090_v49, %v1472_v10  ;;  %v9135_v1 = vpop.f32.mrb[109].mxu1  ;;  %v2400_v10 = vrot.slane %v10765_v18, 3  ;;  %v2370_v18 = vrot.slane %v10446_v14, 3 }
 0x1d2   : > { %v1480_v61 = vpop.f32.mrb[108].mxu0  ;;  %v2093_v21 = vpop.f32.mrb[110].mxu1  ;;  %v2369_v1 = vsel %vm2360_vm4, %v2366_v9, %v2368_v0 }
 0x1d3   : > { %v8925_v31 = vpop.f32.mrb[109].mxu0  ;;  %v11587_v12 = vadd.f32 %v2093_v21, %v1475_v15  ;;  %v9136_v11 = vpop.f32.mrb[111].mxu1 }
 0x1d4   : > { %v1483_v25 = vpop.f32.mrb[110].mxu0  ;;  %v11604_v31 = vsel %vm2360_vm4, %v2398_v47, %v2400_v10 }
 0x1d5   : > { %v8926_v7 = vpop.f32.mrb[111].mxu0 }
 0x1d7   : > { %9252 = vmatmul.mubr.msk.bf16.gmra.mrb[216].mxu0 %vm1066_vm2, %v2367_v50 }
 0x1d8   : > { %v2098_v52 = vpop.f32.mrb[112].mxu1  ;;  %9255 = vmatprep.mubr.msk.bf16.mxu0 %vm10205_vm1, %v14920_v56 }
 0x1d9   : > { %v11598_v57 = vadd.f32 %v2098_v52, %v1480_v61  ;;  %v9139_v40 = vpop.f32.mrb[113].mxu1  ;;  %v2402_v61 = vrot.slane %v10786_v33, 3  ;;  %v2372_v33 = vrot.slane %v10467_v22, 3 }
 0x1da   : > { %v1488_v15 = vpop.f32.mrb[112].mxu0  ;;  %v2101_v45 = vpop.f32.mrb[114].mxu1 }
 0x1db   : > { %v8929_v26 = vpop.f32.mrb[113].mxu0  ;;  %v11600_v6 = vadd.f32 %v2101_v45, %v1483_v25  ;;  %v9140_v51 = vpop.f32.mrb[115].mxu1  ;;  %v2371_v45 = vsel %vm2360_vm4, %v2368_v0, %v2370_v18 }
 0x1dc   : > { %v1491_v49 = vpop.f32.mrb[114].mxu0  ;;  %v11617_v51 = vsel %vm2360_vm4, %v2400_v10, %v2402_v61 }
 0x1dd   : > { %v8930_v21 = vpop.f32.mrb[115].mxu0 }
 0x1df   : > { %9256 = vmatmul.mubr.msk.bf16.gmra.mrb[220].mxu0 %vm1066_vm2, %v2369_v1 }
 0x1e0   : > { %v2106_v62 = vpop.f32.mrb[116].mxu1  ;;  %9259 = vmatprep.mubr.msk.bf16.mxu0 %vm10205_vm1, %v14920_v56 }
 0x1e1   : > { %v11611_v11 = vadd.f32 %v2106_v62, %v1488_v15  ;;  %v9143_v25 = vpop.f32.mrb[117].mxu1  ;;  %v2404_v15 = vrot.slane %v10807_v36, 3  ;;  %v2374_v36 = vrot.slane %v10488_v34, 3 }
 0x1e2   : > { %v1496_v50 = vpop.f32.mrb[116].mxu0  ;;  %v2109_v7 = vpop.f32.mrb[118].mxu1 }
 0x1e3   : > { %v8933_v9 = vpop.f32.mrb[117].mxu0  ;;  %v11613_v52 = vadd.f32 %v2109_v7, %v1491_v49  ;;  %v9144_v47 = vpop.f32.mrb[119].mxu1 }
 0x1e4   : > { %v1499_v40 = vpop.f32.mrb[118].mxu0  ;;  %v2373_v9 = vsel %vm2360_vm4, %v2370_v18, %v2372_v33 }
 0x1e5   : > { %v8934_v26 = vpop.f32.mrb[119].mxu0 }
 0x1e7   : > { %9260 = vmatmul.mubr.msk.bf16.gmra.mrb[224].mxu0 %vm1066_vm2, %v2371_v45  ;;  %v11630_v45 = vsel %vm2360_vm4, %v2402_v61, %v2404_v15 }
 0x1e8   : > { %v2114_v14 = vpop.f32.mrb[120].mxu1  ;;  %9263 = vmatprep.mubr.msk.bf16.mxu0 %vm10205_vm1, %v14920_v56 }
 0x1e9   : > { %v11624_v49 = vadd.f32 %v2114_v14, %v1496_v50  ;;  %v9147_v1 = vpop.f32.mrb[121].mxu1  ;;  %v2406_v50 = vrot.slane %v10828_v59, 3  ;;  %v2376_v59 = vrot.slane %v10509_v44, 3 }
 0x1ea   : > { %v1504_v21 = vpop.f32.mrb[120].mxu0  ;;  %v2117_v62 = vpop.f32.mrb[122].mxu1 }
 0x1eb   : > { %v8937_v0 = vpop.f32.mrb[121].mxu0  ;;  %v11626_v25 = vadd.f32 %v2117_v62, %v1499_v40  ;;  %v9148_v10 = vpop.f32.mrb[123].mxu1 }
 0x1ec   : > { %v1507_v7 = vpop.f32.mrb[122].mxu0  ;;  %v2375_v10 = vsel %vm2360_vm4, %v2372_v33, %v2374_v36 }
 0x1ed   : > { %14977 = vst [vmem:[#allocation68_spill] sm:$0xff] %v11626_v25  ;;  %v8938_v47 = vpop.f32.mrb[123].mxu0 }
 0x1ee   : > { %v11643_v47 = vsel %vm2360_vm4, %v2404_v15, %v2406_v50 }
 0x1ef   : > { %9264 = vmatmul.mubr.msk.bf16.gmra.mrb[228].mxu0 %vm1066_vm2, %v2373_v9 }
 0x1f0   : > { %v2122_v22 = vpop.f32.mrb[124].mxu1  ;;  %9267 = vmatprep.mubr.msk.bf16.mxu0 %vm10205_vm1, %v14920_v56 }
 0x1f1   : > { %v11637_v40 = vadd.f32 %v2122_v22, %v1504_v21  ;;  %v9151_v26 = vpop.f32.mrb[125].mxu1  ;;  %v2408_v21 = vrot.slane %v10849_v19, 3  ;;  %v2378_v19 = vrot.slane %v10530_v55, 3 }
 0x1f2   : > { %v1512_v14 = vpop.f32.mrb[124].mxu0  ;;  %v2125_v1 = vpop.f32.mrb[126].mxu1 }
 0x1f3   : > { %14978 = vst [vmem:[#allocation69_spill] sm:$0xff] %v11637_v40  ;;  %v8941_v18 = vpop.f32.mrb[125].mxu0  ;;  %v11639_v62 = vadd.f32 %v2125_v1, %v1507_v7  ;;  %v9152_v61 = vpop.f32.mrb[127].mxu1  ;;  %v11656_v2 = vsel %vm2360_vm4, %v2406_v50, %v2408_v21 }
 0x1f4   : > { %v1515_v0 = vpop.f32.mrb[126].mxu0 }
 0x1f5   : > { %14979 = vst [vmem:[#allocation70_spill] sm:$0xff] %v11639_v62  ;;  %v8942_v9 = vpop.f32.mrb[127].mxu0 }
 0x1f7   : > { %9268 = vmatmul.mubr.msk.bf16.gmra.mrb[232].mxu0 %vm1066_vm2, %v2375_v10  ;;  %v2377_v10 = vsel %vm2360_vm4, %v2374_v36, %v2376_v59 }
 0x1f8   : > { %v2130_v34 = vpop.f32.mrb[128].mxu1  ;;  %9271 = vmatprep.mubr.msk.bf16.mxu0 %vm10205_vm1, %v14920_v56 }
 0x1f9   : > { %v11650_v7 = vadd.f32 %v2130_v34, %v1512_v14  ;;  %v9155_v22 = vpop.f32.mrb[129].mxu1  ;;  %v2410_v14 = vrot.slane %v10870_v35, 3  ;;  %v2380_v35 = vrot.slane %v10551_v3, 3 }
 0x1fa   : > { %v1520_v26 = vpop.f32.mrb[128].mxu0  ;;  %v2133_v1 = vpop.f32.mrb[130].mxu1 }
 0x1fb   : > { %14980 = vst [vmem:[#allocation71_spill] sm:$0xff] %v11650_v7  ;;  %v8945_v33 = vpop.f32.mrb[129].mxu0  ;;  %v11652_v18 = vadd.f32 %v2133_v1, %v1515_v0  ;;  %v9156_v15 = vpop.f32.mrb[131].mxu1 }
 0x1fc   : > { %v1523_v61 = vpop.f32.mrb[130].mxu0 }
 0x1fd   : > { %14981 = vst [vmem:[#allocation72_spill] sm:$0xff] %v11652_v18  ;;  %v8946_v9 = vpop.f32.mrb[131].mxu0  ;;  %v11669_v18 = vsel %vm2360_vm4, %v2408_v21, %v2410_v14 }
 0x1ff   : > { %9272 = vmatmul.mubr.msk.bf16.gmra.mrb[236].mxu0 %vm1066_vm2, %v2377_v10  ;;  %v2379_v10 = vsel %vm2360_vm4, %v2376_v59, %v2378_v19 }
 0x200   : > { %v2138_v44 = vpop.f32.mrb[132].mxu1  ;;  %9275 = vmatprep.mubr.msk.bf16.mxu0 %vm10205_vm1, %v14920_v56 }
 0x201   : > { %v11663_v0 = vadd.f32 %v2138_v44, %v1520_v26  ;;  %v9159_v34 = vpop.f32.mrb[133].mxu1  ;;  %v2412_v26 = vrot.slane %v10891_v58, 3  ;;  %v2382_v58 = vrot.slane %v10572_v17, 3 }
 0x202   : > { %v1528_v22 = vpop.f32.mrb[132].mxu0  ;;  %v2141_v1 = vpop.f32.mrb[134].mxu1 }
 0x203   : > { %14982 = vst [vmem:[#allocation73_spill] sm:$0xff] %v11663_v0  ;;  %v8949_v36 = vpop.f32.mrb[133].mxu0  ;;  %v11665_v33 = vadd.f32 %v2141_v1, %v1523_v61  ;;  %v9160_v50 = vpop.f32.mrb[135].mxu1 }
 0x204   : > { %v1531_v15 = vpop.f32.mrb[134].mxu0 }
 0x205   : > { %14983 = vst [vmem:[#allocation74_spill] sm:$0xff] %v11665_v33  ;;  %v8950_v9 = vpop.f32.mrb[135].mxu0  ;;  %v11682_v33 = vsel %vm2360_vm4, %v2410_v14, %v2412_v26 }
 0x207   : > { %9276 = vmatmul.mubr.msk.bf16.gmra.mrb[240].mxu0 %vm1066_vm2, %v2379_v10  ;;  %v2381_v10 = vsel %vm2360_vm4, %v2378_v19, %v2380_v35 }
 0x208   : > { %v2146_v55 = vpop.f32.mrb[136].mxu1  ;;  %9279 = vmatprep.mubr.msk.bf16.mxu0 %vm10205_vm1, %v14920_v56 }
 0x209   : > { %v11676_v61 = vadd.f32 %v2146_v55, %v1528_v22  ;;  %v9163_v44 = vpop.f32.mrb[137].mxu1  ;;  %v2414_v22 = vrot.slane %v10912_v60, 3  ;;  %v2384_v60 = vrot.slane %v10593_v30, 3  ;;  %v2386_v30 = vrot.slane %v10614_v42, 3 }
 0x20a   : > { %v1536_v34 = vpop.f32.mrb[136].mxu0  ;;  %v2149_v1 = vpop.f32.mrb[138].mxu1 }
 0x20b   : > { %14984 = vst [vmem:[#allocation75_spill] sm:$0xff] %v11676_v61  ;;  %v8953_v59 = vpop.f32.mrb[137].mxu0  ;;  %v11678_v36 = vadd.f32 %v2149_v1, %v1531_v15  ;;  %v9164_v21 = vpop.f32.mrb[139].mxu1  ;;  %v15049_v61 = vld [vmem:[#allocation16_spill] sm:$0xff] }
 0x20c   : > { %v1539_v50 = vpop.f32.mrb[138].mxu0 }
 0x20d   : > { %14985 = vst [vmem:[#allocation76_spill] sm:$0xff] %v11678_v36  ;;  %v8954_v9 = vpop.f32.mrb[139].mxu0  ;;  %v11695_v36 = vsel %vm2360_vm4, %v2412_v26, %v2414_v22 }
 0x20f   : > { %9280 = vmatmul.mubr.msk.bf16.gmra.mrb[244].mxu0 %vm1066_vm2, %v2381_v10  ;;  %v2383_v10 = vsel %vm2360_vm4, %v2380_v35, %v2382_v58 }
 0x210   : > { %v2154_v3 = vpop.f32.mrb[140].mxu1  ;;  %9283 = vmatprep.mubr.msk.bf16.mxu0 %vm10205_vm1, %v14920_v56 }
 0x211   : > { %v11689_v15 = vadd.f32 %v2154_v3, %v1536_v34  ;;  %v9167_v55 = vpop.f32.mrb[141].mxu1  ;;  %v2416_v3 = vrot.slane %v10933_v24, 3 }
 0x212   : > { %v1544_v44 = vpop.f32.mrb[140].mxu0  ;;  %v2157_v1 = vpop.f32.mrb[142].mxu1 }
 0x213   : > { %14986 = vst [vmem:[#allocation77_spill] sm:$0xff] %v11689_v15  ;;  %v8957_v19 = vpop.f32.mrb[141].mxu0  ;;  %v11691_v59 = vadd.f32 %v2157_v1, %v1539_v50  ;;  %v9168_v14 = vpop.f32.mrb[143].mxu1 }
 0x214   : > { %v1547_v21 = vpop.f32.mrb[142].mxu0 }
 0x215   : > { %14987 = vst [vmem:[#allocation78_spill] sm:$0xff] %v11691_v59  ;;  %v8958_v9 = vpop.f32.mrb[143].mxu0  ;;  %v11708_v59 = vsel %vm2360_vm4, %v2414_v22, %v2416_v3 }
 0x217   : > { %9284 = vmatmul.mubr.msk.bf16.gmra.mrb[248].mxu0 %vm1066_vm2, %v2383_v10  ;;  %v2385_v10 = vsel %vm2360_vm4, %v2382_v58, %v2384_v60 }
 0x218   : > { %v2162_v17 = vpop.f32.mrb[144].mxu1  ;;  %9287 = vmatprep.mubr.msk.bf16.mxu0 %vm10205_vm1, %v14920_v56 }
 0x219   : > { %v11701_v34 = vadd.f32 %v2162_v17, %v1544_v44  ;;  %v9171_v50 = vpop.f32.mrb[145].mxu1  ;;  %v2418_v17 = vrot.slane %v10956_v53, 3 }
 0x21a   : > { %v1552_v55 = vpop.f32.mrb[144].mxu0  ;;  %v2165_v1 = vpop.f32.mrb[146].mxu1 }
 0x21b   : > { %14988 = vst [vmem:[#allocation79_spill] sm:$0xff] %v11701_v34  ;;  %v8961_v35 = vpop.f32.mrb[145].mxu0  ;;  %v11704_v19 = vadd.f32 %v2165_v1, %v1547_v21  ;;  %v9172_v26 = vpop.f32.mrb[147].mxu1  ;;  %v11721_v42 = vsel %vm2360_vm4, %v2416_v3, %v2418_v17  ;;  %v14994_v3 = vrot.slane %v10635_v54, 3 }
 0x21c   : > { %v1555_v14 = vpop.f32.mrb[146].mxu0  ;;  %v2387_v26 = vsel %vm2360_vm4, %v2384_v60, %v2386_v30 }
 0x21d   : > { %14989 = vst [vmem:[#allocation80_spill] sm:$0xff] %v11704_v19  ;;  %v8962_v9 = vpop.f32.mrb[147].mxu0 }
 0x21f   : > { %9288 = vmatmul.mubr.msk.bf16.gmra.mrb[252].mxu0 %vm1066_vm2, %v2385_v10 }
 0x220   : > { %v2170_v44 = vpop.f32.mrb[148].mxu1  ;;  %9291 = vmatprep.mubr.msk.bf16.mxu0 %vm10205_vm1, %v14920_v56 }
 0x221   : > { %v11714_v24 = vadd.f32 %v2170_v44, %v1552_v55  ;;  %v9175_v21 = vpop.f32.mrb[149].mxu1 }
 0x222   : > { %v1560_v50 = vpop.f32.mrb[148].mxu0  ;;  %v2173_v1 = vpop.f32.mrb[150].mxu1 }
 0x223   : > { %14990 = vst [vmem:[#allocation81_spill] sm:$0xff] %v11714_v24  ;;  %v8965_v58 = vpop.f32.mrb[149].mxu0  ;;  %v11717_v35 = vadd.f32 %v2173_v1, %v1555_v14  ;;  %v9176_v22 = vpop.f32.mrb[151].mxu1  ;;  %v2420_v14 = vrot.slane %v10981_v32, 3  ;;  %v10127_v32 = vld [vmem:[%s14854_s4 + $0x20] sm:$0xff]  }
 0x224   : > { %v1563_v10 = vpop.f32.mrb[150].mxu0  ;;  %9872 = vmatpush3.bf16.msra.mxu0 %v10127_v32 }
 0x225   : > { %14991 = vst [vmem:[#allocation82_spill] sm:$0xff] %v11717_v35  ;;  %v8966_v9 = vpop.f32.mrb[151].mxu0  ;;  %v11735_v24 = vsel %vm2360_vm4, %v2418_v17, %v2420_v14  ;;  %9873 = vmatprep.subr.bf16.mxu0 %v14920_v56  ;;  %v2422_v17 = vrot.slane %v11006_v28, 3 }
 0x227   : > { %9292 = vmatmul.mubr.msk.bf16.gmra.mrb[0].mxu0 %vm1066_vm2, %v2387_v26  ;;  %v2389_v26 = vsel %vm2360_vm4, %v2386_v30, %v14994_v3 }
 0x228   : > { %v2178_v55 = vpop.f32.mrb[152].mxu1  ;;  %9295 = vmatprep.mubr.msk.bf16.mxu0 %vm10205_vm1, %v14920_v56 }
 0x229   : > { %v11726_v53 = vadd.f32 %v2178_v55, %v1560_v50  ;;  %v9179_v44 = vpop.f32.mrb[153].mxu1 }
 0x22a   : > { %v1568_v21 = vpop.f32.mrb[152].mxu0  ;;  %v2181_v1 = vpop.f32.mrb[154].mxu1 }
 0x22b   : > { %14992 = vst [vmem:[#allocation83_spill] sm:$0xff] %v11726_v53  ;;  %v8969_v58 = vpop.f32.mrb[153].mxu0  ;;  %v11729_v60 = vadd.f32 %v2181_v1, %v1563_v10  ;;  %v9180_v22 = vpop.f32.mrb[155].mxu1 }
 0x22c   : > { %v1571_v9 = vpop.f32.mrb[154].mxu0 }
 0x22d   : > { %14993 = vst [vmem:[#allocation84_spill] sm:$0xff] %v11729_v60  ;;  %v8970_v35 = vpop.f32.mrb[155].mxu0 }
 0x22f   : > { %9296 = vmatmul.mubr.msk.bf16.gmra.mrb[4].mxu0 %vm1066_vm2, %v2389_v26 }
 0x230   : > { %v2186_v50 = vpop.f32.mrb[156].mxu1  ;;  %9299 = vmatprep.mubr.msk.bf16.mxu0 %vm10205_vm1, %v14920_v56 }
 0x231   : > { %v11743_v10 = vadd.f32 %v2186_v50, %v1568_v21  ;;  %v9183_v55 = vpop.f32.mrb[157].mxu1  ;;  %v11752_v21 = vsel %vm2360_vm4, %v2420_v14, %v2422_v17 }
 0x232   : > { %v1576_v54 = vpop.f32.mrb[156].mxu0  ;;  %v2189_v30 = vpop.f32.mrb[158].mxu1 }
 0x233   : > { %14995 = vst [vmem:[#allocation85_spill] sm:$0xff] %v11743_v10  ;;  %v8973_v35 = vpop.f32.mrb[157].mxu0  ;;  %v11747_v44 = vadd.f32 %v2189_v30, %v1571_v9  ;;  %v9184_v1 = vpop.f32.mrb[159].mxu1  ;;  %v14998_v9 = vld [vmem:[#allocation14_spill] sm:$0xff] }
 0x234   : > { %v1579_v58 = vpop.f32.mrb[158].mxu0  ;;  %v2424_v55 = vrot.slane %v14998_v9, 3  ;;  %v15041_v10 = vld [vmem:[#allocation10_spill] sm:$0xff] }
 0x235   : > { %14996 = vst [vmem:[#allocation86_spill] sm:$0xff] %v11747_v44  ;;  %v8974_v22 = vpop.f32.mrb[159].mxu0 }
 0x236   : > { %v11764_v14 = vsel %vm2360_vm4, %v2422_v17, %v2424_v55 }
 0x237   : > { %9300 = vmatmul.mubr.msk.bf16.gmra.mrb[8].mxu0 %vm1066_vm2, %v11521_v4 }
 0x238   : > { %v2194_v3 = vpop.f32.mrb[160].mxu1  ;;  %9303 = vmatprep.mubr.msk.bf16.mxu0 %vm10205_vm1, %v14920_v56 }
 0x239   : > { %v11756_v26 = vadd.f32 %v2194_v3, %v1576_v54  ;;  %v9187_v32 = vpop.f32.mrb[161].mxu1 }
 0x23a   : > { %v1584_v28 = vpop.f32.mrb[160].mxu0  ;;  %v2197_v50 = vpop.f32.mrb[162].mxu1 }
 0x23b   : > { %14997 = vst [vmem:[#allocation87_spill] sm:$0xff] %v11756_v26  ;;  %v8977_v30 = vpop.f32.mrb[161].mxu0  ;;  %v11759_v35 = vadd.f32 %v2197_v50, %v1579_v58  ;;  %v9188_v1 = vpop.f32.mrb[163].mxu1  ;;  %v15001_v58 = vld [vmem:[#allocation17_spill] sm:$0xff] }
 0x23c   : > { %v1587_v22 = vpop.f32.mrb[162].mxu0  ;;  %v2426_v50 = vrot.slane %v15001_v58, 3 }
 0x23d   : > { %14999 = vst [vmem:[#allocation14_spill] sm:$0xff] %v11759_v35  ;;  %v8978_v4 = vpop.f32.mrb[163].mxu0 }
 0x23e   : > { %v11776_v17 = vsel %vm2360_vm4, %v2424_v55, %v2426_v50 }
 0x23f   : > { %9304 = vmatmul.mubr.msk.bf16.gmra.mrb[12].mxu0 %vm1066_vm2, %v11539_v20 }
 0x240   : > { %v2202_v44 = vpop.f32.mrb[164].mxu1  ;;  %9307 = vmatprep.mubr.msk.bf16.mxu0 %vm10205_vm1, %v14920_v56 }
 0x241   : > { %v9191_v54 = vpop.f32.mrb[165].mxu1  ;;  %v11768_v3 = vadd.f32 %v2202_v44, %v1584_v28 }
 0x242   : > { %v1592_v32 = vpop.f32.mrb[164].mxu0  ;;  %v2205_v9 = vpop.f32.mrb[166].mxu1 }
 0x243   : > { %15000 = vst [vmem:[#allocation88_spill] sm:$0xff] %v11768_v3  ;;  %v8981_v30 = vpop.f32.mrb[165].mxu0  ;;  %v9192_v1 = vpop.f32.mrb[167].mxu1  ;;  %v11771_v4 = vadd.f32 %v2205_v9, %v1587_v22 }
 0x244   : > { %v1595_v35 = vpop.f32.mrb[166].mxu0  ;;  %v15004_v30 = vld [vmem:[#allocation20_spill] sm:$0xff] }
 0x245   : > { %15002 = vst [vmem:[#allocation17_spill] sm:$0xff] %v11771_v4  ;;  %v8982_v20 = vpop.f32.mrb[167].mxu0  ;;  %v2428_v22 = vrot.slane %v15004_v30, 3 }
 0x247   : > { %9308 = vmatmul.mubr.msk.bf16.gmra.mrb[16].mxu0 %vm1066_vm2, %v11558_v23  ;;  %v11788_v55 = vsel %vm2360_vm4, %v2426_v50, %v2428_v22 }
 0x248   : > { %v2210_v26 = vpop.f32.mrb[168].mxu1  ;;  %9311 = vmatprep.mubr.msk.bf16.mxu0 %vm10205_vm1, %v14920_v56 }
 0x249   : > { %v9195_v44 = vpop.f32.mrb[169].mxu1  ;;  %v11780_v28 = vadd.f32 %v2210_v26, %v1592_v32 }
 0x24a   : > { %v1600_v54 = vpop.f32.mrb[168].mxu0  ;;  %v2213_v58 = vpop.f32.mrb[170].mxu1 }
 0x24b   : > { %15003 = vst [vmem:[#allocation89_spill] sm:$0xff] %v11780_v28  ;;  %v8985_v9 = vpop.f32.mrb[169].mxu0  ;;  %v9196_v1 = vpop.f32.mrb[171].mxu1  ;;  %v11783_v20 = vadd.f32 %v2213_v58, %v1595_v35 }
 0x24c   : > { %v1603_v4 = vpop.f32.mrb[170].mxu0  ;;  %v15007_v9 = vld [vmem:[#allocation23_spill] sm:$0xff] }
 0x24d   : > { %15005 = vst [vmem:[#allocation20_spill] sm:$0xff] %v11783_v20  ;;  %v8986_v23 = vpop.f32.mrb[171].mxu0  ;;  %v2430_v35 = vrot.slane %v15007_v9, 3 }
 0x24f   : > { %9312 = vmatmul.mubr.msk.bf16.gmra.mrb[20].mxu0 %vm1066_vm2, %v11576_v37  ;;  %v11800_v50 = vsel %vm2360_vm4, %v2428_v22, %v2430_v35 }
 0x250   : > { %v2218_v3 = vpop.f32.mrb[172].mxu1  ;;  %9315 = vmatprep.mubr.msk.bf16.mxu0 %vm10205_vm1, %v14920_v56 }
 0x251   : > { %v9199_v26 = vpop.f32.mrb[173].mxu1  ;;  %v11792_v32 = vadd.f32 %v2218_v3, %v1600_v54 }
 0x252   : > { %v1608_v44 = vpop.f32.mrb[172].mxu0  ;;  %v2221_v30 = vpop.f32.mrb[174].mxu1 }
 0x253   : > { %15006 = vst [vmem:[#allocation90_spill] sm:$0xff] %v11792_v32  ;;  %v8989_v58 = vpop.f32.mrb[173].mxu0  ;;  %v9200_v1 = vpop.f32.mrb[175].mxu1  ;;  %v11795_v23 = vadd.f32 %v2221_v30, %v1603_v4 }
 0x254   : > { %v1611_v20 = vpop.f32.mrb[174].mxu0  ;;  %v15010_v58 = vld [vmem:[#allocation26_spill] sm:$0xff] }
 0x255   : > { %15008 = vst [vmem:[#allocation23_spill] sm:$0xff] %v11795_v23  ;;  %v8990_v37 = vpop.f32.mrb[175].mxu0  ;;  %v2432_v4 = vrot.slane %v15010_v58, 3 }
 0x257   : > { %9316 = vmatmul.mubr.msk.bf16.gmra.mrb[24].mxu0 %vm1066_vm2, %v11591_v46  ;;  %v11812_v22 = vsel %vm2360_vm4, %v2430_v35, %v2432_v4 }
 0x258   : > { %v2226_v28 = vpop.f32.mrb[176].mxu1  ;;  %9319 = vmatprep.mubr.msk.bf16.mxu0 %vm10205_vm1, %v14920_v56 }
 0x259   : > { %v9203_v3 = vpop.f32.mrb[177].mxu1  ;;  %v11804_v54 = vadd.f32 %v2226_v28, %v1608_v44 }
 0x25a   : > { %v1616_v26 = vpop.f32.mrb[176].mxu0  ;;  %v2229_v9 = vpop.f32.mrb[178].mxu1 }
 0x25b   : > { %15009 = vst [vmem:[#allocation91_spill] sm:$0xff] %v11804_v54  ;;  %v8993_v30 = vpop.f32.mrb[177].mxu0  ;;  %v9204_v1 = vpop.f32.mrb[179].mxu1  ;;  %v11807_v37 = vadd.f32 %v2229_v9, %v1611_v20 }
 0x25c   : > { %v1619_v23 = vpop.f32.mrb[178].mxu0  ;;  %v15013_v30 = vld [vmem:[#allocation29_spill] sm:$0xff] }
 0x25d   : > { %15011 = vst [vmem:[#allocation26_spill] sm:$0xff] %v11807_v37  ;;  %v8994_v46 = vpop.f32.mrb[179].mxu0  ;;  %v2434_v20 = vrot.slane %v15013_v30, 3 }
 0x25f   : > { %9320 = vmatmul.mubr.msk.bf16.gmra.mrb[28].mxu0 %vm1066_vm2, %v11604_v31  ;;  %v11824_v35 = vsel %vm2360_vm4, %v2432_v4, %v2434_v20 }
 0x260   : > { %v2234_v32 = vpop.f32.mrb[180].mxu1  ;;  %9323 = vmatprep.mubr.msk.bf16.mxu0 %vm10205_vm1, %v14920_v56 }
 0x261   : > { %v9207_v28 = vpop.f32.mrb[181].mxu1  ;;  %v11816_v44 = vadd.f32 %v2234_v32, %v1616_v26 }
 0x262   : > { %v1624_v3 = vpop.f32.mrb[180].mxu0  ;;  %v2237_v58 = vpop.f32.mrb[182].mxu1 }
 0x263   : > { %15012 = vst [vmem:[#allocation92_spill] sm:$0xff] %v11816_v44  ;;  %v8997_v9 = vpop.f32.mrb[181].mxu0  ;;  %v9208_v1 = vpop.f32.mrb[183].mxu1  ;;  %v11819_v46 = vadd.f32 %v2237_v58, %v1619_v23 }
 0x264   : > { %v1627_v37 = vpop.f32.mrb[182].mxu0  ;;  %v15016_v9 = vld [vmem:[#allocation32_spill] sm:$0xff] }
 0x265   : > { %15014 = vst [vmem:[#allocation29_spill] sm:$0xff] %v11819_v46  ;;  %v8998_v31 = vpop.f32.mrb[183].mxu0  ;;  %v2436_v23 = vrot.slane %v15016_v9, 3 }
 0x267   : > { %9324 = vmatmul.mubr.msk.bf16.gmra.mrb[32].mxu0 %vm1066_vm2, %v11617_v51  ;;  %v11836_v4 = vsel %vm2360_vm4, %v2434_v20, %v2436_v23 }
 0x268   : > { %v2242_v54 = vpop.f32.mrb[184].mxu1  ;;  %9327 = vmatprep.mubr.msk.bf16.mxu0 %vm10205_vm1, %v14920_v56 }
 0x269   : > { %v9211_v32 = vpop.f32.mrb[185].mxu1  ;;  %v11828_v26 = vadd.f32 %v2242_v54, %v1624_v3 }
 0x26a   : > { %v1632_v28 = vpop.f32.mrb[184].mxu0  ;;  %v2245_v30 = vpop.f32.mrb[186].mxu1 }
 0x26b   : > { %15015 = vst [vmem:[#allocation93_spill] sm:$0xff] %v11828_v26  ;;  %v9001_v58 = vpop.f32.mrb[185].mxu0  ;;  %v9212_v1 = vpop.f32.mrb[187].mxu1  ;;  %v11831_v31 = vadd.f32 %v2245_v30, %v1627_v37 }
 0x26c   : > { %v1635_v46 = vpop.f32.mrb[186].mxu0  ;;  %v15019_v58 = vld [vmem:[#allocation35_spill] sm:$0xff] }
 0x26d   : > { %15017 = vst [vmem:[#allocation32_spill] sm:$0xff] %v11831_v31  ;;  %v9002_v51 = vpop.f32.mrb[187].mxu0  ;;  %v2438_v37 = vrot.slane %v15019_v58, 3 }
 0x26f   : > { %9328 = vmatmul.mubr.msk.bf16.gmra.mrb[36].mxu0 %vm1066_vm2, %v11630_v45  ;;  %v11848_v20 = vsel %vm2360_vm4, %v2436_v23, %v2438_v37 }
 0x270   : > { %v2250_v44 = vpop.f32.mrb[188].mxu1  ;;  %9331 = vmatprep.mubr.msk.bf16.mxu0 %vm10205_vm1, %v14920_v56 }
 0x271   : > { %v9215_v54 = vpop.f32.mrb[189].mxu1  ;;  %v11840_v3 = vadd.f32 %v2250_v44, %v1632_v28 }
 0x272   : > { %v1640_v32 = vpop.f32.mrb[188].mxu0  ;;  %v2253_v9 = vpop.f32.mrb[190].mxu1 }
 0x273   : > { %15018 = vst [vmem:[#allocation94_spill] sm:$0xff] %v11840_v3  ;;  %v9005_v30 = vpop.f32.mrb[189].mxu0  ;;  %v9216_v1 = vpop.f32.mrb[191].mxu1  ;;  %v11843_v51 = vadd.f32 %v2253_v9, %v1635_v46 }
 0x274   : > { %v1643_v31 = vpop.f32.mrb[190].mxu0  ;;  %v15022_v30 = vld [vmem:[#allocation38_spill] sm:$0xff] }
 0x275   : > { %15020 = vst [vmem:[#allocation35_spill] sm:$0xff] %v11843_v51  ;;  %v9006_v45 = vpop.f32.mrb[191].mxu0  ;;  %v2440_v46 = vrot.slane %v15022_v30, 3 }
 0x277   : > { %9332 = vmatmul.mubr.msk.bf16.gmra.mrb[40].mxu0 %vm1066_vm2, %v11643_v47  ;;  %v11860_v23 = vsel %vm2360_vm4, %v2438_v37, %v2440_v46 }
 0x278   : > { %v2258_v26 = vpop.f32.mrb[192].mxu1  ;;  %9335 = vmatprep.mubr.msk.bf16.mxu0 %vm10205_vm1, %v14920_v56 }
 0x279   : > { %v9219_v44 = vpop.f32.mrb[193].mxu1  ;;  %v11852_v28 = vadd.f32 %v2258_v26, %v1640_v32 }
 0x27a   : > { %v1648_v54 = vpop.f32.mrb[192].mxu0  ;;  %v2261_v58 = vpop.f32.mrb[194].mxu1 }
 0x27b   : > { %15021 = vst [vmem:[#allocation95_spill] sm:$0xff] %v11852_v28  ;;  %v9009_v9 = vpop.f32.mrb[193].mxu0  ;;  %v9220_v1 = vpop.f32.mrb[195].mxu1  ;;  %v11855_v45 = vadd.f32 %v2261_v58, %v1643_v31 }
 0x27c   : > { %v1651_v51 = vpop.f32.mrb[194].mxu0  ;;  %v15025_v9 = vld [vmem:[#allocation41_spill] sm:$0xff] }
 0x27d   : > { %15023 = vst [vmem:[#allocation38_spill] sm:$0xff] %v11855_v45  ;;  %v9010_v47 = vpop.f32.mrb[195].mxu0  ;;  %v2442_v31 = vrot.slane %v15025_v9, 3 }
 0x27f   : > { %9336 = vmatmul.mubr.msk.bf16.gmra.mrb[44].mxu0 %vm1066_vm2, %v11656_v2  ;;  %v11872_v37 = vsel %vm2360_vm4, %v2440_v46, %v2442_v31 }
 0x280   : > { %v2266_v3 = vpop.f32.mrb[196].mxu1  ;;  %9339 = vmatprep.mubr.msk.bf16.mxu0 %vm10205_vm1, %v14920_v56 }
 0x281   : > { %v9223_v26 = vpop.f32.mrb[197].mxu1  ;;  %v11864_v32 = vadd.f32 %v2266_v3, %v1648_v54 }
 0x282   : > { %v1656_v44 = vpop.f32.mrb[196].mxu0  ;;  %v2269_v30 = vpop.f32.mrb[198].mxu1 }
 0x283   : > { %15024 = vst [vmem:[#allocation96_spill] sm:$0xff] %v11864_v32  ;;  %v9013_v58 = vpop.f32.mrb[197].mxu0  ;;  %v9224_v1 = vpop.f32.mrb[199].mxu1  ;;  %v11867_v47 = vadd.f32 %v2269_v30, %v1651_v51 }
 0x284   : > { %v1659_v45 = vpop.f32.mrb[198].mxu0  ;;  %v15028_v58 = vld [vmem:[#allocation44_spill] sm:$0xff] }
 0x285   : > { %15026 = vst [vmem:[#allocation41_spill] sm:$0xff] %v11867_v47  ;;  %v9014_v2 = vpop.f32.mrb[199].mxu0  ;;  %v2444_v51 = vrot.slane %v15028_v58, 3 }
 0x287   : > { %9340 = vmatmul.mubr.msk.bf16.gmra.mrb[48].mxu0 %vm1066_vm2, %v11669_v18  ;;  %v11884_v46 = vsel %vm2360_vm4, %v2442_v31, %v2444_v51 }
 0x288   : > { %v2274_v28 = vpop.f32.mrb[200].mxu1  ;;  %9343 = vmatprep.mubr.msk.bf16.mxu0 %vm10205_vm1, %v14920_v56 }
 0x289   : > { %v9227_v3 = vpop.f32.mrb[201].mxu1  ;;  %v11876_v54 = vadd.f32 %v2274_v28, %v1656_v44 }
 0x28a   : > { %v1664_v26 = vpop.f32.mrb[200].mxu0  ;;  %v2277_v9 = vpop.f32.mrb[202].mxu1 }
 0x28b   : > { %15027 = vst [vmem:[#allocation97_spill] sm:$0xff] %v11876_v54  ;;  %v9017_v30 = vpop.f32.mrb[201].mxu0  ;;  %v9228_v1 = vpop.f32.mrb[203].mxu1  ;;  %v11879_v2 = vadd.f32 %v2277_v9, %v1659_v45  ;;  %v15031_v45 = vld [vmem:[#allocation47_spill] sm:$0xff] }
 0x28c   : > { %v1667_v47 = vpop.f32.mrb[202].mxu0  ;;  %v2446_v9 = vrot.slane %v15031_v45, 3  ;;  %v15035_v45 = vld [vmem:[#allocation8_spill] sm:$0xff] }
 0x28d   : > { %15029 = vst [vmem:[#allocation44_spill] sm:$0xff] %v11879_v2  ;;  %v9018_v18 = vpop.f32.mrb[203].mxu0 }
 0x28e   : > { %v11896_v31 = vsel %vm2360_vm4, %v2444_v51, %v2446_v9 }
 0x28f   : > { %9344 = vmatmul.mubr.msk.bf16.gmra.mrb[52].mxu0 %vm1066_vm2, %v11682_v33 }
 0x290   : > { %v2282_v32 = vpop.f32.mrb[204].mxu1  ;;  %9347 = vmatprep.mubr.msk.bf16.mxu0 %vm10205_vm1, %v14920_v56 }
 0x291   : > { %v9231_v28 = vpop.f32.mrb[205].mxu1  ;;  %v11888_v44 = vadd.f32 %v2282_v32, %v1664_v26 }
 0x292   : > { %v1672_v3 = vpop.f32.mrb[204].mxu0  ;;  %v2285_v58 = vpop.f32.mrb[206].mxu1 }
 0x293   : > { %15030 = vst [vmem:[#allocation98_spill] sm:$0xff] %v11888_v44  ;;  %v9021_v30 = vpop.f32.mrb[205].mxu0  ;;  %v9232_v1 = vpop.f32.mrb[207].mxu1  ;;  %v11891_v18 = vadd.f32 %v2285_v58, %v1667_v47  ;;  %v11906_v47 = vld [vmem:[%s14852_s2] ss:$0 sm:$0xff]  ;;  %v15034_v58 = vld [vmem:[#allocation50_spill] sm:$0xff] }
 0x294   : > { %v1675_v33 = vpop.f32.mrb[206].mxu0 }
 0x295   : > { %15032 = vst [vmem:[#allocation47_spill] sm:$0xff] %v11891_v18  ;;  %v9022_v2 = vpop.f32.mrb[207].mxu0 }
 0x297   : > { %9348 = vmatmul.mubr.msk.bf16.gmra.mrb[56].mxu0 %vm1066_vm2, %v11695_v36  ;;  %v2448_v36 = vrot.slane %v15034_v58, 3 }
 0x298   : > { %v2290_v54 = vpop.f32.mrb[208].mxu1  ;;  %9351 = vmatprep.mubr.msk.bf16.mxu0 %vm10205_vm1, %v14920_v56 }
 0x299   : > { %v9235_v32 = vpop.f32.mrb[209].mxu1  ;;  %v11901_v26 = vadd.f32 %v2290_v54, %v1672_v3  ;;  %v15037_v3 = vld [vmem:[#allocation9_spill] sm:$0xff] }
 0x29a   : > { %v2662_v28 = vpop.f32.mrb[208].mxu0  ;;  %v2293_v2 = vpop.f32.mrb[210].mxu1 }
 0x29b   : > { %15033 = vst [vmem:[#allocation99_spill] sm:$0xff] %v11901_v26  ;;  %v3084_v51 = vadd.f32 %v2662_v28, %v15035_v45  ;;  %v9245_v30 = vpop.f32.mrb[209].mxu0  ;;  %v9236_v1 = vpop.f32.mrb[211].mxu1  ;;  %v11910_v18 = vadd.f32 %v2293_v2, %v1675_v33  ;;  %v11923_v33 = vsel %vm2360_vm4, %v2446_v9, %v2448_v36  ;;  %v3406_v2 = vld [vmem:[%s11915_s21] sm:$0xff]  ;;  %v3407_v45 = vld [vmem:[%s11915_s21 + $0x8] sm:$0xff] }
 0x29c   : > { %v2665_v44 = vpop.f32.mrb[210].mxu0 }
 0x29d   : > { %15036 = vst [vmem:[#allocation50_spill] sm:$0xff] %v11910_v18  ;;  %v3196_v54 = vadd.f32 %v11906_v47, %v3084_v51  ;;  %v3085_v32 = vadd.f32 %v2665_v44, %v15037_v3  ;;  %v9246_v26 = vpop.f32.mrb[211].mxu0  ;;  %v15038_v18 = vld [vmem:[#allocation7_spill] sm:$0xff]  ;;  %v15040_v3 = vld [vmem:[#allocation53_spill] sm:$0xff] }
 0x29f   : > { %v3301_v58 = vmax.f32 %v3196_v54, 0.0  ;;  %v3197_v28 = vadd.f32 %v11906_v47, %v3085_v32  ;;  %9352 = vmatmul.mubr.msk.bf16.gmra.mrb[60].mxu0 %vm1066_vm2, %v11708_v59  ;;  %v2450_v32 = vrot.slane %v15040_v3, 3  ;;  %v15045_v3 = vld [vmem:[#allocation56_spill] sm:$0xff] }
 0x2a0   : > { %v2298_v30 = vpop.f32.mrb[212].mxu1  ;;  %9355 = vmatprep.mubr.msk.bf16.mxu0 %vm10205_vm1, %v14920_v56 }
 0x2a1   : > { %v3302_v1 = vmax.f32 %v3197_v28, 0.0  ;;  %v9239_v51 = vpop.f32.mrb[213].mxu1  ;;  %v11930_v44 = vadd.f32 %v2298_v30, %v15038_v18  ;;  %v3511_v59 = vmul.f32 %v3406_v2, %v3301_v58  ;;  %v11942_v58 = vsel %vm2360_vm4, %v2448_v36, %v2450_v32 }
 0x2a2   : > { %v2670_v26 = vpop.f32.mrb[212].mxu0  ;;  %v2301_v54 = vpop.f32.mrb[214].mxu1  ;;  %v15043_v51 = vld [vmem:[#allocation11_spill] sm:$0xff] }
 0x2a3   : > { %15039 = vst [vmem:[#allocation8_spill] sm:$0xff] %v11930_v44  ;;  %v3512_v9 = vmul.f32 %v3407_v45, %v3302_v1  ;;  %v3086_v60 = vadd.f32 %v2670_v26, %v15041_v10  ;;  %v9249_v53 = vpop.f32.mrb[213].mxu0  ;;  %v9240_v19 = vpop.f32.mrb[215].mxu1  ;;  %v3408_v10 = vld [vmem:[%s11915_s21 + $0x10] sm:$0xff] }
 0x2a4   : > { %v2673_v34 = vpop.f32.mrb[214].mxu0  ;;  %v3409_v53 = vld [vmem:[%s11915_s21 + $0x18] sm:$0xff] }
 0x2a5   : > { %v11934_v15 = vpack.c.bf16 %v3512_v9, %v3511_v59  ;;  %v3198_v28 = vadd.f32 %v11906_v47, %v3086_v60  ;;  %v3087_v18 = vadd.f32 %v2673_v34, %v15043_v51  ;;  %v9250_v30 = vpop.f32.mrb[215].mxu0  ;;  %v15044_v45 = vld [vmem:[#allocation12_spill] sm:$0xff]  ;;  %v2452_v59 = vrot.slane %v15045_v3, 3 }
 0x2a7   : > { %15042 = vst [vmem:[#allocation9_spill] sm:$0xff] %v11934_v15  ;;  %v3303_v44 = vmax.f32 %v3198_v28, 0.0  ;;  %v3199_v54 = vadd.f32 %v11906_v47, %v3087_v18  ;;  %9356 = vmatmul.mubr.msk.bf16.gmra.mrb[64].mxu0 %vm1066_vm2, %v11721_v42  ;;  %v15046_v28 = vld [vmem:[#allocation13_spill] sm:$0xff]  ;;  %v3680_v30 = vshrl.u32 %v11934_v15, 16 }
 0x2a8   : > { %9359 = vmatprep.mubr.msk.bf16.mxu0 %vm10205_vm1, %v14920_v56 }
 0x2a9   : > { %v3304_v19 = vmax.f32 %v3199_v54, 0.0  ;;  %v3513_v60 = vmul.f32 %v3408_v10, %v3303_v44 }
 0x2aa   : > { %v2678_v2 = vpop.f32.mrb[216].mxu0 }
 0x2ab   : > { %v3514_v34 = vmul.f32 %v3409_v53, %v3304_v19  ;;  %v3088_v1 = vadd.f32 %v2678_v2, %v15044_v45  ;;  %v9253_v26 = vpop.f32.mrb[217].mxu0  ;;  %v3410_v53 = vld [vmem:[%s11915_s21 + $0x20] sm:$0xff]  ;;  %v3411_v19 = vld [vmem:[%s11915_s21 + $0x28] sm:$0xff]  ;;  %v11964_v2 = vsel %vm2360_vm4, %v2450_v32, %v2452_v59 }
 0x2ac   : > { %v2681_v42 = vpop.f32.mrb[218].mxu0  ;;  %v10128_v32 = vld [vmem:[%s14854_s4] sm:$0xff]  }
 0x2ad   : > { %v11950_v9 = vpack.c.bf16 %v3514_v34, %v3513_v60  ;;  %v3200_v36 = vadd.f32 %v11906_v47, %v3088_v1  ;;  %v3089_v51 = vadd.f32 %v2681_v42, %v15046_v28  ;;  %v9254_v18 = vpop.f32.mrb[219].mxu0  ;;  %v3682_v1 = vrot.slane %v3680_v30, 7  ;;  %v15047_v42 = vld [vmem:[#allocation15_spill] sm:$0xff] }
 0x2ae   : > { %v15048_v18 = vld [vmem:[#allocation59_spill] sm:$0xff] }
 0x2af   : > { %v3305_v54 = vmax.f32 %v3200_v36, 0.0  ;;  %v3201_v44 = vadd.f32 %v11906_v47, %v3089_v51  ;;  %9360 = vmatmul.mubr.msk.bf16.gmra.mrb[68].mxu0 %vm1066_vm2, %v11735_v24  ;;  %v3684_v10 = vshrl.u32 %v11950_v9, 16  ;;  %v3687_v45 = vshll.u32 %v11950_v9, 16 }
 0x2b0   : > { %9363 = vmatprep.mubr.msk.bf16.mxu0 %vm10205_vm1, %v14920_v56 }
 0x2b1   : > { %v3306_v60 = vmax.f32 %v3201_v44, 0.0  ;;  %v3686_v34 = vrot.slane %v3684_v10, 7  ;;  %v3515_v3 = vmul.f32 %v3410_v53, %v3305_v54  ;;  %v2454_v44 = vrot.slane %v15048_v18, 3 }
 0x2b2   : > { %v2686_v26 = vpop.f32.mrb[220].mxu0 }
 0x2b3   : > { %v3516_v24 = vmul.f32 %v3411_v19, %v3306_v60  ;;  %v3090_v36 = vadd.f32 %v2686_v26, %v15047_v42  ;;  %v9257_v28 = vpop.f32.mrb[221].mxu0  ;;  %v3689_v51 = vor.u32 %v3687_v45, %v3686_v34 }
 0x2b4   : > { %v2689_v10 = vpop.f32.mrb[222].mxu0 }
 0x2b5   : > { %v11972_v15 = vpack.c.bf16 %v3516_v24, %v3515_v3  ;;  %v3202_v30 = vadd.f32 %v11906_v47, %v3090_v36  ;;  %v3091_v54 = vadd.f32 %v2689_v10, %v15049_v61  ;;  %v9258_v53 = vpop.f32.mrb[223].mxu0  ;;  %v3690_v19 = vsel %vm3678_vm5, %v3682_v1, %v3689_v51  ;;  %v3412_v3 = vld [vmem:[%s11915_s21 + $0x30] sm:$0xff]  ;;  %v3413_v24 = vld [vmem:[%s11915_s21 + $0x38] sm:$0xff] }
 0x2b6   : > { %9460 = vmatmul.mubr.msk.bf16.vlgmr.msra.gmra.mrb[216].mxu1 %vm4103_vm6, %v3690_v19  ;;  %v11989_v61 = vsel %vm2360_vm4, %v2452_v59, %v2454_v44 }
 0x2b7   : > { %v3307_v60 = vmax.f32 %v3202_v30, 0.0  ;;  %v3203_v45 = vadd.f32 %v11906_v47, %v3091_v54  ;;  %9664 = vmatpush3.bf16.msra.mxu1 %v10128_v32  ;;  %9364 = vmatmul.mubr.msk.bf16.gmra.mrb[72].mxu0 %vm1066_vm2, %v11752_v21  ;;  %v3692_v26 = vshrl.u32 %v11972_v15, 16  ;;  %v3695_v36 = vshll.u32 %v11972_v15, 16  ;;  %v15050_v32 = vld [vmem:[#allocation18_spill] sm:$0xff] }
 0x2b8   : > { %9463 = vmatprep.mubr.msk.bf16.mxu1 %vm10205_vm1, %v14920_v56  ;;  %9367 = vmatprep.mubr.msk.bf16.mxu0 %vm10205_vm1, %v14920_v56  ;;  %v15051_v54 = vld [vmem:[#allocation62_spill] sm:$0xff] }
 0x2b9   : > { %v3308_v1 = vmax.f32 %v3203_v45, 0.0  ;;  %v3694_v42 = vrot.slane %v3692_v26, 7  ;;  %9665 = vmatprep.subr.bf16.mxu1 %v14920_v56  ;;  %v3517_v28 = vmul.f32 %v3412_v3, %v3307_v60  ;;  %v2456_v53 = vrot.slane %v15051_v54, 3  ;;  %v15052_v26 = vld [vmem:[#allocation19_spill] sm:$0xff] }
 0x2ba   : > { %v2694_v21 = vpop.f32.mrb[224].mxu0 }
 0x2bb   : > { %v3518_v51 = vmul.f32 %v3413_v24, %v3308_v1  ;;  %v3092_v18 = vadd.f32 %v2694_v21, %v15050_v32  ;;  %v9261_v10 = vpop.f32.mrb[225].mxu0  ;;  %v3697_v30 = vor.u32 %v3695_v36, %v3694_v42  ;;  %v3414_v1 = vld [vmem:[%s11915_s21 + $0x40] sm:$0xff]  ;;  %v3415_v36 = vld [vmem:[%s11915_s21 + $0x48] sm:$0xff] }
 0x2bc   : > { %v2697_v19 = vpop.f32.mrb[226].mxu0 }
 0x2bd   : > { %v11995_v59 = vpack.c.bf16 %v3518_v51, %v3517_v28  ;;  %v3204_v45 = vadd.f32 %v11906_v47, %v3092_v18  ;;  %v3093_v0 = vadd.f32 %v2697_v19, %v15052_v26  ;;  %v9262_v7 = vpop.f32.mrb[227].mxu0  ;;  %v3698_v62 = vsel %vm3678_vm5, %v3686_v34, %v3697_v30  ;;  %v15053_v51 = vld [vmem:[#allocation21_spill] sm:$0xff]  ;;  %v15055_v26 = vld [vmem:[#allocation22_spill] sm:$0xff] }
 0x2be   : > { %9464 = vmatmul.mubr.msk.bf16.gmra.mrb[220].mxu1 %vm4103_vm6, %v3698_v62  ;;  %v12012_v7 = vsel %vm2360_vm4, %v2454_v44, %v2456_v53  ;;  %v15054_v30 = vld [vmem:[#allocation65_spill] sm:$0xff] }
 0x2bf   : > { %v3309_v60 = vmax.f32 %v3204_v45, 0.0  ;;  %v3205_v3 = vadd.f32 %v11906_v47, %v3093_v0  ;;  %9368 = vmatmul.mubr.msk.bf16.gmra.mrb[76].mxu0 %vm1066_vm2, %v11764_v14  ;;  %9467 = vmatprep.mubr.msk.bf16.mxu1 %vm10205_vm1, %v14920_v56  ;;  %v3700_v24 = vshrl.u32 %v11995_v59, 16  ;;  %v3703_v0 = vshll.u32 %v11995_v59, 16 }
 0x2c0   : > { %9371 = vmatprep.mubr.msk.bf16.mxu0 %vm10205_vm1, %v14920_v56  ;;  %v2458_v54 = vrot.slane %v15054_v30, 3 }
 0x2c1   : > { %v3310_v62 = vmax.f32 %v3205_v3, 0.0  ;;  %v3702_v34 = vrot.slane %v3700_v24, 7  ;;  %v3519_v28 = vmul.f32 %v3414_v1, %v3309_v60 }
 0x2c2   : > { %v2702_v21 = vpop.f32.mrb[228].mxu0 }
 0x2c3   : > { %v3520_v14 = vmul.f32 %v3415_v36, %v3310_v62  ;;  %v3094_v32 = vadd.f32 %v2702_v21, %v15053_v51  ;;  %v9265_v18 = vpop.f32.mrb[229].mxu0  ;;  %v3705_v10 = vor.u32 %v3703_v0, %v3702_v34  ;;  %v3416_v62 = vld [vmem:[%s11915_s21 + $0x50] sm:$0xff]  ;;  %v3417_v0 = vld [vmem:[%s11915_s21 + $0x58] sm:$0xff] }
 0x2c4   : > { %v2705_v19 = vpop.f32.mrb[230].mxu0 }
 0x2c5   : > { %v12017_v45 = vpack.c.bf16 %v3520_v14, %v3519_v28  ;;  %v3206_v44 = vadd.f32 %v11906_v47, %v3094_v32  ;;  %v3095_v3 = vadd.f32 %v2705_v19, %v15055_v26  ;;  %v9266_v24 = vpop.f32.mrb[231].mxu0  ;;  %v3706_v40 = vsel %vm3678_vm5, %v3694_v42, %v3705_v10  ;;  %v15056_v32 = vld [vmem:[#allocation24_spill] sm:$0xff] }
 0x2c6   : > { %9468 = vmatmul.mubr.msk.bf16.gmra.mrb[224].mxu1 %vm4103_vm6, %v3706_v40  ;;  %v12034_v42 = vsel %vm2360_vm4, %v2456_v53, %v2458_v54  ;;  %v2460_v19 = vrot.slane %v11485_v29, 3 }
 0x2c7   : > { %v3311_v60 = vmax.f32 %v3206_v44, 0.0  ;;  %v3207_v1 = vadd.f32 %v11906_v47, %v3095_v3  ;;  %9372 = vmatmul.mubr.msk.bf16.gmra.mrb[80].mxu0 %vm1066_vm2, %v11776_v17  ;;  %9471 = vmatprep.mubr.msk.bf16.mxu1 %vm10205_vm1, %v14920_v56  ;;  %v3708_v36 = vshrl.u32 %v12017_v45, 16  ;;  %v3711_v28 = vshll.u32 %v12017_v45, 16  ;;  %v15057_v3 = vld [vmem:[#allocation25_spill] sm:$0xff] }
 0x2c8   : > { %9375 = vmatprep.mubr.msk.bf16.mxu0 %vm10205_vm1, %v14920_v56 }
 0x2c9   : > { %v3312_v40 = vmax.f32 %v3207_v1, 0.0  ;;  %v3710_v21 = vrot.slane %v3708_v36, 7  ;;  %v3521_v51 = vmul.f32 %v3416_v62, %v3311_v60 }
 0x2ca   : > { %v2710_v14 = vpop.f32.mrb[232].mxu0 }
 0x2cb   : > { %v3522_v17 = vmul.f32 %v3417_v0, %v3312_v40  ;;  %v3096_v18 = vadd.f32 %v2710_v14, %v15056_v32  ;;  %v9269_v10 = vpop.f32.mrb[233].mxu0  ;;  %v3713_v30 = vor.u32 %v3711_v28, %v3710_v21  ;;  %v3418_v0 = vld [vmem:[%s11915_s21 + $0x60] sm:$0xff]  ;;  %v3419_v40 = vld [vmem:[%s11915_s21 + $0x68] sm:$0xff] }
 0x2cc   : > { %v2713_v44 = vpop.f32.mrb[234].mxu0 }
 0x2cd   : > { %v12039_v26 = vpack.c.bf16 %v3522_v17, %v3521_v51  ;;  %v3208_v53 = vadd.f32 %v11906_v47, %v3096_v18  ;;  %v3097_v24 = vadd.f32 %v2713_v44, %v15057_v3  ;;  %v9270_v1 = vpop.f32.mrb[235].mxu0  ;;  %v3714_v36 = vsel %vm3678_vm5, %v3702_v34, %v3713_v30  ;;  %v15058_v18 = vld [vmem:[#allocation27_spill] sm:$0xff] }
 0x2ce   : > { %9472 = vmatmul.mubr.msk.bf16.gmra.mrb[228].mxu1 %vm4103_vm6, %v3714_v36  ;;  %v12056_v34 = vsel %vm2360_vm4, %v2458_v54, %v2460_v19  ;;  %v15060_v36 = vld [vmem:[#allocation28_spill] sm:$0xff] }
 0x2cf   : > { %v3313_v60 = vmax.f32 %v3208_v53, 0.0  ;;  %v3209_v62 = vadd.f32 %v11906_v47, %v3097_v24  ;;  %9376 = vmatmul.mubr.msk.bf16.gmra.mrb[84].mxu0 %vm1066_vm2, %v11788_v55  ;;  %9475 = vmatprep.mubr.msk.bf16.mxu1 %vm10205_vm1, %v14920_v56  ;;  %v3716_v29 = vshrl.u32 %v12039_v26, 16  ;;  %v3719_v51 = vshll.u32 %v12039_v26, 16  ;;  %v15059_v53 = vld [vmem:[#allocation6_spill] sm:$0xff] }
 0x2d0   : > { %9379 = vmatprep.mubr.msk.bf16.mxu0 %vm10205_vm1, %v14920_v56  ;;  %v14884_v3 = vrot.slane %v15059_v53, 3 }
 0x2d1   : > { %v3314_v28 = vmax.f32 %v3209_v62, 0.0  ;;  %v3718_v14 = vrot.slane %v3716_v29, 7  ;;  %v3523_v32 = vmul.f32 %v3418_v0, %v3313_v60 }
 0x2d2   : > { %v2718_v17 = vpop.f32.mrb[236].mxu0 }
 0x2d3   : > { %v3524_v55 = vmul.f32 %v3419_v40, %v3314_v28  ;;  %v3098_v10 = vadd.f32 %v2718_v17, %v15058_v18  ;;  %v9273_v30 = vpop.f32.mrb[237].mxu0  ;;  %v3721_v44 = vor.u32 %v3719_v51, %v3718_v14  ;;  %v3420_v28 = vld [vmem:[%s11915_s21 + $0x70] sm:$0xff]  ;;  %v3421_v51 = vld [vmem:[%s11915_s21 + $0x78] sm:$0xff] }
 0x2d4   : > { %v2721_v24 = vpop.f32.mrb[238].mxu0 }
 0x2d5   : > { %v12061_v1 = vpack.c.bf16 %v3524_v55, %v3523_v32  ;;  %v3210_v54 = vadd.f32 %v11906_v47, %v3098_v10  ;;  %v3099_v62 = vadd.f32 %v2721_v24, %v15060_v36  ;;  %v9274_v29 = vpop.f32.mrb[239].mxu0  ;;  %v3722_v25 = vsel %vm3678_vm5, %v3710_v21, %v3721_v44  ;;  %v15061_v10 = vld [vmem:[#allocation30_spill] sm:$0xff] }
 0x2d6   : > { %9476 = vmatmul.mubr.msk.bf16.gmra.mrb[232].mxu1 %vm4103_vm6, %v3722_v25  ;;  %v12080_v25 = vsel %vm2360_vm4, %v2460_v19, %v14884_v3  ;;  %v15062_v19 = vld [vmem:[#allocation31_spill] sm:$0xff] }
 0x2d7   : > { %v3315_v60 = vmax.f32 %v3210_v54, 0.0  ;;  %v3211_v0 = vadd.f32 %v11906_v47, %v3099_v62  ;;  %9380 = vmatmul.mubr.msk.bf16.gmra.mrb[88].mxu0 %vm1066_vm2, %v11800_v50  ;;  %9479 = vmatprep.mubr.msk.bf16.mxu1 %vm10205_vm1, %v14920_v56  ;;  %v3724_v40 = vshrl.u32 %v12061_v1, 16  ;;  %v3727_v32 = vshll.u32 %v12061_v1, 16 }
 0x2d8   : > { %9383 = vmatprep.mubr.msk.bf16.mxu0 %vm10205_vm1, %v14920_v56 }
 0x2d9   : > { %v3316_v21 = vmax.f32 %v3211_v0, 0.0  ;;  %v3726_v17 = vrot.slane %v3724_v40, 7  ;;  %v3525_v55 = vmul.f32 %v3420_v28, %v3315_v60 }
 0x2da   : > { %v2726_v50 = vpop.f32.mrb[240].mxu0 }
 0x2db   : > { %v3526_v18 = vmul.f32 %v3421_v51, %v3316_v21  ;;  %v3100_v30 = vadd.f32 %v2726_v50, %v15061_v10  ;;  %v9277_v44 = vpop.f32.mrb[241].mxu0  ;;  %v3729_v24 = vor.u32 %v3727_v32, %v3726_v17  ;;  %v3422_v21 = vld [vmem:[%s11915_s21 + $0x80] sm:$0xff]  ;;  %v3423_v32 = vld [vmem:[%s11915_s21 + $0x88] sm:$0xff] }
 0x2dc   : > { %v2729_v54 = vpop.f32.mrb[242].mxu0  ;;  %v15063_v44 = vld [vmem:[#allocation33_spill] sm:$0xff] }
 0x2dd   : > { %v12084_v36 = vpack.c.bf16 %v3526_v18, %v3525_v55  ;;  %v3212_v62 = vadd.f32 %v11906_v47, %v3100_v30  ;;  %v3101_v29 = vadd.f32 %v2729_v54, %v15062_v19  ;;  %v9278_v0 = vpop.f32.mrb[243].mxu0  ;;  %v3730_v40 = vsel %vm3678_vm5, %v3718_v14, %v3729_v24 }
 0x2de   : > { %9480 = vmatmul.mubr.msk.bf16.gmra.mrb[236].mxu1 %vm4103_vm6, %v3730_v40  ;;  %v15064_v0 = vld [vmem:[#allocation34_spill] sm:$0xff] }
 0x2df   : > { %v3317_v60 = vmax.f32 %v3212_v62, 0.0  ;;  %v3213_v28 = vadd.f32 %v11906_v47, %v3101_v29  ;;  %9384 = vmatmul.mubr.msk.bf16.gmra.mrb[92].mxu0 %vm1066_vm2, %v11812_v22  ;;  %9483 = vmatprep.mubr.msk.bf16.mxu1 %vm10205_vm1, %v14920_v56  ;;  %v3732_v51 = vshrl.u32 %v12084_v36, 16  ;;  %v3735_v55 = vshll.u32 %v12084_v36, 16 }
 0x2e0   : > { %9387 = vmatprep.mubr.msk.bf16.mxu0 %vm10205_vm1, %v14920_v56 }
 0x2e1   : > { %v3318_v50 = vmax.f32 %v3213_v28, 0.0  ;;  %v3734_v14 = vrot.slane %v3732_v51, 7  ;;  %v3527_v10 = vmul.f32 %v3422_v21, %v3317_v60 }
 0x2e2   : > { %v2734_v18 = vpop.f32.mrb[244].mxu0 }
 0x2e3   : > { %v3528_v30 = vmul.f32 %v3423_v32, %v3318_v50  ;;  %v3102_v22 = vadd.f32 %v2734_v18, %v15063_v44  ;;  %v9281_v24 = vpop.f32.mrb[245].mxu0  ;;  %v3737_v54 = vor.u32 %v3735_v55, %v3734_v14  ;;  %v3424_v50 = vld [vmem:[%s11915_s21 + $0x90] sm:$0xff]  ;;  %v3425_v55 = vld [vmem:[%s11915_s21 + $0x98] sm:$0xff] }
 0x2e4   : > { %v2737_v62 = vpop.f32.mrb[246].mxu0  ;;  %v15065_v24 = vld [vmem:[#allocation36_spill] sm:$0xff] }
 0x2e5   : > { %v12102_v19 = vpack.c.bf16 %v3528_v30, %v3527_v10  ;;  %v3214_v29 = vadd.f32 %v11906_v47, %v3102_v22  ;;  %v3103_v40 = vadd.f32 %v2737_v62, %v15064_v0  ;;  %v9282_v28 = vpop.f32.mrb[247].mxu0  ;;  %v3738_v51 = vsel %vm3678_vm5, %v3726_v17, %v3737_v54 }
 0x2e6   : > { %9484 = vmatmul.mubr.msk.bf16.gmra.mrb[240].mxu1 %vm4103_vm6, %v3738_v51  ;;  %v15066_v51 = vld [vmem:[#allocation37_spill] sm:$0xff] }
 0x2e7   : > { %v3319_v60 = vmax.f32 %v3214_v29, 0.0  ;;  %v3215_v21 = vadd.f32 %v11906_v47, %v3103_v40  ;;  %9388 = vmatmul.mubr.msk.bf16.gmra.mrb[96].mxu0 %vm1066_vm2, %v11824_v35  ;;  %9487 = vmatprep.mubr.msk.bf16.mxu1 %vm10205_vm1, %v14920_v56  ;;  %v3740_v32 = vshrl.u32 %v12102_v19, 16  ;;  %v3743_v10 = vshll.u32 %v12102_v19, 16  ;;  %v10129_v29 = vld [vmem:[%s14854_s4 + $0x28] sm:$0xff]  }
 0x2e8   : > { %9391 = vmatprep.mubr.msk.bf16.mxu0 %vm10205_vm1, %v14920_v56  ;;  %9874 = vmatpush3.bf16.msra.mxu0 %v10129_v29 }
 0x2e9   : > { %v3320_v18 = vmax.f32 %v3215_v21, 0.0  ;;  %v3742_v17 = vrot.slane %v3740_v32, 7  ;;  %v3529_v44 = vmul.f32 %v3424_v50, %v3319_v60 }
 0x2ea   : > { %v2742_v30 = vpop.f32.mrb[248].mxu0 }
 0x2eb   : > { %v3530_v22 = vmul.f32 %v3425_v55, %v3320_v18  ;;  %v3104_v54 = vadd.f32 %v2742_v30, %v15065_v24  ;;  %v9285_v35 = vpop.f32.mrb[249].mxu0  ;;  %v3745_v62 = vor.u32 %v3743_v10, %v3742_v17  ;;  %v3426_v10 = vld [vmem:[%s11915_s21 + $0xa0] sm:$0xff]  ;;  %v3427_v30 = vld [vmem:[%s11915_s21 + $0xa8] sm:$0xff] }
 0x2ec   : > { %v2745_v0 = vpop.f32.mrb[250].mxu0 }
 0x2ed   : > { %v12123_v40 = vpack.c.bf16 %v3530_v22, %v3529_v44  ;;  %v3216_v28 = vadd.f32 %v11906_v47, %v3104_v54  ;;  %v3105_v21 = vadd.f32 %v2745_v0, %v15066_v51  ;;  %v9286_v32 = vpop.f32.mrb[251].mxu0  ;;  %v3746_v60 = vsel %vm3678_vm5, %v3734_v14, %v3745_v62  ;;  %v15067_v62 = vld [vmem:[#allocation39_spill] sm:$0xff] }
 0x2ee   : > { %9488 = vmatmul.mubr.msk.bf16.gmra.mrb[244].mxu1 %vm4103_vm6, %v3746_v60  ;;  %v15068_v32 = vld [vmem:[#allocation40_spill] sm:$0xff] }
 0x2ef   : > { %v3321_v50 = vmax.f32 %v3216_v28, 0.0  ;;  %v3217_v55 = vadd.f32 %v11906_v47, %v3105_v21  ;;  %9392 = vmatmul.mubr.msk.bf16.gmra.mrb[100].mxu0 %vm1066_vm2, %v11836_v4  ;;  %9491 = vmatprep.mubr.msk.bf16.mxu1 %vm10205_vm1, %v14920_v56  ;;  %v3748_v18 = vshrl.u32 %v12123_v40, 16  ;;  %v3751_v22 = vshll.u32 %v12123_v40, 16 }
 0x2f0   : > { %9395 = vmatprep.mubr.msk.bf16.mxu0 %vm10205_vm1, %v14920_v56 }
 0x2f1   : > { %v3322_v14 = vmax.f32 %v3217_v55, 0.0  ;;  %v3750_v44 = vrot.slane %v3748_v18, 7  ;;  %v3531_v54 = vmul.f32 %v3426_v10, %v3321_v50 }
 0x2f2   : > { %v2750_v24 = vpop.f32.mrb[252].mxu0 }
 0x2f3   : > { %v3532_v35 = vmul.f32 %v3427_v30, %v3322_v14  ;;  %v3106_v4 = vadd.f32 %v2750_v24, %v15067_v62  ;;  %v9289_v29 = vpop.f32.mrb[253].mxu0  ;;  %v3753_v0 = vor.u32 %v3751_v22, %v3750_v44  ;;  %v3428_v14 = vld [vmem:[%s11915_s21 + $0xb0] sm:$0xff]  ;;  %v3429_v22 = vld [vmem:[%s11915_s21 + $0xb8] sm:$0xff] }
 0x2f4   : > { %v2753_v28 = vpop.f32.mrb[254].mxu0  ;;  %v15069_v29 = vld [vmem:[#allocation42_spill] sm:$0xff] }
 0x2f5   : > { %v12141_v51 = vpack.c.bf16 %v3532_v35, %v3531_v54  ;;  %v3218_v21 = vadd.f32 %v11906_v47, %v3106_v4  ;;  %v3107_v60 = vadd.f32 %v2753_v28, %v15068_v32  ;;  %v9290_v55 = vpop.f32.mrb[255].mxu0  ;;  %v3754_v18 = vsel %vm3678_vm5, %v3742_v17, %v3753_v0 }
 0x2f6   : > { %9492 = vmatmul.mubr.msk.bf16.gmra.mrb[248].mxu1 %vm4103_vm6, %v3754_v18  ;;  %v15070_v55 = vld [vmem:[#allocation43_spill] sm:$0xff] }
 0x2f7   : > { %v3323_v50 = vmax.f32 %v3218_v21, 0.0  ;;  %v3219_v10 = vadd.f32 %v11906_v47, %v3107_v60  ;;  %9396 = vmatmul.mubr.msk.bf16.gmra.mrb[104].mxu0 %vm1066_vm2, %v11848_v20  ;;  %9495 = vmatprep.mubr.msk.bf16.mxu1 %vm10205_vm1, %v14920_v56  ;;  %v3756_v30 = vshrl.u32 %v12141_v51, 16  ;;  %v3759_v54 = vshll.u32 %v12141_v51, 16 }
 0x2f8   : > { %9399 = vmatprep.mubr.msk.bf16.mxu0 %vm10205_vm1, %v14920_v56 }
 0x2f9   : > { %v3324_v24 = vmax.f32 %v3219_v10, 0.0  ;;  %v3758_v17 = vrot.slane %v3756_v30, 7  ;;  %v3533_v62 = vmul.f32 %v3428_v14, %v3323_v50 }
 0x2fa   : > { %v2758_v35 = vpop.f32.mrb[0].mxu0 }
 0x2fb   : > { %v3534_v4 = vmul.f32 %v3429_v22, %v3324_v24  ;;  %v3108_v0 = vadd.f32 %v2758_v35, %v15069_v29  ;;  %v9293_v20 = vpop.f32.mrb[1].mxu0  ;;  %v3761_v28 = vor.u32 %v3759_v54, %v3758_v17  ;;  %v3431_v35 = vld [vmem:[%s11915_s21 + $0xc8] sm:$0xff] }
 0x2fc   : > { %v2761_v21 = vpop.f32.mrb[2].mxu0 }
 0x2fd   : > { %v12159_v32 = vpack.c.bf16 %v3534_v4, %v3533_v62  ;;  %v3220_v60 = vadd.f32 %v11906_v47, %v3108_v0  ;;  %v3109_v18 = vadd.f32 %v2761_v21, %v15070_v55  ;;  %v9294_v10 = vpop.f32.mrb[3].mxu0  ;;  %v3762_v30 = vsel %vm3678_vm5, %v3750_v44, %v3761_v28  ;;  %v3430_v44 = vld [vmem:[%s11915_s21 + $0xc0] sm:$0xff] }
 0x2fe   : > { %9496 = vmatmul.mubr.msk.bf16.gmra.mrb[252].mxu1 %vm4103_vm6, %v3762_v30  ;;  %v15071_v0 = vld [vmem:[#allocation45_spill] sm:$0xff]  ;;  %v15072_v10 = vld [vmem:[#allocation46_spill] sm:$0xff] }
 0x2ff   : > { %v3764_v50 = vshrl.u32 %v12159_v32, 16  ;;  %9400 = vmatmul.mubr.msk.bf16.gmra.mrb[108].mxu0 %vm1066_vm2, %v11860_v23  ;;  %9499 = vmatprep.mubr.msk.bf16.mxu1 %vm10205_vm1, %v14920_v56  ;;  %v3325_v14 = vmax.f32 %v3220_v60, 0.0  ;;  %v3221_v22 = vadd.f32 %v11906_v47, %v3109_v18  ;;  %v3767_v54 = vshll.u32 %v12159_v32, 16 }
 0x300   : > { %9403 = vmatprep.mubr.msk.bf16.mxu0 %vm10205_vm1, %v14920_v56 }
 0x301   : > { %v3766_v24 = vrot.slane %v3764_v50, 7  ;;  %v3326_v62 = vmax.f32 %v3221_v22, 0.0  ;;  %v3535_v28 = vmul.f32 %v3430_v44, %v3325_v14  ;;  %v3432_v14 = vld [vmem:[%s11915_s21 + $0xd0] sm:$0xff]  ;;  %v3433_v44 = vld [vmem:[%s11915_s21 + $0xd8] sm:$0xff] }
 0x302   : > { %v2766_v4 = vpop.f32.mrb[4].mxu0 }
 0x303   : > { %v3769_v29 = vor.u32 %v3767_v54, %v3766_v24  ;;  %v3110_v20 = vadd.f32 %v2766_v4, %v15071_v0  ;;  %v9297_v23 = vpop.f32.mrb[5].mxu0  ;;  %v3536_v21 = vmul.f32 %v3431_v35, %v3326_v62  ;;  %v10130_v0 = vld [vmem:[%s14854_s4 + $0x8] sm:$0xff]  }
 0x304   : > { %v2769_v60 = vpop.f32.mrb[6].mxu0  ;;  %v15073_v23 = vld [vmem:[#allocation48_spill] sm:$0xff]  ;;  %9666 = vmatpush3.bf16.msra.mxu1 %v10130_v0 }
 0x305   : > { %v3770_v55 = vsel %vm3678_vm5, %v3758_v17, %v3769_v29  ;;  %v3222_v18 = vadd.f32 %v11906_v47, %v3110_v20  ;;  %v3111_v30 = vadd.f32 %v2769_v60, %v15072_v10  ;;  %v9298_v50 = vpop.f32.mrb[7].mxu0  ;;  %v12180_v3 = vpack.c.bf16 %v3536_v21, %v3535_v28 }
 0x306   : > { %9500 = vmatmul.mubr.msk.bf16.gmra.mrb[0].mxu1 %vm4103_vm6, %v3770_v55 }
 0x307   : > { %v3327_v22 = vmax.f32 %v3222_v18, 0.0  ;;  %v3223_v54 = vadd.f32 %v11906_v47, %v3111_v30  ;;  %9404 = vmatmul.mubr.msk.bf16.gmra.mrb[112].mxu0 %vm1066_vm2, %v11872_v37  ;;  %9503 = vmatprep.mubr.msk.bf16.mxu1 %vm10205_vm1, %v14920_v56  ;;  %v3772_v17 = vshrl.u32 %v12180_v3, 16  ;;  %v3775_v4 = vshll.u32 %v12180_v3, 16  ;;  %v15075_v30 = vld [vmem:[#allocation49_spill] sm:$0xff] }
 0x308   : > { %9407 = vmatprep.mubr.msk.bf16.mxu0 %vm10205_vm1, %v14920_v56 }
 0x309   : > { %v3328_v35 = vmax.f32 %v3223_v54, 0.0  ;;  %v3774_v62 = vrot.slane %v3772_v17, 7  ;;  %v3537_v37 = vmul.f32 %v3432_v14, %v3327_v22 }
 0x30a   : > { %v2774_v29 = vpop.f32.mrb[8].mxu0 }
 0x30b   : > { %v3538_v20 = vmul.f32 %v3433_v44, %v3328_v35  ;;  %v3112_v28 = vadd.f32 %v2774_v29, %v15073_v23  ;;  %v9301_v21 = vpop.f32.mrb[9].mxu0  ;;  %v3777_v55 = vor.u32 %v3775_v4, %v3774_v62  ;;  %v3435_v29 = vld [vmem:[%s11915_s21 + $0xe8] sm:$0xff] }
 0x30c   : > { %v2777_v60 = vpop.f32.mrb[10].mxu0 }
 0x30d   : > { %v12198_v18 = vpack.c.bf16 %v3538_v20, %v3537_v37  ;;  %v3224_v10 = vadd.f32 %v11906_v47, %v3112_v28  ;;  %v3113_v50 = vadd.f32 %v2777_v60, %v15075_v30  ;;  %v9302_v54 = vpop.f32.mrb[11].mxu0  ;;  %v3778_v17 = vsel %vm3678_vm5, %v3766_v24, %v3777_v55  ;;  %v3434_v24 = vld [vmem:[%s11915_s21 + $0xe0] sm:$0xff]  ;;  %v15076_v20 = vld [vmem:[#allocation51_spill] sm:$0xff]  ;;  %v15077_v30 = vld [vmem:[#allocation52_spill] sm:$0xff] }
 0x30e   : > { %9504 = vmatmul.mubr.msk.bf16.gmra.mrb[4].mxu1 %vm4103_vm6, %v3778_v17 }
 0x30f   : > { %15074 = vst [vmem:[#allocation7_spill] sm:$0xff] %v12198_v18  ;;  %v3780_v22 = vshrl.u32 %v12198_v18, 16  ;;  %9408 = vmatmul.mubr.msk.bf16.gmra.mrb[116].mxu0 %vm1066_vm2, %v11884_v46  ;;  %v3329_v14 = vmax.f32 %v3224_v10, 0.0  ;;  %v3225_v44 = vadd.f32 %v11906_v47, %v3113_v50  ;;  %9507 = vmatprep.mubr.msk.bf16.mxu1 %vm10205_vm1, %v14920_v56  ;;  %v3783_v4 = vshll.u32 %v12198_v18, 16 }
 0x310   : > { %9411 = vmatprep.mubr.msk.bf16.mxu0 %vm10205_vm1, %v14920_v56 }
 0x311   : > { %v3782_v35 = vrot.slane %v3780_v22, 7  ;;  %v3330_v0 = vmax.f32 %v3225_v44, 0.0  ;;  %v3539_v21 = vmul.f32 %v3434_v24, %v3329_v14  ;;  %v3437_v24 = vld [vmem:[%s11915_s21 + $0xf8] sm:$0xff] }
 0x312   : > { %v2782_v37 = vpop.f32.mrb[12].mxu0 }
 0x313   : > { %v3114_v23 = vadd.f32 %v2782_v37, %v15076_v20  ;;  %v9305_v46 = vpop.f32.mrb[13].mxu0  ;;  %v3785_v28 = vor.u32 %v3783_v4, %v3782_v35  ;;  %v3540_v60 = vmul.f32 %v3435_v29, %v3330_v0  ;;  %v3436_v4 = vld [vmem:[%s11915_s21 + $0xf0] sm:$0xff] }
 0x314   : > { %v2785_v55 = vpop.f32.mrb[14].mxu0  ;;  %v15078_v46 = vld [vmem:[#allocation54_spill] sm:$0xff] }
 0x315   : > { %v3226_v10 = vadd.f32 %v11906_v47, %v3114_v23  ;;  %v3115_v50 = vadd.f32 %v2785_v55, %v15077_v30  ;;  %v9306_v54 = vpop.f32.mrb[15].mxu0  ;;  %v3786_v17 = vsel %vm3678_vm5, %v3774_v62, %v3785_v28  ;;  %v12219_v22 = vpack.c.bf16 %v3540_v60, %v3539_v21  ;;  %v15080_v30 = vld [vmem:[#allocation55_spill] sm:$0xff] }
 0x316   : > { %9508 = vmatmul.mubr.msk.bf16.gmra.mrb[8].mxu1 %vm4103_vm6, %v3786_v17 }
 0x317   : > { %v3331_v44 = vmax.f32 %v3226_v10, 0.0  ;;  %v3227_v18 = vadd.f32 %v11906_v47, %v3115_v50  ;;  %9412 = vmatmul.mubr.msk.bf16.gmra.mrb[120].mxu0 %vm1066_vm2, %v11896_v31  ;;  %v3788_v14 = vshrl.u32 %v12219_v22, 16  ;;  %9511 = vmatprep.mubr.msk.bf16.mxu1 %vm10205_vm1, %v14920_v56  ;;  %v3791_v0 = vshll.u32 %v12219_v22, 16 }
 0x318   : > { %9415 = vmatprep.mubr.msk.bf16.mxu0 %vm10205_vm1, %v14920_v56 }
 0x319   : > { %v3332_v62 = vmax.f32 %v3227_v18, 0.0  ;;  %v3790_v29 = vrot.slane %v3788_v14, 7  ;;  %v3541_v20 = vmul.f32 %v3436_v4, %v3331_v44 }
 0x31a   : > { %v2790_v37 = vpop.f32.mrb[16].mxu0 }
 0x31b   : > { %v3542_v23 = vmul.f32 %v3437_v24, %v3332_v62  ;;  %v3116_v28 = vadd.f32 %v2790_v37, %v15078_v46  ;;  %v9309_v31 = vpop.f32.mrb[17].mxu0  ;;  %v3793_v60 = vor.u32 %v3791_v0, %v3790_v29  ;;  %v3439_v62 = vld [vmem:[%s11915_s21 + $0x108] sm:$0xff] }
 0x31c   : > { %v2793_v21 = vpop.f32.mrb[18].mxu0 }
 0x31d   : > { %v12234_v55 = vpack.c.bf16 %v3542_v23, %v3541_v20  ;;  %v3228_v10 = vadd.f32 %v11906_v47, %v3116_v28  ;;  %v3117_v50 = vadd.f32 %v2793_v21, %v15080_v30  ;;  %v9310_v18 = vpop.f32.mrb[19].mxu0  ;;  %v3794_v54 = vsel %vm3678_vm5, %v3782_v35, %v3793_v60  ;;  %v3438_v35 = vld [vmem:[%s11915_s21 + $0x100] sm:$0xff] }
 0x31e   : > { %9512 = vmatmul.mubr.msk.bf16.gmra.mrb[12].mxu1 %vm4103_vm6, %v3794_v54  ;;  %v15081_v20 = vld [vmem:[#allocation57_spill] sm:$0xff] }
 0x31f   : > { %15079 = vst [vmem:[#allocation53_spill] sm:$0xff] %v12234_v55  ;;  %v3796_v17 = vshrl.u32 %v12234_v55, 16  ;;  %9416 = vmatmul.mubr.msk.bf16.gmra.mrb[124].mxu0 %vm1066_vm2, %v11923_v33  ;;  %v3333_v44 = vmax.f32 %v3228_v10, 0.0  ;;  %v3229_v14 = vadd.f32 %v11906_v47, %v3117_v50  ;;  %9515 = vmatprep.mubr.msk.bf16.mxu1 %vm10205_vm1, %v14920_v56  ;;  %v3799_v24 = vshll.u32 %v12234_v55, 16  ;;  %v15082_v10 = vld [vmem:[#allocation58_spill] sm:$0xff] }
 0x320   : > { %9419 = vmatprep.mubr.msk.bf16.mxu0 %vm10205_vm1, %v14920_v56 }
 0x321   : > { %v3798_v4 = vrot.slane %v3796_v17, 7  ;;  %v3334_v0 = vmax.f32 %v3229_v14, 0.0  ;;  %v3543_v28 = vmul.f32 %v3438_v35, %v3333_v44  ;;  %v3441_v35 = vld [vmem:[%s11915_s21 + $0x118] sm:$0xff] }
 0x322   : > { %v2798_v37 = vpop.f32.mrb[20].mxu0 }
 0x323   : > { %v3118_v23 = vadd.f32 %v2798_v37, %v15081_v20  ;;  %v9313_v33 = vpop.f32.mrb[21].mxu0  ;;  %v3801_v46 = vor.u32 %v3799_v24, %v3798_v4  ;;  %v3544_v31 = vmul.f32 %v3439_v62, %v3334_v0  ;;  %v3440_v24 = vld [vmem:[%s11915_s21 + $0x110] sm:$0xff] }
 0x324   : > { %v2801_v21 = vpop.f32.mrb[22].mxu0  ;;  %v15084_v33 = vld [vmem:[#allocation60_spill] sm:$0xff] }
 0x325   : > { %v3230_v60 = vadd.f32 %v11906_v47, %v3118_v23  ;;  %v3119_v30 = vadd.f32 %v2801_v21, %v15082_v10  ;;  %v9314_v50 = vpop.f32.mrb[23].mxu0  ;;  %v3802_v18 = vsel %vm3678_vm5, %v3790_v29, %v3801_v46  ;;  %v12255_v54 = vpack.c.bf16 %v3544_v31, %v3543_v28  ;;  %v15086_v10 = vld [vmem:[#allocation61_spill] sm:$0xff] }
 0x326   : > { %9516 = vmatmul.mubr.msk.bf16.gmra.mrb[16].mxu1 %vm4103_vm6, %v3802_v18 }
 0x327   : > { %15083 = vst [vmem:[#allocation10_spill] sm:$0xff] %v12255_v54  ;;  %v3335_v17 = vmax.f32 %v3230_v60, 0.0  ;;  %v3231_v14 = vadd.f32 %v11906_v47, %v3119_v30  ;;  %9420 = vmatmul.mubr.msk.bf16.gmra.mrb[128].mxu0 %vm1066_vm2, %v11942_v58  ;;  %v3804_v44 = vshrl.u32 %v12255_v54, 16  ;;  %9519 = vmatprep.mubr.msk.bf16.mxu1 %vm10205_vm1, %v14920_v56  ;;  %v3807_v0 = vshll.u32 %v12255_v54, 16 }
 0x328   : > { %9423 = vmatprep.mubr.msk.bf16.mxu0 %vm10205_vm1, %v14920_v56 }
 0x329   : > { %v3336_v29 = vmax.f32 %v3231_v14, 0.0  ;;  %v3806_v62 = vrot.slane %v3804_v44, 7  ;;  %v3545_v20 = vmul.f32 %v3440_v24, %v3335_v17 }
 0x32a   : > { %v2806_v37 = vpop.f32.mrb[24].mxu0 }
 0x32b   : > { %v3546_v23 = vmul.f32 %v3441_v35, %v3336_v29  ;;  %v3120_v46 = vadd.f32 %v2806_v37, %v15084_v33  ;;  %v9317_v58 = vpop.f32.mrb[25].mxu0  ;;  %v3809_v31 = vor.u32 %v3807_v0, %v3806_v62  ;;  %v3443_v29 = vld [vmem:[%s11915_s21 + $0x128] sm:$0xff] }
 0x32c   : > { %v2809_v28 = vpop.f32.mrb[26].mxu0 }
 0x32d   : > { %v12270_v21 = vpack.c.bf16 %v3546_v23, %v3545_v20  ;;  %v3232_v60 = vadd.f32 %v11906_v47, %v3120_v46  ;;  %v3121_v30 = vadd.f32 %v2809_v28, %v15086_v10  ;;  %v9318_v50 = vpop.f32.mrb[27].mxu0  ;;  %v3810_v18 = vsel %vm3678_vm5, %v3798_v4, %v3809_v31  ;;  %v3442_v4 = vld [vmem:[%s11915_s21 + $0x120] sm:$0xff]  ;;  %v15087_v20 = vld [vmem:[#allocation63_spill] sm:$0xff] }
 0x32e   : > { %9520 = vmatmul.mubr.msk.bf16.gmra.mrb[20].mxu1 %vm4103_vm6, %v3810_v18 }
 0x32f   : > { %15085 = vst [vmem:[#allocation11_spill] sm:$0xff] %v12270_v21  ;;  %v3812_v14 = vshrl.u32 %v12270_v21, 16  ;;  %9424 = vmatmul.mubr.msk.bf16.gmra.mrb[132].mxu0 %vm1066_vm2, %v11964_v2  ;;  %v3337_v17 = vmax.f32 %v3232_v60, 0.0  ;;  %v3233_v44 = vadd.f32 %v11906_v47, %v3121_v30  ;;  %9523 = vmatprep.mubr.msk.bf16.mxu1 %vm10205_vm1, %v14920_v56  ;;  %v3815_v35 = vshll.u32 %v12270_v21, 16  ;;  %v15088_v60 = vld [vmem:[#allocation64_spill] sm:$0xff] }
 0x330   : > { %9427 = vmatprep.mubr.msk.bf16.mxu0 %vm10205_vm1, %v14920_v56 }
 0x331   : > { %v3814_v24 = vrot.slane %v3812_v14, 7  ;;  %v3338_v0 = vmax.f32 %v3233_v44, 0.0  ;;  %v3547_v46 = vmul.f32 %v3442_v4, %v3337_v17  ;;  %v3445_v4 = vld [vmem:[%s11915_s21 + $0x138] sm:$0xff] }
 0x332   : > { %v2814_v37 = vpop.f32.mrb[28].mxu0 }
 0x333   : > { %v3122_v23 = vadd.f32 %v2814_v37, %v15087_v20  ;;  %v9321_v2 = vpop.f32.mrb[29].mxu0  ;;  %v3817_v33 = vor.u32 %v3815_v35, %v3814_v24  ;;  %v3548_v58 = vmul.f32 %v3443_v29, %v3338_v0  ;;  %v3444_v35 = vld [vmem:[%s11915_s21 + $0x130] sm:$0xff] }
 0x334   : > { %v2817_v28 = vpop.f32.mrb[30].mxu0  ;;  %v15089_v2 = vld [vmem:[#allocation66_spill] sm:$0xff] }
 0x335   : > { %v3234_v31 = vadd.f32 %v11906_v47, %v3122_v23  ;;  %v3123_v10 = vadd.f32 %v2817_v28, %v15088_v60  ;;  %v9322_v30 = vpop.f32.mrb[31].mxu0  ;;  %v3818_v50 = vsel %vm3678_vm5, %v3806_v62, %v3817_v33  ;;  %v12291_v18 = vpack.c.bf16 %v3548_v58, %v3547_v46  ;;  %v15091_v60 = vld [vmem:[#allocation67_spill] sm:$0xff] }
 0x336   : > { %9524 = vmatmul.mubr.msk.bf16.gmra.mrb[24].mxu1 %vm4103_vm6, %v3818_v50 }
 0x337   : > { %v3339_v14 = vmax.f32 %v3234_v31, 0.0  ;;  %v3235_v44 = vadd.f32 %v11906_v47, %v3123_v10  ;;  %9428 = vmatmul.mubr.msk.bf16.gmra.mrb[136].mxu0 %vm1066_vm2, %v11989_v61  ;;  %v3820_v17 = vshrl.u32 %v12291_v18, 16  ;;  %9527 = vmatprep.mubr.msk.bf16.mxu1 %vm10205_vm1, %v14920_v56  ;;  %v3823_v0 = vshll.u32 %v12291_v18, 16 }
 0x338   : > { %9431 = vmatprep.mubr.msk.bf16.mxu0 %vm10205_vm1, %v14920_v56 }
 0x339   : > { %v3340_v62 = vmax.f32 %v3235_v44, 0.0  ;;  %v3822_v29 = vrot.slane %v3820_v17, 7  ;;  %v3549_v20 = vmul.f32 %v3444_v35, %v3339_v14 }
 0x33a   : > { %v2822_v37 = vpop.f32.mrb[32].mxu0 }
 0x33b   : > { %v3550_v23 = vmul.f32 %v3445_v4, %v3340_v62  ;;  %v3124_v33 = vadd.f32 %v2822_v37, %v15089_v2  ;;  %v9325_v61 = vpop.f32.mrb[33].mxu0  ;;  %v3825_v58 = vor.u32 %v3823_v0, %v3822_v29  ;;  %v3447_v62 = vld [vmem:[%s11915_s21 + $0x148] sm:$0xff] }
 0x33c   : > { %v2825_v46 = vpop.f32.mrb[34].mxu0  ;;  %v12327_v61 = vld [vmem:[%s14852_s2] ss:$0 sm:$0xff] }
 0x33d   : > { %v12306_v28 = vpack.c.bf16 %v3550_v23, %v3549_v20  ;;  %v3236_v31 = vadd.f32 %v11906_v47, %v3124_v33  ;;  %v3125_v10 = vadd.f32 %v2825_v46, %v15091_v60  ;;  %v9326_v30 = vpop.f32.mrb[35].mxu0  ;;  %v3826_v50 = vsel %vm3678_vm5, %v3814_v24, %v3825_v58  ;;  %v3446_v24 = vld [vmem:[%s11915_s21 + $0x140] sm:$0xff] }
 0x33e   : > { %9528 = vmatmul.mubr.msk.bf16.gmra.mrb[28].mxu1 %vm4103_vm6, %v3826_v50 }
 0x33f   : > { %15090 = vst [vmem:[#allocation12_spill] sm:$0xff] %v12306_v28  ;;  %v3828_v44 = vshrl.u32 %v12306_v28, 16  ;;  %9432 = vmatmul.mubr.msk.bf16.gmra.mrb[140].mxu0 %vm1066_vm2, %v12012_v7  ;;  %v3341_v14 = vmax.f32 %v3236_v31, 0.0  ;;  %v3237_v17 = vadd.f32 %v11906_v47, %v3125_v10  ;;  %9531 = vmatprep.mubr.msk.bf16.mxu1 %vm10205_vm1, %v14920_v56  ;;  %v3831_v4 = vshll.u32 %v12306_v28, 16 }
 0x340   : > { %9435 = vmatprep.mubr.msk.bf16.mxu0 %vm10205_vm1, %v14920_v56 }
 0x341   : > { %v3830_v35 = vrot.slane %v3828_v44, 7  ;;  %v3342_v0 = vmax.f32 %v3237_v17, 0.0  ;;  %v3551_v47 = vmul.f32 %v3446_v24, %v3341_v14  ;;  %v3448_v44 = vld [vmem:[%s11915_s21 + $0x150] sm:$0xff]  ;;  %v3449_v14 = vld [vmem:[%s11915_s21 + $0x158] sm:$0xff] }
 0x342   : > { %v2830_v37 = vpop.f32.mrb[36].mxu0 }
 0x343   : > { %v3126_v20 = vadd.f32 %v2830_v37, %v11495_v48  ;;  %v9329_v23 = vpop.f32.mrb[37].mxu0  ;;  %v3833_v7 = vor.u32 %v3831_v4, %v3830_v35  ;;  %v3552_v2 = vmul.f32 %v3447_v62, %v3342_v0 }
 0x344   : > { %v2833_v33 = vpop.f32.mrb[38].mxu0 }
 0x345   : > { %v3238_v46 = vadd.f32 %v12327_v61, %v3126_v20  ;;  %v3127_v58 = vadd.f32 %v2833_v33, %v11499_v13  ;;  %v9330_v31 = vpop.f32.mrb[39].mxu0  ;;  %v3834_v60 = vsel %vm3678_vm5, %v3822_v29, %v3833_v7  ;;  %v12332_v48 = vpack.c.bf16 %v3552_v2, %v3551_v47 }
 0x346   : > { %9532 = vmatmul.mubr.msk.bf16.gmra.mrb[32].mxu1 %vm4103_vm6, %v3834_v60  ;;  %v3451_v60 = vld [vmem:[%s11915_s21 + $0x168] sm:$0xff] }
 0x347   : > { %15092 = vst [vmem:[#allocation56_spill] sm:$0xff] %v12332_v48  ;;  %v3343_v10 = vmax.f32 %v3238_v46, 0.0  ;;  %v3239_v30 = vadd.f32 %v12327_v61, %v3127_v58  ;;  %9436 = vmatmul.mubr.msk.bf16.gmra.mrb[144].mxu0 %vm1066_vm2, %v12034_v42  ;;  %v3836_v50 = vshrl.u32 %v12332_v48, 16  ;;  %9535 = vmatprep.mubr.msk.bf16.mxu1 %vm10205_vm1, %v14920_v56  ;;  %v3839_v17 = vshll.u32 %v12332_v48, 16  ;;  %v3450_v58 = vld [vmem:[%s11915_s21 + $0x160] sm:$0xff] }
 0x348   : > { %9439 = vmatprep.mubr.msk.bf16.mxu0 %vm10205_vm1, %v14920_v56 }
 0x349   : > { %v3344_v13 = vmax.f32 %v3239_v30, 0.0  ;;  %v3838_v29 = vrot.slane %v3836_v50, 7  ;;  %v3553_v24 = vmul.f32 %v3448_v44, %v3343_v10  ;;  %v478_v10 = vld [vmem:[%s10325_s27 + $0x358] sm:$0xff]  ;;  %v479_v30 = vld [vmem:[%s10325_s27 + $0x360] sm:$0x3f] }
 0x34a   : > { %v2838_v4 = vpop.f32.mrb[40].mxu0 }
 0x34b   : > { %v3554_v62 = vmul.f32 %v3449_v14, %v3344_v13  ;;  %v3128_v42 = vadd.f32 %v2838_v4, %v11509_v43  ;;  %v9333_v0 = vpop.f32.mrb[41].mxu0  ;;  %v3841_v20 = vor.u32 %v3839_v17, %v3838_v29 }
 0x34c   : > { %v2841_v37 = vpop.f32.mrb[42].mxu0 }
 0x34d   : > { %v12347_v23 = vpack.c.bf16 %v3554_v62, %v3553_v24  ;;  %v3240_v7 = vadd.f32 %v12327_v61, %v3128_v42  ;;  %v3129_v47 = vadd.f32 %v2841_v37, %v11514_v27  ;;  %v9334_v2 = vpop.f32.mrb[43].mxu0  ;;  %v3842_v33 = vsel %vm3678_vm5, %v3830_v35, %v3841_v20 }
 0x34e   : > { %9536 = vmatmul.mubr.msk.bf16.gmra.mrb[36].mxu1 %vm4103_vm6, %v3842_v33  ;;  %v2304_v62 = vpack.c.bf16 %v479_v30, %v478_v10  ;;  %v3452_v33 = vld [vmem:[%s11915_s21 + $0x170] sm:$0xff] }
 0x34f   : > { %15093 = vst [vmem:[#allocation13_spill] sm:$0xff] %v12347_v23  ;;  %v3844_v46 = vshrl.u32 %v12347_v23, 16  ;;  %9440 = vmatmul.mubr.msk.bf16.gmra.mrb[148].mxu0 %vm1066_vm2, %v12056_v34  ;;  %v3345_v43 = vmax.f32 %v3240_v7, 0.0  ;;  %v3241_v31 = vadd.f32 %v12327_v61, %v3129_v47  ;;  %9539 = vmatprep.mubr.msk.bf16.mxu1 %vm10205_vm1, %v14920_v56  ;;  %v3847_v35 = vshll.u32 %v12347_v23, 16 }
 0x350   : > { %9443 = vmatprep.mubr.msk.bf16.mxu0 %vm10205_vm1, %v14920_v56 }
 0x351   : > { %v3846_v27 = vrot.slane %v3844_v46, 7  ;;  %v3346_v50 = vmax.f32 %v3241_v31, 0.0  ;;  %v3555_v17 = vmul.f32 %v3450_v58, %v3345_v43  ;;  %v3453_v46 = vld [vmem:[%s11915_s21 + $0x178] sm:$0xff] }
 0x352   : > { %v2846_v44 = vpop.f32.mrb[44].mxu0 }
 0x353   : > { %v3130_v34 = vadd.f32 %v2846_v44, %v11529_v63  ;;  %v9337_v14 = vpop.f32.mrb[45].mxu0  ;;  %v3849_v13 = vor.u32 %v3847_v35, %v3846_v27  ;;  %v3556_v4 = vmul.f32 %v3451_v60, %v3346_v50  ;;  %v15095_v44 = vrot.slane %v15059_v53, 3 }
 0x354   : > { %v2849_v24 = vpop.f32.mrb[46].mxu0 }
 0x355   : > { %v3242_v42 = vadd.f32 %v12327_v61, %v3130_v34  ;;  %v3131_v0 = vadd.f32 %v2849_v24, %v11533_v39  ;;  %v9338_v37 = vpop.f32.mrb[47].mxu0  ;;  %v3850_v20 = vsel %vm3678_vm5, %v3838_v29, %v3849_v13  ;;  %v12370_v7 = vpack.c.bf16 %v3556_v4, %v3555_v17 }
 0x356   : > { %9540 = vmatmul.mubr.msk.bf16.gmra.mrb[40].mxu1 %vm4103_vm6, %v3850_v20  ;;  %v2464_v39 = vrot.slane %v2304_v62, 3 }
 0x357   : > { %15094 = vst [vmem:[#allocation15_spill] sm:$0xff] %v12370_v7  ;;  %v3347_v47 = vmax.f32 %v3242_v42, 0.0  ;;  %v3243_v63 = vadd.f32 %v12327_v61, %v3131_v0  ;;  %9444 = vmatmul.mubr.msk.bf16.gmra.mrb[152].mxu0 %vm1066_vm2, %v12080_v25  ;;  %v3852_v2 = vshrl.u32 %v12370_v7, 16  ;;  %9543 = vmatprep.mubr.msk.bf16.mxu1 %vm10205_vm1, %v14920_v56  ;;  %v3855_v58 = vshll.u32 %v12370_v7, 16  ;;  %v3454_v0 = vld [vmem:[%s11915_s21 + $0x180] sm:$0xff] }
 0x358   : > { %9447 = vmatprep.mubr.msk.bf16.mxu0 %vm10205_vm1, %v14920_v56  ;;  %v2465_v34 = vsel %vm2360_vm4, %v15095_v44, %v2464_v39  ;;  %v3457_v44 = vld [vmem:[%s11915_s21 + $0x198] sm:$0xff] }
 0x359   : > { %v3348_v29 = vmax.f32 %v3243_v63, 0.0  ;;  %v3854_v43 = vrot.slane %v3852_v2, 7  ;;  %v3557_v35 = vmul.f32 %v3452_v33, %v3347_v47 }
 0x35a   : > { %v2854_v31 = vpop.f32.mrb[48].mxu0 }
 0x35b   : > { %v3558_v60 = vmul.f32 %v3453_v46, %v3348_v29  ;;  %v3132_v25 = vadd.f32 %v2854_v31, %v11549_v41  ;;  %v9341_v10 = vpop.f32.mrb[49].mxu0  ;;  %v3857_v50 = vor.u32 %v3855_v58, %v3854_v43 }
 0x35c   : > { %v2857_v30 = vpop.f32.mrb[50].mxu0 }
 0x35d   : > { %v12388_v14 = vpack.c.bf16 %v3558_v60, %v3557_v35  ;;  %v3244_v13 = vadd.f32 %v12327_v61, %v3132_v25  ;;  %v3133_v17 = vadd.f32 %v2857_v30, %v11553_v8  ;;  %v9342_v4 = vpop.f32.mrb[51].mxu0  ;;  %v3858_v24 = vsel %vm3678_vm5, %v3846_v27, %v3857_v50  ;;  %v3455_v27 = vld [vmem:[%s11915_s21 + $0x188] sm:$0xff]  ;;  %v3456_v50 = vld [vmem:[%s11915_s21 + $0x190] sm:$0xff] }
 0x35e   : > { %9544 = vmatmul.mubr.msk.bf16.gmra.mrb[44].mxu1 %vm4103_vm6, %v3858_v24 }
 0x35f   : > { %15096 = vst [vmem:[#allocation59_spill] sm:$0xff] %v12388_v14  ;;  %v3860_v41 = vshrl.u32 %v12388_v14, 16  ;;  %9448 = vmatmul.mubr.msk.bf16.gmra.mrb[156].mxu0 %vm1066_vm2, %v2465_v34  ;;  %v3349_v53 = vmax.f32 %v3244_v13, 0.0  ;;  %v3245_v62 = vadd.f32 %v12327_v61, %v3133_v17  ;;  %9547 = vmatprep.mubr.msk.bf16.mxu1 %vm10205_vm1, %v14920_v56  ;;  %v3863_v8 = vshll.u32 %v12388_v14, 16 }
 0x360   : > { %9451 = vmatprep.mubr.msk.bf16.mxu0 %vm10205_vm1, %v14920_v56 }
 0x361   : > { %v3862_v42 = vrot.slane %v3860_v41, 7  ;;  %v3350_v37 = vmax.f32 %v3245_v62, 0.0  ;;  %v3559_v33 = vmul.f32 %v3454_v0, %v3349_v53  ;;  %v5311_v53 = vrot.slane %v11950_v9, 7 }
 0x362   : > { %v2862_v20 = vpop.f32.mrb[52].mxu0 }
 0x363   : > { %v3134_v47 = vadd.f32 %v2862_v20, %v11567_v16  ;;  %v9345_v63 = vpop.f32.mrb[53].mxu0  ;;  %v3865_v2 = vor.u32 %v3863_v8, %v3862_v42  ;;  %v3560_v46 = vmul.f32 %v3455_v27, %v3350_v37 }
 0x364   : > { %v2865_v29 = vpop.f32.mrb[54].mxu0 }
 0x365   : > { %v3246_v58 = vadd.f32 %v12327_v61, %v3134_v47  ;;  %v3135_v31 = vadd.f32 %v2865_v29, %v11571_v38  ;;  %v9346_v35 = vpop.f32.mrb[55].mxu0  ;;  %v3866_v60 = vsel %vm3678_vm5, %v3854_v43, %v3865_v2  ;;  %v12408_v25 = vpack.c.bf16 %v3560_v46, %v3559_v33  ;;  %v3458_v29 = vld [vmem:[%s11915_s21 + $0x1a0] sm:$0xff] }
 0x366   : > { %9548 = vmatmul.mubr.msk.bf16.gmra.mrb[48].mxu1 %vm4103_vm6, %v3866_v60  ;;  %v5312_v43 = vrot.slane %v11972_v15, 7 }
 0x367   : > { %15097 = vst [vmem:[#allocation16_spill] sm:$0xff] %v12408_v25  ;;  %v3351_v10 = vmax.f32 %v3246_v58, 0.0  ;;  %v3247_v30 = vadd.f32 %v12327_v61, %v3135_v31  ;;  %9452 = vmatmul.mubr.msk.bf16.gmra.mrb[160].mxu0 %vm1066_vm2, %v2464_v39  ;;  %v3868_v16 = vshrl.u32 %v12408_v25, 16  ;;  %9551 = vmatprep.mubr.msk.bf16.mxu1 %vm10205_vm1, %v14920_v56  ;;  %v3871_v13 = vshll.u32 %v12408_v25, 16 }
 0x368   : > { %9875 = vmatprep.mubr.msk.bf16.mxu0 %vm10205_vm1, %v14920_v56  ;;  %v5313_v47 = vsel %vm5310_vm7, %v5311_v53, %v5312_v43  ;;  %v5314_v58 = vrot.slane %v11995_v59, 7  ;;  %vm6771_vm2 = vcmask 523271  }
 0x369   : > { %v3352_v38 = vmax.f32 %v3247_v30, 0.0  ;;  %v3870_v34 = vrot.slane %v3868_v16, 7  ;;  %v3561_v4 = vmul.f32 %v3456_v50, %v3351_v10 }
 0x36a   : > { %v2870_v17 = vpop.f32.mrb[56].mxu0 }
 0x36b   : > { %v3562_v39 = vmul.f32 %v3457_v44, %v3352_v38  ;;  %v3136_v24 = vadd.f32 %v2870_v17, %v11585_v5  ;;  %v9349_v41 = vpop.f32.mrb[57].mxu0  ;;  %v3873_v8 = vor.u32 %v3871_v13, %v3870_v34 }
 0x36c   : > { %v2873_v62 = vpop.f32.mrb[58].mxu0 }
 0x36d   : > { %v12424_v0 = vpack.c.bf16 %v3562_v39, %v3561_v4  ;;  %v3248_v27 = vadd.f32 %v12327_v61, %v3136_v24  ;;  %v3137_v37 = vadd.f32 %v2873_v62, %v11587_v12  ;;  %v9350_v20 = vpop.f32.mrb[59].mxu0  ;;  %v3874_v63 = vsel %vm3678_vm5, %v3862_v42, %v3873_v8  ;;  %v3459_v42 = vld [vmem:[%s11915_s21 + $0x1a8] sm:$0xff]  ;;  %v3460_v62 = vld [vmem:[%s11915_s21 + $0x1b0] sm:$0xff]  ;;  %v3461_v8 = vld [vmem:[%s11915_s21 + $0x1b8] sm:$0xff] }
 0x36e   : > { %9552 = vmatmul.mubr.msk.bf16.gmra.mrb[52].mxu1 %vm4103_vm6, %v3874_v63  ;;  %v5315_v24 = vsel %vm5310_vm7, %v5312_v43, %v5314_v58  ;;  %v5316_v43 = vrot.slane %v12017_v45, 7 }
 0x36f   : > { %15098 = vst [vmem:[#allocation18_spill] sm:$0xff] %v12424_v0  ;;  %v3876_v5 = vshrl.u32 %v12424_v0, 16  ;;  %9876 = vmatmul.mubr.msk.bf16.vlgmr.msra.gmra.mrb[164].mxu0 %vm4103_vm6, %v5313_v47  ;;  %v3353_v2 = vmax.f32 %v3248_v27, 0.0  ;;  %v3249_v33 = vadd.f32 %v12327_v61, %v3137_v37  ;;  %9555 = vmatprep.mubr.msk.bf16.mxu1 %vm10205_vm1, %v14920_v56  ;;  %v3879_v46 = vshll.u32 %v12424_v0, 16 }
 0x370   : > { %9879 = vmatprep.mubr.msk.bf16.mxu0 %vm10205_vm1, %v14920_v56 }
 0x371   : > { %v3878_v12 = vrot.slane %v3876_v5, 7  ;;  %v3354_v31 = vmax.f32 %v3249_v33, 0.0  ;;  %v3563_v16 = vmul.f32 %v3458_v29, %v3353_v2 }
 0x372   : > { %v2878_v35 = vpop.f32.mrb[60].mxu0 }
 0x373   : > { %v3138_v60 = vadd.f32 %v2878_v35, %v11598_v57  ;;  %v9353_v10 = vpop.f32.mrb[61].mxu0  ;;  %v3881_v30 = vor.u32 %v3879_v46, %v3878_v12  ;;  %v3564_v50 = vmul.f32 %v3459_v42, %v3354_v31 }
 0x374   : > { %v2881_v44 = vpop.f32.mrb[62].mxu0 }
 0x375   : > { %v3250_v38 = vadd.f32 %v12327_v61, %v3138_v60  ;;  %v3139_v13 = vadd.f32 %v2881_v44, %v11600_v6  ;;  %v9354_v17 = vpop.f32.mrb[63].mxu0  ;;  %v3882_v4 = vsel %vm3678_vm5, %v3870_v34, %v3881_v30  ;;  %v12446_v39 = vpack.c.bf16 %v3564_v50, %v3563_v16  ;;  %v3462_v16 = vld [vmem:[%s11915_s21 + $0x1c0] sm:$0xff] }
 0x376   : > { %9556 = vmatmul.mubr.msk.bf16.gmra.mrb[56].mxu1 %vm4103_vm6, %v3882_v4  ;;  %v5317_v60 = vsel %vm5310_vm7, %v5314_v58, %v5316_v43  ;;  %v3463_v58 = vld [vmem:[%s11915_s21 + $0x1c8] sm:$0xff]  ;;  %v5318_v50 = vrot.slane %v12039_v26, 7 }
 0x377   : > { %15099 = vst [vmem:[#allocation62_spill] sm:$0xff] %v12446_v39  ;;  %v3355_v41 = vmax.f32 %v3250_v38, 0.0  ;;  %v3251_v57 = vadd.f32 %v12327_v61, %v3139_v13  ;;  %9880 = vmatmul.mubr.msk.bf16.gmra.mrb[168].mxu0 %vm4103_vm6, %v5315_v24  ;;  %v3884_v53 = vshrl.u32 %v12446_v39, 16  ;;  %9559 = vmatprep.mubr.msk.bf16.mxu1 %vm10205_vm1, %v14920_v56  ;;  %v3887_v27 = vshll.u32 %v12446_v39, 16 }
 0x378   : > { %9883 = vmatprep.mubr.msk.bf16.mxu0 %vm10205_vm1, %v14920_v56 }
 0x379   : > { %v3356_v6 = vmax.f32 %v3251_v57, 0.0  ;;  %v3886_v34 = vrot.slane %v3884_v53, 7  ;;  %v3565_v20 = vmul.f32 %v3460_v62, %v3355_v41  ;;  %v15101_v62 = vld [vmem:[#allocation68_spill] sm:$0xff] }
 0x37a   : > { %v2886_v37 = vpop.f32.mrb[64].mxu0 }
 0x37b   : > { %v3566_v47 = vmul.f32 %v3461_v8, %v3356_v6  ;;  %v3140_v63 = vadd.f32 %v2886_v37, %v11611_v11  ;;  %v9357_v5 = vpop.f32.mrb[65].mxu0  ;;  %v3889_v33 = vor.u32 %v3887_v27, %v3886_v34 }
 0x37c   : > { %v2889_v2 = vpop.f32.mrb[66].mxu0  ;;  %v3464_v5 = vld [vmem:[%s11915_s21 + $0x1d0] sm:$0xff] }
 0x37d   : > { %v12462_v46 = vpack.c.bf16 %v3566_v47, %v3565_v20  ;;  %v3252_v29 = vadd.f32 %v12327_v61, %v3140_v63  ;;  %v3141_v42 = vadd.f32 %v2889_v2, %v11613_v52  ;;  %v9358_v31 = vpop.f32.mrb[67].mxu0  ;;  %v3890_v35 = vsel %vm3678_vm5, %v3878_v12, %v3889_v33  ;;  %v3465_v2 = vld [vmem:[%s11915_s21 + $0x1d8] sm:$0xff] }
 0x37e   : > { %9560 = vmatmul.mubr.msk.bf16.gmra.mrb[60].mxu1 %vm4103_vm6, %v3890_v35  ;;  %v5319_v20 = vsel %vm5310_vm7, %v5316_v43, %v5318_v50  ;;  %v5320_v43 = vrot.slane %v12061_v1, 7 }
 0x37f   : > { %15100 = vst [vmem:[#allocation19_spill] sm:$0xff] %v12462_v46  ;;  %v3892_v10 = vshrl.u32 %v12462_v46, 16  ;;  %9884 = vmatmul.mubr.msk.bf16.gmra.mrb[172].mxu0 %vm4103_vm6, %v5317_v60  ;;  %v3357_v11 = vmax.f32 %v3252_v29, 0.0  ;;  %v3253_v30 = vadd.f32 %v12327_v61, %v3141_v42  ;;  %9563 = vmatprep.mubr.msk.bf16.mxu1 %vm10205_vm1, %v14920_v56  ;;  %v3895_v12 = vshll.u32 %v12462_v46, 16 }
 0x380   : > { %9887 = vmatprep.mubr.msk.bf16.mxu0 %vm10205_vm1, %v14920_v56 }
 0x381   : > { %v3894_v52 = vrot.slane %v3892_v10, 7  ;;  %v3358_v44 = vmax.f32 %v3253_v30, 0.0  ;;  %v3567_v24 = vmul.f32 %v3462_v16, %v3357_v11  ;;  %v15104_v11 = vld [vmem:[#allocation69_spill] sm:$0xff] }
 0x382   : > { %v2894_v38 = vpop.f32.mrb[68].mxu0 }
 0x383   : > { %v3142_v13 = vadd.f32 %v2894_v38, %v11624_v49  ;;  %v9361_v17 = vpop.f32.mrb[69].mxu0  ;;  %v3897_v4 = vor.u32 %v3895_v12, %v3894_v52  ;;  %v3568_v41 = vmul.f32 %v3463_v58, %v3358_v44 }
 0x384   : > { %v2897_v57 = vpop.f32.mrb[70].mxu0 }
 0x385   : > { %v3254_v53 = vadd.f32 %v12327_v61, %v3142_v13  ;;  %v3143_v8 = vadd.f32 %v2897_v57, %v15101_v62  ;;  %v9362_v6 = vpop.f32.mrb[71].mxu0  ;;  %v3898_v27 = vsel %vm3678_vm5, %v3886_v34, %v3897_v4  ;;  %v12484_v37 = vpack.c.bf16 %v3568_v41, %v3567_v24  ;;  %v15106_v4 = vld [vmem:[#allocation70_spill] sm:$0xff] }
 0x386   : > { %9564 = vmatmul.mubr.msk.bf16.gmra.mrb[64].mxu1 %vm4103_vm6, %v3898_v27 }
 0x387   : > { %15102 = vst [vmem:[#allocation21_spill] sm:$0xff] %v12484_v37  ;;  %v3359_v47 = vmax.f32 %v3254_v53, 0.0  ;;  %v3255_v49 = vadd.f32 %v12327_v61, %v3143_v8  ;;  %9888 = vmatmul.mubr.msk.bf16.gmra.mrb[176].mxu0 %vm4103_vm6, %v5319_v20  ;;  %v3900_v63 = vshrl.u32 %v12484_v37, 16  ;;  %9567 = vmatprep.mubr.msk.bf16.mxu1 %vm10205_vm1, %v14920_v56  ;;  %v3903_v42 = vshll.u32 %v12484_v37, 16  ;;  %v3466_v20 = vld [vmem:[%s11915_s21 + $0x1e0] sm:$0xff] }
 0x388   : > { %9891 = vmatprep.mubr.msk.bf16.mxu0 %vm10205_vm1, %v14920_v56  ;;  %v5321_v53 = vsel %vm5310_vm7, %v5318_v50, %v5320_v43  ;;  %v3467_v50 = vld [vmem:[%s11915_s21 + $0x1e8] sm:$0xff] }
 0x389   : > { %v3360_v34 = vmax.f32 %v3255_v49, 0.0  ;;  %v12497_v33 = vpop.f32.mrb[216].mxu1  ;;  %v3902_v29 = vrot.slane %v3900_v63, 7  ;;  %v3569_v60 = vmul.f32 %v3464_v5, %v3359_v47  ;;  %v5322_v49 = vrot.slane %v12084_v36, 7 }
 0x38a   : > { %15103 = vst [vmem:[#allocation65_spill] sm:$0xff] %v12497_v33  ;;  %v2902_v31 = vpop.f32.mrb[72].mxu0  ;;  %v9461_v35 = vpop.f32.mrb[217].mxu1 }
 0x38b   : > { %v3570_v10 = vmul.f32 %v3465_v2, %v3360_v34  ;;  %v3144_v30 = vadd.f32 %v2902_v31, %v15104_v11  ;;  %v9365_v12 = vpop.f32.mrb[73].mxu0  ;;  %v12502_v16 = vpop.f32.mrb[218].mxu1  ;;  %v3905_v38 = vor.u32 %v3903_v42, %v3902_v29  ;;  %v15108_v34 = vld [vmem:[#allocation71_spill] sm:$0xff] }
 0x38c   : > { %15105 = vst [vmem:[#allocation22_spill] sm:$0xff] %v12502_v16  ;;  %v2905_v58 = vpop.f32.mrb[74].mxu0  ;;  %v9462_v44 = vpop.f32.mrb[219].mxu1 }
 0x38d   : > { %v12504_v13 = vpack.c.bf16 %v3570_v10, %v3569_v60  ;;  %v3256_v17 = vadd.f32 %v12327_v61, %v3144_v30  ;;  %v3145_v24 = vadd.f32 %v2905_v58, %v15106_v4  ;;  %v9366_v41 = vpop.f32.mrb[75].mxu0  ;;  %v3906_v57 = vsel %vm3678_vm5, %v3894_v52, %v3905_v38  ;;  %v15110_v44 = vld [vmem:[#allocation72_spill] sm:$0xff] }
 0x38e   : > { %9568 = vmatmul.mubr.msk.bf16.gmra.mrb[68].mxu1 %vm4103_vm6, %v3906_v57  ;;  %v5323_v41 = vsel %vm5310_vm7, %v5320_v43, %v5322_v49  ;;  %v5324_v43 = vrot.slane %v12102_v19, 7 }
 0x38f   : > { %v3908_v62 = vshrl.u32 %v12504_v13, 16  ;;  %9892 = vmatmul.mubr.msk.bf16.gmra.mrb[180].mxu0 %vm4103_vm6, %v5321_v53  ;;  %v3361_v8 = vmax.f32 %v3256_v17, 0.0  ;;  %v3257_v6 = vadd.f32 %v12327_v61, %v3145_v24  ;;  %9571 = vmatprep.mubr.msk.bf16.mxu1 %vm10205_vm1, %v14920_v56  ;;  %v3911_v52 = vshll.u32 %v12504_v13, 16 }
 0x390   : > { %9895 = vmatprep.mubr.msk.bf16.mxu0 %vm10205_vm1, %v14920_v56 }
 0x391   : > { %v3910_v27 = vrot.slane %v3908_v62, 7  ;;  %v12521_v47 = vpop.f32.mrb[220].mxu1  ;;  %v3362_v63 = vmax.f32 %v3257_v6, 0.0  ;;  %v3571_v10 = vmul.f32 %v3466_v20, %v3361_v8  ;;  %v3468_v8 = vld [vmem:[%s11915_s21 + $0x1f0] sm:$0xff]  ;;  %v3469_v6 = vld [vmem:[%s11915_s21 + $0x1f8] sm:$0xff] }
 0x392   : > { %15107 = vst [vmem:[#allocation24_spill] sm:$0xff] %v12521_v47  ;;  %v2910_v5 = vpop.f32.mrb[76].mxu0  ;;  %v9465_v2 = vpop.f32.mrb[221].mxu1 }
 0x393   : > { %v3146_v42 = vadd.f32 %v2910_v5, %v15108_v34  ;;  %v9369_v31 = vpop.f32.mrb[77].mxu0  ;;  %v12525_v35 = vpop.f32.mrb[222].mxu1  ;;  %v3913_v60 = vor.u32 %v3911_v52, %v3910_v27  ;;  %v3572_v11 = vmul.f32 %v3467_v50, %v3362_v63 }
 0x394   : > { %15109 = vst [vmem:[#allocation25_spill] sm:$0xff] %v12525_v35  ;;  %v2913_v30 = vpop.f32.mrb[78].mxu0  ;;  %v9466_v12 = vpop.f32.mrb[223].mxu1 }
 0x395   : > { %v3258_v58 = vadd.f32 %v12327_v61, %v3146_v42  ;;  %v3147_v38 = vadd.f32 %v2913_v30, %v15110_v44  ;;  %v9370_v17 = vpop.f32.mrb[79].mxu0  ;;  %v3914_v4 = vsel %vm3678_vm5, %v3902_v29, %v3913_v60  ;;  %v12530_v24 = vpack.c.bf16 %v3572_v11, %v3571_v10  ;;  %v15112_v42 = vld [vmem:[#allocation73_spill] sm:$0xff] }
 0x396   : > { %9572 = vmatmul.mubr.msk.bf16.gmra.mrb[72].mxu1 %vm4103_vm6, %v3914_v4 }
 0x397   : > { %v3363_v57 = vmax.f32 %v3258_v58, 0.0  ;;  %v3259_v53 = vadd.f32 %v12327_v61, %v3147_v38  ;;  %9896 = vmatmul.mubr.msk.bf16.gmra.mrb[184].mxu0 %vm4103_vm6, %v5323_v41  ;;  %v3916_v62 = vshrl.u32 %v12530_v24, 16  ;;  %9575 = vmatprep.mubr.msk.bf16.mxu1 %vm10205_vm1, %v14920_v56  ;;  %v3919_v50 = vshll.u32 %v12530_v24, 16  ;;  %v15114_v38 = vld [vmem:[#allocation74_spill] sm:$0xff] }
 0x398   : > { %9899 = vmatprep.mubr.msk.bf16.mxu0 %vm10205_vm1, %v14920_v56 }
 0x399   : > { %v3364_v29 = vmax.f32 %v3259_v53, 0.0  ;;  %v12543_v52 = vpop.f32.mrb[224].mxu1  ;;  %v3918_v20 = vrot.slane %v3916_v62, 7  ;;  %v3573_v2 = vmul.f32 %v3468_v8, %v3363_v57  ;;  %v5325_v57 = vsel %vm5310_vm7, %v5322_v49, %v5324_v43  ;;  %v3471_v49 = vld [vmem:[%s11915_s21 + $0x208] sm:$0xff] }
 0x39a   : > { %15111 = vst [vmem:[#allocation27_spill] sm:$0xff] %v12543_v52  ;;  %v2918_v63 = vpop.f32.mrb[80].mxu0  ;;  %v9469_v5 = vpop.f32.mrb[225].mxu1 }
 0x39b   : > { %v3574_v34 = vmul.f32 %v3469_v6, %v3364_v29  ;;  %v3148_v31 = vadd.f32 %v2918_v63, %v15112_v42  ;;  %v9373_v60 = vpop.f32.mrb[81].mxu0  ;;  %v12548_v10 = vpop.f32.mrb[226].mxu1  ;;  %v3921_v12 = vor.u32 %v3919_v50, %v3918_v20  ;;  %v3470_v29 = vld [vmem:[%s11915_s21 + $0x200] sm:$0xff]  ;;  %v5326_v63 = vrot.slane %v12123_v40, 7  ;;  %v15116_v42 = vld [vmem:[#allocation75_spill] sm:$0xff] }
 0x39c   : > { %15113 = vst [vmem:[#allocation6_spill] sm:$0xff] %v12548_v10  ;;  %v2921_v11 = vpop.f32.mrb[82].mxu0  ;;  %v9470_v30 = vpop.f32.mrb[227].mxu1 }
 0x39d   : > { %v12550_v58 = vpack.c.bf16 %v3574_v34, %v3573_v2  ;;  %v3260_v44 = vadd.f32 %v12327_v61, %v3148_v31  ;;  %v3149_v17 = vadd.f32 %v2921_v11, %v15114_v38  ;;  %v9374_v4 = vpop.f32.mrb[83].mxu0  ;;  %v3922_v41 = vsel %vm3678_vm5, %v3910_v27, %v3921_v12 }
 0x39e   : > { %9576 = vmatmul.mubr.msk.bf16.gmra.mrb[76].mxu1 %vm4103_vm6, %v3922_v41  ;;  %v15118_v41 = vld [vmem:[#allocation76_spill] sm:$0xff] }
 0x39f   : > { %v3924_v53 = vshrl.u32 %v12550_v58, 16  ;;  %9900 = vmatmul.mubr.msk.bf16.gmra.mrb[188].mxu0 %vm4103_vm6, %v5325_v57  ;;  %v3365_v62 = vmax.f32 %v3260_v44, 0.0  ;;  %v3261_v8 = vadd.f32 %v12327_v61, %v3149_v17  ;;  %9579 = vmatprep.mubr.msk.bf16.mxu1 %vm10205_vm1, %v14920_v56  ;;  %v3927_v27 = vshll.u32 %v12550_v58, 16 }
 0x3a0   : > { %9903 = vmatprep.mubr.msk.bf16.mxu0 %vm10205_vm1, %v14920_v56 }
 0x3a1   : > { %v3926_v6 = vrot.slane %v3924_v53, 7  ;;  %v12567_v50 = vpop.f32.mrb[228].mxu1  ;;  %v3366_v5 = vmax.f32 %v3261_v8, 0.0  ;;  %v3575_v12 = vmul.f32 %v3470_v29, %v3365_v62  ;;  %v3472_v29 = vld [vmem:[%s11915_s21 + $0x210] sm:$0xff] }
 0x3a2   : > { %15115 = vst [vmem:[#allocation28_spill] sm:$0xff] %v12567_v50  ;;  %v2926_v2 = vpop.f32.mrb[84].mxu0  ;;  %v9473_v34 = vpop.f32.mrb[229].mxu1 }
 0x3a3   : > { %v3150_v31 = vadd.f32 %v2926_v2, %v15116_v42  ;;  %v9377_v60 = vpop.f32.mrb[85].mxu0  ;;  %v12571_v11 = vpop.f32.mrb[230].mxu1  ;;  %v3929_v30 = vor.u32 %v3927_v27, %v3926_v6  ;;  %v3576_v44 = vmul.f32 %v3471_v49, %v3366_v5  ;;  %v5327_v2 = vsel %vm5310_vm7, %v5324_v43, %v5326_v63  ;;  %v3473_v49 = vld [vmem:[%s11915_s21 + $0x218] sm:$0xff] }
 0x3a4   : > { %15117 = vst [vmem:[#allocation30_spill] sm:$0xff] %v12571_v11  ;;  %v2929_v38 = vpop.f32.mrb[86].mxu0  ;;  %v9474_v17 = vpop.f32.mrb[231].mxu1  ;;  %v5328_v43 = vrot.slane %v12141_v51, 7 }
 0x3a5   : > { %v3262_v4 = vadd.f32 %v12327_v61, %v3150_v31  ;;  %v3151_v57 = vadd.f32 %v2929_v38, %v15118_v41  ;;  %v9378_v53 = vpop.f32.mrb[87].mxu0  ;;  %v3930_v8 = vsel %vm3678_vm5, %v3918_v20, %v3929_v30  ;;  %v12576_v34 = vpack.c.bf16 %v3576_v44, %v3575_v12  ;;  %v15120_v17 = vld [vmem:[#allocation77_spill] sm:$0xff] }
 0x3a6   : > { %9580 = vmatmul.mubr.msk.bf16.gmra.mrb[80].mxu1 %vm4103_vm6, %v3930_v8 }
 0x3a7   : > { %v3367_v42 = vmax.f32 %v3262_v4, 0.0  ;;  %v3263_v27 = vadd.f32 %v12327_v61, %v3151_v57  ;;  %9904 = vmatmul.mubr.msk.bf16.gmra.mrb[192].mxu0 %vm4103_vm6, %v5327_v2  ;;  %v3932_v62 = vshrl.u32 %v12576_v34, 16  ;;  %9583 = vmatprep.mubr.msk.bf16.mxu1 %vm10205_vm1, %v14920_v56  ;;  %v3935_v60 = vshll.u32 %v12576_v34, 16 }
 0x3a8   : > { %9907 = vmatprep.mubr.msk.bf16.mxu0 %vm10205_vm1, %v14920_v56 }
 0x3a9   : > { %v3368_v20 = vmax.f32 %v3263_v27, 0.0  ;;  %v12589_v5 = vpop.f32.mrb[232].mxu1  ;;  %v3934_v31 = vrot.slane %v3932_v62, 7  ;;  %v3577_v44 = vmul.f32 %v3472_v29, %v3367_v42  ;;  %v5329_v29 = vsel %vm5310_vm7, %v5326_v63, %v5328_v43  ;;  %v3475_v63 = vld [vmem:[%s11915_s21 + $0x228] sm:$0xff] }
 0x3aa   : > { %15119 = vst [vmem:[#allocation31_spill] sm:$0xff] %v12589_v5  ;;  %v2934_v30 = vpop.f32.mrb[88].mxu0  ;;  %v9477_v12 = vpop.f32.mrb[233].mxu1  ;;  %v15122_v5 = vld [vmem:[#allocation78_spill] sm:$0xff] }
 0x3ab   : > { %v3578_v38 = vmul.f32 %v3473_v49, %v3368_v20  ;;  %v3152_v4 = vadd.f32 %v2934_v30, %v15120_v17  ;;  %v9381_v41 = vpop.f32.mrb[89].mxu0  ;;  %v12594_v57 = vpop.f32.mrb[234].mxu1  ;;  %v3937_v2 = vor.u32 %v3935_v60, %v3934_v31  ;;  %v5330_v12 = vrot.slane %v12159_v32, 7 }
 0x3ac   : > { %15121 = vst [vmem:[#allocation33_spill] sm:$0xff] %v12594_v57  ;;  %v2937_v53 = vpop.f32.mrb[90].mxu0  ;;  %v9478_v8 = vpop.f32.mrb[235].mxu1 }
 0x3ad   : > { %v12596_v27 = vpack.c.bf16 %v3578_v38, %v3577_v44  ;;  %v3264_v62 = vadd.f32 %v12327_v61, %v3152_v4  ;;  %v3153_v11 = vadd.f32 %v2937_v53, %v15122_v5  ;;  %v9382_v50 = vpop.f32.mrb[91].mxu0  ;;  %v3938_v42 = vsel %vm3678_vm5, %v3926_v6, %v3937_v2  ;;  %v3474_v5 = vld [vmem:[%s11915_s21 + $0x220] sm:$0xff]  ;;  %v15124_v4 = vld [vmem:[#allocation79_spill] sm:$0xff] }
 0x3ae   : > { %9584 = vmatmul.mubr.msk.bf16.gmra.mrb[84].mxu1 %vm4103_vm6, %v3938_v42 }
 0x3af   : > { %v3940_v49 = vshrl.u32 %v12596_v27, 16  ;;  %9908 = vmatmul.mubr.msk.bf16.gmra.mrb[196].mxu0 %vm4103_vm6, %v5329_v29  ;;  %v3369_v20 = vmax.f32 %v3264_v62, 0.0  ;;  %v3265_v60 = vadd.f32 %v12327_v61, %v3153_v11  ;;  %9587 = vmatprep.mubr.msk.bf16.mxu1 %vm10205_vm1, %v14920_v56  ;;  %v3943_v6 = vshll.u32 %v12596_v27, 16 }
 0x3b0   : > { %9911 = vmatprep.mubr.msk.bf16.mxu0 %vm10205_vm1, %v14920_v56 }
 0x3b1   : > { %v3942_v50 = vrot.slane %v3940_v49, 7  ;;  %v12613_v30 = vpop.f32.mrb[236].mxu1  ;;  %v3370_v44 = vmax.f32 %v3265_v60, 0.0  ;;  %v3579_v2 = vmul.f32 %v3474_v5, %v3369_v20  ;;  %v3476_v5 = vld [vmem:[%s11915_s21 + $0x230] sm:$0xff] }
 0x3b2   : > { %15123 = vst [vmem:[#allocation34_spill] sm:$0xff] %v12613_v30  ;;  %v2942_v38 = vpop.f32.mrb[92].mxu0  ;;  %v9481_v17 = vpop.f32.mrb[237].mxu1  ;;  %v15126_v30 = vld [vmem:[#allocation80_spill] sm:$0xff] }
 0x3b3   : > { %v3154_v11 = vadd.f32 %v2942_v38, %v15124_v4  ;;  %v9385_v41 = vpop.f32.mrb[93].mxu0  ;;  %v12617_v53 = vpop.f32.mrb[238].mxu1  ;;  %v3945_v8 = vor.u32 %v3943_v6, %v3942_v50  ;;  %v3580_v62 = vmul.f32 %v3475_v63, %v3370_v44  ;;  %v5331_v38 = vsel %vm5310_vm7, %v5328_v43, %v5330_v12  ;;  %v3477_v63 = vld [vmem:[%s11915_s21 + $0x238] sm:$0xff] }
 0x3b4   : > { %15125 = vst [vmem:[#allocation36_spill] sm:$0xff] %v12617_v53  ;;  %v2945_v42 = vpop.f32.mrb[94].mxu0  ;;  %v9482_v29 = vpop.f32.mrb[239].mxu1  ;;  %v5332_v43 = vrot.slane %v12180_v3, 7 }
 0x3b5   : > { %v3266_v49 = vadd.f32 %v12327_v61, %v3154_v11  ;;  %v3155_v57 = vadd.f32 %v2945_v42, %v15126_v30  ;;  %v9386_v10 = vpop.f32.mrb[95].mxu0  ;;  %v3946_v60 = vsel %vm3678_vm5, %v3934_v31, %v3945_v8  ;;  %v12622_v17 = vpack.c.bf16 %v3580_v62, %v3579_v2  ;;  %v15128_v2 = vld [vmem:[#allocation81_spill] sm:$0xff] }
 0x3b6   : > { %9588 = vmatmul.mubr.msk.bf16.gmra.mrb[88].mxu1 %vm4103_vm6, %v3946_v60 }
 0x3b7   : > { %v3371_v4 = vmax.f32 %v3266_v49, 0.0  ;;  %v3267_v6 = vadd.f32 %v12327_v61, %v3155_v57  ;;  %9912 = vmatmul.mubr.msk.bf16.gmra.mrb[200].mxu0 %vm4103_vm6, %v5331_v38  ;;  %v3948_v20 = vshrl.u32 %v12622_v17, 16  ;;  %9591 = vmatprep.mubr.msk.bf16.mxu1 %vm10205_vm1, %v14920_v56  ;;  %v3951_v30 = vshll.u32 %v12622_v17, 16 }
 0x3b8   : > { %9915 = vmatprep.mubr.msk.bf16.mxu0 %vm10205_vm1, %v14920_v56 }
 0x3b9   : > { %v3372_v10 = vmax.f32 %v3267_v6, 0.0  ;;  %v12635_v31 = vpop.f32.mrb[240].mxu1  ;;  %v3950_v57 = vrot.slane %v3948_v20, 7  ;;  %v3581_v41 = vmul.f32 %v3476_v5, %v3371_v4  ;;  %v5333_v5 = vsel %vm5310_vm7, %v5330_v12, %v5332_v43  ;;  %v3479_v12 = vld [vmem:[%s11915_s21 + $0x248] sm:$0xff] }
 0x3ba   : > { %15127 = vst [vmem:[#allocation37_spill] sm:$0xff] %v12635_v31  ;;  %v2950_v44 = vpop.f32.mrb[96].mxu0  ;;  %v9485_v11 = vpop.f32.mrb[241].mxu1  ;;  %v15130_v31 = vld [vmem:[#allocation82_spill] sm:$0xff] }
 0x3bb   : > { %v3582_v8 = vmul.f32 %v3477_v63, %v3372_v10  ;;  %v3156_v62 = vadd.f32 %v2950_v44, %v15128_v2  ;;  %v9389_v42 = vpop.f32.mrb[97].mxu0  ;;  %v12640_v29 = vpop.f32.mrb[242].mxu1  ;;  %v3953_v38 = vor.u32 %v3951_v30, %v3950_v57  ;;  %v15132_v11 = vld [vmem:[#allocation7_spill] sm:$0xff] }
 0x3bc   : > { %15129 = vst [vmem:[#allocation39_spill] sm:$0xff] %v12640_v29  ;;  %v2953_v49 = vpop.f32.mrb[98].mxu0  ;;  %v9486_v60 = vpop.f32.mrb[243].mxu1  ;;  %v15133_v42 = vld [vmem:[#allocation83_spill] sm:$0xff] }
 0x3bd   : > { %v12642_v6 = vpack.c.bf16 %v3582_v8, %v3581_v41  ;;  %v3268_v20 = vadd.f32 %v12327_v61, %v3156_v62  ;;  %v3157_v53 = vadd.f32 %v2953_v49, %v15130_v31  ;;  %v9390_v52 = vpop.f32.mrb[99].mxu0  ;;  %v3954_v4 = vsel %vm3678_vm5, %v3942_v50, %v3953_v38  ;;  %v3478_v31 = vld [vmem:[%s11915_s21 + $0x240] sm:$0xff] }
 0x3be   : > { %9592 = vmatmul.mubr.msk.bf16.gmra.mrb[92].mxu1 %vm4103_vm6, %v3954_v4  ;;  %v5334_v41 = vrot.slane %v15132_v11, 7 }
 0x3bf   : > { %v3956_v63 = vshrl.u32 %v12642_v6, 16  ;;  %9916 = vmatmul.mubr.msk.bf16.gmra.mrb[204].mxu0 %vm4103_vm6, %v5333_v5  ;;  %v3373_v10 = vmax.f32 %v3268_v20, 0.0  ;;  %v3269_v30 = vadd.f32 %v12327_v61, %v3157_v53  ;;  %9595 = vmatprep.mubr.msk.bf16.mxu1 %vm10205_vm1, %v14920_v56  ;;  %v3959_v50 = vshll.u32 %v12642_v6, 16 }
 0x3c0   : > { %9919 = vmatprep.mubr.msk.bf16.mxu0 %vm10205_vm1, %v14920_v56 }
 0x3c1   : > { %v3958_v52 = vrot.slane %v3956_v63, 7  ;;  %v12659_v44 = vpop.f32.mrb[244].mxu1  ;;  %v3374_v8 = vmax.f32 %v3269_v30, 0.0  ;;  %v3583_v20 = vmul.f32 %v3478_v31, %v3373_v10  ;;  %v3480_v31 = vld [vmem:[%s11915_s21 + $0x250] sm:$0xff] }
 0x3c2   : > { %15131 = vst [vmem:[#allocation40_spill] sm:$0xff] %v12659_v44  ;;  %v2958_v2 = vpop.f32.mrb[100].mxu0  ;;  %v9489_v62 = vpop.f32.mrb[245].mxu1  ;;  %v15135_v44 = vld [vmem:[#allocation84_spill] sm:$0xff] }
 0x3c3   : > { %v3158_v53 = vadd.f32 %v2958_v2, %v15133_v42  ;;  %v9393_v49 = vpop.f32.mrb[101].mxu0  ;;  %v12663_v60 = vpop.f32.mrb[246].mxu1  ;;  %v3961_v38 = vor.u32 %v3959_v50, %v3958_v52  ;;  %v3584_v4 = vmul.f32 %v3479_v12, %v3374_v8  ;;  %v5335_v2 = vsel %vm5310_vm7, %v5332_v43, %v5334_v41  ;;  %v3481_v12 = vld [vmem:[%s11915_s21 + $0x258] sm:$0xff] }
 0x3c4   : > { %15134 = vst [vmem:[#allocation42_spill] sm:$0xff] %v12663_v60  ;;  %v2961_v5 = vpop.f32.mrb[102].mxu0  ;;  %v9490_v63 = vpop.f32.mrb[247].mxu1  ;;  %v5336_v43 = vrot.slane %v12219_v22, 7 }
 0x3c5   : > { %v3270_v29 = vadd.f32 %v12327_v61, %v3158_v53  ;;  %v3159_v35 = vadd.f32 %v2961_v5, %v15135_v44  ;;  %v9394_v47 = vpop.f32.mrb[103].mxu0  ;;  %v3962_v30 = vsel %vm3678_vm5, %v3950_v57, %v3961_v38  ;;  %v12668_v62 = vpack.c.bf16 %v3584_v4, %v3583_v20  ;;  %v15137_v38 = vld [vmem:[#allocation85_spill] sm:$0xff] }
 0x3c6   : > { %9596 = vmatmul.mubr.msk.bf16.gmra.mrb[96].mxu1 %vm4103_vm6, %v3962_v30 }
 0x3c7   : > { %v3375_v42 = vmax.f32 %v3270_v29, 0.0  ;;  %v3271_v50 = vadd.f32 %v12327_v61, %v3159_v35  ;;  %9920 = vmatmul.mubr.msk.bf16.gmra.mrb[208].mxu0 %vm4103_vm6, %v5335_v2  ;;  %v3964_v10 = vshrl.u32 %v12668_v62, 16  ;;  %9599 = vmatprep.mubr.msk.bf16.mxu1 %vm10205_vm1, %v14920_v56  ;;  %v3967_v29 = vshll.u32 %v12668_v62, 16 }
 0x3c8   : > { %9923 = vmatprep.mubr.msk.bf16.mxu0 %vm10205_vm1, %v14920_v56 }
 0x3c9   : > { %v3376_v47 = vmax.f32 %v3271_v50, 0.0  ;;  %v12681_v57 = vpop.f32.mrb[248].mxu1  ;;  %v3966_v35 = vrot.slane %v3964_v10, 7  ;;  %v3585_v53 = vmul.f32 %v3480_v31, %v3375_v42  ;;  %v5337_v31 = vsel %vm5310_vm7, %v5334_v41, %v5336_v43  ;;  %v3483_v41 = vld [vmem:[%s11915_s21 + $0x268] sm:$0xff] }
 0x3ca   : > { %15136 = vst [vmem:[#allocation43_spill] sm:$0xff] %v12681_v57  ;;  %v2966_v44 = vpop.f32.mrb[104].mxu0  ;;  %v9493_v8 = vpop.f32.mrb[249].mxu1  ;;  %v15139_v57 = vld [vmem:[#allocation86_spill] sm:$0xff] }
 0x3cb   : > { %v3586_v49 = vmul.f32 %v3481_v12, %v3376_v47  ;;  %v3160_v20 = vadd.f32 %v2966_v44, %v15137_v38  ;;  %v9397_v4 = vpop.f32.mrb[105].mxu0  ;;  %v12686_v5 = vpop.f32.mrb[250].mxu1  ;;  %v3969_v2 = vor.u32 %v3967_v29, %v3966_v35  ;;  %v5338_v8 = vrot.slane %v12234_v55, 7 }
 0x3cc   : > { %15138 = vst [vmem:[#allocation45_spill] sm:$0xff] %v12686_v5  ;;  %v2969_v63 = vpop.f32.mrb[106].mxu0  ;;  %v9494_v30 = vpop.f32.mrb[251].mxu1 }
 0x3cd   : > { %v12688_v50 = vpack.c.bf16 %v3586_v49, %v3585_v53  ;;  %v3272_v10 = vadd.f32 %v12327_v61, %v3160_v20  ;;  %v3161_v60 = vadd.f32 %v2969_v63, %v15139_v57  ;;  %v9398_v16 = vpop.f32.mrb[107].mxu0  ;;  %v3970_v42 = vsel %vm3678_vm5, %v3958_v52, %v3969_v2  ;;  %v3482_v57 = vld [vmem:[%s11915_s21 + $0x260] sm:$0xff]  ;;  %v15141_v20 = vld [vmem:[#allocation87_spill] sm:$0xff] }
 0x3ce   : > { %9600 = vmatmul.mubr.msk.bf16.gmra.mrb[100].mxu1 %vm4103_vm6, %v3970_v42 }
 0x3cf   : > { %v3972_v12 = vshrl.u32 %v12688_v50, 16  ;;  %9924 = vmatmul.mubr.msk.bf16.gmra.mrb[212].mxu0 %vm4103_vm6, %v5337_v31  ;;  %v3377_v47 = vmax.f32 %v3272_v10, 0.0  ;;  %v3273_v29 = vadd.f32 %v12327_v61, %v3161_v60  ;;  %9603 = vmatprep.mubr.msk.bf16.mxu1 %vm10205_vm1, %v14920_v56  ;;  %v3975_v52 = vshll.u32 %v12688_v50, 16 }
 0x3d0   : > { %9927 = vmatprep.mubr.msk.bf16.mxu0 %vm10205_vm1, %v14920_v56 }
 0x3d1   : > { %v3974_v16 = vrot.slane %v3972_v12, 7  ;;  %v12705_v44 = vpop.f32.mrb[252].mxu1  ;;  %v3378_v53 = vmax.f32 %v3273_v29, 0.0  ;;  %v3587_v2 = vmul.f32 %v3482_v57, %v3377_v47  ;;  %v12720_v47 = vld [vmem:[%s14852_s2] ss:$0 sm:$0xff] }
 0x3d2   : > { %15140 = vst [vmem:[#allocation46_spill] sm:$0xff] %v12705_v44  ;;  %v2974_v49 = vpop.f32.mrb[108].mxu0  ;;  %v9497_v38 = vpop.f32.mrb[253].mxu1  ;;  %v15143_v44 = vld [vmem:[#allocation14_spill] sm:$0xff] }
 0x3d3   : > { %v3162_v60 = vadd.f32 %v2974_v49, %v15141_v20  ;;  %v9401_v4 = vpop.f32.mrb[109].mxu0  ;;  %v12709_v63 = vpop.f32.mrb[254].mxu1  ;;  %v3977_v30 = vor.u32 %v3975_v52, %v3974_v16  ;;  %v3588_v10 = vmul.f32 %v3483_v41, %v3378_v53  ;;  %v5339_v49 = vsel %vm5310_vm7, %v5336_v43, %v5338_v8 }
 0x3d4   : > { %15142 = vst [vmem:[#allocation48_spill] sm:$0xff] %v12709_v63  ;;  %v2977_v42 = vpop.f32.mrb[110].mxu0  ;;  %v9498_v31 = vpop.f32.mrb[255].mxu1  ;;  %v5340_v41 = vrot.slane %v12255_v54, 7 }
 0x3d5   : > { %v3274_v12 = vadd.f32 %v12327_v61, %v3162_v60  ;;  %v3163_v5 = vadd.f32 %v2977_v42, %v15143_v44  ;;  %v9402_v33 = vpop.f32.mrb[111].mxu0  ;;  %v3978_v29 = vsel %vm3678_vm5, %v3966_v35, %v3977_v30  ;;  %v12714_v38 = vpack.c.bf16 %v3588_v10, %v3587_v2  ;;  %v3485_v35 = vld [vmem:[%s11915_s21 + $0x278] sm:$0xff] }
 0x3d6   : > { %9604 = vmatmul.mubr.msk.bf16.gmra.mrb[104].mxu1 %vm4103_vm6, %v3978_v29  ;;  %v3484_v33 = vld [vmem:[%s11915_s21 + $0x270] sm:$0xff] }
 0x3d7   : > { %v3379_v20 = vmax.f32 %v3274_v12, 0.0  ;;  %v3275_v52 = vadd.f32 %v12720_v47, %v3163_v5  ;;  %9928 = vmatmul.mubr.msk.bf16.gmra.mrb[216].mxu0 %vm4103_vm6, %v5339_v49  ;;  %v3980_v61 = vshrl.u32 %v12714_v38, 16  ;;  %9607 = vmatprep.mubr.msk.bf16.mxu1 %vm10205_vm1, %v14920_v56  ;;  %v3983_v44 = vshll.u32 %v12714_v38, 16  ;;  %v15145_v2 = vld [vmem:[#allocation88_spill] sm:$0xff] }
 0x3d8   : > { %9931 = vmatprep.mubr.msk.bf16.mxu0 %vm10205_vm1, %v14920_v56 }
 0x3d9   : > { %v3380_v43 = vmax.f32 %v3275_v52, 0.0  ;;  %v12732_v57 = vpop.f32.mrb[0].mxu1  ;;  %v3982_v5 = vrot.slane %v3980_v61, 7  ;;  %v3589_v4 = vmul.f32 %v3484_v33, %v3379_v20  ;;  %v5341_v33 = vsel %vm5310_vm7, %v5338_v8, %v5340_v41  ;;  %v3487_v8 = vld [vmem:[%s11915_s21 + $0x288] sm:$0xff] }
 0x3da   : > { %15144 = vst [vmem:[#allocation49_spill] sm:$0xff] %v12732_v57  ;;  %v2982_v53 = vpop.f32.mrb[112].mxu0  ;;  %v9501_v60 = vpop.f32.mrb[1].mxu1  ;;  %v15147_v57 = vld [vmem:[#allocation17_spill] sm:$0xff] }
 0x3db   : > { %v3590_v30 = vmul.f32 %v3485_v35, %v3380_v43  ;;  %v3164_v10 = vadd.f32 %v2982_v53, %v15145_v2  ;;  %v9405_v42 = vpop.f32.mrb[113].mxu0  ;;  %v12737_v31 = vpop.f32.mrb[2].mxu1  ;;  %v3985_v49 = vor.u32 %v3983_v44, %v3982_v5  ;;  %v5342_v53 = vrot.slane %v12270_v21, 7  ;;  %v15149_v2 = vld [vmem:[#allocation89_spill] sm:$0xff] }
 0x3dc   : > { %15146 = vst [vmem:[#allocation51_spill] sm:$0xff] %v12737_v31  ;;  %v2985_v12 = vpop.f32.mrb[114].mxu0  ;;  %v9502_v29 = vpop.f32.mrb[3].mxu1 }
 0x3dd   : > { %v12739_v52 = vpack.c.bf16 %v3590_v30, %v3589_v4  ;;  %v3276_v61 = vadd.f32 %v12720_v47, %v3164_v10  ;;  %v3165_v63 = vadd.f32 %v2985_v12, %v15147_v57  ;;  %v9406_v54 = vpop.f32.mrb[115].mxu0  ;;  %v3986_v20 = vsel %vm3678_vm5, %v3974_v16, %v3985_v49  ;;  %v3486_v57 = vld [vmem:[%s11915_s21 + $0x280] sm:$0xff] }
 0x3de   : > { %9608 = vmatmul.mubr.msk.bf16.gmra.mrb[108].mxu1 %vm4103_vm6, %v3986_v20 }
 0x3df   : > { %v3988_v35 = vshrl.u32 %v12739_v52, 16  ;;  %9932 = vmatmul.mubr.msk.bf16.gmra.mrb[220].mxu0 %vm4103_vm6, %v5341_v33  ;;  %v3381_v43 = vmax.f32 %v3276_v61, 0.0  ;;  %v3277_v44 = vadd.f32 %v12720_v47, %v3165_v63  ;;  %9611 = vmatprep.mubr.msk.bf16.mxu1 %vm10205_vm1, %v14920_v56  ;;  %v3991_v16 = vshll.u32 %v12739_v52, 16 }
 0x3e0   : > { %9935 = vmatprep.mubr.msk.bf16.mxu0 %vm10205_vm1, %v14920_v56 }
 0x3e1   : > { %v3990_v54 = vrot.slane %v3988_v35, 7  ;;  %v3382_v60 = vmax.f32 %v3277_v44, 0.0  ;;  %v12757_v4 = vpop.f32.mrb[4].mxu1  ;;  %v3591_v29 = vmul.f32 %v3486_v57, %v3381_v43  ;;  %v15151_v35 = vld [vmem:[#allocation20_spill] sm:$0xff] }
 0x3e2   : > { %15148 = vst [vmem:[#allocation52_spill] sm:$0xff] %v12757_v4  ;;  %v2990_v30 = vpop.f32.mrb[116].mxu0  ;;  %v9505_v63 = vpop.f32.mrb[5].mxu1 }
 0x3e3   : > { %v3166_v10 = vadd.f32 %v2990_v30, %v15149_v2  ;;  %v9409_v42 = vpop.f32.mrb[117].mxu0  ;;  %v3993_v12 = vor.u32 %v3991_v16, %v3990_v54  ;;  %v3592_v49 = vmul.f32 %v3487_v8, %v3382_v60  ;;  %v12760_v61 = vpop.f32.mrb[6].mxu1  ;;  %v5343_v30 = vsel %vm5310_vm7, %v5340_v41, %v5342_v53  ;;  %v3488_v8 = vld [vmem:[%s11915_s21 + $0x290] sm:$0xff]  ;;  %v3489_v60 = vld [vmem:[%s11915_s21 + $0x298] sm:$0xff] }
 0x3e4   : > { %15150 = vst [vmem:[#allocation54_spill] sm:$0xff] %v12760_v61  ;;  %v2993_v20 = vpop.f32.mrb[118].mxu0  ;;  %v9506_v44 = vpop.f32.mrb[7].mxu1  ;;  %v5344_v41 = vrot.slane %v12291_v18, 7  ;;  %v15154_v42 = vld [vmem:[#allocation90_spill] sm:$0xff] }
 0x3e5   : > { %v3278_v33 = vadd.f32 %v12720_v47, %v3166_v10  ;;  %v3167_v31 = vadd.f32 %v2993_v20, %v15151_v35  ;;  %v9410_v21 = vpop.f32.mrb[119].mxu0  ;;  %v3994_v4 = vsel %vm3678_vm5, %v3982_v5, %v3993_v12  ;;  %v12765_v55 = vpack.c.bf16 %v3592_v49, %v3591_v29 }
 0x3e6   : > { %9612 = vmatmul.mubr.msk.bf16.gmra.mrb[112].mxu1 %vm4103_vm6, %v3994_v4 }
 0x3e7   : > { %15152 = vst [vmem:[#allocation55_spill] sm:$0xff] %v12765_v55  ;;  %v3383_v16 = vmax.f32 %v3278_v33, 0.0  ;;  %v3279_v43 = vadd.f32 %v12720_v47, %v3167_v31  ;;  %9936 = vmatmul.mubr.msk.bf16.gmra.mrb[224].mxu0 %vm4103_vm6, %v5343_v30  ;;  %v3996_v57 = vshrl.u32 %v12765_v55, 16  ;;  %9615 = vmatprep.mubr.msk.bf16.mxu1 %vm10205_vm1, %v14920_v56  ;;  %v3999_v31 = vshll.u32 %v12765_v55, 16 }
 0x3e8   : > { %9939 = vmatprep.mubr.msk.bf16.mxu0 %vm10205_vm1, %v14920_v56 }
 0x3e9   : > { %v3384_v21 = vmax.f32 %v3279_v43, 0.0  ;;  %v3998_v5 = vrot.slane %v3996_v57, 7  ;;  %v12780_v2 = vpop.f32.mrb[8].mxu1  ;;  %v3593_v10 = vmul.f32 %v3488_v8, %v3383_v16  ;;  %v15157_v43 = vld [vmem:[#allocation23_spill] sm:$0xff]  ;;  %v5345_v8 = vsel %vm5310_vm7, %v5342_v53, %v5344_v41 }
 0x3ea   : > { %15153 = vst [vmem:[#allocation57_spill] sm:$0xff] %v12780_v2  ;;  %v2998_v4 = vpop.f32.mrb[120].mxu0  ;;  %v9509_v29 = vpop.f32.mrb[9].mxu1  ;;  %v3491_v53 = vld [vmem:[%s11915_s21 + $0x2a8] sm:$0xff] }
 0x3eb   : > { %v3594_v63 = vmul.f32 %v3489_v60, %v3384_v21  ;;  %v3168_v12 = vadd.f32 %v2998_v4, %v15154_v42  ;;  %v9413_v49 = vpop.f32.mrb[121].mxu0  ;;  %v4001_v20 = vor.u32 %v3999_v31, %v3998_v5  ;;  %v12783_v33 = vpop.f32.mrb[10].mxu1  ;;  %v5346_v4 = vrot.slane %v12306_v28, 7  ;;  %v15159_v29 = vld [vmem:[#allocation91_spill] sm:$0xff] }
 0x3ec   : > { %15155 = vst [vmem:[#allocation58_spill] sm:$0xff] %v12783_v33  ;;  %v3001_v35 = vpop.f32.mrb[122].mxu0  ;;  %v9510_v2 = vpop.f32.mrb[11].mxu1 }
 0x3ed   : > { %v12785_v44 = vpack.c.bf16 %v3594_v63, %v3593_v10  ;;  %v3280_v30 = vadd.f32 %v12720_v47, %v3168_v12  ;;  %v3169_v57 = vadd.f32 %v3001_v35, %v15157_v43  ;;  %v9414_v61 = vpop.f32.mrb[123].mxu0  ;;  %v4002_v16 = vsel %vm3678_vm5, %v3990_v54, %v4001_v20  ;;  %v3490_v2 = vld [vmem:[%s11915_s21 + $0x2a0] sm:$0xff] }
 0x3ee   : > { %9616 = vmatmul.mubr.msk.bf16.gmra.mrb[116].mxu1 %vm4103_vm6, %v4002_v16 }
 0x3ef   : > { %15156 = vst [vmem:[#allocation60_spill] sm:$0xff] %v12785_v44  ;;  %v4004_v60 = vshrl.u32 %v12785_v44, 16  ;;  %9940 = vmatmul.mubr.msk.bf16.gmra.mrb[228].mxu0 %vm4103_vm6, %v5345_v8  ;;  %v3385_v21 = vmax.f32 %v3280_v30, 0.0  ;;  %v3281_v31 = vadd.f32 %v12720_v47, %v3169_v57  ;;  %9619 = vmatprep.mubr.msk.bf16.mxu1 %vm10205_vm1, %v14920_v56  ;;  %v4007_v54 = vshll.u32 %v12785_v44, 16 }
 0x3f0   : > { %9943 = vmatprep.mubr.msk.bf16.mxu0 %vm10205_vm1, %v14920_v56 }
 0x3f1   : > { %v4006_v61 = vrot.slane %v4004_v60, 7  ;;  %v3386_v10 = vmax.f32 %v3281_v31, 0.0  ;;  %v12803_v63 = vpop.f32.mrb[12].mxu1  ;;  %v3595_v30 = vmul.f32 %v3490_v2, %v3385_v21  ;;  %v15161_v60 = vld [vmem:[#allocation26_spill] sm:$0xff] }
 0x3f2   : > { %15158 = vst [vmem:[#allocation61_spill] sm:$0xff] %v12803_v63  ;;  %v3006_v42 = vpop.f32.mrb[124].mxu0  ;;  %v9513_v20 = vpop.f32.mrb[13].mxu1 }
 0x3f3   : > { %v4009_v12 = vor.u32 %v4007_v54, %v4006_v61  ;;  %v3170_v49 = vadd.f32 %v3006_v42, %v15159_v29  ;;  %v9417_v35 = vpop.f32.mrb[125].mxu0  ;;  %v3596_v43 = vmul.f32 %v3491_v53, %v3386_v10  ;;  %v12806_v57 = vpop.f32.mrb[14].mxu1  ;;  %v5347_v42 = vsel %vm5310_vm7, %v5344_v41, %v5346_v4  ;;  %v3492_v53 = vld [vmem:[%s11915_s21 + $0x2b0] sm:$0xff]  ;;  %v3493_v10 = vld [vmem:[%s11915_s21 + $0x2b8] sm:$0xff] }
 0x3f4   : > { %15160 = vst [vmem:[#allocation63_spill] sm:$0xff] %v12806_v57  ;;  %v3009_v16 = vpop.f32.mrb[126].mxu0  ;;  %v9514_v31 = vpop.f32.mrb[15].mxu1  ;;  %v5348_v41 = vrot.slane %v12332_v48, 7  ;;  %v15164_v35 = vld [vmem:[#allocation92_spill] sm:$0xff] }
 0x3f5   : > { %v3282_v8 = vadd.f32 %v12720_v47, %v3170_v49  ;;  %v3171_v33 = vadd.f32 %v3009_v16, %v15161_v60  ;;  %v9418_v28 = vpop.f32.mrb[127].mxu0  ;;  %v4010_v63 = vsel %vm3678_vm5, %v3998_v5, %v4009_v12  ;;  %v12811_v54 = vpack.c.bf16 %v3596_v43, %v3595_v30 }
 0x3f6   : > { %9620 = vmatmul.mubr.msk.bf16.gmra.mrb[120].mxu1 %vm4103_vm6, %v4010_v63 }
 0x3f7   : > { %15162 = vst [vmem:[#allocation64_spill] sm:$0xff] %v12811_v54  ;;  %v3387_v29 = vmax.f32 %v3282_v8, 0.0  ;;  %v3283_v21 = vadd.f32 %v12720_v47, %v3171_v33  ;;  %9944 = vmatmul.mubr.msk.bf16.gmra.mrb[232].mxu0 %vm4103_vm6, %v5347_v42  ;;  %v4012_v2 = vshrl.u32 %v12811_v54, 16  ;;  %9623 = vmatprep.mubr.msk.bf16.mxu1 %vm10205_vm1, %v14920_v56  ;;  %v4015_v33 = vshll.u32 %v12811_v54, 16 }
 0x3f8   : > { %9947 = vmatprep.mubr.msk.bf16.mxu0 %vm10205_vm1, %v14920_v56 }
 0x3f9   : > { %v3388_v28 = vmax.f32 %v3283_v21, 0.0  ;;  %v4014_v5 = vrot.slane %v4012_v2, 7  ;;  %v12826_v12 = vpop.f32.mrb[16].mxu1  ;;  %v3597_v49 = vmul.f32 %v3492_v53, %v3387_v29  ;;  %v15167_v2 = vld [vmem:[#allocation29_spill] sm:$0xff]  ;;  %v5349_v53 = vsel %vm5310_vm7, %v5346_v4, %v5348_v41  ;;  %v3495_v4 = vld [vmem:[%s11915_s21 + $0x2c8] sm:$0xff] }
 0x3fa   : > { %15163 = vst [vmem:[#allocation66_spill] sm:$0xff] %v12826_v12  ;;  %v3014_v63 = vpop.f32.mrb[128].mxu0  ;;  %v9517_v43 = vpop.f32.mrb[17].mxu1 }
 0x3fb   : > { %v3598_v20 = vmul.f32 %v3493_v10, %v3388_v28  ;;  %v3172_v30 = vadd.f32 %v3014_v63, %v15164_v35  ;;  %v9421_v16 = vpop.f32.mrb[129].mxu0  ;;  %v4017_v8 = vor.u32 %v4015_v33, %v4014_v5  ;;  %v12829_v60 = vpop.f32.mrb[18].mxu1  ;;  %v5350_v63 = vrot.slane %v12347_v23, 7  ;;  %v15169_v43 = vld [vmem:[#allocation93_spill] sm:$0xff] }
 0x3fc   : > { %15165 = vst [vmem:[#allocation67_spill] sm:$0xff] %v12829_v60  ;;  %v3017_v31 = vpop.f32.mrb[130].mxu0  ;;  %v9518_v12 = vpop.f32.mrb[19].mxu1 }
 0x3fd   : > { %v12831_v42 = vpack.c.bf16 %v3598_v20, %v3597_v49  ;;  %v3284_v21 = vadd.f32 %v12720_v47, %v3172_v30  ;;  %v3173_v57 = vadd.f32 %v3017_v31, %v15167_v2  ;;  %v9422_v48 = vpop.f32.mrb[131].mxu0  ;;  %v4018_v29 = vsel %vm3678_vm5, %v4006_v61, %v4017_v8  ;;  %v3494_v12 = vld [vmem:[%s11915_s21 + $0x2c0] sm:$0xff] }
 0x3fe   : > { %9624 = vmatmul.mubr.msk.bf16.gmra.mrb[124].mxu1 %vm4103_vm6, %v4018_v29 }
 0x3ff   : > { %15166 = vst [vmem:[#allocation68_spill] sm:$0xff] %v12831_v42  ;;  %v4020_v10 = vshrl.u32 %v12831_v42, 16  ;;  %9948 = vmatmul.mubr.msk.bf16.gmra.mrb[236].mxu0 %vm4103_vm6, %v5349_v53  ;;  %v3389_v28 = vmax.f32 %v3284_v21, 0.0  ;;  %v3285_v33 = vadd.f32 %v12720_v47, %v3173_v57  ;;  %9627 = vmatprep.mubr.msk.bf16.mxu1 %vm10205_vm1, %v14920_v56  ;;  %v4023_v61 = vshll.u32 %v12831_v42, 16 }
 0x400   : > { %9951 = vmatprep.mubr.msk.bf16.mxu0 %vm10205_vm1, %v14920_v56 }
 0x401   : > { %v4022_v48 = vrot.slane %v4020_v10, 7  ;;  %v3390_v49 = vmax.f32 %v3285_v33, 0.0  ;;  %v12849_v20 = vpop.f32.mrb[20].mxu1  ;;  %v3599_v31 = vmul.f32 %v3494_v12, %v3389_v28  ;;  %v15171_v10 = vld [vmem:[#allocation32_spill] sm:$0xff] }
 0x402   : > { %15168 = vst [vmem:[#allocation69_spill] sm:$0xff] %v12849_v20  ;;  %v3022_v35 = vpop.f32.mrb[132].mxu0  ;;  %v9521_v16 = vpop.f32.mrb[21].mxu1 }
 0x403   : > { %v4025_v30 = vor.u32 %v4023_v61, %v4022_v48  ;;  %v3174_v57 = vadd.f32 %v3022_v35, %v15169_v43  ;;  %v9425_v8 = vpop.f32.mrb[133].mxu0  ;;  %v3600_v21 = vmul.f32 %v3495_v4, %v3390_v49  ;;  %v12852_v2 = vpop.f32.mrb[22].mxu1  ;;  %v5351_v35 = vsel %vm5310_vm7, %v5348_v41, %v5350_v63  ;;  %v3496_v4 = vld [vmem:[%s11915_s21 + $0x2d0] sm:$0xff]  ;;  %v3497_v49 = vld [vmem:[%s11915_s21 + $0x2d8] sm:$0xff] }
 0x404   : > { %15170 = vst [vmem:[#allocation70_spill] sm:$0xff] %v12852_v2  ;;  %v3025_v29 = vpop.f32.mrb[134].mxu0  ;;  %v9522_v33 = vpop.f32.mrb[23].mxu1  ;;  %v5352_v41 = vrot.slane %v12370_v7, 7  ;;  %v15174_v8 = vld [vmem:[#allocation94_spill] sm:$0xff] }
 0x405   : > { %v3286_v53 = vadd.f32 %v12720_v47, %v3174_v57  ;;  %v3175_v60 = vadd.f32 %v3025_v29, %v15171_v10  ;;  %v9426_v23 = vpop.f32.mrb[135].mxu0  ;;  %v4026_v20 = vsel %vm3678_vm5, %v4014_v5, %v4025_v30  ;;  %v12857_v61 = vpack.c.bf16 %v3600_v21, %v3599_v31 }
 0x406   : > { %9628 = vmatmul.mubr.msk.bf16.gmra.mrb[128].mxu1 %vm4103_vm6, %v4026_v20 }
 0x407   : > { %15172 = vst [vmem:[#allocation71_spill] sm:$0xff] %v12857_v61  ;;  %v3391_v43 = vmax.f32 %v3286_v53, 0.0  ;;  %v3287_v28 = vadd.f32 %v12720_v47, %v3175_v60  ;;  %9952 = vmatmul.mubr.msk.bf16.gmra.mrb[240].mxu0 %vm4103_vm6, %v5351_v35  ;;  %v4028_v12 = vshrl.u32 %v12857_v61, 16  ;;  %9631 = vmatprep.mubr.msk.bf16.mxu1 %vm10205_vm1, %v14920_v56  ;;  %v4031_v60 = vshll.u32 %v12857_v61, 16 }
 0x408   : > { %9955 = vmatprep.mubr.msk.bf16.mxu0 %vm10205_vm1, %v14920_v56 }
 0x409   : > { %v3392_v23 = vmax.f32 %v3287_v28, 0.0  ;;  %v4030_v5 = vrot.slane %v4028_v12, 7  ;;  %v12872_v30 = vpop.f32.mrb[24].mxu1  ;;  %v3601_v57 = vmul.f32 %v3496_v4, %v3391_v43  ;;  %v15177_v12 = vld [vmem:[#allocation35_spill] sm:$0xff]  ;;  %v5353_v4 = vsel %vm5310_vm7, %v5350_v63, %v5352_v41 }
 0x40a   : > { %15173 = vst [vmem:[#allocation72_spill] sm:$0xff] %v12872_v30  ;;  %v3030_v20 = vpop.f32.mrb[136].mxu0  ;;  %v9525_v21 = vpop.f32.mrb[25].mxu1  ;;  %v3499_v63 = vld [vmem:[%s11915_s21 + $0x2e8] sm:$0xff] }
 0x40b   : > { %v3602_v16 = vmul.f32 %v3497_v49, %v3392_v23  ;;  %v3176_v31 = vadd.f32 %v3030_v20, %v15174_v8  ;;  %v9429_v29 = vpop.f32.mrb[137].mxu0  ;;  %v4033_v53 = vor.u32 %v4031_v60, %v4030_v5  ;;  %v12875_v10 = vpop.f32.mrb[26].mxu1  ;;  %v5354_v20 = vrot.slane %v12388_v14, 7  ;;  %v15179_v21 = vld [vmem:[#allocation95_spill] sm:$0xff] }
 0x40c   : > { %15175 = vst [vmem:[#allocation73_spill] sm:$0xff] %v12875_v10  ;;  %v3033_v33 = vpop.f32.mrb[138].mxu0  ;;  %v9526_v30 = vpop.f32.mrb[27].mxu1 }
 0x40d   : > { %v12877_v35 = vpack.c.bf16 %v3602_v16, %v3601_v57  ;;  %v3288_v28 = vadd.f32 %v12720_v47, %v3176_v31  ;;  %v3177_v2 = vadd.f32 %v3033_v33, %v15177_v12  ;;  %v9430_v7 = vpop.f32.mrb[139].mxu0  ;;  %v4034_v43 = vsel %vm3678_vm5, %v4022_v48, %v4033_v53  ;;  %v3498_v30 = vld [vmem:[%s11915_s21 + $0x2e0] sm:$0xff] }
 0x40e   : > { %9632 = vmatmul.mubr.msk.bf16.gmra.mrb[132].mxu1 %vm4103_vm6, %v4034_v43 }
 0x40f   : > { %15176 = vst [vmem:[#allocation74_spill] sm:$0xff] %v12877_v35  ;;  %v4036_v49 = vshrl.u32 %v12877_v35, 16  ;;  %9956 = vmatmul.mubr.msk.bf16.gmra.mrb[244].mxu0 %vm4103_vm6, %v5353_v4  ;;  %v3393_v23 = vmax.f32 %v3288_v28, 0.0  ;;  %v3289_v60 = vadd.f32 %v12720_v47, %v3177_v2  ;;  %9635 = vmatprep.mubr.msk.bf16.mxu1 %vm10205_vm1, %v14920_v56  ;;  %v4039_v48 = vshll.u32 %v12877_v35, 16 }
 0x410   : > { %9959 = vmatprep.mubr.msk.bf16.mxu0 %vm10205_vm1, %v14920_v56 }
 0x411   : > { %v4038_v7 = vrot.slane %v4036_v49, 7  ;;  %v3394_v57 = vmax.f32 %v3289_v60, 0.0  ;;  %v12895_v16 = vpop.f32.mrb[28].mxu1  ;;  %v3603_v33 = vmul.f32 %v3498_v30, %v3393_v23  ;;  %v15181_v49 = vld [vmem:[#allocation38_spill] sm:$0xff] }
 0x412   : > { %15178 = vst [vmem:[#allocation75_spill] sm:$0xff] %v12895_v16  ;;  %v3038_v8 = vpop.f32.mrb[140].mxu0  ;;  %v9529_v29 = vpop.f32.mrb[29].mxu1 }
 0x413   : > { %v4041_v31 = vor.u32 %v4039_v48, %v4038_v7  ;;  %v3178_v2 = vadd.f32 %v3038_v8, %v15179_v21  ;;  %v9433_v53 = vpop.f32.mrb[141].mxu0  ;;  %v3604_v28 = vmul.f32 %v3499_v63, %v3394_v57  ;;  %v12898_v12 = vpop.f32.mrb[30].mxu1  ;;  %v5355_v8 = vsel %vm5310_vm7, %v5352_v41, %v5354_v20  ;;  %v3500_v63 = vld [vmem:[%s11915_s21 + $0x2f0] sm:$0xff]  ;;  %v3501_v57 = vld [vmem:[%s11915_s21 + $0x2f8] sm:$0xff] }
 0x414   : > { %15180 = vst [vmem:[#allocation76_spill] sm:$0xff] %v12898_v12  ;;  %v3041_v43 = vpop.f32.mrb[142].mxu0  ;;  %v9530_v60 = vpop.f32.mrb[31].mxu1  ;;  %v5356_v41 = vrot.slane %v12408_v25, 7  ;;  %v15184_v53 = vld [vmem:[#allocation96_spill] sm:$0xff] }
 0x415   : > { %v3290_v4 = vadd.f32 %v12720_v47, %v3178_v2  ;;  %v3179_v10 = vadd.f32 %v3041_v43, %v15181_v49  ;;  %v9434_v14 = vpop.f32.mrb[143].mxu0  ;;  %v4042_v16 = vsel %vm3678_vm5, %v4030_v5, %v4041_v31  ;;  %v12903_v48 = vpack.c.bf16 %v3604_v28, %v3603_v33 }
 0x416   : > { %9636 = vmatmul.mubr.msk.bf16.gmra.mrb[136].mxu1 %vm4103_vm6, %v4042_v16 }
 0x417   : > { %15182 = vst [vmem:[#allocation77_spill] sm:$0xff] %v12903_v48  ;;  %v3395_v21 = vmax.f32 %v3290_v4, 0.0  ;;  %v3291_v23 = vadd.f32 %v12720_v47, %v3179_v10  ;;  %9960 = vmatmul.mubr.msk.bf16.gmra.mrb[248].mxu0 %vm4103_vm6, %v5355_v8  ;;  %v4044_v30 = vshrl.u32 %v12903_v48, 16  ;;  %9639 = vmatprep.mubr.msk.bf16.mxu1 %vm10205_vm1, %v14920_v56  ;;  %v4047_v10 = vshll.u32 %v12903_v48, 16 }
 0x418   : > { %9963 = vmatprep.mubr.msk.bf16.mxu0 %vm10205_vm1, %v14920_v56 }
 0x419   : > { %v3396_v14 = vmax.f32 %v3291_v23, 0.0  ;;  %v4046_v5 = vrot.slane %v4044_v30, 7  ;;  %v12918_v31 = vpop.f32.mrb[32].mxu1  ;;  %v3605_v2 = vmul.f32 %v3500_v63, %v3395_v21  ;;  %v15187_v30 = vld [vmem:[#allocation41_spill] sm:$0xff]  ;;  %v5357_v63 = vsel %vm5310_vm7, %v5354_v20, %v5356_v41  ;;  %v3503_v20 = vld [vmem:[%s11915_s21 + $0x308] sm:$0xff] }
 0x41a   : > { %15183 = vst [vmem:[#allocation78_spill] sm:$0xff] %v12918_v31  ;;  %v3046_v16 = vpop.f32.mrb[144].mxu0  ;;  %v9533_v28 = vpop.f32.mrb[33].mxu1 }
 0x41b   : > { %v3606_v29 = vmul.f32 %v3501_v57, %v3396_v14  ;;  %v3180_v33 = vadd.f32 %v3046_v16, %v15184_v53  ;;  %v9437_v43 = vpop.f32.mrb[145].mxu0  ;;  %v4049_v4 = vor.u32 %v4047_v10, %v4046_v5  ;;  %v12921_v49 = vpop.f32.mrb[34].mxu1  ;;  %v5358_v16 = vrot.slane %v12424_v0, 7  ;;  %v15189_v28 = vld [vmem:[#allocation97_spill] sm:$0xff] }
 0x41c   : > { %15185 = vst [vmem:[#allocation79_spill] sm:$0xff] %v12921_v49  ;;  %v3049_v60 = vpop.f32.mrb[146].mxu0  ;;  %v9534_v31 = vpop.f32.mrb[35].mxu1 }
 0x41d   : > { %v12923_v8 = vpack.c.bf16 %v3606_v29, %v3605_v2  ;;  %v3292_v23 = vadd.f32 %v12720_v47, %v3180_v33  ;;  %v3181_v12 = vadd.f32 %v3049_v60, %v15187_v30  ;;  %v9438_v25 = vpop.f32.mrb[147].mxu0  ;;  %v4050_v21 = vsel %vm3678_vm5, %v4038_v7, %v4049_v4  ;;  %v3502_v31 = vld [vmem:[%s11915_s21 + $0x300] sm:$0xff] }
 0x41e   : > { %9640 = vmatmul.mubr.msk.bf16.gmra.mrb[140].mxu1 %vm4103_vm6, %v4050_v21 }
 0x41f   : > { %15186 = vst [vmem:[#allocation80_spill] sm:$0xff] %v12923_v8  ;;  %v4052_v57 = vshrl.u32 %v12923_v8, 16  ;;  %9964 = vmatmul.mubr.msk.bf16.gmra.mrb[252].mxu0 %vm4103_vm6, %v5357_v63  ;;  %v3397_v14 = vmax.f32 %v3292_v23, 0.0  ;;  %v3293_v10 = vadd.f32 %v12720_v47, %v3181_v12  ;;  %9643 = vmatprep.mubr.msk.bf16.mxu1 %vm10205_vm1, %v14920_v56  ;;  %v4055_v7 = vshll.u32 %v12923_v8, 16 }
 0x420   : > { %9967 = vmatprep.mubr.msk.bf16.mxu0 %vm10205_vm1, %v14920_v56 }
 0x421   : > { %v4054_v25 = vrot.slane %v4052_v57, 7  ;;  %v3398_v2 = vmax.f32 %v3293_v10, 0.0  ;;  %v12941_v29 = vpop.f32.mrb[36].mxu1  ;;  %v3607_v60 = vmul.f32 %v3502_v31, %v3397_v14  ;;  %v15191_v57 = vld [vmem:[#allocation44_spill] sm:$0xff] }
 0x422   : > { %15188 = vst [vmem:[#allocation81_spill] sm:$0xff] %v12941_v29  ;;  %v3054_v53 = vpop.f32.mrb[148].mxu0  ;;  %v9537_v43 = vpop.f32.mrb[37].mxu1 }
 0x423   : > { %v4057_v33 = vor.u32 %v4055_v7, %v4054_v25  ;;  %v3182_v12 = vadd.f32 %v3054_v53, %v15189_v28  ;;  %v9441_v4 = vpop.f32.mrb[149].mxu0  ;;  %v3608_v23 = vmul.f32 %v3503_v20, %v3398_v2  ;;  %v12944_v30 = vpop.f32.mrb[38].mxu1  ;;  %v5359_v53 = vsel %vm5310_vm7, %v5356_v41, %v5358_v16  ;;  %v3504_v20 = vld [vmem:[%s11915_s21 + $0x310] sm:$0xff]  ;;  %v3505_v2 = vld [vmem:[%s11915_s21 + $0x318] sm:$0xff] }
 0x424   : > { %15190 = vst [vmem:[#allocation82_spill] sm:$0xff] %v12944_v30  ;;  %v3057_v21 = vpop.f32.mrb[150].mxu0  ;;  %v9538_v10 = vpop.f32.mrb[39].mxu1  ;;  %v5360_v41 = vrot.slane %v12446_v39, 7  ;;  %v15194_v4 = vld [vmem:[#allocation98_spill] sm:$0xff] }
 0x425   : > { %v3294_v63 = vadd.f32 %v12720_v47, %v3182_v12  ;;  %v3183_v49 = vadd.f32 %v3057_v21, %v15191_v57  ;;  %v9442_v0 = vpop.f32.mrb[151].mxu0  ;;  %v4058_v29 = vsel %vm3678_vm5, %v4046_v5, %v4057_v33  ;;  %v12949_v7 = vpack.c.bf16 %v3608_v23, %v3607_v60 }
 0x426   : > { %9644 = vmatmul.mubr.msk.bf16.gmra.mrb[144].mxu1 %vm4103_vm6, %v4058_v29 }
 0x427   : > { %15192 = vst [vmem:[#allocation7_spill] sm:$0xff] %v12949_v7  ;;  %v3399_v28 = vmax.f32 %v3294_v63, 0.0  ;;  %v3295_v14 = vadd.f32 %v12720_v47, %v3183_v49  ;;  %9968 = vmatmul.mubr.msk.bf16.gmra.mrb[0].mxu0 %vm4103_vm6, %v5359_v53  ;;  %v4060_v31 = vshrl.u32 %v12949_v7, 16  ;;  %9647 = vmatprep.mubr.msk.bf16.mxu1 %vm10205_vm1, %v14920_v56  ;;  %v4063_v49 = vshll.u32 %v12949_v7, 16 }
 0x428   : > { %9971 = vmatprep.mubr.msk.bf16.mxu0 %vm10205_vm1, %v14920_v56 }
 0x429   : > { %v3400_v0 = vmax.f32 %v3295_v14, 0.0  ;;  %v4062_v5 = vrot.slane %v4060_v31, 7  ;;  %v12964_v33 = vpop.f32.mrb[40].mxu1  ;;  %v3609_v12 = vmul.f32 %v3504_v20, %v3399_v28  ;;  %v15197_v31 = vld [vmem:[#allocation47_spill] sm:$0xff]  ;;  %v5361_v20 = vsel %vm5310_vm7, %v5358_v16, %v5360_v41 }
 0x42a   : > { %15193 = vst [vmem:[#allocation83_spill] sm:$0xff] %v12964_v33  ;;  %v3062_v29 = vpop.f32.mrb[152].mxu0  ;;  %v9541_v23 = vpop.f32.mrb[41].mxu1  ;;  %v3507_v16 = vld [vmem:[%s11915_s21 + $0x328] sm:$0xff] }
 0x42b   : > { %v3610_v43 = vmul.f32 %v3505_v2, %v3400_v0  ;;  %v3184_v60 = vadd.f32 %v3062_v29, %v15194_v4  ;;  %v9445_v21 = vpop.f32.mrb[153].mxu0  ;;  %v4065_v63 = vor.u32 %v4063_v49, %v4062_v5  ;;  %v12967_v57 = vpop.f32.mrb[42].mxu1  ;;  %v5362_v29 = vrot.slane %v12462_v46, 7  ;;  %v15199_v23 = vld [vmem:[#allocation99_spill] sm:$0xff] }
 0x42c   : > { %15195 = vst [vmem:[#allocation84_spill] sm:$0xff] %v12967_v57  ;;  %v3065_v10 = vpop.f32.mrb[154].mxu0  ;;  %v9542_v33 = vpop.f32.mrb[43].mxu1 }
 0x42d   : > { %v12969_v53 = vpack.c.bf16 %v3610_v43, %v3609_v12  ;;  %v3296_v14 = vadd.f32 %v12720_v47, %v3184_v60  ;;  %v3185_v30 = vadd.f32 %v3065_v10, %v15197_v31  ;;  %v9446_v39 = vpop.f32.mrb[155].mxu0  ;;  %v4066_v28 = vsel %vm3678_vm5, %v4054_v25, %v4065_v63  ;;  %v3506_v33 = vld [vmem:[%s11915_s21 + $0x320] sm:$0xff] }
 0x42e   : > { %9648 = vmatmul.mubr.msk.bf16.gmra.mrb[148].mxu1 %vm4103_vm6, %v4066_v28 }
 0x42f   : > { %15196 = vst [vmem:[#allocation85_spill] sm:$0xff] %v12969_v53  ;;  %v4068_v2 = vshrl.u32 %v12969_v53, 16  ;;  %9972 = vmatmul.mubr.msk.bf16.gmra.mrb[4].mxu0 %vm4103_vm6, %v5361_v20  ;;  %v3401_v0 = vmax.f32 %v3296_v14, 0.0  ;;  %v3297_v49 = vadd.f32 %v12720_v47, %v3185_v30  ;;  %9651 = vmatprep.mubr.msk.bf16.mxu1 %vm10205_vm1, %v14920_v56  ;;  %v4071_v25 = vshll.u32 %v12969_v53, 16 }
 0x430   : > { %9975 = vmatprep.mubr.msk.bf16.mxu0 %vm10205_vm1, %v14920_v56 }
 0x431   : > { %v4070_v39 = vrot.slane %v4068_v2, 7  ;;  %v3402_v12 = vmax.f32 %v3297_v49, 0.0  ;;  %v12987_v43 = vpop.f32.mrb[44].mxu1  ;;  %v3611_v10 = vmul.f32 %v3506_v33, %v3401_v0  ;;  %v15201_v2 = vld [vmem:[#allocation50_spill] sm:$0xff] }
 0x432   : > { %15198 = vst [vmem:[#allocation86_spill] sm:$0xff] %v12987_v43  ;;  %v3070_v4 = vpop.f32.mrb[156].mxu0  ;;  %v9545_v21 = vpop.f32.mrb[45].mxu1 }
 0x433   : > { %v4073_v60 = vor.u32 %v4071_v25, %v4070_v39  ;;  %v3186_v30 = vadd.f32 %v3070_v4, %v15199_v23  ;;  %v9449_v63 = vpop.f32.mrb[157].mxu0  ;;  %v3612_v14 = vmul.f32 %v3507_v16, %v3402_v12  ;;  %v12990_v31 = vpop.f32.mrb[46].mxu1  ;;  %v5363_v4 = vsel %vm5310_vm7, %v5360_v41, %v5362_v29  ;;  %v3508_v16 = vld [vmem:[%s11915_s21 + $0x330] sm:$0xff]  ;;  %v3509_v12 = vld [vmem:[%s11915_s21 + $0x338] sm:$0xff] }
 0x434   : > { %15200 = vst [vmem:[#allocation87_spill] sm:$0xff] %v12990_v31  ;;  %v3073_v28 = vpop.f32.mrb[158].mxu0  ;;  %v9546_v49 = vpop.f32.mrb[47].mxu1  ;;  %v5364_v41 = vrot.slane %v12484_v37, 7  ;;  %v15204_v63 = vld [vmem:[#allocation8_spill] sm:$0xff]  ;;  %v3510_v37 = vld [vmem:[%s11915_s21 + $0x340] sm:$0xff] }
 0x435   : > { %v3298_v20 = vadd.f32 %v12720_v47, %v3186_v30  ;;  %v3187_v57 = vadd.f32 %v3073_v28, %v15201_v2  ;;  %v9450_v46 = vpop.f32.mrb[159].mxu0  ;;  %v4074_v43 = vsel %vm3678_vm5, %v4062_v5, %v4073_v60  ;;  %v12995_v25 = vpack.c.bf16 %v3612_v14, %v3611_v10  ;;  %s10083_s21 = smul.u32 816, %s10313_s23 }
 0x436   : > { %9652 = vmatmul.mubr.msk.bf16.gmra.mrb[152].mxu1 %vm4103_vm6, %v4074_v43 }
 0x437   : > { %15202 = vst [vmem:[#allocation14_spill] sm:$0xff] %v12995_v25  ;;  %v3403_v23 = vmax.f32 %v3298_v20, 0.0  ;;  %v3299_v0 = vadd.f32 %v12720_v47, %v3187_v57  ;;  %9976 = vmatmul.mubr.msk.bf16.gmra.mrb[8].mxu0 %vm4103_vm6, %v5363_v4  ;;  %v4076_v33 = vshrl.u32 %v12995_v25, 16  ;;  %9655 = vmatprep.mubr.msk.bf16.mxu1 %vm10205_vm1, %v14920_v56  ;;  %v4079_v57 = vshll.u32 %v12995_v25, 16  ;;  %s13514_s23 = scalar_lea.vmem %s14856_s6, %s10083_s21  ;;  %s8025_s21 = scalar_lea.sflag [#allocation4], %s353_s28 }
 0x438   : > { %9979 = vmatprep.mubr.msk.bf16.mxu0 %vm10205_vm1, %v14920_v56 }
 0x439   : > { %v3404_v46 = vmax.f32 %v3299_v0, 0.0  ;;  %v4078_v5 = vrot.slane %v4076_v33, 7  ;;  %v13010_v43 = vpop.f32.mrb[48].mxu1  ;;  %v3613_v30 = vmul.f32 %v3508_v16, %v3403_v23  ;;  %v5365_v23 = vsel %vm5310_vm7, %v5362_v29, %v5364_v41 }
 0x43a   : > { %15203 = vst [vmem:[#allocation88_spill] sm:$0xff] %v13010_v43  ;;  %v3078_v60 = vpop.f32.mrb[160].mxu0  ;;  %v9549_v14 = vpop.f32.mrb[49].mxu1 }
 0x43b   : > { %v3614_v21 = vmul.f32 %v3509_v12, %v3404_v46  ;;  %v3188_v10 = vadd.f32 %v3078_v60, %v15204_v63  ;;  %v9453_v28 = vpop.f32.mrb[161].mxu0  ;;  %v4081_v20 = vor.u32 %v4079_v57, %v4078_v5  ;;  %v13013_v2 = vpop.f32.mrb[50].mxu1 }
 0x43c   : > { %15205 = vst [vmem:[#allocation17_spill] sm:$0xff] %v13013_v2  ;;  %v3081_v49 = vpop.f32.mrb[162].mxu0  ;;  %v9550_v33 = vpop.f32.mrb[51].mxu1 }
 0x43d   : > { %v13015_v4 = vpack.c.bf16 %v3614_v21, %v3613_v30  ;;  %v3300_v0 = vadd.f32 %v12720_v47, %v3188_v10  ;;  %v9454_v31 = vpop.f32.mrb[163].mxu0  ;;  %v4082_v43 = vsel %vm3678_vm5, %v4070_v39, %v4081_v20  ;;  %v5366_v39 = vrot.slane %v12504_v13, 7 }
 0x43e   : > { %9656 = vmatmul.mubr.msk.bf16.gmra.mrb[156].mxu1 %vm4103_vm6, %v4082_v43 }
 0x43f   : > { %v4084_v16 = vshrl.u32 %v13015_v4, 16  ;;  %v3405_v12 = vmax.f32 %v3300_v0, 0.0  ;;  %9980 = vmatmul.mubr.msk.bf16.gmra.mrb[12].mxu0 %vm4103_vm6, %v5365_v23  ;;  %9659 = vmatprep.mubr.msk.bf16.mxu1 %vm10205_vm1, %v14920_v56  ;;  %v4087_v31 = vshll.u32 %v13015_v4, 16  ;;  %v14900_v14 = vrot.slane %v13015_v4, 7 }
 0x440   : > { %9983 = vmatprep.mubr.msk.bf16.mxu0 %vm10205_vm1, %v14920_v56  ;;  %v5367_v0 = vsel %vm5310_vm7, %v5364_v41, %v5366_v39  ;;  %v5368_v23 = vrot.slane %v12530_v24, 7 }
 0x441   : > { %v4086_v47 = vrot.slane %v4084_v16, 7  ;;  %v3615_v46 = vmul.f32 %v3510_v37, %v3405_v12  ;;  %v13030_v29 = vpop.f32.mrb[52].mxu1 }
 0x442   : > { %15206 = vst [vmem:[#allocation89_spill] sm:$0xff] %v13030_v29  ;;  %v13032_v57 = vpop.f32.mrb[164].mxu0  ;;  %v9553_v30 = vpop.f32.mrb[53].mxu1 }
 0x443   : > { %v4089_v60 = vor.u32 %v4087_v31, %v4086_v47  ;;  %v3668_v43 = vpack.c.bf16 %v3615_v46, %v3615_v46  ;;  %v9877_v21 = vpop.f32.mrb[165].mxu0  ;;  %v13034_v63 = vpop.f32.mrb[54].mxu1  ;;  %v15210_v30 = vld [vmem:[#allocation9_spill] sm:$0xff] }
 0x444   : > { %15207 = vst [vmem:[#allocation20_spill] sm:$0xff] %v13034_v63  ;;  %v13036_v10 = vpop.f32.mrb[166].mxu0  ;;  %v9554_v20 = vpop.f32.mrb[55].mxu1  ;;  %v5370_v21 = vrot.slane %v12550_v58, 7 }
 0x445   : > { %v5412_v28 = vrot.slane %v3668_v43, 7  ;;  %v9878_v49 = vpop.f32.mrb[167].mxu0  ;;  %v4090_v37 = vsel %vm3678_vm5, %v4078_v5, %v4089_v60  ;;  %v5369_v43 = vsel %vm5310_vm7, %v5366_v39, %v5368_v23 }
 0x446   : > { %9660 = vmatmul.mubr.msk.bf16.gmra.mrb[160].mxu1 %vm4103_vm6, %v4090_v37 }
 0x447   : > { %v13044_v33 = vsel %vm5310_vm7, %v14900_v14, %v5412_v28  ;;  %9984 = vmatmul.mubr.msk.bf16.gmra.mrb[16].mxu0 %vm4103_vm6, %v5367_v0  ;;  %9667 = vmatprep.mubr.msk.bf16.mxu1 %vm10205_vm1, %v14920_v56 }
 0x448   : > { %9987 = vmatprep.mubr.msk.bf16.mxu0 %vm10205_vm1, %v14920_v56 }
 0x449   : > { %v13053_v5 = vpop.f32.mrb[56].mxu1 }
 0x44a   : > { %15208 = vst [vmem:[#allocation90_spill] sm:$0xff] %v13053_v5  ;;  %v13055_v41 = vpop.f32.mrb[168].mxu0  ;;  %v9557_v16 = vpop.f32.mrb[57].mxu1 }
 0x44b   : > { %v9881_v12 = vpop.f32.mrb[169].mxu0  ;;  %v13057_v47 = vpop.f32.mrb[58].mxu1 }
 0x44c   : > { %15209 = vst [vmem:[#allocation23_spill] sm:$0xff] %v13057_v47  ;;  %v13059_v31 = vpop.f32.mrb[170].mxu0  ;;  %v9558_v46 = vpop.f32.mrb[59].mxu1 }
 0x44d   : > { %v9882_v60 = vpop.f32.mrb[171].mxu0  ;;  %v5371_v46 = vsel %vm5310_vm7, %v5368_v23, %v5370_v21 }
 0x44e   : > { %9668 = vmatmul.mubr.msk.bf16.vlgmr.msra.gmra.mrb[164].mxu1 %vm4103_vm6, %v15210_v30  ;;  %v5372_v60 = vrot.slane %v12576_v34, 7 }
 0x44f   : > { %9988 = vmatmul.mubr.msk.bf16.gmra.mrb[20].mxu0 %vm4103_vm6, %v5369_v43  ;;  %9671 = vmatprep.mubr.msk.bf16.mxu1 %vm10205_vm1, %v14920_v56 }
 0x450   : > { %9991 = vmatprep.mubr.msk.bf16.mxu0 %vm10205_vm1, %v14920_v56 }
 0x451   : > { %v13070_v28 = vpop.f32.mrb[60].mxu1 }
 0x452   : > { %15211 = vst [vmem:[#allocation91_spill] sm:$0xff] %v13070_v28  ;;  %v13072_v20 = vpop.f32.mrb[172].mxu0  ;;  %v9561_v49 = vpop.f32.mrb[61].mxu1 }
 0x453   : > { %v9885_v37 = vpop.f32.mrb[173].mxu0  ;;  %v13074_v39 = vpop.f32.mrb[62].mxu1 }
 0x454   : > { %15212 = vst [vmem:[#allocation26_spill] sm:$0xff] %v13074_v39  ;;  %v13076_v0 = vpop.f32.mrb[174].mxu0  ;;  %v9562_v16 = vpop.f32.mrb[63].mxu1 }
 0x455   : > { %v9886_v12 = vpop.f32.mrb[175].mxu0 }
 0x456   : > { %9672 = vmatmul.mubr.msk.bf16.gmra.mrb[168].mxu1 %vm4103_vm6, %v11950_v9 }
 0x457   : > { %9992 = vmatmul.mubr.msk.bf16.gmra.mrb[24].mxu0 %vm4103_vm6, %v5371_v46  ;;  %9675 = vmatprep.mubr.msk.bf16.mxu1 %vm10205_vm1, %v14920_v56  ;;  %v5373_v46 = vsel %vm5310_vm7, %v5370_v21, %v5372_v60 }
 0x458   : > { %9995 = vmatprep.mubr.msk.bf16.mxu0 %vm10205_vm1, %v14920_v56 }
 0x459   : > { %v13087_v43 = vpop.f32.mrb[64].mxu1 }
 0x45a   : > { %15213 = vst [vmem:[#allocation92_spill] sm:$0xff] %v13087_v43  ;;  %v13089_v30 = vpop.f32.mrb[176].mxu0  ;;  %v9565_v49 = vpop.f32.mrb[65].mxu1 }
 0x45b   : > { %v9889_v37 = vpop.f32.mrb[177].mxu0  ;;  %v13091_v23 = vpop.f32.mrb[66].mxu1  ;;  %v5374_v49 = vrot.slane %v12596_v27, 7 }
 0x45c   : > { %15214 = vst [vmem:[#allocation29_spill] sm:$0xff] %v13091_v23  ;;  %v13093_v16 = vpop.f32.mrb[178].mxu0  ;;  %v9566_v9 = vpop.f32.mrb[67].mxu1 }
 0x45d   : > { %v9890_v12 = vpop.f32.mrb[179].mxu0  ;;  %v5375_v43 = vsel %vm5310_vm7, %v5372_v60, %v5374_v49 }
 0x45e   : > { %9676 = vmatmul.mubr.msk.bf16.gmra.mrb[172].mxu1 %vm4103_vm6, %v11972_v15 }
 0x45f   : > { %9996 = vmatmul.mubr.msk.bf16.gmra.mrb[28].mxu0 %vm4103_vm6, %v5373_v46  ;;  %9679 = vmatprep.mubr.msk.bf16.mxu1 %vm10205_vm1, %v14920_v56 }
 0x460   : > { %9999 = vmatprep.mubr.msk.bf16.mxu0 %vm10205_vm1, %v14920_v56 }
 0x461   : > { %v13104_v37 = vpop.f32.mrb[68].mxu1 }
 0x462   : > { %15215 = vst [vmem:[#allocation93_spill] sm:$0xff] %v13104_v37  ;;  %v13106_v14 = vpop.f32.mrb[180].mxu0  ;;  %v9569_v9 = vpop.f32.mrb[69].mxu1 }
 0x463   : > { %v9893_v12 = vpop.f32.mrb[181].mxu0  ;;  %v13108_v21 = vpop.f32.mrb[70].mxu1  ;;  %v5376_v9 = vrot.slane %v12622_v17, 7 }
 0x464   : > { %15216 = vst [vmem:[#allocation32_spill] sm:$0xff] %v13108_v21  ;;  %v13110_v23 = vpop.f32.mrb[182].mxu0  ;;  %v9570_v15 = vpop.f32.mrb[71].mxu1 }
 0x465   : > { %v9894_v46 = vpop.f32.mrb[183].mxu0  ;;  %v5377_v39 = vsel %vm5310_vm7, %v5374_v49, %v5376_v9 }
 0x466   : > { %9680 = vmatmul.mubr.msk.bf16.gmra.mrb[176].mxu1 %vm4103_vm6, %v11995_v59 }
 0x467   : > { %10000 = vmatmul.mubr.msk.bf16.gmra.mrb[32].mxu0 %vm4103_vm6, %v5375_v43  ;;  %9683 = vmatprep.mubr.msk.bf16.mxu1 %vm10205_vm1, %v14920_v56 }
 0x468   : > { %10003 = vmatprep.mubr.msk.bf16.mxu0 %vm10205_vm1, %v14920_v56 }
 0x469   : > { %v13121_v12 = vpop.f32.mrb[72].mxu1 }
 0x46a   : > { %15217 = vst [vmem:[#allocation94_spill] sm:$0xff] %v13121_v12  ;;  %v13123_v21 = vpop.f32.mrb[184].mxu0  ;;  %v9573_v15 = vpop.f32.mrb[73].mxu1 }
 0x46b   : > { %v9897_v46 = vpop.f32.mrb[185].mxu0  ;;  %v13125_v60 = vpop.f32.mrb[74].mxu1  ;;  %v5378_v15 = vrot.slane %v12642_v6, 7 }
 0x46c   : > { %15218 = vst [vmem:[#allocation35_spill] sm:$0xff] %v13125_v60  ;;  %v13127_v37 = vpop.f32.mrb[186].mxu0  ;;  %v9574_v59 = vpop.f32.mrb[75].mxu1 }
 0x46d   : > { %v9898_v43 = vpop.f32.mrb[187].mxu0  ;;  %v5379_v28 = vsel %vm5310_vm7, %v5376_v9, %v5378_v15 }
 0x46e   : > { %9684 = vmatmul.mubr.msk.bf16.gmra.mrb[180].mxu1 %vm4103_vm6, %v12017_v45 }
 0x46f   : > { %10004 = vmatmul.mubr.msk.bf16.gmra.mrb[36].mxu0 %vm4103_vm6, %v5377_v39  ;;  %9687 = vmatprep.mubr.msk.bf16.mxu1 %vm10205_vm1, %v14920_v56 }
 0x470   : > { %10007 = vmatprep.mubr.msk.bf16.mxu0 %vm10205_vm1, %v14920_v56 }
 0x471   : > { %v13138_v46 = vpop.f32.mrb[76].mxu1 }
 0x472   : > { %15219 = vst [vmem:[#allocation95_spill] sm:$0xff] %v13138_v46  ;;  %v13140_v60 = vpop.f32.mrb[188].mxu0  ;;  %v9577_v59 = vpop.f32.mrb[77].mxu1 }
 0x473   : > { %v9901_v43 = vpop.f32.mrb[189].mxu0  ;;  %v13142_v49 = vpop.f32.mrb[78].mxu1  ;;  %v5380_v59 = vrot.slane %v12668_v62, 7 }
 0x474   : > { %15220 = vst [vmem:[#allocation38_spill] sm:$0xff] %v13142_v49  ;;  %v13144_v12 = vpop.f32.mrb[190].mxu0  ;;  %v9578_v45 = vpop.f32.mrb[79].mxu1 }
 0x475   : > { %v9902_v39 = vpop.f32.mrb[191].mxu0  ;;  %v5381_v47 = vsel %vm5310_vm7, %v5378_v15, %v5380_v59 }
 0x476   : > { %9688 = vmatmul.mubr.msk.bf16.gmra.mrb[184].mxu1 %vm4103_vm6, %v12039_v26 }
 0x477   : > { %10008 = vmatmul.mubr.msk.bf16.gmra.mrb[40].mxu0 %vm4103_vm6, %v5379_v28  ;;  %9691 = vmatprep.mubr.msk.bf16.mxu1 %vm10205_vm1, %v14920_v56 }
 0x478   : > { %10011 = vmatprep.mubr.msk.bf16.mxu0 %vm10205_vm1, %v14920_v56 }
 0x479   : > { %v13155_v43 = vpop.f32.mrb[80].mxu1 }
 0x47a   : > { %15221 = vst [vmem:[#allocation96_spill] sm:$0xff] %v13155_v43  ;;  %v13157_v49 = vpop.f32.mrb[192].mxu0  ;;  %v9581_v45 = vpop.f32.mrb[81].mxu1 }
 0x47b   : > { %v9905_v39 = vpop.f32.mrb[193].mxu0  ;;  %v13159_v9 = vpop.f32.mrb[82].mxu1  ;;  %v5382_v45 = vrot.slane %v12688_v50, 7 }
 0x47c   : > { %15222 = vst [vmem:[#allocation41_spill] sm:$0xff] %v13159_v9  ;;  %v13161_v46 = vpop.f32.mrb[194].mxu0  ;;  %v9582_v26 = vpop.f32.mrb[83].mxu1 }
 0x47d   : > { %v9906_v28 = vpop.f32.mrb[195].mxu0  ;;  %v5383_v5 = vsel %vm5310_vm7, %v5380_v59, %v5382_v45 }
 0x47e   : > { %9692 = vmatmul.mubr.msk.bf16.gmra.mrb[188].mxu1 %vm4103_vm6, %v12061_v1 }
 0x47f   : > { %10012 = vmatmul.mubr.msk.bf16.gmra.mrb[44].mxu0 %vm4103_vm6, %v5381_v47  ;;  %9695 = vmatprep.mubr.msk.bf16.mxu1 %vm10205_vm1, %v14920_v56 }
 0x480   : > { %10015 = vmatprep.mubr.msk.bf16.mxu0 %vm10205_vm1, %v14920_v56 }
 0x481   : > { %v13172_v39 = vpop.f32.mrb[84].mxu1 }
 0x482   : > { %15223 = vst [vmem:[#allocation97_spill] sm:$0xff] %v13172_v39  ;;  %v13174_v9 = vpop.f32.mrb[196].mxu0  ;;  %v9585_v26 = vpop.f32.mrb[85].mxu1 }
 0x483   : > { %v9909_v28 = vpop.f32.mrb[197].mxu0  ;;  %v13176_v15 = vpop.f32.mrb[86].mxu1  ;;  %v5384_v26 = vrot.slane %v12714_v38, 7 }
 0x484   : > { %15224 = vst [vmem:[#allocation44_spill] sm:$0xff] %v13176_v15  ;;  %v13178_v43 = vpop.f32.mrb[198].mxu0  ;;  %v9586_v1 = vpop.f32.mrb[87].mxu1 }
 0x485   : > { %v9910_v47 = vpop.f32.mrb[199].mxu0  ;;  %v5385_v63 = vsel %vm5310_vm7, %v5382_v45, %v5384_v26 }
 0x486   : > { %9696 = vmatmul.mubr.msk.bf16.gmra.mrb[192].mxu1 %vm4103_vm6, %v12084_v36 }
 0x487   : > { %10016 = vmatmul.mubr.msk.bf16.gmra.mrb[48].mxu0 %vm4103_vm6, %v5383_v5  ;;  %9699 = vmatprep.mubr.msk.bf16.mxu1 %vm10205_vm1, %v14920_v56 }
 0x488   : > { %10019 = vmatprep.mubr.msk.bf16.mxu0 %vm10205_vm1, %v14920_v56 }
 0x489   : > { %v13189_v28 = vpop.f32.mrb[88].mxu1 }
 0x48a   : > { %15225 = vst [vmem:[#allocation98_spill] sm:$0xff] %v13189_v28  ;;  %v13191_v15 = vpop.f32.mrb[200].mxu0  ;;  %v9589_v1 = vpop.f32.mrb[89].mxu1 }
 0x48b   : > { %v9913_v47 = vpop.f32.mrb[201].mxu0  ;;  %v13193_v59 = vpop.f32.mrb[90].mxu1  ;;  %v5386_v1 = vrot.slane %v12739_v52, 7 }
 0x48c   : > { %15226 = vst [vmem:[#allocation47_spill] sm:$0xff] %v13193_v59  ;;  %v13195_v39 = vpop.f32.mrb[202].mxu0  ;;  %v9590_v36 = vpop.f32.mrb[91].mxu1 }
 0x48d   : > { %v9914_v5 = vpop.f32.mrb[203].mxu0  ;;  %v5387_v29 = vsel %vm5310_vm7, %v5384_v26, %v5386_v1 }
 0x48e   : > { %9700 = vmatmul.mubr.msk.bf16.gmra.mrb[196].mxu1 %vm4103_vm6, %v12102_v19 }
 0x48f   : > { %10020 = vmatmul.mubr.msk.bf16.gmra.mrb[52].mxu0 %vm4103_vm6, %v5385_v63  ;;  %9703 = vmatprep.mubr.msk.bf16.mxu1 %vm10205_vm1, %v14920_v56 }
 0x490   : > { %10023 = vmatprep.mubr.msk.bf16.mxu0 %vm10205_vm1, %v14920_v56 }
 0x491   : > { %v13206_v47 = vpop.f32.mrb[92].mxu1 }
 0x492   : > { %15227 = vst [vmem:[#allocation99_spill] sm:$0xff] %v13206_v47  ;;  %v13208_v59 = vpop.f32.mrb[204].mxu0  ;;  %v9593_v36 = vpop.f32.mrb[93].mxu1 }
 0x493   : > { %v9917_v5 = vpop.f32.mrb[205].mxu0  ;;  %v13210_v45 = vpop.f32.mrb[94].mxu1  ;;  %v5388_v36 = vrot.slane %v12765_v55, 7 }
 0x494   : > { %15228 = vst [vmem:[#allocation50_spill] sm:$0xff] %v13210_v45  ;;  %v13212_v28 = vpop.f32.mrb[206].mxu0  ;;  %v9594_v19 = vpop.f32.mrb[95].mxu1 }
 0x495   : > { %v9918_v63 = vpop.f32.mrb[207].mxu0  ;;  %v5389_v2 = vsel %vm5310_vm7, %v5386_v1, %v5388_v36 }
 0x496   : > { %9704 = vmatmul.mubr.msk.bf16.gmra.mrb[200].mxu1 %vm4103_vm6, %v12123_v40 }
 0x497   : > { %10024 = vmatmul.mubr.msk.bf16.gmra.mrb[56].mxu0 %vm4103_vm6, %v5387_v29  ;;  %9707 = vmatprep.mubr.msk.bf16.mxu1 %vm10205_vm1, %v14920_v56 }
 0x498   : > { %10027 = vmatprep.mubr.msk.bf16.mxu0 %vm10205_vm1, %v14920_v56 }
 0x499   : > { %v13223_v5 = vpop.f32.mrb[96].mxu1 }
 0x49a   : > { %15229 = vst [vmem:[#allocation8_spill] sm:$0xff] %v13223_v5  ;;  %v13225_v45 = vpop.f32.mrb[208].mxu0  ;;  %v9597_v19 = vpop.f32.mrb[97].mxu1 }
 0x49b   : > { %v9921_v63 = vpop.f32.mrb[209].mxu0  ;;  %v13227_v26 = vpop.f32.mrb[98].mxu1  ;;  %v5390_v19 = vrot.slane %v12785_v44, 7 }
 0x49c   : > { %15230 = vst [vmem:[#allocation9_spill] sm:$0xff] %v13227_v26  ;;  %v13229_v47 = vpop.f32.mrb[210].mxu0  ;;  %v9598_v40 = vpop.f32.mrb[99].mxu1 }
 0x49d   : > { %v9922_v29 = vpop.f32.mrb[211].mxu0  ;;  %v5391_v55 = vsel %vm5310_vm7, %v5388_v36, %v5390_v19 }
 0x49e   : > { %9708 = vmatmul.mubr.msk.bf16.gmra.mrb[204].mxu1 %vm4103_vm6, %v12141_v51 }
 0x49f   : > { %10028 = vmatmul.mubr.msk.bf16.gmra.mrb[60].mxu0 %vm4103_vm6, %v5389_v2  ;;  %9711 = vmatprep.mubr.msk.bf16.mxu1 %vm10205_vm1, %v14920_v56 }
 0x4a0   : > { %10031 = vmatprep.mubr.msk.bf16.mxu0 %vm10205_vm1, %v14920_v56 }
 0x4a1   : > { %v13240_v63 = vpop.f32.mrb[100].mxu1 }
 0x4a2   : > { %15231 = vst [vmem:[#allocation100_spill] sm:$0xff] %v13240_v63  ;;  %v13242_v26 = vpop.f32.mrb[212].mxu0  ;;  %v9601_v40 = vpop.f32.mrb[101].mxu1 }
 0x4a3   : > { %v9925_v29 = vpop.f32.mrb[213].mxu0  ;;  %v13244_v1 = vpop.f32.mrb[102].mxu1  ;;  %v5392_v40 = vrot.slane %v12811_v54, 7 }
 0x4a4   : > { %15232 = vst [vmem:[#allocation101_spill] sm:$0xff] %v13244_v1  ;;  %v13246_v5 = vpop.f32.mrb[214].mxu0  ;;  %v9602_v51 = vpop.f32.mrb[103].mxu1 }
 0x4a5   : > { %v9926_v2 = vpop.f32.mrb[215].mxu0  ;;  %v5393_v44 = vsel %vm5310_vm7, %v5390_v19, %v5392_v40 }
 0x4a6   : > { %9712 = vmatmul.mubr.msk.bf16.gmra.mrb[208].mxu1 %vm4103_vm6, %v12159_v32 }
 0x4a7   : > { %10032 = vmatmul.mubr.msk.bf16.gmra.mrb[64].mxu0 %vm4103_vm6, %v5391_v55  ;;  %9715 = vmatprep.mubr.msk.bf16.mxu1 %vm10205_vm1, %v14920_v56 }
 0x4a8   : > { %10035 = vmatprep.mubr.msk.bf16.mxu0 %vm10205_vm1, %v14920_v56 }
 0x4a9   : > { %v13257_v29 = vpop.f32.mrb[104].mxu1 }
 0x4aa   : > { %15233 = vst [vmem:[#allocation102_spill] sm:$0xff] %v13257_v29  ;;  %v13259_v1 = vpop.f32.mrb[216].mxu0  ;;  %v9605_v51 = vpop.f32.mrb[105].mxu1 }
 0x4ab   : > { %v9929_v2 = vpop.f32.mrb[217].mxu0  ;;  %v13261_v36 = vpop.f32.mrb[106].mxu1  ;;  %v5394_v51 = vrot.slane %v12831_v42, 7 }
 0x4ac   : > { %15234 = vst [vmem:[#allocation103_spill] sm:$0xff] %v13261_v36  ;;  %v13263_v63 = vpop.f32.mrb[218].mxu0  ;;  %v9606_v32 = vpop.f32.mrb[107].mxu1 }
 0x4ad   : > { %v9930_v55 = vpop.f32.mrb[219].mxu0  ;;  %v5395_v54 = vsel %vm5310_vm7, %v5392_v40, %v5394_v51 }
 0x4ae   : > { %9716 = vmatmul.mubr.msk.bf16.gmra.mrb[212].mxu1 %vm4103_vm6, %v12180_v3 }
 0x4af   : > { %10036 = vmatmul.mubr.msk.bf16.gmra.mrb[68].mxu0 %vm4103_vm6, %v5393_v44  ;;  %9719 = vmatprep.mubr.msk.bf16.mxu1 %vm10205_vm1, %v14920_v56 }
 0x4b0   : > { %10039 = vmatprep.mubr.msk.bf16.mxu0 %vm10205_vm1, %v14920_v56 }
 0x4b1   : > { %v13274_v2 = vpop.f32.mrb[108].mxu1 }
 0x4b2   : > { %15235 = vst [vmem:[#allocation104_spill] sm:$0xff] %v13274_v2  ;;  %v13276_v36 = vpop.f32.mrb[220].mxu0  ;;  %v9609_v32 = vpop.f32.mrb[109].mxu1 }
 0x4b3   : > { %v9933_v55 = vpop.f32.mrb[221].mxu0  ;;  %v13278_v19 = vpop.f32.mrb[110].mxu1  ;;  %v5396_v32 = vrot.slane %v12857_v61, 7 }
 0x4b4   : > { %15236 = vst [vmem:[#allocation105_spill] sm:$0xff] %v13278_v19  ;;  %v13280_v29 = vpop.f32.mrb[222].mxu0  ;;  %v9610_v3 = vpop.f32.mrb[111].mxu1 }
 0x4b5   : > { %15237 = vst [vmem:[#allocation106_spill] sm:$0xff] %v13280_v29  ;;  %v9934_v44 = vpop.f32.mrb[223].mxu0  ;;  %v5397_v42 = vsel %vm5310_vm7, %v5394_v51, %v5396_v32 }
 0x4b6   : > { %9720 = vmatmul.mubr.msk.bf16.gmra.mrb[216].mxu1 %vm4103_vm6, %v15132_v11 }
 0x4b7   : > { %10040 = vmatmul.mubr.msk.bf16.gmra.mrb[72].mxu0 %vm4103_vm6, %v5395_v54  ;;  %9723 = vmatprep.mubr.msk.bf16.mxu1 %vm10205_vm1, %v14920_v56 }
 0x4b8   : > { %10043 = vmatprep.mubr.msk.bf16.mxu0 %vm10205_vm1, %v14920_v56 }
 0x4b9   : > { %v13291_v55 = vpop.f32.mrb[112].mxu1 }
 0x4ba   : > { %15238 = vst [vmem:[#allocation107_spill] sm:$0xff] %v13291_v55  ;;  %v13293_v19 = vpop.f32.mrb[224].mxu0  ;;  %v9613_v3 = vpop.f32.mrb[113].mxu1 }
 0x4bb   : > { %15239 = vst [vmem:[#allocation108_spill] sm:$0xff] %v13293_v19  ;;  %v9937_v44 = vpop.f32.mrb[225].mxu0  ;;  %v13295_v40 = vpop.f32.mrb[114].mxu1  ;;  %v5398_v3 = vrot.slane %v12877_v35, 7 }
 0x4bc   : > { %15240 = vst [vmem:[#allocation109_spill] sm:$0xff] %v13295_v40  ;;  %v13297_v2 = vpop.f32.mrb[226].mxu0  ;;  %v9614_v11 = vpop.f32.mrb[115].mxu1 }
 0x4bd   : > { %15241 = vst [vmem:[#allocation110_spill] sm:$0xff] %v13297_v2  ;;  %v9938_v54 = vpop.f32.mrb[227].mxu0  ;;  %v5399_v61 = vsel %vm5310_vm7, %v5396_v32, %v5398_v3  ;;  %v15246_v2 = vld [vmem:[#allocation53_spill] sm:$0xff] }
 0x4be   : > { %9724 = vmatmul.mubr.msk.bf16.gmra.mrb[220].mxu1 %vm4103_vm6, %v12219_v22 }
 0x4bf   : > { %10044 = vmatmul.mubr.msk.bf16.gmra.mrb[76].mxu0 %vm4103_vm6, %v5397_v42  ;;  %9727 = vmatprep.mubr.msk.bf16.mxu1 %vm10205_vm1, %v14920_v56 }
 0x4c0   : > { %10047 = vmatprep.mubr.msk.bf16.mxu0 %vm10205_vm1, %v14920_v56 }
 0x4c1   : > { %v13308_v44 = vpop.f32.mrb[116].mxu1 }
 0x4c2   : > { %15242 = vst [vmem:[#allocation111_spill] sm:$0xff] %v13308_v44  ;;  %v13310_v40 = vpop.f32.mrb[228].mxu0  ;;  %v9617_v11 = vpop.f32.mrb[117].mxu1 }
 0x4c3   : > { %15243 = vst [vmem:[#allocation112_spill] sm:$0xff] %v13310_v40  ;;  %v9941_v54 = vpop.f32.mrb[229].mxu0  ;;  %v13312_v51 = vpop.f32.mrb[118].mxu1  ;;  %v5400_v11 = vrot.slane %v12903_v48, 7 }
 0x4c4   : > { %15244 = vst [vmem:[#allocation113_spill] sm:$0xff] %v13312_v51  ;;  %v13314_v55 = vpop.f32.mrb[230].mxu0  ;;  %v9618_v22 = vpop.f32.mrb[119].mxu1 }
 0x4c5   : > { %15245 = vst [vmem:[#allocation114_spill] sm:$0xff] %v13314_v55  ;;  %v9942_v42 = vpop.f32.mrb[231].mxu0  ;;  %v5401_v35 = vsel %vm5310_vm7, %v5398_v3, %v5400_v11  ;;  %v15251_v55 = vld [vmem:[#allocation10_spill] sm:$0xff] }
 0x4c6   : > { %9728 = vmatmul.mubr.msk.bf16.gmra.mrb[224].mxu1 %vm4103_vm6, %v15246_v2 }
 0x4c7   : > { %10048 = vmatmul.mubr.msk.bf16.gmra.mrb[80].mxu0 %vm4103_vm6, %v5399_v61  ;;  %9731 = vmatprep.mubr.msk.bf16.mxu1 %vm10205_vm1, %v14920_v56 }
 0x4c8   : > { %10051 = vmatprep.mubr.msk.bf16.mxu0 %vm10205_vm1, %v14920_v56 }
 0x4c9   : > { %v13325_v54 = vpop.f32.mrb[120].mxu1 }
 0x4ca   : > { %15247 = vst [vmem:[#allocation53_spill] sm:$0xff] %v13325_v54  ;;  %v13327_v51 = vpop.f32.mrb[232].mxu0  ;;  %v9621_v22 = vpop.f32.mrb[121].mxu1 }
 0x4cb   : > { %15248 = vst [vmem:[#allocation115_spill] sm:$0xff] %v13327_v51  ;;  %v9945_v42 = vpop.f32.mrb[233].mxu0  ;;  %v13329_v32 = vpop.f32.mrb[122].mxu1  ;;  %v5402_v22 = vrot.slane %v12923_v8, 7 }
 0x4cc   : > { %15249 = vst [vmem:[#allocation116_spill] sm:$0xff] %v13329_v32  ;;  %v13331_v44 = vpop.f32.mrb[234].mxu0  ;;  %v9622_v2 = vpop.f32.mrb[123].mxu1 }
 0x4cd   : > { %15250 = vst [vmem:[#allocation117_spill] sm:$0xff] %v13331_v44  ;;  %v9946_v61 = vpop.f32.mrb[235].mxu0  ;;  %v5403_v48 = vsel %vm5310_vm7, %v5400_v11, %v5402_v22  ;;  %v15256_v44 = vld [vmem:[#allocation11_spill] sm:$0xff] }
 0x4ce   : > { %9732 = vmatmul.mubr.msk.bf16.gmra.mrb[228].mxu1 %vm4103_vm6, %v15251_v55 }
 0x4cf   : > { %10052 = vmatmul.mubr.msk.bf16.gmra.mrb[84].mxu0 %vm4103_vm6, %v5401_v35  ;;  %9735 = vmatprep.mubr.msk.bf16.mxu1 %vm10205_vm1, %v14920_v56 }
 0x4d0   : > { %10055 = vmatprep.mubr.msk.bf16.mxu0 %vm10205_vm1, %v14920_v56 }
 0x4d1   : > { %v13342_v42 = vpop.f32.mrb[124].mxu1 }
 0x4d2   : > { %15252 = vst [vmem:[#allocation10_spill] sm:$0xff] %v13342_v42  ;;  %v13344_v32 = vpop.f32.mrb[236].mxu0  ;;  %v9625_v2 = vpop.f32.mrb[125].mxu1 }
 0x4d3   : > { %15253 = vst [vmem:[#allocation118_spill] sm:$0xff] %v13344_v32  ;;  %v9949_v61 = vpop.f32.mrb[237].mxu0  ;;  %v13346_v3 = vpop.f32.mrb[126].mxu1  ;;  %v5404_v2 = vrot.slane %v12949_v7, 7  ;;  %v15315_v32 = vld [vmem:[#allocation6_spill] sm:$0xff] }
 0x4d4   : > { %15254 = vst [vmem:[#allocation119_spill] sm:$0xff] %v13346_v3  ;;  %v13348_v54 = vpop.f32.mrb[238].mxu0  ;;  %v9626_v55 = vpop.f32.mrb[127].mxu1 }
 0x4d5   : > { %15255 = vst [vmem:[#allocation120_spill] sm:$0xff] %v13348_v54  ;;  %v9950_v35 = vpop.f32.mrb[239].mxu0  ;;  %v5405_v8 = vsel %vm5310_vm7, %v5402_v22, %v5404_v2 }
 0x4d6   : > { %9736 = vmatmul.mubr.msk.bf16.gmra.mrb[232].mxu1 %vm4103_vm6, %v15256_v44 }
 0x4d7   : > { %10056 = vmatmul.mubr.msk.bf16.gmra.mrb[88].mxu0 %vm4103_vm6, %v5403_v48  ;;  %9739 = vmatprep.mubr.msk.bf16.mxu1 %vm10205_vm1, %v14920_v56 }
 0x4d8   : > { %10059 = vmatprep.mubr.msk.bf16.mxu0 %vm10205_vm1, %v14920_v56 }
 0x4d9   : > { %v13359_v61 = vpop.f32.mrb[128].mxu1 }
 0x4da   : > { %15257 = vst [vmem:[#allocation11_spill] sm:$0xff] %v13359_v61  ;;  %v13361_v3 = vpop.f32.mrb[240].mxu0  ;;  %v9629_v55 = vpop.f32.mrb[129].mxu1 }
 0x4db   : > { %15258 = vst [vmem:[#allocation121_spill] sm:$0xff] %v13361_v3  ;;  %v9953_v35 = vpop.f32.mrb[241].mxu0  ;;  %v13363_v11 = vpop.f32.mrb[130].mxu1  ;;  %v5406_v55 = vrot.slane %v12969_v53, 7 }
 0x4dc   : > { %15259 = vst [vmem:[#allocation122_spill] sm:$0xff] %v13363_v11  ;;  %v13365_v42 = vpop.f32.mrb[242].mxu0  ;;  %v9630_v44 = vpop.f32.mrb[131].mxu1 }
 0x4dd   : > { %15260 = vst [vmem:[#allocation123_spill] sm:$0xff] %v13365_v42  ;;  %v9954_v48 = vpop.f32.mrb[243].mxu0  ;;  %v5407_v7 = vsel %vm5310_vm7, %v5404_v2, %v5406_v55  ;;  %v15265_v42 = vld [vmem:[#allocation12_spill] sm:$0xff] }
 0x4de   : > { %9740 = vmatmul.mubr.msk.bf16.gmra.mrb[236].mxu1 %vm4103_vm6, %v12291_v18 }
 0x4df   : > { %10060 = vmatmul.mubr.msk.bf16.gmra.mrb[92].mxu0 %vm4103_vm6, %v5405_v8  ;;  %9743 = vmatprep.mubr.msk.bf16.mxu1 %vm10205_vm1, %v14920_v56 }
 0x4e0   : > { %10063 = vmatprep.mubr.msk.bf16.mxu0 %vm10205_vm1, %v14920_v56 }
 0x4e1   : > { %v13376_v35 = vpop.f32.mrb[132].mxu1 }
 0x4e2   : > { %15261 = vst [vmem:[#allocation124_spill] sm:$0xff] %v13376_v35  ;;  %v13378_v11 = vpop.f32.mrb[244].mxu0  ;;  %v9633_v44 = vpop.f32.mrb[133].mxu1 }
 0x4e3   : > { %15262 = vst [vmem:[#allocation125_spill] sm:$0xff] %v13378_v11  ;;  %v9957_v48 = vpop.f32.mrb[245].mxu0  ;;  %v13380_v22 = vpop.f32.mrb[134].mxu1  ;;  %v5408_v44 = vrot.slane %v12995_v25, 7 }
 0x4e4   : > { %15263 = vst [vmem:[#allocation126_spill] sm:$0xff] %v13380_v22  ;;  %v13382_v61 = vpop.f32.mrb[246].mxu0  ;;  %v9634_v18 = vpop.f32.mrb[135].mxu1 }
 0x4e5   : > { %15264 = vst [vmem:[#allocation127_spill] sm:$0xff] %v13382_v61  ;;  %v9958_v8 = vpop.f32.mrb[247].mxu0  ;;  %v5409_v53 = vsel %vm5310_vm7, %v5406_v55, %v5408_v44  ;;  %v15270_v61 = vld [vmem:[#allocation56_spill] sm:$0xff] }
 0x4e6   : > { %9744 = vmatmul.mubr.msk.bf16.gmra.mrb[240].mxu1 %vm4103_vm6, %v15265_v42 }
 0x4e7   : > { %10064 = vmatmul.mubr.msk.bf16.gmra.mrb[96].mxu0 %vm4103_vm6, %v5407_v7  ;;  %9747 = vmatprep.mubr.msk.bf16.mxu1 %vm10205_vm1, %v14920_v56 }
 0x4e8   : > { %10067 = vmatprep.mubr.msk.bf16.mxu0 %vm10205_vm1, %v14920_v56 }
 0x4e9   : > { %v13393_v48 = vpop.f32.mrb[136].mxu1 }
 0x4ea   : > { %15266 = vst [vmem:[#allocation12_spill] sm:$0xff] %v13393_v48  ;;  %v13395_v22 = vpop.f32.mrb[248].mxu0  ;;  %v9637_v18 = vpop.f32.mrb[137].mxu1 }
 0x4eb   : > { %15267 = vst [vmem:[#allocation128_spill] sm:$0xff] %v13395_v22  ;;  %v9961_v8 = vpop.f32.mrb[249].mxu0  ;;  %v13397_v2 = vpop.f32.mrb[138].mxu1  ;;  %v15306_v22 = vld [vmem:[#allocation19_spill] sm:$0xff] }
 0x4ec   : > { %15268 = vst [vmem:[#allocation129_spill] sm:$0xff] %v13397_v2  ;;  %v13399_v35 = vpop.f32.mrb[250].mxu0  ;;  %v9638_v42 = vpop.f32.mrb[139].mxu1 }
 0x4ed   : > { %15269 = vst [vmem:[#allocation130_spill] sm:$0xff] %v13399_v35  ;;  %v9962_v7 = vpop.f32.mrb[251].mxu0  ;;  %v15276_v35 = vld [vmem:[#allocation13_spill] sm:$0xff] }
 0x4ee   : > { %9748 = vmatmul.mubr.msk.bf16.gmra.mrb[244].mxu1 %vm4103_vm6, %v15270_v61 }
 0x4ef   : > { %10068 = vmatmul.mubr.msk.bf16.gmra.mrb[100].mxu0 %vm4103_vm6, %v5409_v53  ;;  %9751 = vmatprep.mubr.msk.bf16.mxu1 %vm10205_vm1, %v14920_v56  ;;  %v15275_v53 = vrot.slane %v13015_v4, 7 }
 0x4f0   : > { %10071 = vmatprep.mubr.msk.bf16.mxu0 %vm10205_vm1, %v14920_v56 }
 0x4f1   : > { %v13409_v18 = vpop.f32.mrb[140].mxu1  ;;  %v5411_v25 = vsel %vm5310_vm7, %v5408_v44, %v15275_v53 }
 0x4f2   : > { %15271 = vst [vmem:[#allocation56_spill] sm:$0xff] %v13409_v18  ;;  %v13411_v8 = vpop.f32.mrb[252].mxu0  ;;  %v9641_v2 = vpop.f32.mrb[141].mxu1 }
 0x4f3   : > { %15272 = vst [vmem:[#allocation131_spill] sm:$0xff] %v13411_v8  ;;  %v9965_v42 = vpop.f32.mrb[253].mxu0  ;;  %v13413_v7 = vpop.f32.mrb[142].mxu1 }
 0x4f4   : > { %15273 = vst [vmem:[#allocation132_spill] sm:$0xff] %v13413_v7  ;;  %v13415_v55 = vpop.f32.mrb[254].mxu0  ;;  %v9642_v48 = vpop.f32.mrb[143].mxu1  ;;  %v15281_v7 = vld [vmem:[#allocation15_spill] sm:$0xff] }
 0x4f5   : > { %15274 = vst [vmem:[#allocation133_spill] sm:$0xff] %v13415_v55  ;;  %v9966_v61 = vpop.f32.mrb[255].mxu0 }
 0x4f6   : > { %9752 = vmatmul.mubr.msk.bf16.gmra.mrb[248].mxu1 %vm4103_vm6, %v15276_v35 }
 0x4f7   : > { %10072 = vmatmul.mubr.msk.bf16.gmra.mrb[104].mxu0 %vm4103_vm6, %v5411_v25  ;;  %9755 = vmatprep.mubr.msk.bf16.mxu1 %vm10205_vm1, %v14920_v56 }
 0x4f8   : > { %10075 = vmatprep.mubr.msk.bf16.mxu0 %vm10205_vm1, %v14920_v56 }
 0x4f9   : > { %v13427_v2 = vpop.f32.mrb[144].mxu1 }
 0x4fa   : > { %15277 = vst [vmem:[#allocation13_spill] sm:$0xff] %v13427_v2  ;;  %v13429_v42 = vpop.f32.mrb[0].mxu0  ;;  %v9645_v48 = vpop.f32.mrb[145].mxu1 }
 0x4fb   : > { %15278 = vst [vmem:[#allocation134_spill] sm:$0xff] %v13429_v42  ;;  %v9969_v61 = vpop.f32.mrb[1].mxu0  ;;  %v13431_v4 = vpop.f32.mrb[146].mxu1 }
 0x4fc   : > { %15279 = vst [vmem:[#allocation135_spill] sm:$0xff] %v13431_v4  ;;  %v13433_v44 = vpop.f32.mrb[2].mxu0  ;;  %v9646_v53 = vpop.f32.mrb[147].mxu1 }
 0x4fd   : > { %15280 = vst [vmem:[#allocation136_spill] sm:$0xff] %v13433_v44  ;;  %v9970_v35 = vpop.f32.mrb[3].mxu0  ;;  %v15286_v44 = vld [vmem:[#allocation59_spill] sm:$0xff] }
 0x4fe   : > { %9756 = vmatmul.mubr.msk.bf16.gmra.mrb[252].mxu1 %vm4103_vm6, %v15281_v7 }
 0x4ff   : > { %10076 = vmatmul.mubr.msk.bf16.gmra.mrb[108].mxu0 %vm4103_vm6, %v13044_v33  ;;  %9759 = vmatprep.mubr.msk.bf16.mxu1 %vm10205_vm1, %v14920_v56 }
 0x501   : > { %v13441_v25 = vpop.f32.mrb[148].mxu1 }
 0x502   : > { %15282 = vst [vmem:[#allocation15_spill] sm:$0xff] %v13441_v25  ;;  %v13443_v2 = vpop.f32.mrb[4].mxu0  ;;  %v9649_v48 = vpop.f32.mrb[149].mxu1 }
 0x503   : > { %15283 = vst [vmem:[#allocation137_spill] sm:$0xff] %v13443_v2  ;;  %v9973_v61 = vpop.f32.mrb[5].mxu0  ;;  %v13445_v4 = vpop.f32.mrb[150].mxu1 }
 0x504   : > { %15284 = vst [vmem:[#allocation138_spill] sm:$0xff] %v13445_v4  ;;  %v13447_v18 = vpop.f32.mrb[6].mxu0  ;;  %v9650_v53 = vpop.f32.mrb[151].mxu1 }
 0x505   : > { %15285 = vst [vmem:[#allocation139_spill] sm:$0xff] %v13447_v18  ;;  %v9974_v35 = vpop.f32.mrb[7].mxu0  ;;  %v15291_v53 = vld [vmem:[#allocation16_spill] sm:$0xff] }
 0x506   : > { %9760 = vmatmul.mubr.msk.bf16.gmra.mrb[0].mxu1 %vm4103_vm6, %v15286_v44 }
 0x507   : > { %9763 = vmatprep.mubr.msk.bf16.mxu1 %vm10205_vm1, %v14920_v56 }
 0x509   : > { %v13453_v33 = vpop.f32.mrb[152].mxu1 }
 0x50a   : > { %15287 = vst [vmem:[#allocation59_spill] sm:$0xff] %v13453_v33  ;;  %v13455_v7 = vpop.f32.mrb[8].mxu0  ;;  %v9653_v25 = vpop.f32.mrb[153].mxu1 }
 0x50b   : > { %15288 = vst [vmem:[#allocation140_spill] sm:$0xff] %v13455_v7  ;;  %v9977_v2 = vpop.f32.mrb[9].mxu0  ;;  %v13457_v48 = vpop.f32.mrb[154].mxu1 }
 0x50c   : > { %15289 = vst [vmem:[#allocation141_spill] sm:$0xff] %v13457_v48  ;;  %v13459_v61 = vpop.f32.mrb[10].mxu0  ;;  %v9654_v4 = vpop.f32.mrb[155].mxu1 }
 0x50d   : > { %15290 = vst [vmem:[#allocation142_spill] sm:$0xff] %v13459_v61  ;;  %v9978_v18 = vpop.f32.mrb[11].mxu0  ;;  %v15296_v4 = vld [vmem:[#allocation18_spill] sm:$0xff] }
 0x50e   : > { %9764 = vmatmul.mubr.msk.bf16.gmra.mrb[4].mxu1 %vm4103_vm6, %v15291_v53 }
 0x50f   : > { %9767 = vmatprep.mubr.msk.bf16.mxu1 %vm10205_vm1, %v14920_v56 }
 0x511   : > { %v13465_v44 = vpop.f32.mrb[156].mxu1 }
 0x512   : > { %15292 = vst [vmem:[#allocation16_spill] sm:$0xff] %v13465_v44  ;;  %v13467_v35 = vpop.f32.mrb[12].mxu0  ;;  %v9657_v33 = vpop.f32.mrb[157].mxu1 }
 0x513   : > { %15293 = vst [vmem:[#allocation143_spill] sm:$0xff] %v13467_v35  ;;  %v9981_v7 = vpop.f32.mrb[13].mxu0  ;;  %v13469_v25 = vpop.f32.mrb[158].mxu1 }
 0x514   : > { %15294 = vst [vmem:[#allocation144_spill] sm:$0xff] %v13469_v25  ;;  %v13471_v2 = vpop.f32.mrb[14].mxu0  ;;  %v9658_v48 = vpop.f32.mrb[159].mxu1 }
 0x515   : > { %15295 = vst [vmem:[#allocation145_spill] sm:$0xff] %v13471_v2  ;;  %v9982_v61 = vpop.f32.mrb[15].mxu0  ;;  %v15301_v48 = vld [vmem:[#allocation62_spill] sm:$0xff] }
 0x516   : > { %9768 = vmatmul.mubr.msk.bf16.gmra.mrb[8].mxu1 %vm4103_vm6, %v15296_v4 }
 0x517   : > { %9771 = vmatprep.mubr.msk.bf16.mxu1 %vm10205_vm1, %v14920_v56 }
 0x519   : > { %v13477_v18 = vpop.f32.mrb[160].mxu1 }
 0x51a   : > { %15297 = vst [vmem:[#allocation18_spill] sm:$0xff] %v13477_v18  ;;  %v13479_v53 = vpop.f32.mrb[16].mxu0  ;;  %v9661_v44 = vpop.f32.mrb[161].mxu1  ;;  %v15303_v18 = vld [vmem:[#allocation65_spill] sm:$0xff] }
 0x51b   : > { %15298 = vst [vmem:[#allocation146_spill] sm:$0xff] %v13479_v53  ;;  %v9985_v35 = vpop.f32.mrb[17].mxu0  ;;  %v13481_v33 = vpop.f32.mrb[162].mxu1 }
 0x51c   : > { %15299 = vst [vmem:[#allocation147_spill] sm:$0xff] %v13481_v33  ;;  %v13483_v7 = vpop.f32.mrb[18].mxu0  ;;  %v9662_v25 = vpop.f32.mrb[163].mxu1 }
 0x51d   : > { %15300 = vst [vmem:[#allocation148_spill] sm:$0xff] %v13483_v7  ;;  %v9986_v2 = vpop.f32.mrb[19].mxu0 }
 0x51e   : > { %9772 = vmatmul.mubr.msk.bf16.gmra.mrb[12].mxu1 %vm4103_vm6, %v15301_v48  ;;  %v15305_v2 = vld [vmem:[#allocation22_spill] sm:$0xff] }
 0x51f   : > { %9775 = vmatprep.mubr.msk.bf16.mxu1 %vm10205_vm1, %v14920_v56 }
 0x521   : > { %v4846_v61 = vpop.f32.mrb[164].mxu1 }
 0x522   : > { %v13489_v4 = vpop.f32.mrb[20].mxu0  ;;  %v4847_v53 = vadd.f32 %v4846_v61, %v15303_v18  ;;  %v9669_v44 = vpop.f32.mrb[165].mxu1  ;;  %v13503_v18 = vld [vmem:[%s14855_s5] ss:$0 sm:$0xff] }
 0x523   : > { %15302 = vst [vmem:[#allocation62_spill] sm:$0xff] %v13489_v4  ;;  %v9989_v35 = vpop.f32.mrb[21].mxu0  ;;  %v4849_v42 = vpop.f32.mrb[166].mxu1  ;;  %v15311_v4 = vld [vmem:[#allocation21_spill] sm:$0xff] }
 0x524   : > { %v13492_v33 = vpop.f32.mrb[22].mxu0  ;;  %v6020_v25 = vadd.f32 %v13032_v57, %v4847_v53  ;;  %v4850_v7 = vadd.f32 %v4849_v42, %v15305_v2  ;;  %v9670_v55 = vpop.f32.mrb[167].mxu1  ;;  %v6334_v35 = vld [vmem:[%s13514_s23 + $0x8] sm:$0xff] }
 0x525   : > { %15304 = vst [vmem:[#allocation65_spill] sm:$0xff] %v13492_v33  ;;  %v9990_v8 = vpop.f32.mrb[23].mxu0 }
 0x526   : > { %v6021_v48 = vadd.f32 %v13036_v10, %v4850_v7  ;;  %9776 = vmatmul.mubr.msk.bf16.gmra.mrb[16].mxu1 %vm4103_vm6, %v15306_v22  ;;  %v15308_v8 = vld [vmem:[#allocation24_spill] sm:$0xff] }
 0x527   : > { %9779 = vmatprep.mubr.msk.bf16.mxu1 %vm10205_vm1, %v14920_v56 }
 0x528   : > { %v6130_v57 = vadd.f32 %v13503_v18, %v6021_v48  ;;  %v15310_v48 = vld [vmem:[#allocation25_spill] sm:$0xff] }
 0x529   : > { %v4854_v53 = vpop.f32.mrb[168].mxu1 }
 0x52a   : > { %v13508_v42 = vpop.f32.mrb[24].mxu0  ;;  %v4855_v55 = vadd.f32 %v4854_v53, %v15308_v8  ;;  %v9673_v10 = vpop.f32.mrb[169].mxu1  ;;  %v6232_v22 = vmax.f32 %v6130_v57, 0.0 }
 0x52b   : > { %15307 = vst [vmem:[#allocation22_spill] sm:$0xff] %v13508_v42  ;;  %v9993_v7 = vpop.f32.mrb[25].mxu0  ;;  %v4857_v61 = vpop.f32.mrb[170].mxu1  ;;  %v6129_v10 = vadd.f32 %v13503_v18, %v6020_v25 }
 0x52c   : > { %v13516_v44 = vpop.f32.mrb[26].mxu0  ;;  %v6022_v2 = vadd.f32 %v13055_v41, %v4855_v55  ;;  %v4858_v42 = vadd.f32 %v4857_v61, %v15310_v48  ;;  %v9674_v53 = vpop.f32.mrb[171].mxu1  ;;  %v13526_v57 = vmul.f32 %v6334_v35, %v6232_v22  ;;  %v6336_v48 = vld [vmem:[%s13514_s23 + $0x18] sm:$0xff] }
 0x52d   : > { %15309 = vst [vmem:[#allocation19_spill] sm:$0xff] %v13516_v44  ;;  %v9994_v8 = vpop.f32.mrb[27].mxu0  ;;  %v6335_v44 = vld [vmem:[%s13514_s23 + $0x10] sm:$0xff]  ;;  %v6231_v61 = vmax.f32 %v6129_v10, 0.0 }
 0x52e   : > { %v6131_v7 = vadd.f32 %v13503_v18, %v6022_v2  ;;  %v6023_v33 = vadd.f32 %v13059_v31, %v4858_v42  ;;  %9780 = vmatmul.mubr.msk.bf16.gmra.mrb[20].mxu1 %vm4103_vm6, %v15311_v4  ;;  %v6333_v2 = vld [vmem:[%s13514_s23] sm:$0xff]  ;;  %v15313_v42 = vld [vmem:[#allocation27_spill] sm:$0xff]  ;;  %v6541_v35 = vrot.slane %v13526_v57, 7 }
 0x52f   : > { %9783 = vmatprep.mubr.msk.bf16.mxu1 %vm10205_vm1, %v14920_v56 }
 0x530   : > { %v6233_v41 = vmax.f32 %v6131_v7, 0.0  ;;  %v6132_v55 = vadd.f32 %v13503_v18, %v6023_v33 }
 0x531   : > { %v4862_v53 = vpop.f32.mrb[172].mxu1 }
 0x532   : > { %v13533_v25 = vpop.f32.mrb[28].mxu0  ;;  %v6437_v8 = vmul.f32 %v6335_v44, %v6233_v41  ;;  %v6234_v31 = vmax.f32 %v6132_v55, 0.0  ;;  %v4863_v11 = vadd.f32 %v4862_v53, %v15313_v42  ;;  %v9677_v4 = vpop.f32.mrb[173].mxu1  ;;  %v6435_v44 = vmul.f32 %v6333_v2, %v6231_v61  ;;  %v6338_v2 = vld [vmem:[%s13514_s23 + $0x28] sm:$0xff] }
 0x533   : > { %15312 = vst [vmem:[#allocation24_spill] sm:$0xff] %v13533_v25  ;;  %v9997_v22 = vpop.f32.mrb[29].mxu0  ;;  %v4865_v3 = vpop.f32.mrb[174].mxu1  ;;  %v6337_v4 = vld [vmem:[%s13514_s23 + $0x20] sm:$0xff] }
 0x534   : > { %v13538_v54 = vpop.f32.mrb[30].mxu0  ;;  %v6542_v7 = vrot.slane %v6437_v8, 7  ;;  %v6438_v33 = vmul.f32 %v6336_v48, %v6234_v31  ;;  %v6024_v10 = vadd.f32 %v13072_v20, %v4863_v11  ;;  %v4866_v51 = vadd.f32 %v4865_v3, %v15315_v32  ;;  %v9678_v25 = vpop.f32.mrb[175].mxu1 }
 0x535   : > { %15314 = vst [vmem:[#allocation25_spill] sm:$0xff] %v13538_v54  ;;  %v9998_v40 = vpop.f32.mrb[31].mxu0  ;;  %v6342_v54 = vld [vmem:[%s13514_s23 + $0x48] sm:$0xff] }
 0x536   : > { %v6543_v41 = vsel %vm5310_vm7, %v6541_v35, %v6542_v7  ;;  %v6544_v55 = vrot.slane %v6438_v33, 7  ;;  %v6133_v53 = vadd.f32 %v13503_v18, %v6024_v10  ;;  %9784 = vmatmul.mubr.msk.bf16.gmra.mrb[24].mxu1 %vm4103_vm6, %v12504_v13  ;;  %v6025_v48 = vadd.f32 %v13076_v0, %v4866_v51  ;;  %v15317_v13 = vld [vmem:[#allocation28_spill] sm:$0xff] }
 0x537   : > { %v6548_v42 = vmax.f32 %v6435_v44, %v6543_v41  ;;  %9787 = vmatprep.mubr.msk.bf16.mxu1 %vm10205_vm1, %v14920_v56  ;;  %v6552_v10 = vrot.slane %v6438_v33, 6 }
 0x538   : > { %v6545_v20 = vsel %vm5310_vm7, %v6542_v7, %v6544_v55  ;;  %v6235_v40 = vmax.f32 %v6133_v53, 0.0  ;;  %v6134_v3 = vadd.f32 %v13503_v18, %v6025_v48 }
 0x539   : > { %v6549_v32 = vmax.f32 %v13526_v57, %v6545_v20  ;;  %v4870_v11 = vpop.f32.mrb[176].mxu1  ;;  %v15319_v57 = vld [vmem:[#allocation30_spill] sm:$0xff] }
 0x53a   : > { %v13553_v61 = vpop.f32.mrb[32].mxu0  ;;  %v6439_v25 = vmul.f32 %v6337_v4, %v6235_v40  ;;  %v4871_v8 = vadd.f32 %v4870_v11, %v15317_v13  ;;  %v9681_v31 = vpop.f32.mrb[177].mxu1  ;;  %v6236_v0 = vmax.f32 %v6134_v3, 0.0 }
 0x53b   : > { %15316 = vst [vmem:[#allocation21_spill] sm:$0xff] %v13553_v61  ;;  %v10001_v22 = vpop.f32.mrb[33].mxu0  ;;  %v4873_v51 = vpop.f32.mrb[178].mxu1  ;;  %v6340_v31 = vld [vmem:[%s13514_s23 + $0x38] sm:$0xff] }
 0x53c   : > { %v13557_v35 = vpop.f32.mrb[34].mxu0  ;;  %v6553_v7 = vrot.slane %v6439_v25, 6  ;;  %v6026_v44 = vadd.f32 %v13089_v30, %v4871_v8  ;;  %v4874_v41 = vadd.f32 %v4873_v51, %v15319_v57  ;;  %v9682_v55 = vpop.f32.mrb[179].mxu1  ;;  %v6440_v48 = vmul.f32 %v6338_v2, %v6236_v0  ;;  %v15321_v57 = vld [vmem:[#allocation31_spill] sm:$0xff] }
 0x53d   : > { %15318 = vst [vmem:[#allocation27_spill] sm:$0xff] %v13557_v35  ;;  %v10002_v53 = vpop.f32.mrb[35].mxu0 }
 0x53e   : > { %v6554_v4 = vsel %vm1226_vm0, %v6552_v10, %v6553_v7  ;;  %v6027_v20 = vadd.f32 %v13093_v16, %v4874_v41  ;;  %9788 = vmatmul.mubr.msk.bf16.gmra.mrb[28].mxu1 %vm4103_vm6, %v12530_v24  ;;  %v6555_v3 = vrot.slane %v6440_v48, 6  ;;  %v13566_v33 = vadd.f32 %v13503_v18, %v6026_v44 }
 0x53f   : > { %v6559_v40 = vmax.f32 %v6548_v42, %v6554_v4  ;;  %9791 = vmatprep.mubr.msk.bf16.mxu1 %vm10205_vm1, %v14920_v56 }
 0x540   : > { %v6136_v30 = vadd.f32 %v13503_v18, %v6027_v20  ;;  %v6556_v25 = vsel %vm1226_vm0, %v6553_v7, %v6555_v3 }
 0x541   : > { %v6562_v11 = vsel %vm6561_vm8, %v6559_v40, -inf  ;;  %v6572_v16 = vsel %vm6571_vm9, %v6559_v40, -inf  ;;  %v4878_v24 = vpop.f32.mrb[180].mxu1  ;;  %v6560_v8 = vmax.f32 %v6549_v32, %v6556_v25  ;;  %v6581_v51 = vsel %vm6580_vm11, %v6559_v40, -inf }
 0x542   : > { %v13574_v42 = vpop.f32.mrb[36].mxu0  ;;  %v6563_v2 = vrot.slane %v6562_v11, 4  ;;  %v6573_v13 = vrot.slane %v6572_v16, 4  ;;  %v9685_v22 = vpop.f32.mrb[181].mxu1  ;;  %v6238_v44 = vmax.f32 %v6136_v30, 0.0  ;;  %v4879_v41 = vadd.f32 %v4878_v24, %v15321_v57 }
 0x543   : > { %15320 = vst [vmem:[#allocation6_spill] sm:$0xff] %v13574_v42  ;;  %v10005_v0 = vpop.f32.mrb[37].mxu0  ;;  %v4881_v55 = vpop.f32.mrb[182].mxu1  ;;  %v6582_v20 = vsel %vm6569_vm10, %v6560_v8, -inf  ;;  %v6592_v32 = vsel %vm6591_vm12, %v6560_v8, -inf  ;;  %v6601_v40 = vsel %vm6600_vm13, %v6560_v8, -inf }
 0x544   : > { %v13580_v7 = vpop.f32.mrb[38].mxu0  ;;  %v6564_v53 = vmax.f32 %v6562_v11, %v6563_v2  ;;  %v6574_v4 = vmax.f32 %v6572_v16, %v6573_v13  ;;  %v9686_v3 = vpop.f32.mrb[183].mxu1  ;;  %v6583_v22 = vmax.f32 %v6581_v51, %v6582_v20  ;;  %v6593_v0 = vrot.slane %v6592_v32, 4  ;;  %v15323_v13 = vld [vmem:[#allocation33_spill] sm:$0xff] }
 0x545   : > { %15322 = vst [vmem:[#allocation28_spill] sm:$0xff] %v13580_v7  ;;  %v10006_v25 = vpop.f32.mrb[39].mxu0  ;;  %v13585_v42 = vmul.f32 %v6340_v31, %v6238_v44  ;;  %v6602_v24 = vrot.slane %v6601_v40, 4  ;;  %v6028_v57 = vadd.f32 %v13106_v14, %v4879_v41  ;;  %v4882_v51 = vadd.f32 %v4881_v55, %v15323_v13 }
 0x546   : > { %v6565_v30 = vrot.slane %v6564_v53, 2  ;;  %v6575_v10 = vrot.slane %v6574_v4, 2  ;;  %9792 = vmatmul.mubr.msk.bf16.gmra.mrb[32].mxu1 %vm4103_vm6, %v12550_v58  ;;  %v6584_v11 = vrot.slane %v6583_v22, 4  ;;  %v6594_v16 = vmax.f32 %v6592_v32, %v6593_v0  ;;  %v6341_v25 = vld [vmem:[%s13514_s23 + $0x40] sm:$0xff] }
 0x547   : > { %v6612_v2 = vrot.slane %v13585_v42, 7  ;;  %9795 = vmatprep.mubr.msk.bf16.mxu1 %vm10205_vm1, %v14920_v56  ;;  %v6603_v44 = vmax.f32 %v6601_v40, %v6602_v24  ;;  %v6137_v20 = vadd.f32 %v13503_v18, %v6028_v57  ;;  %v6029_v58 = vadd.f32 %v13110_v23, %v4882_v51  ;;  %v15325_v24 = vld [vmem:[#allocation34_spill] sm:$0xff] }
 0x548   : > { %v6566_v8 = vmax.f32 %v6564_v53, %v6565_v30  ;;  %v6576_v31 = vmax.f32 %v6574_v4, %v6575_v10  ;;  %v6585_v3 = vmax.f32 %v6583_v22, %v6584_v11  ;;  %v6595_v14 = vrot.slane %v6594_v16, 2  ;;  %v6339_v30 = vld [vmem:[%s13514_s23 + $0x30] sm:$0xff] }
 0x549   : > { %v6620_v41 = vmax.f32 %v6440_v48, %v6612_v2  ;;  %v4886_v32 = vpop.f32.mrb[184].mxu1  ;;  %v6604_v13 = vrot.slane %v6603_v44, 2  ;;  %v6239_v35 = vmax.f32 %v6137_v20, 0.0  ;;  %v6138_v22 = vadd.f32 %v13503_v18, %v6029_v58 }
 0x54a   : > { %v13597_v0 = vpop.f32.mrb[40].mxu0  ;;  %v6567_v7 = vrot.slane %v6566_v8, 1  ;;  %v6577_v55 = vrot.slane %v6576_v31, 1  ;;  %v9689_v53 = vpop.f32.mrb[185].mxu1  ;;  %v6586_v4 = vrot.slane %v6585_v3, 2  ;;  %v6596_v40 = vmax.f32 %v6594_v16, %v6595_v14 }
 0x54b   : > { %15324 = vst [vmem:[#allocation30_spill] sm:$0xff] %v13597_v0  ;;  %v10009_v10 = vpop.f32.mrb[41].mxu0  ;;  %v4887_v48 = vadd.f32 %v4886_v32, %v15325_v24  ;;  %v4889_v57 = vpop.f32.mrb[186].mxu1  ;;  %v6605_v0 = vmax.f32 %v6603_v44, %v6604_v13  ;;  %v6443_v61 = vmul.f32 %v6341_v25, %v6239_v35  ;;  %v15326_v58 = vmax.f32 %v13566_v33, 0.0  ;;  %v6343_v13 = vld [vmem:[%s13514_s23 + $0x50] sm:$0xff] }
 0x54c   : > { %v13602_v11 = vpop.f32.mrb[42].mxu0  ;;  %v6568_v23 = vmax.f32 %v6566_v8, %v6567_v7  ;;  %v6578_v51 = vmax.f32 %v6576_v31, %v6577_v55  ;;  %v9690_v19 = vpop.f32.mrb[187].mxu1  ;;  %v6587_v20 = vmax.f32 %v6585_v3, %v6586_v4  ;;  %v6597_v53 = vrot.slane %v6596_v40, 1  ;;  %v15327_v8 = vld [vmem:[#allocation36_spill] sm:$0xff] }
 0x54d   : > { %v10010_v29 = vpop.f32.mrb[43].mxu0  ;;  %v6240_v10 = vmax.f32 %v6138_v22, 0.0  ;;  %v6030_v16 = vadd.f32 %v13123_v21, %v4887_v48  ;;  %v6606_v14 = vrot.slane %v6605_v0, 1  ;;  %v6441_v32 = vmul.f32 %v6339_v30, %v15326_v58 }
 0x54e   : > { %6570 = vst.msk [vmem:[#allocation2] sm:$0x1] %vm6569_vm10, %v6568_v23  ;;  %6579 = vst.msk [vmem:[#allocation2 + $0x1] sm:$0x1] %vm6569_vm10, %v6578_v51  ;;  %v6613_v7 = vrot.slane %v6443_v61, 7  ;;  %v4890_v35 = vadd.f32 %v4889_v57, %v15327_v8  ;;  %9796 = vmatmul.mubr.msk.bf16.gmra.mrb[36].mxu1 %vm4103_vm6, %v12576_v34  ;;  %v6588_v29 = vrot.slane %v6587_v20, 1  ;;  %v6598_v19 = vmax.f32 %v6596_v40, %v6597_v53 }
 0x54f   : > { %v6444_v31 = vmul.f32 %v6342_v54, %v6240_v10  ;;  %v6139_v21 = vadd.f32 %v13503_v18, %v6030_v16  ;;  %9799 = vmatprep.mubr.msk.bf16.mxu1 %vm10205_vm1, %v14920_v56  ;;  %v6607_v44 = vmax.f32 %v6605_v0, %v6606_v14  ;;  %v6344_v57 = vld [vmem:[%s13514_s23 + $0x58] sm:$0xff]  ;;  %v15329_v8 = vld [vmem:[#allocation39_spill] sm:$0xff] }
 0x550   : > { %v6614_v3 = vsel %vm5310_vm7, %v6612_v2, %v6613_v7  ;;  %v6031_v33 = vadd.f32 %v13127_v37, %v4890_v35  ;;  %v6589_v61 = vmax.f32 %v6587_v20, %v6588_v29  ;;  %6599 = vst.msk [vmem:[#allocation2 + $0x3] sm:$0x1] %vm6569_vm10, %v6598_v19  ;;  %v15328_v2 = vld [vmem:[#allocation37_spill] sm:$0xff] }
 0x551   : > { %v6621_v25 = vmax.f32 %v6441_v32, %v6614_v3  ;;  %v6615_v55 = vrot.slane %v6444_v31, 7  ;;  %v6625_v34 = vrot.slane %v6444_v31, 6  ;;  %v4894_v4 = vpop.f32.mrb[188].mxu1  ;;  %6608 = vst.msk [vmem:[#allocation2 + $0x4] sm:$0x1] %vm6569_vm10, %v6607_v44  ;;  %v6241_v40 = vmax.f32 %v6139_v21, 0.0 }
 0x552   : > { %v13620_v54 = vpop.f32.mrb[44].mxu0  ;;  %v6140_v0 = vadd.f32 %v13503_v18, %v6031_v33  ;;  %v4895_v30 = vadd.f32 %v4894_v4, %v15328_v2  ;;  %v9693_v37 = vpop.f32.mrb[189].mxu1  ;;  %6590 = vst.msk [vmem:[#allocation2 + $0x2] sm:$0x1] %vm6569_vm10, %v6589_v61 }
 0x553   : > { %v10013_v22 = vpop.f32.mrb[45].mxu0  ;;  %v6616_v24 = vsel %vm5310_vm7, %v6613_v7, %v6615_v55  ;;  %v6633_v48 = vmax.f32 %v6620_v41, %v6625_v34  ;;  %v4897_v23 = vpop.f32.mrb[190].mxu1  ;;  %v6445_v53 = vmul.f32 %v6343_v13, %v6241_v40  ;;  %v15330_v40 = vld [vmem:[#allocation40_spill] sm:$0xff] }
 0x554   : > { %v13628_v51 = vpop.f32.mrb[46].mxu0  ;;  %v6622_v20 = vmax.f32 %v13585_v42, %v6616_v24  ;;  %v6242_v10 = vmax.f32 %v6140_v0, 0.0  ;;  %v6032_v16 = vadd.f32 %v13140_v60, %v4895_v30  ;;  %v9694_v14 = vpop.f32.mrb[191].mxu1  ;;  %v4898_v35 = vadd.f32 %v4897_v23, %v15329_v8  ;;  %v6345_v42 = vld [vmem:[%s13514_s23 + $0x60] sm:$0xff] }
 0x555   : > { %v10014_v58 = vpop.f32.mrb[47].mxu0  ;;  %v6637_v32 = vsel %vm6636_vm14, %v6633_v48, -inf  ;;  %v6626_v7 = vrot.slane %v6445_v53, 6 }
 0x556   : > { %v6638_v29 = vrot.slane %v6637_v32, 4  ;;  %v13634_v41 = vmul.f32 %v6344_v57, %v6242_v10  ;;  %v6141_v19 = vadd.f32 %v13503_v18, %v6032_v16  ;;  %9800 = vmatmul.mubr.msk.bf16.gmra.mrb[40].mxu1 %vm4103_vm6, %v12596_v27  ;;  %v6033_v31 = vadd.f32 %v13144_v12, %v4898_v35  ;;  %v6346_v16 = vld [vmem:[%s13514_s23 + $0x68] sm:$0xff] }
 0x557   : > { %9803 = vmatprep.mubr.msk.bf16.mxu1 %vm10205_vm1, %v14920_v56  ;;  %v6627_v21 = vsel %vm1226_vm0, %v6625_v34, %v6626_v7 }
 0x558   : > { %v6639_v60 = vmax.f32 %v6637_v32, %v6638_v29  ;;  %v6628_v44 = vrot.slane %v13634_v41, 6  ;;  %v6243_v3 = vmax.f32 %v6141_v19, 0.0  ;;  %v6634_v33 = vmax.f32 %v6621_v25, %v6627_v21  ;;  %v15331_v29 = vld [vmem:[#allocation42_spill] sm:$0xff] }
 0x559   : > { %v6142_v61 = vadd.f32 %v13503_v18, %v6033_v31  ;;  %v4902_v55 = vpop.f32.mrb[192].mxu1 }
 0x55a   : > { %v13646_v13 = vpop.f32.mrb[48].mxu0  ;;  %v6640_v4 = vrot.slane %v6639_v60, 2  ;;  %v6629_v27 = vsel %vm1226_vm0, %v6626_v7, %v6628_v44  ;;  %v13649_v12 = vmul.f32 %v6345_v42, %v6243_v3  ;;  %v4903_v0 = vadd.f32 %v4902_v55, %v15330_v40  ;;  %v9697_v2 = vpop.f32.mrb[193].mxu1 }
 0x55b   : > { %v10017_v30 = vpop.f32.mrb[49].mxu0  ;;  %v6645_v34 = vsel %vm6561_vm8, %v6634_v33, -inf  ;;  %v6653_v37 = vsel %vm6571_vm9, %v6634_v33, -inf  ;;  %v6661_v25 = vsel %vm6580_vm11, %v6634_v33, -inf  ;;  %v6635_v22 = vmax.f32 %v6622_v20, %v6629_v27  ;;  %v4905_v24 = vpop.f32.mrb[194].mxu1 }
 0x55c   : > { %v13655_v48 = vpop.f32.mrb[50].mxu0  ;;  %v6641_v57 = vmax.f32 %v6639_v60, %v6640_v4  ;;  %v6646_v23 = vrot.slane %v6645_v34, 4  ;;  %v6654_v53 = vrot.slane %v6653_v37, 4  ;;  %v6244_v10 = vmax.f32 %v6142_v61, 0.0  ;;  %v9698_v14 = vpop.f32.mrb[195].mxu1  ;;  %v6347_v4 = vld [vmem:[%s13514_s23 + $0x70] sm:$0xff] }
 0x55d   : > { %v10018_v58 = vpop.f32.mrb[51].mxu0  ;;  %v6662_v32 = vsel %vm6569_vm10, %v6635_v22, -inf  ;;  %v6671_v8 = vsel %vm6591_vm12, %v6635_v22, -inf  ;;  %v6034_v35 = vadd.f32 %v13157_v49, %v4903_v0  ;;  %v4906_v7 = vadd.f32 %v4905_v24, %v15331_v29  ;;  %v15332_v22 = vld [vmem:[#allocation43_spill] sm:$0xff] }
 0x55e   : > { %v6642_v20 = vrot.slane %v6641_v57, 1  ;;  %v6647_v19 = vmax.f32 %v6645_v34, %v6646_v23  ;;  %v6655_v42 = vmax.f32 %v6653_v37, %v6654_v53  ;;  %v6663_v31 = vmax.f32 %v6661_v25, %v6662_v32  ;;  %9804 = vmatmul.mubr.msk.bf16.gmra.mrb[44].mxu1 %vm4103_vm6, %v12622_v17  ;;  %v6348_v25 = vld [vmem:[%s13514_s23 + $0x78] sm:$0xff] }
 0x55f   : > { %v6672_v60 = vrot.slane %v6671_v8, 4  ;;  %v6448_v21 = vmul.f32 %v6346_v16, %v6244_v10  ;;  %v6143_v44 = vadd.f32 %v13503_v18, %v6034_v35  ;;  %v6035_v3 = vadd.f32 %v13161_v46, %v4906_v7  ;;  %9807 = vmatprep.mubr.msk.bf16.mxu1 %vm10205_vm1, %v14920_v56 }
 0x560   : > { %v6643_v49 = vmax.f32 %v6641_v57, %v6642_v20  ;;  %v6648_v33 = vrot.slane %v6647_v19, 2  ;;  %v6656_v61 = vrot.slane %v6655_v42, 2  ;;  %v6664_v55 = vrot.slane %v6663_v31, 4 }
 0x561   : > { %v6673_v27 = vmax.f32 %v6671_v8, %v6672_v60  ;;  %v6681_v40 = vrot.slane %v6448_v21, 7  ;;  %v6245_v0 = vmax.f32 %v6143_v44, 0.0  ;;  %v6144_v17 = vadd.f32 %v13503_v18, %v6035_v3  ;;  %v4910_v2 = vpop.f32.mrb[196].mxu1  ;;  %v15333_v44 = vld [vmem:[#allocation45_spill] sm:$0xff] }
 0x562   : > { %v13670_v30 = vpop.f32.mrb[52].mxu0  ;;  %6644 = vst.msk [vmem:[#allocation2 + $0x5] sm:$0x1] %vm6569_vm10, %v6643_v49  ;;  %v6649_v46 = vmax.f32 %v6647_v19, %v6648_v33  ;;  %v6657_v34 = vmax.f32 %v6655_v42, %v6656_v61  ;;  %v6665_v37 = vmax.f32 %v6663_v31, %v6664_v55  ;;  %v4911_v24 = vadd.f32 %v4910_v2, %v15332_v22  ;;  %v9701_v57 = vpop.f32.mrb[197].mxu1 }
 0x563   : > { %v10021_v23 = vpop.f32.mrb[53].mxu0  ;;  %v6674_v53 = vrot.slane %v6673_v27, 2  ;;  %v6687_v10 = vmax.f32 %v13634_v41, %v6681_v40  ;;  %v6449_v16 = vmul.f32 %v6347_v4, %v6245_v0  ;;  %v6246_v14 = vmax.f32 %v6144_v17, 0.0  ;;  %v4913_v58 = vpop.f32.mrb[198].mxu1  ;;  %v6349_v17 = vld [vmem:[%s13514_s23 + $0x80] sm:$0xff] }
 0x564   : > { %v13676_v32 = vpop.f32.mrb[54].mxu0  ;;  %v6650_v8 = vrot.slane %v6649_v46, 1  ;;  %v6658_v35 = vrot.slane %v6657_v34, 1  ;;  %v6666_v29 = vrot.slane %v6665_v37, 2  ;;  %v6036_v7 = vadd.f32 %v13174_v9, %v4911_v24  ;;  %v9702_v20 = vpop.f32.mrb[199].mxu1  ;;  %v15334_v24 = vld [vmem:[#allocation46_spill] sm:$0xff] }
 0x565   : > { %v10022_v19 = vpop.f32.mrb[55].mxu0  ;;  %v6675_v42 = vmax.f32 %v6673_v27, %v6674_v53  ;;  %v6682_v31 = vrot.slane %v6449_v16, 7  ;;  %v6450_v60 = vmul.f32 %v6348_v25, %v6246_v14  ;;  %v4914_v3 = vadd.f32 %v4913_v58, %v15333_v44 }
 0x566   : > { %v6651_v49 = vmax.f32 %v6649_v46, %v6650_v8  ;;  %v6659_v41 = vmax.f32 %v6657_v34, %v6658_v35  ;;  %v6667_v33 = vmax.f32 %v6665_v37, %v6666_v29  ;;  %v6145_v61 = vadd.f32 %v13503_v18, %v6036_v7  ;;  %9808 = vmatmul.mubr.msk.bf16.gmra.mrb[48].mxu1 %vm4103_vm6, %v12642_v6  ;;  %v15335_v19 = vld [vmem:[#allocation48_spill] sm:$0xff] }
 0x567   : > { %v6676_v55 = vrot.slane %v6675_v42, 1  ;;  %v6683_v4 = vsel %vm5310_vm7, %v6681_v40, %v6682_v31  ;;  %v6689_v9 = vmax.f32 %v6448_v21, %v6682_v31  ;;  %v6692_v0 = vrot.slane %v6450_v60, 6  ;;  %9811 = vmatprep.mubr.msk.bf16.mxu1 %vm10205_vm1, %v14920_v56 }
 0x568   : > { %6652 = vst.msk [vmem:[#allocation2 + $0x6] sm:$0x1] %vm6569_vm10, %v6651_v49  ;;  %6660 = vst.msk [vmem:[#allocation2 + $0x7] sm:$0x1] %vm6569_vm10, %v6659_v41  ;;  %v6668_v27 = vrot.slane %v6667_v33, 1  ;;  %v6688_v2 = vmax.f32 %v13649_v12, %v6683_v4  ;;  %v6247_v46 = vmax.f32 %v6145_v61, 0.0  ;;  %v6037_v34 = vadd.f32 %v13178_v43, %v4914_v3 }
 0x569   : > { %v6677_v6 = vmax.f32 %v6675_v42, %v6676_v55  ;;  %v6698_v37 = vmax.f32 %v6687_v10, %v6692_v0  ;;  %v4918_v25 = vpop.f32.mrb[200].mxu1 }
 0x56a   : > { %v13691_v40 = vpop.f32.mrb[56].mxu0  ;;  %v6669_v21 = vmax.f32 %v6667_v33, %v6668_v27  ;;  %v13693_v22 = vmul.f32 %v6349_v17, %v6247_v46  ;;  %v4919_v57 = vadd.f32 %v4918_v25, %v15334_v24  ;;  %v9705_v23 = vpop.f32.mrb[201].mxu1  ;;  %v13704_v35 = vadd.f32 %v13503_v18, %v6037_v34  ;;  %v6351_v17 = vld [vmem:[%s13514_s23 + $0x90] sm:$0xff] }
 0x56b   : > { %v10025_v53 = vpop.f32.mrb[57].mxu0  ;;  %6678 = vst.msk [vmem:[#allocation2 + $0x9] sm:$0x1] %vm6569_vm10, %v6677_v6  ;;  %v6702_v16 = vsel %vm6701_vm15, %v6698_v37, -inf  ;;  %v6710_v12 = vsel %vm6636_vm14, %v6698_v37, -inf  ;;  %v4921_v14 = vpop.f32.mrb[202].mxu1 }
 0x56c   : > { %v13699_v43 = vpop.f32.mrb[58].mxu0  ;;  %6670 = vst.msk [vmem:[#allocation2 + $0x8] sm:$0x1] %vm6569_vm10, %v6669_v21  ;;  %v6703_v10 = vrot.slane %v6702_v16, 4  ;;  %v6711_v58 = vrot.slane %v6710_v12, 4  ;;  %v6693_v8 = vrot.slane %v13693_v22, 6  ;;  %v6038_v20 = vadd.f32 %v13191_v15, %v4919_v57 }
 0x56d   : > { %v9706_v29 = vpop.f32.mrb[203].mxu1  ;;  %v10026_v7 = vpop.f32.mrb[59].mxu0  ;;  %v4922_v42 = vadd.f32 %v4921_v14, %v15335_v19  ;;  %v6248_v4 = vmax.f32 %v13704_v35, 0.0  ;;  %v15336_v53 = vld [vmem:[#allocation49_spill] sm:$0xff] }
 0x56e   : > { %v6704_v31 = vmax.f32 %v6702_v16, %v6703_v10  ;;  %v6712_v60 = vmax.f32 %v6710_v12, %v6711_v58  ;;  %v6694_v44 = vsel %vm1226_vm0, %v6692_v0, %v6693_v8  ;;  %v6700_v3 = vmax.f32 %v6689_v9, %v6693_v8  ;;  %9812 = vmatmul.mubr.msk.bf16.gmra.mrb[52].mxu1 %vm4103_vm6, %v12668_v62  ;;  %v6352_v29 = vld [vmem:[%s13514_s23 + $0x98] sm:$0xff] }
 0x56f   : > { %v6699_v49 = vmax.f32 %v6688_v2, %v6694_v44  ;;  %v6147_v41 = vadd.f32 %v13503_v18, %v6038_v20  ;;  %v6039_v33 = vadd.f32 %v13195_v39, %v4922_v42  ;;  %9815 = vmatprep.mubr.msk.bf16.mxu1 %vm10205_vm1, %v14920_v56 }
 0x570   : > { %v6705_v61 = vrot.slane %v6704_v31, 2  ;;  %v6713_v15 = vrot.slane %v6712_v60, 2  ;;  %v6735_v55 = vsel %vm6569_vm10, %v6700_v3, -inf }
 0x571   : > { %v6718_v9 = vsel %vm6561_vm8, %v6699_v49, -inf  ;;  %v6726_v0 = vsel %vm6571_vm9, %v6699_v49, -inf  ;;  %v6734_v62 = vsel %vm6580_vm11, %v6699_v49, -inf  ;;  %v6249_v27 = vmax.f32 %v6147_v41, 0.0  ;;  %v4926_v2 = vpop.f32.mrb[204].mxu1 }
 0x572   : > { %v13721_v46 = vpop.f32.mrb[60].mxu0  ;;  %v6706_v39 = vmax.f32 %v6704_v31, %v6705_v61  ;;  %v6714_v34 = vmax.f32 %v6712_v60, %v6713_v15  ;;  %v6719_v6 = vrot.slane %v6718_v9, 4  ;;  %v6727_v37 = vrot.slane %v6726_v0, 4  ;;  %v9709_v25 = vpop.f32.mrb[205].mxu1 }
 0x573   : > { %v10029_v21 = vpop.f32.mrb[61].mxu0  ;;  %v6736_v24 = vmax.f32 %v6734_v62, %v6735_v55  ;;  %v13723_v57 = vmul.f32 %v6351_v17, %v6249_v27  ;;  %v6148_v23 = vadd.f32 %v13503_v18, %v6039_v33  ;;  %v4927_v16 = vadd.f32 %v4926_v2, %v15336_v53  ;;  %v4929_v12 = vpop.f32.mrb[206].mxu1  ;;  %v6350_v33 = vld [vmem:[%s13514_s23 + $0x88] sm:$0xff] }
 0x574   : > { %v13727_v14 = vpop.f32.mrb[62].mxu0  ;;  %v6707_v10 = vrot.slane %v6706_v39, 1  ;;  %v6715_v58 = vrot.slane %v6714_v34, 1  ;;  %v6720_v8 = vmax.f32 %v6718_v9, %v6719_v6  ;;  %v6728_v35 = vmax.f32 %v6726_v0, %v6727_v37  ;;  %v9710_v7 = vpop.f32.mrb[207].mxu1  ;;  %v6353_v0 = vld [vmem:[%s13514_s23 + $0xa0] sm:$0xff]  ;;  %v15337_v62 = vld [vmem:[#allocation51_spill] sm:$0xff] }
 0x575   : > { %v10030_v20 = vpop.f32.mrb[63].mxu0  ;;  %v6737_v19 = vrot.slane %v6736_v24, 4  ;;  %v6747_v42 = vrot.slane %v13723_v57, 7  ;;  %v6250_v31 = vmax.f32 %v6148_v23, 0.0  ;;  %v6040_v60 = vadd.f32 %v13208_v59, %v4927_v16 }
 0x576   : > { %v6708_v44 = vmax.f32 %v6706_v39, %v6707_v10  ;;  %v6716_v3 = vmax.f32 %v6714_v34, %v6715_v58  ;;  %v6721_v49 = vrot.slane %v6720_v8, 2  ;;  %v6729_v41 = vrot.slane %v6728_v35, 2  ;;  %9816 = vmatmul.mubr.msk.bf16.gmra.mrb[56].mxu1 %vm4103_vm6, %v12688_v50 }
 0x577   : > { %v6738_v61 = vmax.f32 %v6736_v24, %v6737_v19  ;;  %v6755_v15 = vmax.f32 %v13693_v22, %v6747_v42  ;;  %v6454_v55 = vmul.f32 %v6352_v29, %v6250_v31  ;;  %v6149_v17 = vadd.f32 %v13503_v18, %v6040_v60  ;;  %9819 = vmatprep.mubr.msk.bf16.mxu1 %vm10205_vm1, %v14920_v56  ;;  %v15338_v24 = vld [vmem:[#allocation52_spill] sm:$0xff] }
 0x578   : > { %6709 = vst.msk [vmem:[#allocation2 + $0xa] sm:$0x1] %vm6569_vm10, %v6708_v44  ;;  %6717 = vst.msk [vmem:[#allocation2 + $0xb] sm:$0x1] %vm6569_vm10, %v6716_v3  ;;  %v6722_v59 = vmax.f32 %v6720_v8, %v6721_v49  ;;  %v6730_v9 = vmax.f32 %v6728_v35, %v6729_v41  ;;  %v4930_v27 = vadd.f32 %v4929_v12, %v15337_v62  ;;  %v6354_v3 = vld [vmem:[%s13514_s23 + $0xa8] sm:$0xff] }
 0x579   : > { %v6739_v2 = vrot.slane %v6738_v61, 2  ;;  %v6452_v50 = vmul.f32 %v6350_v33, %v6248_v4  ;;  %v6748_v39 = vrot.slane %v6454_v55, 7  ;;  %v6251_v34 = vmax.f32 %v6149_v17, 0.0  ;;  %v4934_v22 = vpop.f32.mrb[208].mxu1  ;;  %v15339_v41 = vld [vmem:[#allocation54_spill] sm:$0xff] }
 0x57a   : > { %v13743_v6 = vpop.f32.mrb[64].mxu0  ;;  %v6723_v37 = vrot.slane %v6722_v59, 1  ;;  %v6731_v25 = vrot.slane %v6730_v9, 1  ;;  %v6041_v21 = vadd.f32 %v13212_v28, %v4930_v27  ;;  %v4935_v23 = vadd.f32 %v4934_v22, %v15338_v24  ;;  %v9713_v53 = vpop.f32.mrb[209].mxu1 }
 0x57b   : > { %v10033_v16 = vpop.f32.mrb[65].mxu0  ;;  %v6740_v10 = vmax.f32 %v6738_v61, %v6739_v2  ;;  %v6749_v58 = vsel %vm5310_vm7, %v6747_v42, %v6748_v39  ;;  %v6455_v12 = vmul.f32 %v6353_v0, %v6251_v34  ;;  %v4937_v8 = vpop.f32.mrb[210].mxu1  ;;  %v6355_v0 = vld [vmem:[%s13514_s23 + $0xb0] sm:$0xff] }
 0x57c   : > { %v13748_v4 = vpop.f32.mrb[66].mxu0  ;;  %v6724_v35 = vmax.f32 %v6722_v59, %v6723_v37  ;;  %v6732_v29 = vmax.f32 %v6730_v9, %v6731_v25  ;;  %v6756_v7 = vmax.f32 %v6452_v50, %v6749_v58  ;;  %v6150_v20 = vadd.f32 %v13503_v18, %v6041_v21  ;;  %v9714_v19 = vpop.f32.mrb[211].mxu1 }
 0x57d   : > { %v10034_v31 = vpop.f32.mrb[67].mxu0  ;;  %v6741_v28 = vrot.slane %v6740_v10, 1  ;;  %v6750_v60 = vrot.slane %v6455_v12, 7  ;;  %v6760_v44 = vrot.slane %v6455_v12, 6  ;;  %v6042_v49 = vadd.f32 %v13225_v45, %v4935_v23  ;;  %v15341_v23 = vld [vmem:[#allocation58_spill] sm:$0xff] }
 0x57e   : > { %6725 = vst.msk [vmem:[#allocation2 + $0xc] sm:$0x1] %vm6569_vm10, %v6724_v35  ;;  %6733 = vst.msk [vmem:[#allocation2 + $0xd] sm:$0x1] %vm6569_vm10, %v6732_v29  ;;  %v6252_v42 = vmax.f32 %v6150_v20, 0.0  ;;  %v4938_v33 = vadd.f32 %v4937_v8, %v15339_v41  ;;  %9820 = vmatmul.mubr.msk.bf16.gmra.mrb[60].mxu1 %vm4103_vm6, %v12714_v38  ;;  %v6356_v29 = vld [vmem:[%s13514_s23 + $0xb8] sm:$0xff] }
 0x57f   : > { %v6742_v61 = vmax.f32 %v6740_v10, %v6741_v28  ;;  %v6751_v55 = vsel %vm5310_vm7, %v6748_v39, %v6750_v60  ;;  %v6768_v17 = vmax.f32 %v6755_v15, %v6760_v44  ;;  %v6151_v59 = vadd.f32 %v13503_v18, %v6042_v49  ;;  %9823 = vmatprep.mubr.msk.bf16.mxu1 %vm10205_vm1, %v14920_v56  ;;  %v15340_v39 = vld [vmem:[#allocation57_spill] sm:$0xff] }
 0x580   : > { %v6757_v45 = vmax.f32 %v13723_v57, %v6751_v55  ;;  %v6456_v9 = vmul.f32 %v6354_v3, %v6252_v42  ;;  %v6043_v62 = vadd.f32 %v13229_v47, %v4938_v33 }
 0x581   : > { %6743 = vst.msk [vmem:[#allocation2 + $0xe] sm:$0x1] %vm6569_vm10, %v6742_v61  ;;  %v6253_v27 = vmax.f32 %v6151_v59, 0.0  ;;  %v4942_v2 = vpop.f32.mrb[212].mxu1  ;;  %v6772_v35 = vsel %vm6771_vm2, %v6768_v17, -inf }
 0x582   : > { %v13766_v38 = vpop.f32.mrb[68].mxu0  ;;  %v6761_v50 = vrot.slane %v6456_v9, 6  ;;  %v6152_v15 = vadd.f32 %v13503_v18, %v6043_v62  ;;  %v4943_v34 = vadd.f32 %v4942_v2, %v15340_v39  ;;  %v9717_v22 = vpop.f32.mrb[213].mxu1 }
 0x583   : > { %v10037_v37 = vpop.f32.mrb[69].mxu0  ;;  %v6457_v57 = vmul.f32 %v6355_v0, %v6253_v27  ;;  %v4945_v25 = vpop.f32.mrb[214].mxu1  ;;  %v6358_v0 = vld [vmem:[%s13514_s23 + $0xc8] sm:$0xff] }
 0x584   : > { %v13770_v21 = vpop.f32.mrb[70].mxu0  ;;  %v6762_v47 = vsel %vm1226_vm0, %v6760_v44, %v6761_v50  ;;  %v6044_v24 = vadd.f32 %v13242_v26, %v4943_v34  ;;  %v4946_v53 = vadd.f32 %v4945_v25, %v15341_v23  ;;  %v9718_v16 = vpop.f32.mrb[215].mxu1  ;;  %v6254_v8 = vmax.f32 %v6152_v15, 0.0 }
 0x585   : > { %v10038_v10 = vpop.f32.mrb[71].mxu0  ;;  %v6769_v58 = vmax.f32 %v6756_v7, %v6762_v47  ;;  %v6763_v12 = vrot.slane %v6457_v57, 6 }
 0x586   : > { %v6153_v20 = vadd.f32 %v13503_v18, %v6044_v24  ;;  %v6045_v19 = vadd.f32 %v13246_v5, %v4946_v53  ;;  %9824 = vmatmul.mubr.msk.bf16.gmra.mrb[64].mxu1 %vm4103_vm6, %v12739_v52  ;;  %v6357_v5 = vld [vmem:[%s13514_s23 + $0xc0] sm:$0xff]  ;;  %v13788_v42 = vmul.f32 %v6356_v29, %v6254_v8 }
 0x587   : > { %v6774_v26 = vsel %vm6773_vm3, %v6769_v58, -inf  ;;  %v6783_v31 = vsel %vm6701_vm15, %v6769_v58, -inf  ;;  %v6791_v28 = vsel %vm6636_vm14, %v6769_v58, -inf  ;;  %v6764_v7 = vsel %vm1226_vm0, %v6761_v50, %v6763_v12  ;;  %9827 = vmatprep.mubr.msk.bf16.mxu1 %vm10205_vm1, %v14920_v56  ;;  %v15342_v10 = vld [vmem:[#allocation61_spill] sm:$0xff] }
 0x588   : > { %v6775_v60 = vmax.f32 %v6772_v35, %v6774_v26  ;;  %v6784_v44 = vrot.slane %v6783_v31, 4  ;;  %v6792_v3 = vrot.slane %v6791_v28, 4  ;;  %v6770_v49 = vmax.f32 %v6757_v45, %v6764_v7 }
 0x589   : > { %v6255_v52 = vmax.f32 %v6153_v20, 0.0  ;;  %v6154_v41 = vadd.f32 %v13503_v18, %v6045_v19  ;;  %v4950_v33 = vpop.f32.mrb[216].mxu1  ;;  %v15343_v20 = vld [vmem:[#allocation55_spill] sm:$0xff] }
 0x58a   : > { %v13791_v61 = vpop.f32.mrb[72].mxu0  ;;  %v6776_v55 = vrot.slane %v6775_v60, 4  ;;  %v6785_v17 = vmax.f32 %v6783_v31, %v6784_v44  ;;  %v6793_v59 = vmax.f32 %v6791_v28, %v6792_v3  ;;  %v6799_v9 = vsel %vm6561_vm8, %v6770_v49, -inf  ;;  %v9721_v62 = vpop.f32.mrb[217].mxu1 }
 0x58b   : > { %v10041_v27 = vpop.f32.mrb[73].mxu0  ;;  %v6800_v2 = vrot.slane %v6799_v9, 4  ;;  %v6807_v45 = vsel %vm6571_vm9, %v6770_v49, -inf  ;;  %v13796_v50 = vmul.f32 %v6357_v5, %v6255_v52  ;;  %v6256_v15 = vmax.f32 %v6154_v41, 0.0  ;;  %v4953_v39 = vpop.f32.mrb[218].mxu1  ;;  %v6359_v62 = vld [vmem:[%s13514_s23 + $0xd0] sm:$0xff] }
 0x58c   : > { %v13798_v34 = vpop.f32.mrb[74].mxu0  ;;  %v6777_v18 = vmax.f32 %v6775_v60, %v6776_v55  ;;  %v6786_v22 = vrot.slane %v6785_v17, 2  ;;  %v6794_v37 = vrot.slane %v6793_v59, 2  ;;  %v6808_v25 = vrot.slane %v6807_v45, 4  ;;  %v9722_v47 = vpop.f32.mrb[219].mxu1 }
 0x58d   : > { %v10042_v24 = vpop.f32.mrb[75].mxu0  ;;  %v6801_v23 = vmax.f32 %v6799_v9, %v6800_v2  ;;  %v6818_v53 = vrot.slane %v13796_v50, 7  ;;  %v6460_v16 = vmul.f32 %v6358_v0, %v6256_v15  ;;  %v4951_v58 = vadd.f32 %v4950_v33, %v15342_v10  ;;  %v13813_v52 = vld [vmem:[%s14855_s5] ss:$0 sm:$0xff] }
 0x58e   : > { %v6778_v12 = vrot.slane %v6777_v18, 2  ;;  %v6787_v8 = vmax.f32 %v6785_v17, %v6786_v22  ;;  %v6795_v35 = vmax.f32 %v6793_v59, %v6794_v37  ;;  %v6809_v29 = vmax.f32 %v6807_v45, %v6808_v25  ;;  %9828 = vmatmul.mubr.msk.bf16.gmra.mrb[68].mxu1 %vm4103_vm6, %v15343_v20  ;;  %v15345_v24 = vld [vmem:[#allocation66_spill] sm:$0xff] }
 0x58f   : > { %v6802_v19 = vrot.slane %v6801_v23, 2  ;;  %v6826_v26 = vmax.f32 %v6457_v57, %v6818_v53  ;;  %v6819_v31 = vrot.slane %v6460_v16, 7  ;;  %v6046_v28 = vadd.f32 %v13259_v1, %v4951_v58  ;;  %9831 = vmatprep.mubr.msk.bf16.mxu1 %vm10205_vm1, %v14920_v56  ;;  %v15344_v1 = vld [vmem:[#allocation63_spill] sm:$0xff]  ;;  %v15347_v20 = vld [vmem:[#allocation106_spill] sm:$0xff] }
 0x590   : > { %v6779_v7 = vmax.f32 %v6777_v18, %v6778_v12  ;;  %v6788_v60 = vrot.slane %v6787_v8, 1  ;;  %v6796_v44 = vrot.slane %v6795_v35, 1  ;;  %v6810_v3 = vrot.slane %v6809_v29, 2 }
 0x591   : > { %v6803_v49 = vmax.f32 %v6801_v23, %v6802_v19  ;;  %v13808_v5 = vsel %vm5310_vm7, %v6818_v53, %v6819_v31  ;;  %v6155_v57 = vadd.f32 %v13813_v52, %v6046_v28  ;;  %v4954_v41 = vadd.f32 %v4953_v39, %v15344_v1  ;;  %v4958_v33 = vpop.f32.mrb[220].mxu1  ;;  %v15346_v53 = vld [vmem:[#allocation67_spill] sm:$0xff]  ;;  %v15348_v28 = vld [vmem:[#allocation60_spill] sm:$0xff] }
 0x592   : > { %v13817_v55 = vpop.f32.mrb[76].mxu0  ;;  %v6780_v17 = vrot.slane %v6779_v7, 1  ;;  %v6789_v59 = vmax.f32 %v6787_v8, %v6788_v60  ;;  %v6797_v9 = vmax.f32 %v6795_v35, %v6796_v44  ;;  %v6811_v0 = vmax.f32 %v6809_v29, %v6810_v3  ;;  %v9725_v27 = vpop.f32.mrb[221].mxu1  ;;  %v6360_v35 = vld [vmem:[%s13514_s23 + $0xd8] sm:$0xff] }
 0x593   : > { %v10045_v2 = vpop.f32.mrb[77].mxu0  ;;  %v6804_v45 = vrot.slane %v6803_v49, 1  ;;  %v6827_v15 = vmax.f32 %v13788_v42, %v13808_v5  ;;  %v6257_v18 = vmax.f32 %v6155_v57, 0.0  ;;  %v6047_v22 = vadd.f32 %v13263_v63, %v4954_v41  ;;  %v4961_v37 = vpop.f32.mrb[222].mxu1  ;;  %v6361_v57 = vld [vmem:[%s13514_s23 + $0xe0] sm:$0xff] }
 0x594   : > { %v13823_v39 = vpop.f32.mrb[78].mxu0  ;;  %v6781_v25 = vmax.f32 %v6779_v7, %v6780_v17  ;;  %6790 = vst.msk [vmem:[#allocation2 + $0x10] sm:$0x1] %vm6569_vm10, %v6789_v59  ;;  %6798 = vst.msk [vmem:[#allocation2 + $0x11] sm:$0x1] %vm6569_vm10, %v6797_v9  ;;  %v6812_v47 = vrot.slane %v6811_v0, 1  ;;  %v4959_v23 = vadd.f32 %v4958_v33, %v15345_v24  ;;  %v4962_v16 = vadd.f32 %v4961_v37, %v15346_v53 }
 0x595   : > { %v9726_v10 = vpop.f32.mrb[223].mxu1  ;;  %v10046_v58 = vpop.f32.mrb[79].mxu0  ;;  %v6805_v42 = vmax.f32 %v6803_v49, %v6804_v45  ;;  %v6461_v12 = vmul.f32 %v6359_v62, %v6257_v18  ;;  %v6156_v63 = vadd.f32 %v13813_v52, %v6047_v22  ;;  %v15349_v59 = vld [vmem:[#allocation69_spill] sm:$0xff]  ;;  %v15350_v37 = vld [vmem:[#allocation108_spill] sm:$0xff] }
 0x596   : > { %6782 = vst.msk [vmem:[#allocation2 + $0xf] sm:$0x1] %vm6569_vm10, %v6781_v25  ;;  %v6813_v8 = vmax.f32 %v6811_v0, %v6812_v47  ;;  %v6048_v29 = vadd.f32 %v13276_v36, %v4959_v23  ;;  %v6049_v19 = vadd.f32 %v15347_v20, %v4962_v16  ;;  %9832 = vmatmul.mubr.msk.bf16.gmra.mrb[72].mxu1 %vm4103_vm6, %v15348_v28  ;;  %v15351_v23 = vld [vmem:[#allocation70_spill] sm:$0xff] }
 0x597   : > { %6806 = vst.msk [vmem:[#allocation2 + $0x12] sm:$0x1] %vm6569_vm10, %v6805_v42  ;;  %v6821_v7 = vrot.slane %v6461_v12, 7  ;;  %v6831_v60 = vrot.slane %v6461_v12, 6  ;;  %v6258_v44 = vmax.f32 %v6156_v63, 0.0  ;;  %9835 = vmatprep.mubr.msk.bf16.mxu1 %vm10205_vm1, %v14920_v56  ;;  %v15352_v12 = vld [vmem:[#allocation64_spill] sm:$0xff] }
 0x598   : > { %6814 = vst.msk [vmem:[#allocation2 + $0x13] sm:$0x1] %vm6569_vm10, %v6813_v8  ;;  %v6157_v3 = vadd.f32 %v13813_v52, %v6048_v29  ;;  %v13849_v45 = vadd.f32 %v13813_v52, %v6049_v19 }
 0x599   : > { %v6822_v49 = vsel %vm5310_vm7, %v6819_v31, %v6821_v7  ;;  %v6839_v36 = vmax.f32 %v6826_v26, %v6831_v60  ;;  %v6462_v5 = vmul.f32 %v6360_v35, %v6258_v44  ;;  %v4966_v1 = vpop.f32.mrb[224].mxu1  ;;  %v15353_v35 = vld [vmem:[#allocation110_spill] sm:$0xff] }
 0x59a   : > { %v13843_v41 = vpop.f32.mrb[80].mxu0  ;;  %v6828_v33 = vmax.f32 %v13796_v50, %v6822_v49  ;;  %v6259_v17 = vmax.f32 %v6157_v3, 0.0  ;;  %v4967_v9 = vadd.f32 %v4966_v1, %v15349_v59  ;;  %v9729_v0 = vpop.f32.mrb[225].mxu1  ;;  %v6260_v8 = vmax.f32 %v13849_v45, 0.0  ;;  %v6363_v49 = vld [vmem:[%s13514_s23 + $0xf0] sm:$0xff] }
 0x59b   : > { %v10049_v62 = vpop.f32.mrb[81].mxu0  ;;  %v6842_v27 = vsel %vm6600_vm13, %v6839_v36, -inf  ;;  %v6832_v2 = vrot.slane %v6462_v5, 6  ;;  %v4969_v31 = vpop.f32.mrb[226].mxu1  ;;  %v6850_v63 = vsel %vm6771_vm2, %v6839_v36, -inf }
 0x59c   : > { %v13851_v26 = vpop.f32.mrb[82].mxu0  ;;  %v6843_v18 = vrot.slane %v6842_v27, 4  ;;  %v6463_v22 = vmul.f32 %v6361_v57, %v6259_v17  ;;  %v6050_v25 = vadd.f32 %v15350_v37, %v4967_v9  ;;  %v9730_v47 = vpop.f32.mrb[227].mxu1  ;;  %v4970_v53 = vadd.f32 %v4969_v31, %v15351_v23  ;;  %v6364_v31 = vld [vmem:[%s13514_s23 + $0xf8] sm:$0xff] }
 0x59d   : > { %v10050_v50 = vpop.f32.mrb[83].mxu0  ;;  %v6833_v24 = vsel %vm1226_vm0, %v6831_v60, %v6832_v2 }
 0x59e   : > { %v6844_v16 = vmax.f32 %v6842_v27, %v6843_v18  ;;  %v6840_v10 = vmax.f32 %v6827_v15, %v6833_v24  ;;  %v6834_v58 = vrot.slane %v6463_v22, 6  ;;  %v6159_v42 = vadd.f32 %v13813_v52, %v6050_v25  ;;  %9836 = vmatmul.mubr.msk.bf16.gmra.mrb[76].mxu1 %vm4103_vm6, %v15352_v12  ;;  %v15354_v18 = vld [vmem:[#allocation72_spill] sm:$0xff]  ;;  %v6362_v12 = vld [vmem:[%s13514_s23 + $0xe8] sm:$0xff] }
 0x59f   : > { %v6051_v29 = vadd.f32 %v15353_v35, %v4970_v53  ;;  %9839 = vmatprep.mubr.msk.bf16.mxu1 %vm10205_vm1, %v14920_v56 }
 0x5a0   : > { %v6845_v20 = vrot.slane %v6844_v16, 2  ;;  %v6851_v19 = vsel %vm6773_vm3, %v6840_v10, -inf  ;;  %v6860_v15 = vsel %vm6701_vm15, %v6840_v10, -inf  ;;  %v6868_v28 = vsel %vm6636_vm14, %v6840_v10, -inf }
 0x5a1   : > { %v6852_v7 = vmax.f32 %v6850_v63, %v6851_v19  ;;  %v6861_v60 = vrot.slane %v6860_v15, 4  ;;  %v6869_v44 = vrot.slane %v6868_v28, 4  ;;  %v6835_v3 = vsel %vm1226_vm0, %v6832_v2, %v6834_v58  ;;  %v4974_v36 = vpop.f32.mrb[228].mxu1 }
 0x5a2   : > { %v13869_v5 = vpop.f32.mrb[84].mxu0  ;;  %v6846_v57 = vmax.f32 %v6844_v16, %v6845_v20  ;;  %v6841_v1 = vmax.f32 %v6828_v33, %v6835_v3  ;;  %v6261_v17 = vmax.f32 %v6159_v42, 0.0  ;;  %v6160_v59 = vadd.f32 %v13813_v52, %v6051_v29  ;;  %v9733_v9 = vpop.f32.mrb[229].mxu1  ;;  %v15355_v20 = vld [vmem:[#allocation112_spill] sm:$0xff] }
 0x5a3   : > { %v10053_v0 = vpop.f32.mrb[85].mxu0  ;;  %v6853_v62 = vrot.slane %v6852_v7, 4  ;;  %v6862_v27 = vmax.f32 %v6860_v15, %v6861_v60  ;;  %v6870_v45 = vmax.f32 %v6868_v28, %v6869_v44  ;;  %v4975_v37 = vadd.f32 %v4974_v36, %v15354_v18  ;;  %v4977_v25 = vpop.f32.mrb[230].mxu1  ;;  %v15356_v15 = vld [vmem:[#allocation68_spill] sm:$0xff]  ;;  %v15357_v18 = vld [vmem:[#allocation73_spill] sm:$0xff] }
 0x5a4   : > { %v13874_v2 = vpop.f32.mrb[86].mxu0  ;;  %v6847_v47 = vrot.slane %v6846_v57, 1  ;;  %v6876_v50 = vsel %vm6561_vm8, %v6841_v1, -inf  ;;  %v6465_v24 = vmul.f32 %v6363_v49, %v6261_v17  ;;  %v6262_v33 = vmax.f32 %v6160_v59, 0.0  ;;  %v9734_v23 = vpop.f32.mrb[231].mxu1  ;;  %v6365_v0 = vld [vmem:[%s13514_s23 + $0x100] sm:$0xff] }
 0x5a5   : > { %v10054_v53 = vpop.f32.mrb[87].mxu0  ;;  %v6854_v16 = vmax.f32 %v6852_v7, %v6853_v62  ;;  %v6863_v10 = vrot.slane %v6862_v27, 2  ;;  %v6871_v58 = vrot.slane %v6870_v45, 2  ;;  %v6877_v42 = vrot.slane %v6876_v50, 4 }
 0x5a6   : > { %v6848_v63 = vmax.f32 %v6846_v57, %v6847_v47  ;;  %v6886_v35 = vrot.slane %v6465_v24, 7  ;;  %v6466_v29 = vmul.f32 %v6364_v31, %v6262_v33  ;;  %v6052_v19 = vadd.f32 %v15355_v20, %v4975_v37  ;;  %9840 = vmatmul.mubr.msk.bf16.gmra.mrb[80].mxu1 %vm4103_vm6, %v15356_v15 }
 0x5a7   : > { %v6855_v28 = vrot.slane %v6854_v16, 2  ;;  %v6864_v60 = vmax.f32 %v6862_v27, %v6863_v10  ;;  %v6872_v44 = vmax.f32 %v6870_v45, %v6871_v58  ;;  %v6878_v3 = vmax.f32 %v6876_v50, %v6877_v42  ;;  %9843 = vmatprep.mubr.msk.bf16.mxu1 %vm10205_vm1, %v14920_v56 }
 0x5a8   : > { %6849 = vst.msk [vmem:[#allocation2 + $0x14] sm:$0x1] %vm6569_vm10, %v6848_v63  ;;  %v13884_v7 = vmul.f32 %v6362_v12, %v6260_v8  ;;  %v6891_v49 = vmax.f32 %v6463_v22, %v6886_v35  ;;  %v6887_v36 = vrot.slane %v6466_v29, 7  ;;  %v6161_v57 = vadd.f32 %v13813_v52, %v6052_v19  ;;  %v15358_v8 = vld [vmem:[#allocation75_spill] sm:$0xff]  ;;  %v15359_v12 = vld [vmem:[#allocation114_spill] sm:$0xff] }
 0x5a9   : > { %v6856_v1 = vmax.f32 %v6854_v16, %v6855_v28  ;;  %v6865_v17 = vrot.slane %v6864_v60, 1  ;;  %v6873_v59 = vrot.slane %v6872_v44, 1  ;;  %v6879_v9 = vrot.slane %v6878_v3, 2  ;;  %v4982_v62 = vpop.f32.mrb[232].mxu1 }
 0x5aa   : > { %v13888_v27 = vpop.f32.mrb[88].mxu0  ;;  %v13891_v45 = vsel %vm5310_vm7, %v6886_v35, %v6887_v36  ;;  %v6263_v31 = vmax.f32 %v6161_v57, 0.0  ;;  %v4978_v37 = vadd.f32 %v4977_v25, %v15357_v18  ;;  %v4983_v47 = vadd.f32 %v4982_v62, %v15358_v8  ;;  %v9737_v22 = vpop.f32.mrb[233].mxu1  ;;  %v15360_v35 = vld [vmem:[#allocation115_spill] sm:$0xff] }
 0x5ab   : > { %v10057_v50 = vpop.f32.mrb[89].mxu0  ;;  %v6857_v24 = vrot.slane %v6856_v1, 1  ;;  %v6866_v33 = vmax.f32 %v6864_v60, %v6865_v17  ;;  %v6874_v23 = vmax.f32 %v6872_v44, %v6873_v59  ;;  %v6880_v53 = vmax.f32 %v6878_v3, %v6879_v9  ;;  %v4985_v16 = vpop.f32.mrb[234].mxu1  ;;  %v15361_v60 = vld [vmem:[#allocation76_spill] sm:$0xff]  ;;  %v15362_v57 = vld [vmem:[#allocation71_spill] sm:$0xff]  ;;  %v15363_v9 = vld [vmem:[#allocation117_spill] sm:$0xff] }
 0x5ac   : > { %v13895_v10 = vpop.f32.mrb[90].mxu0  ;;  %v6892_v58 = vmax.f32 %v13884_v7, %v13891_v45  ;;  %v6467_v42 = vmul.f32 %v6365_v0, %v6263_v31  ;;  %v6053_v63 = vadd.f32 %v15359_v12, %v4978_v37  ;;  %v6054_v25 = vadd.f32 %v15360_v35, %v4983_v47  ;;  %v9738_v20 = vpop.f32.mrb[235].mxu1  ;;  %v6366_v59 = vld [vmem:[%s13514_s23 + $0x108] sm:$0xff]  ;;  %v6368_v47 = vld [vmem:[%s13514_s23 + $0x118] sm:$0xff] }
 0x5ad   : > { %v10058_v19 = vpop.f32.mrb[91].mxu0  ;;  %v6858_v15 = vmax.f32 %v6856_v1, %v6857_v24  ;;  %6867 = vst.msk [vmem:[#allocation2 + $0x16] sm:$0x1] %vm6569_vm10, %v6866_v33  ;;  %6875 = vst.msk [vmem:[#allocation2 + $0x17] sm:$0x1] %vm6569_vm10, %v6874_v23  ;;  %v6881_v28 = vrot.slane %v6880_v53, 1  ;;  %v4986_v44 = vadd.f32 %v4985_v16, %v15361_v60 }
 0x5ae   : > { %v6895_v3 = vrot.slane %v6466_v29, 6  ;;  %v6896_v36 = vrot.slane %v6467_v42, 6  ;;  %v6162_v7 = vadd.f32 %v13813_v52, %v6053_v63  ;;  %9844 = vmatmul.mubr.msk.bf16.gmra.mrb[84].mxu1 %vm4103_vm6, %v15362_v57  ;;  %v6163_v1 = vadd.f32 %v13813_v52, %v6054_v25  ;;  %v15364_v22 = vld [vmem:[#allocation78_spill] sm:$0xff]  ;;  %v6367_v20 = vld [vmem:[%s13514_s23 + $0x110] sm:$0xff] }
 0x5af   : > { %6859 = vst.msk [vmem:[#allocation2 + $0x15] sm:$0x1] %vm6569_vm10, %v6858_v15  ;;  %v6882_v17 = vmax.f32 %v6880_v53, %v6881_v28  ;;  %v6055_v0 = vadd.f32 %v15363_v9, %v4986_v44  ;;  %9847 = vmatprep.mubr.msk.bf16.mxu1 %vm10205_vm1, %v14920_v56  ;;  %v15366_v19 = vld [vmem:[#allocation118_spill] sm:$0xff] }
 0x5b0   : > { %v6897_v29 = vsel %vm1226_vm0, %v6895_v3, %v6896_v36  ;;  %v6264_v62 = vmax.f32 %v6162_v7, 0.0  ;;  %v6265_v16 = vmax.f32 %v6163_v1, 0.0  ;;  %v15367_v3 = vld [vmem:[#allocation79_spill] sm:$0xff]  ;;  %v15368_v9 = vld [vmem:[#allocation74_spill] sm:$0xff] }
 0x5b1   : > { %6883 = vst.msk [vmem:[#allocation2 + $0x18] sm:$0x1] %vm6569_vm10, %v6882_v17  ;;  %v6902_v45 = vmax.f32 %v6891_v49, %v6897_v29  ;;  %v6164_v31 = vadd.f32 %v13813_v52, %v6055_v0  ;;  %v4990_v18 = vpop.f32.mrb[236].mxu1 }
 0x5b2   : > { %v13916_v37 = vpop.f32.mrb[92].mxu0  ;;  %v6468_v8 = vmul.f32 %v6366_v59, %v6264_v62  ;;  %v4991_v50 = vadd.f32 %v4990_v18, %v15364_v22  ;;  %v9741_v24 = vpop.f32.mrb[237].mxu1  ;;  %v13933_v29 = vmul.f32 %v6367_v20, %v6265_v16 }
 0x5b3   : > { %v10061_v33 = vpop.f32.mrb[93].mxu0  ;;  %v6904_v23 = vsel %vm6591_vm12, %v6902_v45, -inf  ;;  %v6912_v53 = vsel %vm6600_vm13, %v6902_v45, -inf  ;;  %v6266_v42 = vmax.f32 %v6164_v31, 0.0  ;;  %v4993_v12 = vpop.f32.mrb[238].mxu1  ;;  %v15369_v31 = vld [vmem:[#allocation120_spill] sm:$0xff] }
 0x5b4   : > { %v13922_v49 = vpop.f32.mrb[94].mxu0  ;;  %v6905_v63 = vrot.slane %v6904_v23, 4  ;;  %v6913_v35 = vrot.slane %v6912_v53, 4  ;;  %v6898_v25 = vrot.slane %v6468_v8, 6  ;;  %v6056_v15 = vadd.f32 %v15366_v19, %v4991_v50  ;;  %v9742_v28 = vpop.f32.mrb[239].mxu1  ;;  %v6369_v24 = vld [vmem:[%s13514_s23 + $0x120] sm:$0xff] }
 0x5b5   : > { %15365 = vst [vmem:[#allocation31_spill] sm:$0xff] %v13922_v49  ;;  %v10062_v60 = vpop.f32.mrb[95].mxu0  ;;  %v13926_v44 = vmul.f32 %v6368_v47, %v6266_v42  ;;  %v4994_v7 = vadd.f32 %v4993_v12, %v15367_v3  ;;  %v6920_v50 = vsel %vm6771_vm2, %v6902_v45, -inf  ;;  %v15442_v49 = vld [vmem:[#allocation50_spill] sm:$0xff] }
 0x5b6   : > { %v6906_v57 = vmax.f32 %v6904_v23, %v6905_v63  ;;  %v6914_v17 = vmax.f32 %v6912_v53, %v6913_v35  ;;  %v6899_v59 = vsel %vm1226_vm0, %v6896_v36, %v6898_v25  ;;  %v6165_v1 = vadd.f32 %v13813_v52, %v6056_v15  ;;  %9848 = vmatmul.mubr.msk.bf16.gmra.mrb[88].mxu1 %vm4103_vm6, %v15368_v9  ;;  %v15371_v60 = vld [vmem:[#allocation81_spill] sm:$0xff] }
 0x5b7   : > { %v6903_v0 = vmax.f32 %v6892_v58, %v6899_v59  ;;  %v6949_v62 = vrot.slane %v13926_v44, 7  ;;  %v6057_v18 = vadd.f32 %v15369_v31, %v4994_v7  ;;  %9851 = vmatprep.mubr.msk.bf16.mxu1 %vm10205_vm1, %v14920_v56 }
 0x5b8   : > { %v6907_v47 = vrot.slane %v6906_v57, 2  ;;  %v6915_v22 = vrot.slane %v6914_v17, 2  ;;  %v6267_v36 = vmax.f32 %v6165_v1, 0.0 }
 0x5b9   : > { %v6921_v33 = vsel %vm6773_vm3, %v6903_v0, -inf  ;;  %v6930_v23 = vsel %vm6701_vm15, %v6903_v0, -inf  ;;  %v6938_v58 = vsel %vm6636_vm14, %v6903_v0, -inf  ;;  %v6957_v53 = vmax.f32 %v6468_v8, %v6949_v62  ;;  %v4998_v16 = vpop.f32.mrb[240].mxu1 }
 0x5ba   : > { %v13944_v42 = vpop.f32.mrb[96].mxu0  ;;  %v6908_v12 = vmax.f32 %v6906_v57, %v6907_v47  ;;  %v6916_v63 = vmax.f32 %v6914_v17, %v6915_v22  ;;  %v6922_v35 = vmax.f32 %v6920_v50, %v6921_v33  ;;  %v6931_v25 = vrot.slane %v6930_v23, 4  ;;  %v9745_v20 = vpop.f32.mrb[241].mxu1  ;;  %v6370_v57 = vld [vmem:[%s13514_s23 + $0x128] sm:$0xff]  ;;  %v15373_v33 = vld [vmem:[#allocation121_spill] sm:$0xff] }
 0x5bb   : > { %15370 = vst [vmem:[#allocation33_spill] sm:$0xff] %v13944_v42  ;;  %v10065_v19 = vpop.f32.mrb[97].mxu0  ;;  %v6939_v45 = vrot.slane %v6938_v58, 4  ;;  %v6471_v15 = vmul.f32 %v6369_v24, %v6267_v36  ;;  %v6166_v28 = vadd.f32 %v13813_v52, %v6057_v18  ;;  %v4999_v3 = vadd.f32 %v4998_v16, %v15371_v60  ;;  %v5001_v7 = vpop.f32.mrb[242].mxu1 }
 0x5bc   : > { %v13948_v59 = vpop.f32.mrb[98].mxu0  ;;  %v6909_v8 = vrot.slane %v6908_v12, 1  ;;  %v6917_v1 = vrot.slane %v6916_v63, 1  ;;  %v6923_v9 = vrot.slane %v6922_v35, 4  ;;  %v6932_v0 = vmax.f32 %v6930_v23, %v6931_v25  ;;  %v9746_v31 = vpop.f32.mrb[243].mxu1  ;;  %v15374_v19 = vld [vmem:[#allocation77_spill] sm:$0xff] }
 0x5bd   : > { %15372 = vst [vmem:[#allocation34_spill] sm:$0xff] %v13948_v59  ;;  %v10066_v17 = vpop.f32.mrb[99].mxu0  ;;  %v6940_v47 = vmax.f32 %v6938_v58, %v6939_v45  ;;  %v6950_v22 = vrot.slane %v6471_v15, 7  ;;  %v6268_v50 = vmax.f32 %v6166_v28, 0.0  ;;  %v6058_v20 = vadd.f32 %v15373_v33, %v4999_v3  ;;  %v15375_v45 = vld [vmem:[#allocation82_spill] sm:$0xff]  ;;  %v15378_v33 = vld [vmem:[#allocation83_spill] sm:$0xff] }
 0x5be   : > { %v6910_v36 = vmax.f32 %v6908_v12, %v6909_v8  ;;  %v6918_v18 = vmax.f32 %v6916_v63, %v6917_v1  ;;  %v6924_v24 = vmax.f32 %v6922_v35, %v6923_v9  ;;  %v6933_v16 = vrot.slane %v6932_v0, 2  ;;  %9852 = vmatmul.mubr.msk.bf16.gmra.mrb[92].mxu1 %vm4103_vm6, %v15374_v19  ;;  %v6371_v35 = vld [vmem:[%s13514_s23 + $0x130] sm:$0xff] }
 0x5bf   : > { %v6941_v60 = vrot.slane %v6940_v47, 2  ;;  %v6951_v59 = vsel %vm5310_vm7, %v6949_v62, %v6950_v22  ;;  %v6472_v23 = vmul.f32 %v6370_v57, %v6268_v50  ;;  %v6167_v25 = vadd.f32 %v13813_v52, %v6058_v20  ;;  %9855 = vmatprep.mubr.msk.bf16.mxu1 %vm10205_vm1, %v14920_v56  ;;  %v15377_v17 = vld [vmem:[#allocation123_spill] sm:$0xff] }
 0x5c0   : > { %6911 = vst.msk [vmem:[#allocation2 + $0x19] sm:$0x1] %vm6569_vm10, %v6910_v36  ;;  %6919 = vst.msk [vmem:[#allocation2 + $0x1a] sm:$0x1] %vm6569_vm10, %v6918_v18  ;;  %v6925_v58 = vrot.slane %v6924_v24, 2  ;;  %v6934_v12 = vmax.f32 %v6932_v0, %v6933_v16  ;;  %v6958_v63 = vmax.f32 %v13933_v29, %v6951_v59  ;;  %v5002_v15 = vadd.f32 %v5001_v7, %v15375_v45 }
 0x5c1   : > { %v6942_v28 = vmax.f32 %v6940_v47, %v6941_v60  ;;  %v6952_v3 = vrot.slane %v6472_v23, 7  ;;  %v6962_v62 = vrot.slane %v6472_v23, 6  ;;  %v6269_v8 = vmax.f32 %v6167_v25, 0.0  ;;  %v5006_v1 = vpop.f32.mrb[244].mxu1 }
 0x5c2   : > { %v13963_v9 = vpop.f32.mrb[100].mxu0  ;;  %v6926_v57 = vmax.f32 %v6924_v24, %v6925_v58  ;;  %v6935_v31 = vrot.slane %v6934_v12, 1  ;;  %v6059_v50 = vadd.f32 %v15377_v17, %v5002_v15  ;;  %v5007_v20 = vadd.f32 %v5006_v1, %v15378_v33  ;;  %v9749_v36 = vpop.f32.mrb[245].mxu1  ;;  %v6372_v1 = vld [vmem:[%s13514_s23 + $0x138] sm:$0xff] }
 0x5c3   : > { %15376 = vst [vmem:[#allocation36_spill] sm:$0xff] %v13963_v9  ;;  %v10069_v0 = vpop.f32.mrb[101].mxu0  ;;  %v6943_v29 = vrot.slane %v6942_v28, 1  ;;  %v6953_v59 = vsel %vm5310_vm7, %v6950_v22, %v6952_v3  ;;  %v6970_v7 = vmax.f32 %v6957_v53, %v6962_v62  ;;  %v6473_v47 = vmul.f32 %v6371_v35, %v6269_v8  ;;  %v5009_v18 = vpop.f32.mrb[246].mxu1  ;;  %v15380_v17 = vld [vmem:[#allocation125_spill] sm:$0xff]  ;;  %v15381_v22 = vld [vmem:[#allocation84_spill] sm:$0xff] }
 0x5c4   : > { %v13968_v16 = vpop.f32.mrb[102].mxu0  ;;  %v6927_v19 = vrot.slane %v6926_v57, 1  ;;  %v6936_v60 = vmax.f32 %v6934_v12, %v6935_v31  ;;  %v6959_v24 = vmax.f32 %v13926_v44, %v6953_v59  ;;  %v6168_v23 = vadd.f32 %v13813_v52, %v6059_v50  ;;  %v9750_v25 = vpop.f32.mrb[247].mxu1  ;;  %v15382_v3 = vld [vmem:[#allocation80_spill] sm:$0xff] }
 0x5c5   : > { %15379 = vst [vmem:[#allocation37_spill] sm:$0xff] %v13968_v16  ;;  %v10070_v58 = vpop.f32.mrb[103].mxu0  ;;  %v6944_v45 = vmax.f32 %v6942_v28, %v6943_v29  ;;  %v6963_v15 = vrot.slane %v6473_v47, 6  ;;  %v6060_v33 = vadd.f32 %v15380_v17, %v5007_v20  ;;  %v5010_v35 = vadd.f32 %v5009_v18, %v15381_v22  ;;  %v15386_v17 = vld [vmem:[#allocation86_spill] sm:$0xff] }
 0x5c6   : > { %v6928_v36 = vmax.f32 %v6926_v57, %v6927_v19  ;;  %6937 = vst.msk [vmem:[#allocation2 + $0x1c] sm:$0x1] %vm6569_vm10, %v6936_v60  ;;  %v6270_v53 = vmax.f32 %v6168_v23, 0.0  ;;  %9856 = vmatmul.mubr.msk.bf16.gmra.mrb[96].mxu1 %vm4103_vm6, %v15382_v3  ;;  %v15383_v57 = vld [vmem:[#allocation127_spill] sm:$0xff]  ;;  %v6973_v50 = vsel %vm6580_vm11, %v6970_v7, -inf }
 0x5c7   : > { %6945 = vst.msk [vmem:[#allocation2 + $0x1d] sm:$0x1] %vm6569_vm10, %v6944_v45  ;;  %v6964_v44 = vsel %vm1226_vm0, %v6962_v62, %v6963_v15  ;;  %9859 = vmatprep.mubr.msk.bf16.mxu1 %vm10205_vm1, %v14920_v56  ;;  %v13986_v8 = vadd.f32 %v13813_v52, %v6060_v33  ;;  %v6061_v31 = vadd.f32 %v15383_v57, %v5010_v35  ;;  %v6374_v57 = vld [vmem:[%s13514_s23 + $0x148] sm:$0xff] }
 0x5c8   : > { %6929 = vst.msk [vmem:[#allocation2 + $0x1b] sm:$0x1] %vm6569_vm10, %v6928_v36  ;;  %v6971_v12 = vmax.f32 %v6958_v63, %v6964_v44  ;;  %v13983_v28 = vmul.f32 %v6372_v1, %v6270_v53 }
 0x5c9   : > { %v5014_v20 = vpop.f32.mrb[248].mxu1  ;;  %v6170_v1 = vadd.f32 %v13813_v52, %v6061_v31 }
 0x5ca   : > { %v13990_v0 = vpop.f32.mrb[104].mxu0  ;;  %v6974_v62 = vsel %vm6569_vm10, %v6971_v12, -inf  ;;  %v6983_v29 = vsel %vm6591_vm12, %v6971_v12, -inf  ;;  %v6991_v59 = vsel %vm6600_vm13, %v6971_v12, -inf  ;;  %v6965_v63 = vrot.slane %v13983_v28, 6  ;;  %v9753_v47 = vpop.f32.mrb[249].mxu1 }
 0x5cb   : > { %15384 = vst [vmem:[#allocation39_spill] sm:$0xff] %v13990_v0  ;;  %v10073_v18 = vpop.f32.mrb[105].mxu0  ;;  %v6975_v19 = vmax.f32 %v6973_v50, %v6974_v62  ;;  %v6984_v60 = vrot.slane %v6983_v29, 4  ;;  %v6992_v23 = vrot.slane %v6991_v59, 4  ;;  %v5017_v25 = vpop.f32.mrb[250].mxu1  ;;  %v5015_v33 = vadd.f32 %v5014_v20, %v15386_v17  ;;  %v15387_v47 = vld [vmem:[#allocation128_spill] sm:$0xff] }
 0x5cc   : > { %v13996_v58 = vpop.f32.mrb[106].mxu0  ;;  %v6966_v7 = vsel %vm1226_vm0, %v6963_v15, %v6965_v63  ;;  %v9754_v36 = vpop.f32.mrb[251].mxu1  ;;  %v6999_v50 = vsel %vm6771_vm2, %v6971_v12, -inf  ;;  %v6272_v62 = vmax.f32 %v6170_v1, 0.0  ;;  %v15389_v63 = vld [vmem:[#allocation7_spill] sm:$0xff] }
 0x5cd   : > { %15385 = vst [vmem:[#allocation40_spill] sm:$0xff] %v13996_v58  ;;  %v10074_v53 = vpop.f32.mrb[107].mxu0  ;;  %v6976_v22 = vrot.slane %v6975_v19, 4  ;;  %v6985_v35 = vmax.f32 %v6983_v29, %v6984_v60  ;;  %v6993_v3 = vmax.f32 %v6991_v59, %v6992_v23  ;;  %v6972_v44 = vmax.f32 %v6959_v24, %v6966_v7  ;;  %v15388_v58 = vld [vmem:[#allocation87_spill] sm:$0xff] }
 0x5ce   : > { %v6062_v18 = vadd.f32 %v15387_v47, %v5015_v33  ;;  %v5018_v15 = vadd.f32 %v5017_v25, %v15388_v58  ;;  %9860 = vmatmul.mubr.msk.bf16.gmra.mrb[100].mxu1 %vm4103_vm6, %v15389_v63  ;;  %v14012_v29 = vmul.f32 %v6374_v57, %v6272_v62  ;;  %v6375_v7 = vld [vmem:[%s13514_s23 + $0x150] sm:$0xff] }
 0x5cf   : > { %v6977_v31 = vmax.f32 %v6975_v19, %v6976_v22  ;;  %v6986_v20 = vrot.slane %v6985_v35, 2  ;;  %v6994_v17 = vrot.slane %v6993_v3, 2  ;;  %v7000_v36 = vsel %vm6773_vm3, %v6972_v44, -inf  ;;  %9863 = vmatprep.mubr.msk.bf16.mxu1 %vm10205_vm1, %v14920_v56 }
 0x5d0   : > { %v7001_v24 = vmax.f32 %v6999_v50, %v7000_v36  ;;  %v7009_v12 = vsel %vm6701_vm15, %v6972_v44, -inf  ;;  %v6171_v59 = vadd.f32 %v13813_v52, %v6062_v18  ;;  %v7020_v53 = vrot.slane %v14012_v29, 7  ;;  %v15391_v50 = vld [vmem:[#allocation130_spill] sm:$0xff] }
 0x5d1   : > { %v6978_v60 = vrot.slane %v6977_v31, 2  ;;  %v6987_v23 = vmax.f32 %v6985_v35, %v6986_v20  ;;  %v6995_v25 = vmax.f32 %v6993_v3, %v6994_v17  ;;  %v7010_v58 = vrot.slane %v7009_v12, 4  ;;  %v5022_v19 = vpop.f32.mrb[252].mxu1  ;;  %v6373_v36 = vld [vmem:[%s13514_s23 + $0x140] sm:$0xff] }
 0x5d2   : > { %v14016_v1 = vpop.f32.mrb[108].mxu0  ;;  %v7002_v33 = vrot.slane %v7001_v24, 4  ;;  %v6273_v22 = vmax.f32 %v6171_v59, 0.0  ;;  %v6063_v47 = vadd.f32 %v15391_v50, %v5018_v15  ;;  %v9757_v44 = vpop.f32.mrb[253].mxu1  ;;  %v7028_v45 = vmax.f32 %v13983_v28, %v7020_v53 }
 0x5d3   : > { %15390 = vst [vmem:[#allocation42_spill] sm:$0xff] %v14016_v1  ;;  %v10077_v57 = vpop.f32.mrb[109].mxu0  ;;  %v6979_v62 = vmax.f32 %v6977_v31, %v6978_v60  ;;  %v6988_v63 = vrot.slane %v6987_v23, 1  ;;  %v6996_v18 = vrot.slane %v6995_v25, 1  ;;  %v7011_v35 = vmax.f32 %v7009_v12, %v7010_v58  ;;  %v5025_v3 = vpop.f32.mrb[254].mxu1  ;;  %v6376_v60 = vld [vmem:[%s13514_s23 + $0x158] sm:$0xff] }
 0x5d4   : > { %v14020_v20 = vpop.f32.mrb[110].mxu0  ;;  %v7003_v17 = vmax.f32 %v7001_v24, %v7002_v33  ;;  %v6477_v1 = vmul.f32 %v6375_v7, %v6273_v22  ;;  %v6172_v0 = vadd.f32 %v13813_v52, %v6063_v47  ;;  %v9758_v59 = vpop.f32.mrb[255].mxu1  ;;  %v15393_v58 = vld [vmem:[#allocation88_spill] sm:$0xff]  ;;  %v15397_v33 = vld [vmem:[#allocation131_spill] sm:$0xff] }
 0x5d5   : > { %15392 = vst [vmem:[#allocation43_spill] sm:$0xff] %v14020_v20  ;;  %v10078_v16 = vpop.f32.mrb[111].mxu0  ;;  %v6980_v15 = vrot.slane %v6979_v62, 1  ;;  %v6989_v50 = vmax.f32 %v6987_v23, %v6988_v63  ;;  %v6997_v44 = vmax.f32 %v6995_v25, %v6996_v18  ;;  %v7012_v31 = vrot.slane %v7011_v35, 2  ;;  %v15394_v20 = vld [vmem:[#allocation85_spill] sm:$0xff] }
 0x5d6   : > { %v7004_v57 = vrot.slane %v7003_v17, 2  ;;  %v7021_v9 = vrot.slane %v6477_v1, 7  ;;  %v6274_v12 = vmax.f32 %v6172_v0, 0.0  ;;  %v5023_v42 = vadd.f32 %v5022_v19, %v15393_v58  ;;  %9864 = vmatmul.mubr.msk.bf16.gmra.mrb[104].mxu1 %vm4103_vm6, %v15394_v20  ;;  %v15396_v25 = vld [vmem:[#allocation17_spill] sm:$0xff] }
 0x5d7   : > { %v6981_v24 = vmax.f32 %v6979_v62, %v6980_v15  ;;  %6990 = vst.msk [vmem:[#allocation2 + $0x1f] sm:$0x1] %vm6569_vm10, %v6989_v50  ;;  %6998 = vst.msk [vmem:[#allocation2 + $0x20] sm:$0x1] %vm6569_vm10, %v6997_v44  ;;  %v7013_v28 = vmax.f32 %v7011_v35, %v7012_v31  ;;  %v15395_v16 = vmax.f32 %v13986_v8, 0.0  ;;  %v5026_v7 = vadd.f32 %v5025_v3, %v15396_v25  ;;  %v15398_v63 = vld [vmem:[#allocation133_spill] sm:$0xff] }
 0x5d8   : > { %9867 = vmatprep.mubr.msk.bf16.mxu1 %vm10205_vm1, %v14920_v56  ;;  %v7005_v0 = vmax.f32 %v7003_v17, %v7004_v57  ;;  %v7022_v19 = vsel %vm5310_vm7, %v7020_v53, %v7021_v9  ;;  %v6478_v1 = vmul.f32 %v6376_v60, %v6274_v12  ;;  %v6064_v22 = vadd.f32 %v15397_v33, %v5023_v42  ;;  %v6377_v17 = vld [vmem:[%s13514_s23 + $0x160] sm:$0xff] }
 0x5d9   : > { %v6475_v23 = vmul.f32 %v6373_v36, %v15395_v16  ;;  %6982 = vst.msk [vmem:[#allocation2 + $0x1e] sm:$0x1] %vm6569_vm10, %v6981_v24  ;;  %v7014_v47 = vrot.slane %v7013_v28, 1  ;;  %v6065_v18 = vadd.f32 %v15398_v63, %v5026_v7  ;;  %v5030_v8 = vpop.f32.mrb[0].mxu1  ;;  %v15399_v15 = vld [vmem:[#allocation89_spill] sm:$0xff]  ;;  %v15400_v24 = vld [vmem:[#allocation134_spill] sm:$0xff] }
 0x5da   : > { %v7006_v35 = vrot.slane %v7005_v0, 1  ;;  %v7023_v20 = vrot.slane %v6478_v1, 7  ;;  %v7032_v3 = vrot.slane %v6478_v1, 6  ;;  %v6173_v36 = vadd.f32 %v13813_v52, %v6064_v22  ;;  %v9761_v56 = vpop.f32.mrb[1].mxu1  ;;  %v15401_v16 = vld [vmem:[#allocation20_spill] sm:$0xff]  ;;  %v6378_v63 = vld [vmem:[%s13514_s23 + $0x168] sm:$0xff] }
 0x5db   : > { %v7029_v62 = vmax.f32 %v6475_v23, %v7022_v19  ;;  %v7015_v59 = vmax.f32 %v7013_v28, %v7014_v47  ;;  %v6174_v53 = vadd.f32 %v13813_v52, %v6065_v18  ;;  %v5031_v50 = vadd.f32 %v5030_v8, %v15399_v15  ;;  %v5033_v42 = vpop.f32.mrb[2].mxu1  ;;  %v15403_v19 = vld [vmem:[#allocation136_spill] sm:$0xff] }
 0x5dc   : > { %v7007_v44 = vmax.f32 %v7005_v0, %v7006_v35  ;;  %v7038_v31 = vmax.f32 %v7028_v45, %v7032_v3  ;;  %v6275_v60 = vmax.f32 %v6173_v36, 0.0  ;;  %v7024_v57 = vsel %vm5310_vm7, %v7021_v9, %v7023_v20  ;;  %v9762_v12 = vpop.f32.mrb[3].mxu1  ;;  %v15402_v45 = vld [vmem:[#allocation14_spill] sm:$0xff] }
 0x5dd   : > { %7016 = vst.msk [vmem:[#allocation2 + $0x22] sm:$0x1] %vm6569_vm10, %v7015_v59  ;;  %v7030_v58 = vmax.f32 %v14012_v29, %v7024_v57  ;;  %v6066_v28 = vadd.f32 %v15400_v24, %v5031_v50  ;;  %v5034_v23 = vadd.f32 %v5033_v42, %v15401_v16  ;;  %v6276_v22 = vmax.f32 %v6174_v53, 0.0  ;;  %v6379_v29 = vld [vmem:[%s13514_s23 + $0x170] sm:$0xff]  ;;  %v15404_v59 = vld [vmem:[#allocation90_spill] sm:$0xff]  ;;  %v6380_v24 = vld [vmem:[%s13514_s23 + $0x178] sm:$0xff] }
 0x5de   : > { %7008 = vst.msk [vmem:[#allocation2 + $0x21] sm:$0x1] %vm6569_vm10, %v7007_v44  ;;  %v7041_v25 = vsel %vm6571_vm9, %v7038_v31, -inf  ;;  %v6479_v7 = vmul.f32 %v6377_v17, %v6275_v60  ;;  %9868 = vmatmul.mubr.msk.bf16.gmra.mrb[108].mxu1 %vm4103_vm6, %v15402_v45  ;;  %v7049_v20 = vsel %vm6580_vm11, %v7038_v31, -inf  ;;  %v15406_v31 = vld [vmem:[#allocation23_spill] sm:$0xff]  ;;  %vm7795_vm1 = vcmask 523264  }
 0x5df   : > { %v7042_v0 = vrot.slane %v7041_v25, 4  ;;  %v6175_v9 = vadd.f32 %v13813_v52, %v6066_v28  ;;  %v6067_v1 = vadd.f32 %v15403_v19, %v5034_v23  ;;  %v14064_v12 = vmul.f32 %v6378_v63, %v6276_v22  ;;  %v15405_v28 = vld [vmem:[#allocation137_spill] sm:$0xff] }
 0x5e0   : > { %v7033_v33 = vrot.slane %v6479_v7, 6 }
 0x5e1   : > { %v7043_v47 = vmax.f32 %v7041_v25, %v7042_v0  ;;  %v6277_v18 = vmax.f32 %v6175_v9, 0.0  ;;  %v6176_v8 = vadd.f32 %v13813_v52, %v6067_v1  ;;  %v5038_v35 = vpop.f32.mrb[4].mxu1 }
 0x5e2   : > { %v7034_v36 = vsel %vm1226_vm0, %v7032_v3, %v7033_v33  ;;  %v7040_v56 = vmax.f32 %v7030_v58, %v7033_v33  ;;  %v5039_v17 = vadd.f32 %v5038_v35, %v15404_v59  ;;  %v9765_v15 = vpop.f32.mrb[5].mxu1  ;;  %v15407_v59 = vld [vmem:[#allocation139_spill] sm:$0xff] }
 0x5e3   : > { %v7044_v50 = vrot.slane %v7043_v47, 2  ;;  %v7039_v42 = vmax.f32 %v7029_v62, %v7034_v36  ;;  %v14061_v44 = vmul.f32 %v6379_v29, %v6277_v18  ;;  %v6278_v53 = vmax.f32 %v6176_v8, 0.0  ;;  %v5041_v60 = vpop.f32.mrb[6].mxu1 }
 0x5e4   : > { %v7076_v57 = vsel %vm6773_vm3, %v7040_v56, -inf  ;;  %v6068_v16 = vadd.f32 %v15405_v28, %v5039_v17  ;;  %v5042_v23 = vadd.f32 %v5041_v60, %v15406_v31  ;;  %v9766_v3 = vpop.f32.mrb[7].mxu1  ;;  %v15408_v31 = vld [vmem:[#allocation91_spill] sm:$0xff] }
 0x5e5   : > { %v7045_v58 = vmax.f32 %v7043_v47, %v7044_v50  ;;  %v7050_v25 = vsel %vm6569_vm10, %v7039_v42, -inf  ;;  %v7059_v7 = vsel %vm6591_vm12, %v7039_v42, -inf  ;;  %v7067_v62 = vsel %vm6600_vm13, %v7039_v42, -inf }
 0x5e6   : > { %v7051_v45 = vmax.f32 %v7049_v20, %v7050_v25  ;;  %v7060_v0 = vrot.slane %v7059_v7, 4  ;;  %v7068_v9 = vrot.slane %v7067_v62, 4  ;;  %v7075_v19 = vsel %vm6771_vm2, %v7039_v42, -inf }
 0x5e7   : > { %v7046_v1 = vrot.slane %v7045_v58, 1  ;;  %v7077_v33 = vmax.f32 %v7075_v19, %v7076_v57  ;;  %v7088_v22 = vrot.slane %v14061_v44, 7  ;;  %v6482_v29 = vmul.f32 %v6380_v24, %v6278_v53  ;;  %v6381_v57 = vld [vmem:[%s13514_s23 + $0x180] sm:$0xff] }
 0x5e8   : > { %v7052_v63 = vrot.slane %v7051_v45, 4  ;;  %v7061_v18 = vmax.f32 %v7059_v7, %v7060_v0  ;;  %v7069_v47 = vmax.f32 %v7067_v62, %v7068_v9  ;;  %v6177_v8 = vadd.f32 %v13813_v52, %v6068_v16 }
 0x5e9   : > { %v7047_v35 = vmax.f32 %v7045_v58, %v7046_v1  ;;  %v7078_v36 = vrot.slane %v7077_v33, 4  ;;  %v7089_v56 = vrot.slane %v6482_v29, 7  ;;  %v6069_v20 = vadd.f32 %v15407_v59, %v5042_v23  ;;  %v5046_v17 = vpop.f32.mrb[8].mxu1  ;;  %v15409_v29 = vld [vmem:[#allocation140_spill] sm:$0xff] }
 0x5ea   : > { %v7053_v15 = vmax.f32 %v7051_v45, %v7052_v63  ;;  %v7062_v50 = vrot.slane %v7061_v18, 2  ;;  %v7070_v42 = vrot.slane %v7069_v47, 2  ;;  %v6279_v60 = vmax.f32 %v6177_v8, 0.0  ;;  %v9769_v28 = vpop.f32.mrb[9].mxu1  ;;  %v6382_v45 = vld [vmem:[%s13514_s23 + $0x188] sm:$0xff] }
 0x5eb   : > { %7048 = vst.msk [vmem:[#allocation2 + $0x23] sm:$0x1] %vm6569_vm10, %v7047_v35  ;;  %v7079_v53 = vmax.f32 %v7077_v33, %v7078_v36  ;;  %v7090_v24 = vsel %vm5310_vm7, %v7088_v22, %v7089_v56  ;;  %v6178_v16 = vadd.f32 %v13813_v52, %v6069_v20  ;;  %v5047_v3 = vadd.f32 %v5046_v17, %v15408_v31  ;;  %v5049_v58 = vpop.f32.mrb[10].mxu1  ;;  %v15410_v35 = vld [vmem:[#allocation26_spill] sm:$0xff] }
 0x5ec   : > { %v7054_v25 = vrot.slane %v7053_v15, 2  ;;  %v7063_v23 = vmax.f32 %v7061_v18, %v7062_v50  ;;  %v7071_v7 = vmax.f32 %v7069_v47, %v7070_v42  ;;  %v7095_v62 = vmax.f32 %v14064_v12, %v7090_v24  ;;  %v9770_v0 = vpop.f32.mrb[11].mxu1  ;;  %v6383_v24 = vld [vmem:[%s13514_s23 + $0x190] sm:$0xff] }
 0x5ed   : > { %v7080_v9 = vrot.slane %v7079_v53, 2  ;;  %v6483_v19 = vmul.f32 %v6381_v57, %v6279_v60  ;;  %v6280_v1 = vmax.f32 %v6178_v16, 0.0  ;;  %v6070_v63 = vadd.f32 %v15409_v29, %v5047_v3  ;;  %v15411_v16 = vld [vmem:[#allocation142_spill] sm:$0xff]  ;;  %v15413_v29 = vld [vmem:[#allocation143_spill] sm:$0xff] }
 0x5ee   : > { %v7055_v33 = vmax.f32 %v7053_v15, %v7054_v25  ;;  %v7064_v22 = vrot.slane %v7063_v23, 1  ;;  %v7072_v8 = vrot.slane %v7071_v7, 1  ;;  %v5050_v36 = vadd.f32 %v5049_v58, %v15410_v35  ;;  %v15412_v25 = vld [vmem:[#allocation92_spill] sm:$0xff] }
 0x5ef   : > { %v7081_v59 = vmax.f32 %v7079_v53, %v7080_v9  ;;  %v7091_v20 = vrot.slane %v6483_v19, 7  ;;  %v7099_v17 = vrot.slane %v6483_v19, 6  ;;  %v6484_v18 = vmul.f32 %v6382_v45, %v6280_v1 }
 0x5f0   : > { %v7056_v47 = vrot.slane %v7055_v33, 1  ;;  %v7065_v50 = vmax.f32 %v7063_v23, %v7064_v22  ;;  %v7073_v12 = vmax.f32 %v7071_v7, %v7072_v8  ;;  %v6179_v42 = vadd.f32 %v13813_v52, %v6070_v63 }
 0x5f1   : > { %v7082_v28 = vrot.slane %v7081_v59, 1  ;;  %v7092_v60 = vsel %vm5310_vm7, %v7089_v56, %v7091_v20  ;;  %v7100_v57 = vrot.slane %v6484_v18, 6  ;;  %v6071_v15 = vadd.f32 %v15411_v16, %v5050_v36  ;;  %v5054_v31 = vpop.f32.mrb[12].mxu1  ;;  %v6385_v16 = vld [vmem:[%s13514_s23 + $0x1a0] sm:$0xff] }
 0x5f2   : > { %v7057_v3 = vmax.f32 %v7055_v33, %v7056_v47  ;;  %7066 = vst.msk [vmem:[#allocation2 + $0x25] sm:$0x1] %vm6569_vm10, %v7065_v50  ;;  %7074 = vst.msk [vmem:[#allocation2 + $0x26] sm:$0x1] %vm6569_vm10, %v7073_v12  ;;  %v7096_v53 = vmax.f32 %v14061_v44, %v7092_v60  ;;  %v6281_v58 = vmax.f32 %v6179_v42, 0.0  ;;  %v5055_v23 = vadd.f32 %v5054_v31, %v15412_v25  ;;  %v9773_v7 = vpop.f32.mrb[13].mxu1 }
 0x5f3   : > { %v7083_v45 = vmax.f32 %v7081_v59, %v7082_v28  ;;  %v7101_v0 = vsel %vm1226_vm0, %v7099_v17, %v7100_v57  ;;  %v6180_v56 = vadd.f32 %v13813_v52, %v6071_v15  ;;  %v5057_v9 = vpop.f32.mrb[14].mxu1  ;;  %v15414_v33 = vld [vmem:[#allocation29_spill] sm:$0xff] }
 0x5f4   : > { %7058 = vst.msk [vmem:[#allocation2 + $0x24] sm:$0x1] %vm6569_vm10, %v7057_v3  ;;  %v7106_v19 = vmax.f32 %v7095_v62, %v7101_v0  ;;  %v6485_v1 = vmul.f32 %v6383_v24, %v6281_v58  ;;  %v6072_v63 = vadd.f32 %v15413_v29, %v5055_v23  ;;  %v5058_v22 = vadd.f32 %v5057_v9, %v15414_v33  ;;  %v9774_v44 = vpop.f32.mrb[15].mxu1  ;;  %v6384_v17 = vld [vmem:[%s13514_s23 + $0x198] sm:$0xff]  ;;  %v14105_v62 = vld [vmem:[%s14855_s5] ss:$0 sm:$0xff] }
 0x5f5   : > { %7084 = vst.msk [vmem:[#allocation2 + $0x27] sm:$0x1] %vm6569_vm10, %v7083_v45  ;;  %v6282_v59 = vmax.f32 %v6180_v56, 0.0  ;;  %v15415_v50 = vld [vmem:[#allocation145_spill] sm:$0xff] }
 0x5f6   : > { %v7108_v8 = vsel %vm6561_vm8, %v7106_v19, -inf  ;;  %v7116_v35 = vsel %vm6571_vm9, %v7106_v19, -inf  ;;  %v7102_v36 = vrot.slane %v6485_v1, 6  ;;  %v6181_v18 = vadd.f32 %v14105_v62, %v6072_v63  ;;  %v15416_v25 = vld [vmem:[#allocation93_spill] sm:$0xff] }
 0x5f7   : > { %v7109_v52 = vrot.slane %v7108_v8, 4  ;;  %v7117_v20 = vrot.slane %v7116_v35, 4  ;;  %v6073_v12 = vadd.f32 %v15415_v50, %v5058_v22  ;;  %v7124_v31 = vsel %vm6580_vm11, %v7106_v19, -inf  ;;  %v6386_v19 = vld [vmem:[%s13514_s23 + $0x1a8] sm:$0xff] }
 0x5f8   : > { %v7103_v47 = vsel %vm1226_vm0, %v7100_v57, %v7102_v36  ;;  %v6283_v24 = vmax.f32 %v6181_v18, 0.0  ;;  %v14112_v3 = vmul.f32 %v6384_v17, %v6282_v59  ;;  %v15417_v17 = vld [vmem:[#allocation146_spill] sm:$0xff] }
 0x5f9   : > { %v7110_v42 = vmax.f32 %v7108_v8, %v7109_v52  ;;  %v7118_v28 = vmax.f32 %v7116_v35, %v7117_v20  ;;  %v7107_v60 = vmax.f32 %v7096_v53, %v7103_v47  ;;  %v5062_v15 = vpop.f32.mrb[16].mxu1  ;;  %v6182_v58 = vadd.f32 %v14105_v62, %v6073_v12 }
 0x5fa   : > { %v5063_v23 = vadd.f32 %v5062_v15, %v15416_v25  ;;  %v9777_v7 = vpop.f32.mrb[17].mxu1  ;;  %v14119_v33 = vmul.f32 %v6385_v16, %v6283_v24 }
 0x5fb   : > { %v7111_v45 = vrot.slane %v7110_v42, 2  ;;  %v7119_v57 = vrot.slane %v7118_v28, 2  ;;  %v7125_v0 = vsel %vm6569_vm10, %v7107_v60, -inf  ;;  %v7134_v56 = vsel %vm6591_vm12, %v7107_v60, -inf  ;;  %v5065_v53 = vpop.f32.mrb[18].mxu1  ;;  %v6387_v7 = vld [vmem:[%s13514_s23 + $0x1b0] sm:$0xff] }
 0x5fc   : > { %v7126_v9 = vmax.f32 %v7124_v31, %v7125_v0  ;;  %v7135_v29 = vrot.slane %v7134_v56, 4  ;;  %v7142_v63 = vsel %vm6600_vm13, %v7107_v60, -inf  ;;  %v9778_v22 = vpop.f32.mrb[19].mxu1  ;;  %v6284_v36 = vmax.f32 %v6182_v58, 0.0 }
 0x5fd   : > { %v7112_v44 = vmax.f32 %v7110_v42, %v7111_v45  ;;  %v7120_v8 = vmax.f32 %v7118_v28, %v7119_v57  ;;  %v7143_v35 = vrot.slane %v7142_v63, 4  ;;  %v7153_v20 = vrot.slane %v14119_v33, 7 }
 0x5fe   : > { %v7127_v59 = vrot.slane %v7126_v9, 4  ;;  %v7136_v52 = vmax.f32 %v7134_v56, %v7135_v29  ;;  %v6074_v18 = vadd.f32 %v15417_v17, %v5063_v23  ;;  %v6488_v15 = vmul.f32 %v6386_v19, %v6284_v36  ;;  %v15418_v29 = vld [vmem:[#allocation32_spill] sm:$0xff] }
 0x5ff   : > { %v7113_v47 = vrot.slane %v7112_v44, 1  ;;  %v7121_v50 = vrot.slane %v7120_v8, 1  ;;  %v7144_v12 = vmax.f32 %v7142_v63, %v7143_v35  ;;  %v7161_v16 = vmax.f32 %v6485_v1, %v7153_v20  ;;  %v15419_v63 = vld [vmem:[#allocation94_spill] sm:$0xff] }
 0x600   : > { %v7128_v60 = vmax.f32 %v7126_v9, %v7127_v59  ;;  %v7137_v24 = vrot.slane %v7136_v52, 2  ;;  %v6183_v31 = vadd.f32 %v14105_v62, %v6074_v18  ;;  %v7154_v58 = vrot.slane %v6488_v15, 7  ;;  %v15420_v18 = vld [vmem:[#allocation148_spill] sm:$0xff]  ;;  %v15422_v15 = vld [vmem:[#allocation35_spill] sm:$0xff] }
 0x601   : > { %v7114_v42 = vmax.f32 %v7112_v44, %v7113_v47  ;;  %v7122_v28 = vmax.f32 %v7120_v8, %v7121_v50  ;;  %v7145_v25 = vrot.slane %v7144_v12, 2  ;;  %v5070_v45 = vpop.f32.mrb[20].mxu1  ;;  %v5066_v23 = vadd.f32 %v5065_v53, %v15418_v29  ;;  %v15421_v47 = vld [vmem:[#allocation62_spill] sm:$0xff]  ;;  %v6388_v29 = vld [vmem:[%s13514_s23 + $0x1b8] sm:$0xff] }
 0x602   : > { %v7129_v57 = vrot.slane %v7128_v60, 2  ;;  %v7138_v0 = vmax.f32 %v7136_v52, %v7137_v24  ;;  %v6285_v56 = vmax.f32 %v6183_v31, 0.0  ;;  %v9781_v22 = vpop.f32.mrb[21].mxu1  ;;  %v7155_v1 = vsel %vm5310_vm7, %v7153_v20, %v7154_v58 }
 0x603   : > { %7115 = vst.msk [vmem:[#allocation2 + $0x28] sm:$0x1] %vm6569_vm10, %v7114_v42  ;;  %7123 = vst.msk [vmem:[#allocation2 + $0x29] sm:$0x1] %vm6569_vm10, %v7122_v28  ;;  %v7146_v9 = vmax.f32 %v7144_v12, %v7145_v25  ;;  %v5071_v19 = vadd.f32 %v5070_v45, %v15419_v63  ;;  %v5073_v44 = vpop.f32.mrb[22].mxu1  ;;  %v7162_v36 = vmax.f32 %v14112_v3, %v7155_v1  ;;  %v15423_v25 = vld [vmem:[#allocation65_spill] sm:$0xff] }
 0x604   : > { %v7130_v8 = vmax.f32 %v7128_v60, %v7129_v57  ;;  %v7139_v35 = vrot.slane %v7138_v0, 1  ;;  %v6489_v59 = vmul.f32 %v6387_v7, %v6285_v56  ;;  %v9782_v52 = vpop.f32.mrb[23].mxu1  ;;  %v6075_v53 = vadd.f32 %v15420_v18, %v5066_v23  ;;  %v6389_v23 = vld [vmem:[%s13514_s23 + $0x1c0] sm:$0xff] }
 0x605   : > { %v7147_v17 = vrot.slane %v7146_v9, 1  ;;  %v6076_v50 = vadd.f32 %v15421_v47, %v5071_v19  ;;  %v5074_v12 = vadd.f32 %v5073_v44, %v15422_v15  ;;  %v15424_v44 = vld [vmem:[#allocation95_spill] sm:$0xff] }
 0x606   : > { %v7131_v24 = vrot.slane %v7130_v8, 1  ;;  %v7140_v20 = vmax.f32 %v7138_v0, %v7139_v35  ;;  %v7156_v31 = vrot.slane %v6489_v59, 7  ;;  %v7166_v42 = vrot.slane %v6489_v59, 6 }
 0x607   : > { %v7148_v28 = vmax.f32 %v7146_v9, %v7147_v17  ;;  %v6184_v60 = vadd.f32 %v14105_v62, %v6075_v53  ;;  %v6185_v3 = vadd.f32 %v14105_v62, %v6076_v50  ;;  %v6077_v7 = vadd.f32 %v15423_v25, %v5074_v12  ;;  %v15425_v17 = vld [vmem:[#allocation22_spill] sm:$0xff] }
 0x608   : > { %v7132_v45 = vmax.f32 %v7130_v8, %v7131_v24  ;;  %7141 = vst.msk [vmem:[#allocation2 + $0x2b] sm:$0x1] %vm6569_vm10, %v7140_v20  ;;  %v7157_v57 = vsel %vm5310_vm7, %v7154_v58, %v7156_v31  ;;  %v7174_v56 = vmax.f32 %v7161_v16, %v7166_v42  ;;  %v6390_v20 = vld [vmem:[%s13514_s23 + $0x1c8] sm:$0xff] }
 0x609   : > { %7149 = vst.msk [vmem:[#allocation2 + $0x2c] sm:$0x1] %vm6569_vm10, %v7148_v28  ;;  %v7163_v0 = vmax.f32 %v14119_v33, %v7157_v57  ;;  %v6286_v22 = vmax.f32 %v6184_v60, 0.0  ;;  %v6287_v9 = vmax.f32 %v6185_v3, 0.0  ;;  %v6186_v1 = vadd.f32 %v14105_v62, %v6077_v7  ;;  %v5078_v63 = vpop.f32.mrb[24].mxu1  ;;  %v15426_v33 = vld [vmem:[#allocation38_spill] sm:$0xff] }
 0x60a   : > { %7133 = vst.msk [vmem:[#allocation2 + $0x2a] sm:$0x1] %vm6569_vm10, %v7132_v45  ;;  %v7177_v19 = vsel %vm6636_vm14, %v7174_v56, -inf  ;;  %v5079_v8 = vadd.f32 %v5078_v63, %v15424_v44  ;;  %v9785_v58 = vpop.f32.mrb[25].mxu1  ;;  %v15427_v28 = vld [vmem:[#allocation19_spill] sm:$0xff] }
 0x60b   : > { %v7178_v16 = vrot.slane %v7177_v19, 4  ;;  %v6490_v35 = vmul.f32 %v6388_v29, %v6286_v22  ;;  %v6491_v59 = vmul.f32 %v6389_v23, %v6287_v9  ;;  %v5081_v52 = vpop.f32.mrb[26].mxu1  ;;  %v6288_v24 = vmax.f32 %v6186_v1, 0.0  ;;  %v6391_v9 = vld [vmem:[%s13514_s23 + $0x1d0] sm:$0xff] }
 0x60c   : > { %v6078_v18 = vadd.f32 %v15425_v17, %v5079_v8  ;;  %v5082_v53 = vadd.f32 %v5081_v52, %v15426_v33  ;;  %v9786_v47 = vpop.f32.mrb[27].mxu1 }
 0x60d   : > { %v7179_v50 = vmax.f32 %v7177_v19, %v7178_v16  ;;  %v7167_v15 = vrot.slane %v6490_v35, 6  ;;  %v7169_v12 = vrot.slane %v6491_v59, 6  ;;  %v14156_v22 = vmul.f32 %v6390_v20, %v6288_v24  ;;  %v6392_v35 = vld [vmem:[%s13514_s23 + $0x1d8] sm:$0xff] }
 0x60e   : > { %v6187_v31 = vadd.f32 %v14105_v62, %v6078_v18  ;;  %v6079_v60 = vadd.f32 %v15427_v28, %v5082_v53  ;;  %v15428_v53 = vld [vmem:[#allocation96_spill] sm:$0xff] }
 0x60f   : > { %v7180_v3 = vrot.slane %v7179_v50, 2  ;;  %v7168_v25 = vsel %vm1226_vm0, %v7166_v42, %v7167_v15  ;;  %v7170_v7 = vsel %vm1226_vm0, %v7167_v15, %v7169_v12 }
 0x610   : > { %v7175_v45 = vmax.f32 %v7162_v36, %v7168_v25  ;;  %v7176_v57 = vmax.f32 %v7163_v0, %v7170_v7  ;;  %v6289_v56 = vmax.f32 %v6187_v31, 0.0  ;;  %v6188_v29 = vadd.f32 %v14105_v62, %v6079_v60 }
 0x611   : > { %v7181_v23 = vmax.f32 %v7179_v50, %v7180_v3  ;;  %v5086_v1 = vpop.f32.mrb[28].mxu1  ;;  %v15429_v3 = vld [vmem:[#allocation24_spill] sm:$0xff] }
 0x612   : > { %v7185_v63 = vsel %vm6561_vm8, %v7175_v45, -inf  ;;  %v7193_v19 = vsel %vm6571_vm9, %v7175_v45, -inf  ;;  %v7201_v44 = vsel %vm6580_vm11, %v7175_v45, -inf  ;;  %v7202_v42 = vsel %vm6569_vm10, %v7176_v57, -inf  ;;  %v9789_v8 = vpop.f32.mrb[29].mxu1 }
 0x613   : > { %v7182_v36 = vrot.slane %v7181_v23, 1  ;;  %v7186_v0 = vrot.slane %v7185_v63, 4  ;;  %v7194_v58 = vrot.slane %v7193_v19, 4  ;;  %v7203_v16 = vmax.f32 %v7201_v44, %v7202_v42  ;;  %v5089_v52 = vpop.f32.mrb[30].mxu1  ;;  %v6393_v8 = vld [vmem:[%s13514_s23 + $0x1e0] sm:$0xff] }
 0x614   : > { %v7211_v17 = vsel %vm6591_vm12, %v7176_v57, -inf  ;;  %v6493_v18 = vmul.f32 %v6391_v9, %v6289_v56  ;;  %v6290_v33 = vmax.f32 %v6188_v29, 0.0  ;;  %v5087_v47 = vadd.f32 %v5086_v1, %v15428_v53  ;;  %v9790_v50 = vpop.f32.mrb[31].mxu1  ;;  %v15430_v56 = vld [vmem:[#allocation41_spill] sm:$0xff] }
 0x615   : > { %v7183_v15 = vmax.f32 %v7181_v23, %v7182_v36  ;;  %v7187_v12 = vmax.f32 %v7185_v63, %v7186_v0  ;;  %v7195_v24 = vmax.f32 %v7193_v19, %v7194_v58  ;;  %v7204_v20 = vrot.slane %v7203_v16, 4  ;;  %v15431_v36 = vld [vmem:[#allocation25_spill] sm:$0xff] }
 0x616   : > { %v7212_v31 = vrot.slane %v7211_v17, 4  ;;  %v7221_v28 = vrot.slane %v6493_v18, 7  ;;  %v6494_v60 = vmul.f32 %v6392_v35, %v6290_v33  ;;  %v6080_v25 = vadd.f32 %v15429_v3, %v5087_v47 }
 0x617   : > { %7184 = vst.msk [vmem:[#allocation2 + $0x2d] sm:$0x1] %vm6569_vm10, %v7183_v15  ;;  %v7188_v7 = vrot.slane %v7187_v12, 2  ;;  %v7196_v45 = vrot.slane %v7195_v24, 2  ;;  %v7205_v57 = vmax.f32 %v7203_v16, %v7204_v20  ;;  %v5090_v29 = vadd.f32 %v5089_v52, %v15430_v56 }
 0x618   : > { %v7213_v9 = vmax.f32 %v7211_v17, %v7212_v31  ;;  %v7227_v1 = vmax.f32 %v6491_v59, %v7221_v28  ;;  %v7222_v44 = vrot.slane %v6494_v60, 7  ;;  %v6189_v23 = vadd.f32 %v14105_v62, %v6080_v25  ;;  %v15432_v31 = vld [vmem:[#allocation97_spill] sm:$0xff] }
 0x619   : > { %v7189_v63 = vmax.f32 %v7187_v12, %v7188_v7  ;;  %v7197_v19 = vmax.f32 %v7195_v24, %v7196_v45  ;;  %v7206_v42 = vrot.slane %v7205_v57, 2  ;;  %v6081_v0 = vadd.f32 %v15431_v36, %v5090_v29  ;;  %v5094_v58 = vpop.f32.mrb[32].mxu1  ;;  %v15433_v45 = vld [vmem:[#allocation44_spill] sm:$0xff] }
 0x61a   : > { %v7214_v35 = vrot.slane %v7213_v9, 2  ;;  %v7223_v33 = vsel %vm5310_vm7, %v7221_v28, %v7222_v44  ;;  %v7229_v53 = vmax.f32 %v6493_v18, %v7222_v44  ;;  %v6291_v16 = vmax.f32 %v6189_v23, 0.0  ;;  %v9793_v47 = vpop.f32.mrb[33].mxu1  ;;  %v6394_v18 = vld [vmem:[%s13514_s23 + $0x1e8] sm:$0xff] }
 0x61b   : > { %v7190_v52 = vrot.slane %v7189_v63, 1  ;;  %v7198_v17 = vrot.slane %v7197_v19, 1  ;;  %v7207_v59 = vmax.f32 %v7205_v57, %v7206_v42  ;;  %v7228_v50 = vmax.f32 %v14156_v22, %v7223_v33  ;;  %v5097_v15 = vpop.f32.mrb[34].mxu1  ;;  %v15434_v57 = vld [vmem:[#allocation21_spill] sm:$0xff] }
 0x61c   : > { %v7215_v12 = vmax.f32 %v7213_v9, %v7214_v35  ;;  %v6495_v24 = vmul.f32 %v6393_v8, %v6291_v16  ;;  %v6190_v20 = vadd.f32 %v14105_v62, %v6081_v0  ;;  %v5095_v60 = vadd.f32 %v5094_v58, %v15432_v31  ;;  %v9794_v3 = vpop.f32.mrb[35].mxu1  ;;  %v15435_v9 = vld [vmem:[#allocation27_spill] sm:$0xff] }
 0x61d   : > { %v7191_v25 = vmax.f32 %v7189_v63, %v7190_v52  ;;  %v7199_v7 = vmax.f32 %v7197_v19, %v7198_v17  ;;  %v7208_v28 = vrot.slane %v7207_v59, 1  ;;  %v5098_v56 = vadd.f32 %v5097_v15, %v15433_v45  ;;  %v6396_v52 = vld [vmem:[%s13514_s23 + $0x1f8] sm:$0xff]  ;;  %v15437_v3 = vld [vmem:[#allocation47_spill] sm:$0xff] }
 0x61e   : > { %v7216_v29 = vrot.slane %v7215_v12, 1  ;;  %v7232_v44 = vrot.slane %v6495_v24, 6  ;;  %v6292_v23 = vmax.f32 %v6190_v20, 0.0  ;;  %v6082_v42 = vadd.f32 %v15434_v57, %v5095_v60  ;;  %v15438_v57 = vld [vmem:[#allocation6_spill] sm:$0xff] }
 0x61f   : > { %7192 = vst.msk [vmem:[#allocation2 + $0x2e] sm:$0x1] %vm6569_vm10, %v7191_v25  ;;  %7200 = vst.msk [vmem:[#allocation2 + $0x2f] sm:$0x1] %vm6569_vm10, %v7199_v7  ;;  %v7209_v22 = vmax.f32 %v7207_v59, %v7208_v28  ;;  %v6083_v8 = vadd.f32 %v15435_v9, %v5098_v56 }
 0x620   : > { %v7217_v36 = vmax.f32 %v7215_v12, %v7216_v29  ;;  %v7238_v63 = vmax.f32 %v7227_v1, %v7232_v44  ;;  %v6496_v19 = vmul.f32 %v6394_v18, %v6292_v23  ;;  %v14188_v47 = vadd.f32 %v14105_v62, %v6082_v42  ;;  %v15436_v12 = vld [vmem:[#allocation98_spill] sm:$0xff] }
 0x621   : > { %7210 = vst.msk [vmem:[#allocation2 + $0x30] sm:$0x1] %vm6569_vm10, %v7209_v22  ;;  %v6192_v0 = vadd.f32 %v14105_v62, %v6083_v8  ;;  %v5102_v58 = vpop.f32.mrb[36].mxu1  ;;  %v15439_v22 = vld [vmem:[#allocation28_spill] sm:$0xff] }
 0x622   : > { %7218 = vst.msk [vmem:[#allocation2 + $0x31] sm:$0x1] %vm6569_vm10, %v7217_v36  ;;  %v7241_v35 = vsel %vm6701_vm15, %v7238_v63, -inf  ;;  %v7249_v33 = vsel %vm6636_vm14, %v7238_v63, -inf  ;;  %v7233_v16 = vrot.slane %v6496_v19, 6  ;;  %v9797_v17 = vpop.f32.mrb[37].mxu1  ;;  %v5103_v24 = vadd.f32 %v5102_v58, %v15436_v12 }
 0x623   : > { %v7242_v59 = vrot.slane %v7241_v35, 4  ;;  %v7250_v1 = vrot.slane %v7249_v33, 4  ;;  %v6294_v15 = vmax.f32 %v6192_v0, 0.0  ;;  %v5105_v20 = vpop.f32.mrb[38].mxu1  ;;  %v6293_v23 = vmax.f32 %v14188_v47, 0.0 }
 0x624   : > { %v7234_v31 = vsel %vm1226_vm0, %v7232_v44, %v7233_v16  ;;  %v7240_v60 = vmax.f32 %v7229_v53, %v7233_v16  ;;  %v5106_v25 = vadd.f32 %v5105_v20, %v15437_v3  ;;  %v9798_v7 = vpop.f32.mrb[39].mxu1  ;;  %v6084_v42 = vadd.f32 %v15438_v57, %v5103_v24  ;;  %v15440_v57 = vld [vmem:[#allocation99_spill] sm:$0xff] }
 0x625   : > { %v7243_v28 = vmax.f32 %v7241_v35, %v7242_v59  ;;  %v7251_v18 = vmax.f32 %v7249_v33, %v7250_v1  ;;  %v7239_v45 = vmax.f32 %v7228_v50, %v7234_v31  ;;  %v14194_v56 = vmul.f32 %v6396_v52, %v6294_v15  ;;  %v6397_v15 = vld [vmem:[%s13514_s23 + $0x200] sm:$0xff] }
 0x626   : > { %v7274_v29 = vsel %vm6569_vm10, %v7240_v60, -inf  ;;  %v6085_v9 = vadd.f32 %v15439_v22, %v5106_v25  ;;  %v6193_v47 = vadd.f32 %v14105_v62, %v6084_v42  ;;  %v6398_v25 = vld [vmem:[%s13514_s23 + $0x208] sm:$0xff] }
 0x627   : > { %v7244_v8 = vrot.slane %v7243_v28, 2  ;;  %v7252_v44 = vrot.slane %v7251_v18, 2  ;;  %v7257_v53 = vsel %vm6561_vm8, %v7239_v45, -inf  ;;  %v7265_v36 = vsel %vm6571_vm9, %v7239_v45, -inf }
 0x628   : > { %v7258_v63 = vrot.slane %v7257_v53, 4  ;;  %v7266_v0 = vrot.slane %v7265_v36, 4  ;;  %v7273_v50 = vsel %vm6580_vm11, %v7239_v45, -inf  ;;  %v7286_v58 = vrot.slane %v14194_v56, 7  ;;  %v6395_v45 = vld [vmem:[%s13514_s23 + $0x1f0] sm:$0xff] }
 0x629   : > { %v7245_v35 = vmax.f32 %v7243_v28, %v7244_v8  ;;  %v7253_v33 = vmax.f32 %v7251_v18, %v7252_v44  ;;  %v7275_v16 = vmax.f32 %v7273_v50, %v7274_v29  ;;  %v5110_v52 = vpop.f32.mrb[40].mxu1  ;;  %v6194_v12 = vadd.f32 %v14105_v62, %v6085_v9 }
 0x62a   : > { %v7259_v17 = vmax.f32 %v7257_v53, %v7258_v63  ;;  %v7267_v59 = vmax.f32 %v7265_v36, %v7266_v0  ;;  %v7294_v1 = vmax.f32 %v6496_v19, %v7286_v58  ;;  %v9801_v24 = vpop.f32.mrb[41].mxu1  ;;  %v6295_v3 = vmax.f32 %v6193_v47, 0.0  ;;  %v15441_v0 = vld [vmem:[#allocation30_spill] sm:$0xff] }
 0x62b   : > { %v7246_v20 = vrot.slane %v7245_v35, 1  ;;  %v7254_v31 = vrot.slane %v7253_v33, 1  ;;  %v7276_v60 = vrot.slane %v7275_v16, 4  ;;  %v5113_v7 = vpop.f32.mrb[42].mxu1  ;;  %v6296_v29 = vmax.f32 %v6194_v12, 0.0 }
 0x62c   : > { %v7260_v28 = vrot.slane %v7259_v17, 2  ;;  %v7268_v18 = vrot.slane %v7267_v59, 2  ;;  %v5111_v42 = vadd.f32 %v5110_v52, %v15440_v57  ;;  %v9802_v22 = vpop.f32.mrb[43].mxu1  ;;  %v6499_v53 = vmul.f32 %v6397_v15, %v6295_v3 }
 0x62d   : > { %v7247_v8 = vmax.f32 %v7245_v35, %v7246_v20  ;;  %v7255_v44 = vmax.f32 %v7253_v33, %v7254_v31  ;;  %v7277_v19 = vmax.f32 %v7275_v16, %v7276_v60  ;;  %v6500_v63 = vmul.f32 %v6398_v25, %v6296_v29 }
 0x62e   : > { %v7261_v36 = vmax.f32 %v7259_v17, %v7260_v28  ;;  %v7269_v9 = vmax.f32 %v7267_v59, %v7268_v18  ;;  %v6086_v50 = vadd.f32 %v15441_v0, %v5111_v42  ;;  %v6497_v24 = vmul.f32 %v6395_v45, %v6293_v23  ;;  %v6399_v28 = vld [vmem:[%s13514_s23 + $0x210] sm:$0xff] }
 0x62f   : > { %7248 = vst.msk [vmem:[#allocation2 + $0x32] sm:$0x1] %vm6569_vm10, %v7247_v8  ;;  %7256 = vst.msk [vmem:[#allocation2 + $0x33] sm:$0x1] %vm6569_vm10, %v7255_v44  ;;  %v7278_v47 = vrot.slane %v7277_v19, 2  ;;  %v7287_v12 = vrot.slane %v6499_v53, 7  ;;  %v5114_v52 = vadd.f32 %v5113_v7, %v15442_v49 }
 0x630   : > { %v7262_v57 = vrot.slane %v7261_v36, 1  ;;  %v7270_v35 = vrot.slane %v7269_v9, 1  ;;  %v7289_v33 = vrot.slane %v6500_v63, 7  ;;  %v7299_v16 = vrot.slane %v6500_v63, 6  ;;  %v15444_v8 = vld [vmem:[#allocation9_spill] sm:$0xff] }
 0x631   : > { %v7279_v15 = vmax.f32 %v7277_v19, %v7278_v47  ;;  %v7288_v17 = vsel %vm5310_vm7, %v7286_v58, %v7287_v12  ;;  %v6195_v59 = vadd.f32 %v14105_v62, %v6086_v50  ;;  %v6087_v20 = vadd.f32 %v13602_v11, %v5114_v52  ;;  %v5118_v31 = vpop.f32.mrb[44].mxu1  ;;  %v15443_v58 = vld [vmem:[#allocation8_spill] sm:$0xff] }
 0x632   : > { %v7263_v60 = vmax.f32 %v7261_v36, %v7262_v57  ;;  %v7271_v3 = vmax.f32 %v7269_v9, %v7270_v35  ;;  %v7295_v25 = vmax.f32 %v6497_v24, %v7288_v17  ;;  %v7290_v23 = vsel %vm5310_vm7, %v7287_v12, %v7289_v33  ;;  %v9805_v49 = vpop.f32.mrb[45].mxu1  ;;  %v6400_v9 = vld [vmem:[%s13514_s23 + $0x218] sm:$0xff] }
 0x633   : > { %v7280_v7 = vrot.slane %v7279_v15, 1  ;;  %v7296_v18 = vmax.f32 %v14194_v56, %v7290_v23  ;;  %v7307_v45 = vmax.f32 %v7294_v1, %v7299_v16  ;;  %v6297_v29 = vmax.f32 %v6195_v59, 0.0  ;;  %v5121_v42 = vpop.f32.mrb[46].mxu1  ;;  %v6401_v59 = vld [vmem:[%s13514_s23 + $0x220] sm:$0xff] }
 0x634   : > { %7264 = vst.msk [vmem:[#allocation2 + $0x34] sm:$0x1] %vm6569_vm10, %v7263_v60  ;;  %7272 = vst.msk [vmem:[#allocation2 + $0x35] sm:$0x1] %vm6569_vm10, %v7271_v3  ;;  %v6196_v11 = vadd.f32 %v14105_v62, %v6087_v20  ;;  %v5119_v22 = vadd.f32 %v5118_v31, %v15443_v58  ;;  %v5122_v44 = vadd.f32 %v5121_v42, %v15444_v8  ;;  %v9806_v19 = vpop.f32.mrb[47].mxu1  ;;  %v15445_v20 = vld [vmem:[#allocation100_spill] sm:$0xff] }
 0x635   : > { %v7281_v53 = vmax.f32 %v7279_v15, %v7280_v7  ;;  %v6501_v36 = vmul.f32 %v6399_v28, %v6297_v29 }
 0x636   : > { %v6298_v63 = vmax.f32 %v6196_v11, 0.0  ;;  %v6088_v56 = vadd.f32 %v13620_v54, %v5119_v22  ;;  %v6089_v1 = vadd.f32 %v13628_v51, %v5122_v44  ;;  %v7310_v54 = vsel %vm6771_vm2, %v7307_v45, -inf  ;;  %v6402_v51 = vld [vmem:[%s13514_s23 + $0x228] sm:$0xff]  ;;  %v15446_v22 = vld [vmem:[#allocation101_spill] sm:$0xff] }
 0x637   : > { %7282 = vst.msk [vmem:[#allocation2 + $0x36] sm:$0x1] %vm6569_vm10, %v7281_v53  ;;  %v7300_v0 = vrot.slane %v6501_v36, 6 }
 0x638   : > { %v6502_v50 = vmul.f32 %v6400_v9, %v6298_v63  ;;  %v6197_v47 = vadd.f32 %v14105_v62, %v6088_v56  ;;  %v6198_v24 = vadd.f32 %v14105_v62, %v6089_v1 }
 0x639   : > { %v7301_v12 = vsel %vm1226_vm0, %v7299_v16, %v7300_v0  ;;  %v5126_v52 = vpop.f32.mrb[48].mxu1 }
 0x63a   : > { %v7308_v57 = vmax.f32 %v7295_v25, %v7301_v12  ;;  %v7302_v35 = vrot.slane %v6502_v50, 6  ;;  %v6299_v33 = vmax.f32 %v6197_v47, 0.0  ;;  %v6300_v15 = vmax.f32 %v6198_v24, 0.0  ;;  %v9809_v17 = vpop.f32.mrb[49].mxu1  ;;  %v6403_v12 = vld [vmem:[%s13514_s23 + $0x230] sm:$0xff] }
 0x63b   : > { %v5127_v31 = vadd.f32 %v5126_v52, %v15445_v20  ;;  %v5129_v60 = vpop.f32.mrb[50].mxu1 }
 0x63c   : > { %v7311_v3 = vsel %vm6773_vm3, %v7308_v57, -inf  ;;  %v7320_v23 = vsel %vm6701_vm15, %v7308_v57, -inf  ;;  %v7328_v28 = vsel %vm6636_vm14, %v7308_v57, -inf  ;;  %v7303_v16 = vsel %vm1226_vm0, %v7300_v0, %v7302_v35  ;;  %v9810_v25 = vpop.f32.mrb[51].mxu1 }
 0x63d   : > { %v7312_v49 = vmax.f32 %v7310_v54, %v7311_v3  ;;  %v7321_v7 = vrot.slane %v7320_v23, 4  ;;  %v7329_v29 = vrot.slane %v7328_v28, 4  ;;  %v7309_v42 = vmax.f32 %v7296_v18, %v7303_v16 }
 0x63e   : > { %v14240_v11 = vmul.f32 %v6401_v59, %v6299_v33  ;;  %v14242_v45 = vmul.f32 %v6402_v51, %v6300_v15  ;;  %v6090_v58 = vadd.f32 %v13646_v13, %v5127_v31  ;;  %v5130_v8 = vadd.f32 %v5129_v60, %v15446_v22 }
 0x63f   : > { %v7313_v44 = vrot.slane %v7312_v49, 4  ;;  %v7322_v19 = vmax.f32 %v7320_v23, %v7321_v7  ;;  %v7330_v53 = vmax.f32 %v7328_v28, %v7329_v29  ;;  %v7336_v36 = vsel %vm6561_vm8, %v7309_v42, -inf  ;;  %v15447_v23 = vld [vmem:[#allocation102_spill] sm:$0xff]  ;;  %v6404_v29 = vld [vmem:[%s13514_s23 + $0x238] sm:$0xff] }
 0x640   : > { %v7337_v9 = vrot.slane %v7336_v36, 4  ;;  %v7344_v63 = vsel %vm6571_vm9, %v7309_v42, -inf  ;;  %v7355_v56 = vrot.slane %v14242_v45, 7  ;;  %v6199_v18 = vadd.f32 %v14105_v62, %v6090_v58 }
 0x641   : > { %v7314_v1 = vmax.f32 %v7312_v49, %v7313_v44  ;;  %v7323_v0 = vrot.slane %v7322_v19, 2  ;;  %v7331_v47 = vrot.slane %v7330_v53, 2  ;;  %v7345_v24 = vrot.slane %v7344_v63, 4  ;;  %v5134_v13 = vpop.f32.mrb[52].mxu1 }
 0x642   : > { %v7338_v52 = vmax.f32 %v7336_v36, %v7337_v9  ;;  %v7363_v57 = vmax.f32 %v6502_v50, %v7355_v56  ;;  %v6301_v35 = vmax.f32 %v6199_v18, 0.0  ;;  %v6091_v33 = vadd.f32 %v13655_v48, %v5130_v8  ;;  %v9813_v15 = vpop.f32.mrb[53].mxu1 }
 0x643   : > { %v7315_v17 = vrot.slane %v7314_v1, 2  ;;  %v7324_v54 = vmax.f32 %v7322_v19, %v7323_v0  ;;  %v7332_v59 = vmax.f32 %v7330_v53, %v7331_v47  ;;  %v7346_v51 = vmax.f32 %v7344_v63, %v7345_v24  ;;  %v5137_v20 = vpop.f32.mrb[54].mxu1  ;;  %v6405_v24 = vld [vmem:[%s13514_s23 + $0x240] sm:$0xff] }
 0x644   : > { %v7339_v31 = vrot.slane %v7338_v52, 2  ;;  %v6505_v60 = vmul.f32 %v6403_v12, %v6301_v35  ;;  %v6200_v3 = vadd.f32 %v14105_v62, %v6091_v33  ;;  %v5135_v28 = vadd.f32 %v5134_v13, %v15447_v23  ;;  %v9814_v16 = vpop.f32.mrb[55].mxu1 }
 0x645   : > { %v7316_v25 = vmax.f32 %v7314_v1, %v7315_v17  ;;  %v7325_v49 = vrot.slane %v7324_v54, 1  ;;  %v7333_v50 = vrot.slane %v7332_v59, 1  ;;  %v7347_v7 = vrot.slane %v7346_v51, 2 }
 0x646   : > { %v7340_v48 = vmax.f32 %v7338_v52, %v7339_v31  ;;  %v7356_v42 = vrot.slane %v6505_v60, 7  ;;  %v6302_v58 = vmax.f32 %v6200_v3, 0.0  ;;  %v6092_v22 = vadd.f32 %v13670_v30, %v5135_v28  ;;  %v15448_v30 = vld [vmem:[#allocation103_spill] sm:$0xff]  ;;  %v15450_v3 = vld [vmem:[#allocation105_spill] sm:$0xff] }
 0x647   : > { %v7317_v8 = vrot.slane %v7316_v25, 1  ;;  %v7326_v44 = vmax.f32 %v7324_v54, %v7325_v49  ;;  %v7334_v19 = vmax.f32 %v7332_v59, %v7333_v50  ;;  %v7348_v53 = vmax.f32 %v7346_v51, %v7347_v7  ;;  %v15449_v59 = vld [vmem:[#allocation104_spill] sm:$0xff]  ;;  %v6406_v7 = vld [vmem:[%s13514_s23 + $0x248] sm:$0xff] }
 0x648   : > { %v7341_v36 = vrot.slane %v7340_v48, 1  ;;  %v7357_v9 = vsel %vm5310_vm7, %v7355_v56, %v7356_v42  ;;  %v6506_v63 = vmul.f32 %v6404_v29, %v6302_v58  ;;  %v6201_v18 = vadd.f32 %v14105_v62, %v6092_v22 }
 0x649   : > { %v7318_v1 = vmax.f32 %v7316_v25, %v7317_v8  ;;  %7327 = vst.msk [vmem:[#allocation2 + $0x38] sm:$0x1] %vm6569_vm10, %v7326_v44  ;;  %7335 = vst.msk [vmem:[#allocation2 + $0x39] sm:$0x1] %vm6569_vm10, %v7334_v19  ;;  %v7349_v0 = vrot.slane %v7348_v53, 1  ;;  %v7364_v47 = vmax.f32 %v14240_v11, %v7357_v9  ;;  %v5138_v12 = vadd.f32 %v5137_v20, %v15448_v30  ;;  %v5142_v13 = vpop.f32.mrb[56].mxu1 }
 0x64a   : > { %v7342_v52 = vmax.f32 %v7340_v48, %v7341_v36  ;;  %v7358_v35 = vrot.slane %v6506_v63, 7  ;;  %v7368_v33 = vrot.slane %v6506_v63, 6  ;;  %v6303_v15 = vmax.f32 %v6201_v18, 0.0  ;;  %v9817_v56 = vpop.f32.mrb[57].mxu1  ;;  %v6408_v36 = vld [vmem:[%s13514_s23 + $0x258] sm:$0xff]  ;;  %v15451_v9 = vld [vmem:[#allocation107_spill] sm:$0xff] }
 0x64b   : > { %7319 = vst.msk [vmem:[#allocation2 + $0x37] sm:$0x1] %vm6569_vm10, %v7318_v1  ;;  %v7350_v17 = vmax.f32 %v7348_v53, %v7349_v0  ;;  %v6093_v54 = vadd.f32 %v13676_v32, %v5138_v12  ;;  %v5143_v51 = vadd.f32 %v5142_v13, %v15449_v59  ;;  %v5145_v31 = vpop.f32.mrb[58].mxu1 }
 0x64c   : > { %7343 = vst.msk [vmem:[#allocation2 + $0x3a] sm:$0x1] %vm6569_vm10, %v7342_v52  ;;  %v7359_v11 = vsel %vm5310_vm7, %v7356_v42, %v7358_v35  ;;  %v7376_v20 = vmax.f32 %v7363_v57, %v7368_v33  ;;  %v6507_v60 = vmul.f32 %v6405_v24, %v6303_v15  ;;  %v5146_v23 = vadd.f32 %v5145_v31, %v15450_v3  ;;  %v9818_v28 = vpop.f32.mrb[59].mxu1 }
 0x64d   : > { %7351 = vst.msk [vmem:[#allocation2 + $0x3b] sm:$0x1] %vm6569_vm10, %v7350_v17  ;;  %v7365_v16 = vmax.f32 %v14242_v45, %v7359_v11  ;;  %v6202_v25 = vadd.f32 %v14105_v62, %v6093_v54  ;;  %v6094_v32 = vadd.f32 %v13691_v40, %v5143_v51 }
 0x64e   : > { %v7379_v49 = vsel %vm6600_vm13, %v7376_v20, -inf  ;;  %v7369_v50 = vrot.slane %v6507_v60, 6  ;;  %v6095_v29 = vadd.f32 %v13699_v43, %v5146_v23  ;;  %v7387_v40 = vsel %vm6771_vm2, %v7376_v20, -inf }
 0x64f   : > { %v7380_v57 = vrot.slane %v7379_v49, 4  ;;  %v6304_v48 = vmax.f32 %v6202_v25, 0.0  ;;  %v6203_v44 = vadd.f32 %v14105_v62, %v6094_v32  ;;  %v6409_v32 = vld [vmem:[%s13514_s23 + $0x260] sm:$0xff] }
 0x650   : > { %v7370_v42 = vsel %vm1226_vm0, %v7368_v33, %v7369_v50  ;;  %v6204_v58 = vadd.f32 %v14105_v62, %v6095_v29 }
 0x651   : > { %v7381_v22 = vmax.f32 %v7379_v49, %v7380_v57  ;;  %v7377_v8 = vmax.f32 %v7364_v47, %v7370_v42  ;;  %v6508_v45 = vmul.f32 %v6406_v7, %v6304_v48  ;;  %v5150_v19 = vpop.f32.mrb[60].mxu1  ;;  %v6305_v15 = vmax.f32 %v6203_v44, 0.0  ;;  %v15452_v49 = vld [vmem:[#allocation109_spill] sm:$0xff] }
 0x652   : > { %v6306_v53 = vmax.f32 %v6204_v58, 0.0  ;;  %v5151_v63 = vadd.f32 %v5150_v19, %v15451_v9  ;;  %v9821_v18 = vpop.f32.mrb[61].mxu1 }
 0x653   : > { %v7382_v43 = vrot.slane %v7381_v22, 2  ;;  %v7388_v1 = vsel %vm6773_vm3, %v7377_v8, -inf  ;;  %v7397_v0 = vsel %vm6701_vm15, %v7377_v8, -inf  ;;  %v7405_v24 = vsel %vm6636_vm14, %v7377_v8, -inf  ;;  %v5153_v30 = vpop.f32.mrb[62].mxu1  ;;  %v6407_v8 = vld [vmem:[%s13514_s23 + $0x250] sm:$0xff] }
 0x654   : > { %v7389_v47 = vmax.f32 %v7387_v40, %v7388_v1  ;;  %v7398_v12 = vrot.slane %v7397_v0, 4  ;;  %v7406_v13 = vrot.slane %v7405_v24, 4  ;;  %v7371_v52 = vrot.slane %v6508_v45, 6  ;;  %v9822_v35 = vpop.f32.mrb[63].mxu1 }
 0x655   : > { %v7383_v33 = vmax.f32 %v7381_v22, %v7382_v43  ;;  %v6510_v56 = vmul.f32 %v6408_v36, %v6306_v53  ;;  %v6096_v17 = vadd.f32 %v13721_v46, %v5151_v63  ;;  %v5154_v7 = vadd.f32 %v5153_v30, %v15452_v49  ;;  %v15453_v53 = vld [vmem:[#allocation111_spill] sm:$0xff] }
 0x656   : > { %v7390_v54 = vrot.slane %v7389_v47, 4  ;;  %v7399_v59 = vmax.f32 %v7397_v0, %v7398_v12  ;;  %v7407_v51 = vmax.f32 %v7405_v24, %v7406_v13  ;;  %v7372_v31 = vsel %vm1226_vm0, %v7369_v50, %v7371_v52  ;;  %v6410_v35 = vld [vmem:[%s13514_s23 + $0x268] sm:$0xff] }
 0x657   : > { %v7384_v11 = vrot.slane %v7383_v33, 1  ;;  %v7378_v20 = vmax.f32 %v7365_v16, %v7372_v31  ;;  %v7423_v60 = vrot.slane %v6510_v56, 7  ;;  %v6205_v3 = vadd.f32 %v14105_v62, %v6096_v17 }
 0x658   : > { %v7391_v23 = vmax.f32 %v7389_v47, %v7390_v54  ;;  %v7400_v28 = vrot.slane %v7399_v59, 2  ;;  %v7408_v25 = vrot.slane %v7407_v51, 2  ;;  %v6097_v40 = vadd.f32 %v13727_v14, %v5154_v7  ;;  %v15454_v54 = vld [vmem:[#allocation113_spill] sm:$0xff] }
 0x659   : > { %v7385_v29 = vmax.f32 %v7383_v33, %v7384_v11  ;;  %v7413_v46 = vsel %vm6561_vm8, %v7378_v20, -inf  ;;  %v7428_v57 = vmax.f32 %v6508_v45, %v7423_v60  ;;  %v6307_v48 = vmax.f32 %v6205_v3, 0.0  ;;  %v5158_v42 = vpop.f32.mrb[64].mxu1 }
 0x65a   : > { %v7392_v58 = vrot.slane %v7391_v23, 2  ;;  %v7401_v50 = vmax.f32 %v7399_v59, %v7400_v28  ;;  %v7409_v22 = vmax.f32 %v7407_v51, %v7408_v25  ;;  %v7414_v16 = vrot.slane %v7413_v46, 4  ;;  %v9825_v44 = vpop.f32.mrb[65].mxu1  ;;  %v15455_v28 = vld [vmem:[#allocation53_spill] sm:$0xff] }
 0x65b   : > { %7386 = vst.msk [vmem:[#allocation2 + $0x3c] sm:$0x1] %vm6569_vm10, %v7385_v29  ;;  %v6511_v19 = vmul.f32 %v6409_v32, %v6307_v48  ;;  %v5159_v36 = vadd.f32 %v5158_v42, %v15453_v53  ;;  %v5161_v9 = vpop.f32.mrb[66].mxu1  ;;  %v6509_v0 = vmul.f32 %v6407_v8, %v6305_v15  ;;  %v6206_v30 = vadd.f32 %v14105_v62, %v6097_v40  ;;  %v14311_v8 = vld [vmem:[#allocation2] sm:$0xff] }
 0x65c   : > { %v7393_v63 = vmax.f32 %v7391_v23, %v7392_v58  ;;  %v7402_v18 = vrot.slane %v7401_v50, 1  ;;  %v7410_v45 = vrot.slane %v7409_v22, 1  ;;  %v7415_v43 = vmax.f32 %v7413_v46, %v7414_v16  ;;  %v9826_v1 = vpop.f32.mrb[67].mxu1  ;;  %v6412_v58 = vld [vmem:[%s13514_s23 + $0x278] sm:$0xff]  ;;  %v8465_v44 = vld [vmem:[%s14857_s7 + $0xc0] sm:$0xff] }
 0x65d   : > { %v7424_v24 = vrot.slane %v6511_v19, 7  ;;  %v6098_v47 = vadd.f32 %v13743_v6, %v5159_v36  ;;  %v6308_v56 = vmax.f32 %v6206_v30, 0.0  ;;  %v5162_v59 = vadd.f32 %v5161_v9, %v15454_v54  ;;  %v6411_v6 = vld [vmem:[%s13514_s23 + $0x270] sm:$0xff] }
 0x65e   : > { %v7394_v12 = vrot.slane %v7393_v63, 1  ;;  %v7403_v13 = vmax.f32 %v7401_v50, %v7402_v18  ;;  %v7411_v52 = vmax.f32 %v7409_v22, %v7410_v45  ;;  %v7416_v14 = vrot.slane %v7415_v43, 2  ;;  %v15456_v22 = vld [vmem:[#allocation116_spill] sm:$0xff] }
 0x65f   : > { %v7425_v33 = vsel %vm5310_vm7, %v7423_v60, %v7424_v24  ;;  %v6207_v17 = vadd.f32 %v14105_v62, %v6098_v47  ;;  %v6512_v11 = vmul.f32 %v6410_v35, %v6308_v56  ;;  %v6099_v3 = vadd.f32 %v13748_v4, %v5162_v59  ;;  %v6413_v47 = vld [vmem:[%s13514_s23 + $0x280] sm:$0xff] }
 0x660   : > { %v7395_v51 = vmax.f32 %v7393_v63, %v7394_v12  ;;  %7404 = vst.msk [vmem:[#allocation2 + $0x3e] sm:$0x1] %vm6569_vm10, %v7403_v13  ;;  %7412 = vst.msk [vmem:[#allocation2 + $0x3f] sm:$0x1] %vm6569_vm10, %v7411_v52  ;;  %v7417_v15 = vmax.f32 %v7415_v43, %v7416_v14  ;;  %v7429_v31 = vmax.f32 %v6509_v0, %v7425_v33  ;;  %v7432_v49 = vrot.slane %v6511_v19, 6  ;;  %v15457_v33 = vld [vmem:[#allocation10_spill] sm:$0xff] }
 0x661   : > { %v6309_v20 = vmax.f32 %v6207_v17, 0.0  ;;  %v5166_v23 = vpop.f32.mrb[68].mxu1  ;;  %v7433_v7 = vrot.slane %v6512_v11, 6  ;;  %v6208_v46 = vadd.f32 %v14105_v62, %v6099_v3  ;;  %v14324_v45 = vmul.f32 %v8465_v44, %v14311_v8 }
 0x662   : > { %7396 = vst.msk [vmem:[#allocation2 + $0x3d] sm:$0x1] %vm6569_vm10, %v7395_v51  ;;  %v7418_v60 = vrot.slane %v7417_v15, 1  ;;  %v5167_v25 = vadd.f32 %v5166_v23, %v15455_v28  ;;  %v9829_v32 = vpop.f32.mrb[69].mxu1 }
 0x663   : > { %v6513_v29 = vmul.f32 %v6411_v6, %v6309_v20  ;;  %v5169_v48 = vpop.f32.mrb[70].mxu1  ;;  %v7434_v19 = vsel %vm1226_vm0, %v7432_v49, %v7433_v7  ;;  %v6310_v53 = vmax.f32 %v6208_v46, 0.0 }
 0x664   : > { %v7419_v42 = vmax.f32 %v7417_v15, %v7418_v60  ;;  %v6100_v50 = vadd.f32 %v13766_v38, %v5167_v25  ;;  %v5170_v16 = vadd.f32 %v5169_v48, %v15456_v22  ;;  %v9830_v4 = vpop.f32.mrb[71].mxu1  ;;  %v7439_v36 = vmax.f32 %v7428_v57, %v7434_v19 }
 0x665   : > { %v7435_v40 = vrot.slane %v6513_v29, 6  ;;  %v14321_v18 = vmul.f32 %v6412_v58, %v6310_v53  ;;  %v6415_v4 = vld [vmem:[%s13514_s23 + $0x290] sm:$0xff] }
 0x666   : > { %7420 = vst.msk [vmem:[#allocation2 + $0x40] sm:$0x1] %vm6569_vm10, %v7419_v42  ;;  %v6209_v9 = vadd.f32 %v14105_v62, %v6100_v50  ;;  %v6101_v38 = vadd.f32 %v13770_v21, %v5170_v16  ;;  %v7441_v43 = vsel %vm6591_vm12, %v7439_v36, -inf  ;;  %v7449_v1 = vsel %vm6600_vm13, %v7439_v36, -inf  ;;  %v14333_v21 = vld [vmem:[%s14855_s5] ss:$0 sm:$0xff] }
 0x667   : > { %v7436_v63 = vsel %vm1226_vm0, %v7433_v7, %v7435_v40  ;;  %v7457_v0 = vsel %vm6771_vm2, %v7439_v36, -inf  ;;  %v7442_v30 = vrot.slane %v7441_v43, 4  ;;  %v7450_v57 = vrot.slane %v7449_v1, 4 }
 0x668   : > { %v7440_v24 = vmax.f32 %v7429_v31, %v7436_v63  ;;  %v6311_v62 = vmax.f32 %v6209_v9, 0.0  ;;  %v6210_v12 = vadd.f32 %v14333_v21, %v6101_v38  ;;  %v6414_v31 = vld [vmem:[%s13514_s23 + $0x288] sm:$0xff] }
 0x669   : > { %v5174_v13 = vpop.f32.mrb[72].mxu1  ;;  %v7443_v54 = vmax.f32 %v7441_v43, %v7442_v30  ;;  %v7451_v59 = vmax.f32 %v7449_v1, %v7450_v57 }
 0x66a   : > { %v7458_v52 = vsel %vm6773_vm3, %v7440_v24, -inf  ;;  %v7467_v14 = vsel %vm6701_vm15, %v7440_v24, -inf  ;;  %v7475_v35 = vsel %vm6636_vm14, %v7440_v24, -inf  ;;  %v5175_v56 = vadd.f32 %v5174_v13, %v15457_v33  ;;  %v9833_v17 = vpop.f32.mrb[73].mxu1  ;;  %v15458_v24 = vld [vmem:[#allocation119_spill] sm:$0xff] }
 0x66b   : > { %v7459_v51 = vmax.f32 %v7457_v0, %v7458_v52  ;;  %v7468_v15 = vrot.slane %v7467_v14, 4  ;;  %v5177_v6 = vpop.f32.mrb[74].mxu1  ;;  %v7476_v11 = vrot.slane %v7475_v35, 4  ;;  %v14341_v20 = vmul.f32 %v6413_v47, %v6311_v62 }
 0x66c   : > { %v6312_v3 = vmax.f32 %v6210_v12, 0.0  ;;  %v6102_v23 = vadd.f32 %v13791_v61, %v5175_v56  ;;  %v9834_v60 = vpop.f32.mrb[75].mxu1  ;;  %v7444_v28 = vrot.slane %v7443_v54, 2  ;;  %v7452_v25 = vrot.slane %v7451_v59, 2 }
 0x66d   : > { %v7460_v32 = vrot.slane %v7459_v51, 4  ;;  %v7469_v49 = vmax.f32 %v7467_v14, %v7468_v15  ;;  %v7477_v7 = vmax.f32 %v7475_v35, %v7476_v11  ;;  %v7486_v46 = vrot.slane %v14341_v20, 7  ;;  %v7771_v11 = vld [vmem:[%s14857_s7] sm:$0xff] }
 0x66e   : > { %v6516_v48 = vmul.f32 %v6414_v31, %v6312_v3  ;;  %v6211_v42 = vadd.f32 %v14333_v21, %v6102_v23  ;;  %v7445_v58 = vmax.f32 %v7443_v54, %v7444_v28  ;;  %v7453_v50 = vmax.f32 %v7451_v59, %v7452_v25  ;;  %v14361_v31 = vld [vmem:[#allocation2 + $0x8] sm:$0xff] }
 0x66f   : > { %v7461_v22 = vmax.f32 %v7459_v51, %v7460_v32  ;;  %v7470_v16 = vrot.slane %v7469_v49, 2  ;;  %v7478_v44 = vrot.slane %v7477_v7, 2  ;;  %v7494_v19 = vmax.f32 %v6513_v29, %v7486_v46  ;;  %v15459_v51 = vld [vmem:[#allocation11_spill] sm:$0xff]  ;;  %v15460_v28 = vld [vmem:[#allocation122_spill] sm:$0xff] }
 0x670   : > { %v7487_v40 = vrot.slane %v6516_v48, 7  ;;  %v6313_v61 = vmax.f32 %v6211_v42, 0.0  ;;  %v7446_v53 = vrot.slane %v7445_v58, 1  ;;  %v7454_v36 = vrot.slane %v7453_v50, 1  ;;  %v7772_v25 = vld [vmem:[%s14857_s7 + $0x8] sm:$0xff]  ;;  %v8477_v48 = vld [vmem:[%s14857_s7 + $0x120] sm:$0xff] }
 0x671   : > { %v7462_v9 = vrot.slane %v7461_v22, 2  ;;  %v7471_v38 = vmax.f32 %v7469_v49, %v7470_v16  ;;  %v5182_v63 = vpop.f32.mrb[76].mxu1  ;;  %v7479_v43 = vmax.f32 %v7477_v7, %v7478_v44  ;;  %v5178_v30 = vadd.f32 %v5177_v6, %v15458_v24  ;;  %v8466_v6 = vld [vmem:[%s14857_s7 + $0xc8] sm:$0xff]  ;;  %v8453_v42 = vld [vmem:[%s14857_s7 + $0x60] sm:$0xff] }
 0x672   : > { %v14348_v1 = vsel %vm5310_vm7, %v7486_v46, %v7487_v40  ;;  %v14350_v0 = vmul.f32 %v6415_v4, %v6313_v61  ;;  %v9837_v57 = vpop.f32.mrb[77].mxu1  ;;  %v7447_v62 = vmax.f32 %v7445_v58, %v7446_v53  ;;  %v7455_v47 = vmax.f32 %v7453_v50, %v7454_v36  ;;  %v6416_v58 = vld [vmem:[%s13514_s23 + $0x298] sm:$0xff] }
 0x673   : > { %v7463_v12 = vmax.f32 %v7461_v22, %v7462_v9  ;;  %v7472_v29 = vrot.slane %v7471_v38, 1  ;;  %v5185_v13 = vpop.f32.mrb[78].mxu1  ;;  %v7480_v52 = vrot.slane %v7479_v43, 1  ;;  %v7495_v14 = vmax.f32 %v14321_v18, %v14348_v1  ;;  %v15461_v61 = vld [vmem:[#allocation124_spill] sm:$0xff] }
 0x674   : > { %v7489_v35 = vrot.slane %v14350_v0, 7  ;;  %v7499_v33 = vrot.slane %v14350_v0, 6  ;;  %v9838_v56 = vpop.f32.mrb[79].mxu1  ;;  %7448 = vst.msk [vmem:[#allocation2 + $0x41] sm:$0x1] %vm6569_vm10, %v7447_v62  ;;  %v6103_v59 = vadd.f32 %v13798_v34, %v5178_v30  ;;  %v5183_v15 = vadd.f32 %v5182_v63, %v15459_v51  ;;  %v15462_v62 = vld [vmem:[#allocation126_spill] sm:$0xff] }
 0x675   : > { %7456 = vst.msk [vmem:[#allocation2 + $0x42] sm:$0x1] %vm6569_vm10, %v7455_v47  ;;  %v7464_v17 = vrot.slane %v7463_v12, 1  ;;  %v7473_v54 = vmax.f32 %v7471_v38, %v7472_v29  ;;  %v7481_v3 = vmax.f32 %v7479_v43, %v7480_v52  ;;  %v5186_v34 = vadd.f32 %v5185_v13, %v15460_v28 }
 0x676   : > { %v14370_v23 = vsel %vm5310_vm7, %v7487_v40, %v7489_v35  ;;  %v7507_v60 = vmax.f32 %v7494_v19, %v7499_v33  ;;  %v6212_v7 = vadd.f32 %v14333_v21, %v6103_v59  ;;  %v6104_v46 = vadd.f32 %v13817_v55, %v5183_v15  ;;  %v8478_v55 = vld [vmem:[%s14857_s7 + $0x128] sm:$0xff]  ;;  %v6417_v40 = vld [vmem:[%s13514_s23 + $0x2a0] sm:$0xff] }
 0x677   : > { %v7465_v32 = vmax.f32 %v7463_v12, %v7464_v17  ;;  %7474 = vst.msk [vmem:[#allocation2 + $0x44] sm:$0x1] %vm6569_vm10, %v7473_v54  ;;  %v7496_v49 = vmax.f32 %v14341_v20, %v14370_v23  ;;  %7482 = vst.msk [vmem:[#allocation2 + $0x45] sm:$0x1] %vm6569_vm10, %v7481_v3  ;;  %v6105_v50 = vadd.f32 %v13823_v39, %v5186_v34  ;;  %v7916_v24 = vsel %vm7795_vm1, %v14324_v45, 0.0  ;;  %v6418_v17 = vld [vmem:[%s13514_s23 + $0x2a8] sm:$0xff] }
 0x678   : > { %v7905_v20 = vmul.f32 %v8466_v6, %v14361_v31  ;;  %v7783_v22 = vmul.f32 %v7771_v11, %v14311_v8  ;;  %v6314_v16 = vmax.f32 %v6212_v7, 0.0  ;;  %v6213_v4 = vadd.f32 %v14333_v21, %v6104_v46  ;;  %v8454_v59 = vld [vmem:[%s14857_s7 + $0x68] sm:$0xff]  ;;  %v6419_v7 = vld [vmem:[%s13514_s23 + $0x2b0] sm:$0xff] }
 0x679   : > { %7466 = vst.msk [vmem:[#allocation2 + $0x43] sm:$0x1] %vm6569_vm10, %v7465_v32  ;;  %v5190_v44 = vpop.f32.mrb[80].mxu1  ;;  %v7784_v19 = vmul.f32 %v7772_v25, %v14361_v31  ;;  %v6214_v39 = vadd.f32 %v14333_v21, %v6105_v50  ;;  %v7964_v9 = vmul.f32 %v8477_v48, %v14311_v8  ;;  %v7844_v38 = vmul.f32 %v8453_v42, %v14311_v8 }
 0x67a   : > { %v5191_v53 = vadd.f32 %v5190_v44, %v15461_v61  ;;  %v9841_v36 = vpop.f32.mrb[81].mxu1  ;;  %v6518_v63 = vmul.f32 %v6416_v58, %v6314_v16  ;;  %v6315_v43 = vmax.f32 %v6213_v4, 0.0  ;;  %v7965_v30 = vmul.f32 %v8478_v55, %v14361_v31  ;;  %v6420_v55 = vld [vmem:[%s13514_s23 + $0x2b8] sm:$0xff] }
 0x67b   : > { %v5193_v0 = vpop.f32.mrb[82].mxu1  ;;  %v7917_v29 = vsel %vm7795_vm1, %v7905_v20, 0.0  ;;  %v7796_v13 = vsel %vm7795_vm1, %v7783_v22, 0.0  ;;  %v6316_v8 = vmax.f32 %v6214_v39, 0.0  ;;  %v7797_v56 = vsel %vm7795_vm1, %v7784_v19, 0.0 }
 0x67c   : > { %v6106_v57 = vadd.f32 %v13843_v41, %v5191_v53  ;;  %v5194_v47 = vadd.f32 %v5193_v0, %v15462_v62  ;;  %v9842_v12 = vpop.f32.mrb[83].mxu1  ;;  %v7500_v52 = vrot.slane %v6518_v63, 6  ;;  %v6519_v35 = vmul.f32 %v6417_v40, %v6315_v43  ;;  %v15463_v63 = vld [vmem:[#allocation12_spill] sm:$0xff] }
 0x67d   : > { %v14415_v41 = vsel %vm7795_vm1, %v7964_v9, 0.0  ;;  %v14421_v51 = vsel %vm7795_vm1, %v7844_v38, 0.0  ;;  %v14424_v11 = vadd.f32 %v7917_v29, %v7916_v24  ;;  %v14427_v3 = vsel %vm7795_vm1, %v7965_v30, 0.0 }
 0x67e   : > { %v6215_v54 = vadd.f32 %v14333_v21, %v6106_v57  ;;  %v6107_v45 = vadd.f32 %v13851_v26, %v5194_v47  ;;  %v7501_v15 = vsel %vm1226_vm0, %v7499_v33, %v7500_v52  ;;  %v7502_v6 = vrot.slane %v6519_v35, 6 }
 0x67f   : > { %v7508_v26 = vmax.f32 %v7495_v14, %v7501_v15  ;;  %v14433_v34 = vadd.f32 %v7797_v56, %v7796_v13  ;;  %v7510_v25 = vsel %vm6580_vm11, %v7507_v60, -inf  ;;  %v14437_v32 = vmul.f32 %v6418_v17, %v6316_v8  ;;  %v15464_v15 = vld [vmem:[#allocation129_spill] sm:$0xff] }
 0x680   : > { %v6317_v23 = vmax.f32 %v6215_v54, 0.0  ;;  %v6216_v28 = vadd.f32 %v14333_v21, %v6107_v45  ;;  %v7503_v33 = vsel %vm1226_vm0, %v7500_v52, %v7502_v6  ;;  %v14441_v48 = vmul.f32 %v8454_v59, %v14361_v31 }
 0x681   : > { %v5198_v46 = vpop.f32.mrb[84].mxu1  ;;  %v7511_v18 = vsel %vm6569_vm10, %v7508_v26, -inf  ;;  %v7520_v1 = vsel %vm6591_vm12, %v7508_v26, -inf  ;;  %v7528_v14 = vsel %vm6600_vm13, %v7508_v26, -inf  ;;  %v7509_v42 = vmax.f32 %v7496_v49, %v7503_v33  ;;  %v6421_v33 = vld [vmem:[%s13514_s23 + $0x2c0] sm:$0xff] }
 0x682   : > { %v9845_v58 = vpop.f32.mrb[85].mxu1  ;;  %v7512_v50 = vmax.f32 %v7510_v25, %v7511_v18  ;;  %v7521_v20 = vrot.slane %v7520_v1, 4  ;;  %v7529_v60 = vrot.slane %v7528_v14, 4  ;;  %v7536_v22 = vsel %vm6771_vm2, %v7508_v26, -inf }
 0x683   : > { %v5201_v16 = vpop.f32.mrb[86].mxu1  ;;  %v7537_v4 = vsel %vm6773_vm3, %v7509_v42, -inf  ;;  %v7546_v31 = vsel %vm6701_vm15, %v7509_v42, -inf  ;;  %v14450_v44 = vmul.f32 %v6419_v7, %v6317_v23  ;;  %v6318_v19 = vmax.f32 %v6216_v28, 0.0  ;;  %v14467_v42 = vld [vmem:[#allocation2 + $0x10] sm:$0xff] }
 0x684   : > { %v9846_v40 = vpop.f32.mrb[87].mxu1  ;;  %v7513_v39 = vrot.slane %v7512_v50, 4  ;;  %v7522_v61 = vmax.f32 %v7520_v1, %v7521_v20  ;;  %v7530_v53 = vmax.f32 %v7528_v14, %v7529_v60  ;;  %v7538_v49 = vmax.f32 %v7536_v22, %v7537_v4  ;;  %v8467_v58 = vld [vmem:[%s14857_s7 + $0xd0] sm:$0xff] }
 0x685   : > { %v7547_v36 = vrot.slane %v7546_v31, 4  ;;  %v7557_v9 = vrot.slane %v14450_v44, 7  ;;  %v14453_v38 = vmul.f32 %v6420_v55, %v6318_v19  ;;  %v5199_v43 = vadd.f32 %v5198_v46, %v15463_v63 }
 0x686   : > { %v7514_v0 = vmax.f32 %v7512_v50, %v7513_v39  ;;  %v7523_v24 = vrot.slane %v7522_v61, 2  ;;  %v7531_v30 = vrot.slane %v7530_v53, 2  ;;  %v7539_v57 = vrot.slane %v7538_v49, 4  ;;  %v6422_v39 = vld [vmem:[%s13514_s23 + $0x2c8] sm:$0xff] }
 0x687   : > { %v7548_v62 = vmax.f32 %v7546_v31, %v7547_v36  ;;  %v7565_v47 = vmax.f32 %v6519_v35, %v7557_v9  ;;  %v7558_v12 = vrot.slane %v14453_v38, 7  ;;  %v6108_v29 = vadd.f32 %v13869_v5, %v5199_v43 }
 0x688   : > { %v7515_v13 = vrot.slane %v7514_v0, 2  ;;  %v7524_v52 = vmax.f32 %v7522_v61, %v7523_v24  ;;  %v7532_v8 = vmax.f32 %v7530_v53, %v7531_v30  ;;  %v7540_v56 = vmax.f32 %v7538_v49, %v7539_v57  ;;  %v15466_v61 = vld [vmem:[#allocation132_spill] sm:$0xff] }
 0x689   : > { %v5206_v17 = vpop.f32.mrb[88].mxu1  ;;  %v7549_v54 = vrot.slane %v7548_v62, 2  ;;  %v14459_v45 = vsel %vm5310_vm7, %v7557_v9, %v7558_v12  ;;  %v6217_v59 = vadd.f32 %v14333_v21, %v6108_v29  ;;  %v5202_v6 = vadd.f32 %v5201_v16, %v15464_v15 }
 0x68a   : > { %v9849_v26 = vpop.f32.mrb[89].mxu1  ;;  %v7516_v35 = vmax.f32 %v7514_v0, %v7515_v13  ;;  %v7525_v23 = vrot.slane %v7524_v52, 1  ;;  %v7533_v28 = vrot.slane %v7532_v8, 1  ;;  %v7541_v25 = vrot.slane %v7540_v56, 2 }
 0x68b   : > { %v5209_v5 = vpop.f32.mrb[90].mxu1  ;;  %v7550_v7 = vmax.f32 %v7548_v62, %v7549_v54  ;;  %v7566_v46 = vmax.f32 %v14437_v32, %v14459_v45  ;;  %v6319_v18 = vmax.f32 %v6217_v59, 0.0  ;;  %v6109_v1 = vadd.f32 %v13874_v2, %v5202_v6  ;;  %v15465_v32 = vld [vmem:[#allocation56_spill] sm:$0xff] }
 0x68c   : > { %v9850_v14 = vpop.f32.mrb[91].mxu1  ;;  %v7517_v50 = vrot.slane %v7516_v35, 1  ;;  %v7526_v20 = vmax.f32 %v7524_v52, %v7525_v23  ;;  %v7534_v60 = vmax.f32 %v7532_v8, %v7533_v28  ;;  %v7542_v22 = vmax.f32 %v7540_v56, %v7541_v25  ;;  %v7773_v2 = vld [vmem:[%s14857_s7 + $0x10] sm:$0xff]  ;;  %v15467_v52 = vld [vmem:[#allocation13_spill] sm:$0xff] }
 0x68d   : > { %v7551_v55 = vrot.slane %v7550_v7, 1  ;;  %v6523_v16 = vmul.f32 %v6421_v33, %v6319_v18  ;;  %v6218_v4 = vadd.f32 %v14333_v21, %v6109_v1  ;;  %v5207_v31 = vadd.f32 %v5206_v17, %v15465_v32  ;;  %v6424_v59 = vld [vmem:[%s13514_s23 + $0x2d8] sm:$0xff]  ;;  %v6423_v23 = vld [vmem:[%s13514_s23 + $0x2d0] sm:$0xff] }
 0x68e   : > { %v7518_v19 = vmax.f32 %v7516_v35, %v7517_v50  ;;  %7527 = vst.msk [vmem:[#allocation2 + $0x47] sm:$0x1] %vm6569_vm10, %v7526_v20  ;;  %7535 = vst.msk [vmem:[#allocation2 + $0x48] sm:$0x1] %vm6569_vm10, %v7534_v60  ;;  %v7543_v40 = vrot.slane %v7542_v22, 1  ;;  %v5210_v53 = vadd.f32 %v5209_v5, %v15466_v61  ;;  %v7906_v49 = vmul.f32 %v8467_v58, %v14467_v42  ;;  %v15468_v25 = vld [vmem:[#allocation135_spill] sm:$0xff] }
 0x68f   : > { %v7552_v36 = vmax.f32 %v7550_v7, %v7551_v55  ;;  %v7560_v9 = vrot.slane %v6523_v16, 7  ;;  %v7569_v38 = vrot.slane %v6523_v16, 6  ;;  %v6320_v63 = vmax.f32 %v6218_v4, 0.0  ;;  %v15469_v55 = vld [vmem:[#allocation31_spill] sm:$0xff] }
 0x690   : > { %7519 = vst.msk [vmem:[#allocation2 + $0x46] sm:$0x1] %vm6569_vm10, %v7518_v19  ;;  %v7544_v43 = vmax.f32 %v7542_v22, %v7543_v40  ;;  %v6110_v0 = vadd.f32 %v13888_v27, %v5207_v31  ;;  %v6111_v24 = vadd.f32 %v13895_v10, %v5210_v53  ;;  %v7785_v57 = vmul.f32 %v7773_v2, %v14467_v42  ;;  %v6425_v22 = vld [vmem:[%s13514_s23 + $0x2e0] sm:$0xff] }
 0x691   : > { %v5214_v30 = vpop.f32.mrb[92].mxu1  ;;  %7553 = vst.msk [vmem:[#allocation2 + $0x4a] sm:$0x1] %vm6569_vm10, %v7552_v36  ;;  %v7575_v62 = vmax.f32 %v7565_v47, %v7569_v38  ;;  %v6524_v29 = vmul.f32 %v6422_v39, %v6320_v63  ;;  %v7561_v13 = vsel %vm5310_vm7, %v7558_v12, %v7560_v9  ;;  %v14495_v45 = vsel %vm7795_vm1, %v14441_v48, 0.0 }
 0x692   : > { %v5215_v8 = vadd.f32 %v5214_v30, %v15467_v52  ;;  %v9853_v56 = vpop.f32.mrb[93].mxu1  ;;  %7545 = vst.msk [vmem:[#allocation2 + $0x49] sm:$0x1] %vm6569_vm10, %v7544_v43  ;;  %v7567_v27 = vmax.f32 %v14450_v44, %v7561_v13  ;;  %v6219_v10 = vadd.f32 %v14333_v21, %v6110_v0  ;;  %v6220_v17 = vadd.f32 %v14333_v21, %v6111_v24  ;;  %v15470_v52 = vld [vmem:[#allocation15_spill] sm:$0xff] }
 0x693   : > { %v5217_v54 = vpop.f32.mrb[94].mxu1  ;;  %v7578_v47 = vsel %vm6571_vm9, %v7575_v62, -inf  ;;  %v7570_v12 = vrot.slane %v6524_v29, 6  ;;  %v14501_v26 = vsel %vm7795_vm1, %v7906_v49, 0.0  ;;  %v14508_v18 = vsel %vm7795_vm1, %v7785_v57, 0.0 }
 0x694   : > { %v6112_v15 = vadd.f32 %v13916_v37, %v5215_v8  ;;  %v9854_v6 = vpop.f32.mrb[95].mxu1  ;;  %v7579_v44 = vrot.slane %v7578_v47, 4  ;;  %v6321_v35 = vmax.f32 %v6219_v10, 0.0  ;;  %v6322_v28 = vmax.f32 %v6220_v17, 0.0 }
 0x695   : > { %v5218_v33 = vadd.f32 %v5217_v54, %v15468_v25  ;;  %v7571_v48 = vsel %vm1226_vm0, %v7569_v38, %v7570_v12  ;;  %v7577_v5 = vmax.f32 %v7567_v27, %v7570_v12  ;;  %v7586_v1 = vsel %vm6580_vm11, %v7575_v62, -inf  ;;  %v6426_v54 = vld [vmem:[%s13514_s23 + $0x2e8] sm:$0xff]  ;;  %v8479_v25 = vld [vmem:[%s14857_s7 + $0x130] sm:$0xff] }
 0x696   : > { %v6221_v7 = vadd.f32 %v14333_v21, %v6112_v15  ;;  %v7580_v37 = vmax.f32 %v7578_v47, %v7579_v44  ;;  %v7576_v14 = vmax.f32 %v7566_v46, %v7571_v48  ;;  %v14511_v58 = vmul.f32 %v6424_v59, %v6322_v28  ;;  %v15471_v15 = vld [vmem:[#allocation33_spill] sm:$0xff] }
 0x697   : > { %v7613_v50 = vsel %vm6773_vm3, %v7577_v5, -inf  ;;  %v14514_v20 = vmul.f32 %v6423_v23, %v6321_v35  ;;  %v6113_v16 = vadd.f32 %v15469_v55, %v5218_v33  ;;  %v15473_v55 = vld [vmem:[#allocation59_spill] sm:$0xff] }
 0x698   : > { %v6323_v60 = vmax.f32 %v6221_v7, 0.0  ;;  %v7581_v4 = vrot.slane %v7580_v37, 2  ;;  %v7587_v32 = vsel %vm6569_vm10, %v7576_v14, -inf  ;;  %v7596_v31 = vsel %vm6591_vm12, %v7576_v14, -inf  ;;  %v15472_v7 = vld [vmem:[#allocation138_spill] sm:$0xff] }
 0x699   : > { %v7604_v2 = vsel %vm6600_vm13, %v7576_v14, -inf  ;;  %v5222_v19 = vpop.f32.mrb[96].mxu1  ;;  %v7588_v40 = vmax.f32 %v7586_v1, %v7587_v32  ;;  %v7597_v46 = vrot.slane %v7596_v31, 4  ;;  %v7612_v61 = vsel %vm6771_vm2, %v7576_v14, -inf }
 0x69a   : > { %v7605_v39 = vrot.slane %v7604_v2, 4  ;;  %v9857_v53 = vpop.f32.mrb[97].mxu1  ;;  %v7582_v49 = vmax.f32 %v7580_v37, %v7581_v4  ;;  %v7614_v36 = vmax.f32 %v7612_v61, %v7613_v50  ;;  %v7625_v9 = vrot.slane %v14511_v58, 7  ;;  %v15474_v61 = vld [vmem:[#allocation34_spill] sm:$0xff] }
 0x69b   : > { %v6527_v38 = vmul.f32 %v6425_v22, %v6323_v60  ;;  %v5225_v63 = vpop.f32.mrb[98].mxu1  ;;  %v7589_v43 = vrot.slane %v7588_v40, 4  ;;  %v7598_v0 = vmax.f32 %v7596_v31, %v7597_v46  ;;  %v6222_v30 = vadd.f32 %v14333_v21, %v6113_v16  ;;  %v6427_v22 = vld [vmem:[%s13514_s23 + $0x2f0] sm:$0xff] }
 0x69c   : > { %v7606_v24 = vmax.f32 %v7604_v2, %v7605_v39  ;;  %v9858_v57 = vpop.f32.mrb[99].mxu1  ;;  %v7583_v62 = vrot.slane %v7582_v49, 1  ;;  %v7615_v29 = vrot.slane %v7614_v36, 4  ;;  %v5223_v8 = vadd.f32 %v5222_v19, %v15470_v52  ;;  %v14549_v52 = vld [vmem:[#allocation2 + $0x18] sm:$0xff] }
 0x69d   : > { %v7626_v13 = vrot.slane %v6527_v38, 7  ;;  %v7590_v56 = vmax.f32 %v7588_v40, %v7589_v43  ;;  %v7599_v27 = vrot.slane %v7598_v0, 2  ;;  %v6324_v17 = vmax.f32 %v6222_v30, 0.0  ;;  %v15475_v43 = vld [vmem:[#allocation36_spill] sm:$0xff] }
 0x69e   : > { %v7607_v10 = vrot.slane %v7606_v24, 2  ;;  %v7584_v47 = vmax.f32 %v7582_v49, %v7583_v62  ;;  %v7616_v12 = vmax.f32 %v7614_v36, %v7615_v29  ;;  %v6114_v6 = vadd.f32 %v15471_v15, %v5223_v8  ;;  %v8455_v36 = vld [vmem:[%s14857_s7 + $0x70] sm:$0xff]  ;;  %v15476_v62 = vld [vmem:[#allocation141_spill] sm:$0xff] }
 0x69f   : > { %v7627_v59 = vsel %vm5310_vm7, %v7625_v9, %v7626_v13  ;;  %v7591_v44 = vrot.slane %v7590_v56, 2  ;;  %v7600_v35 = vmax.f32 %v7598_v0, %v7599_v27  ;;  %v6528_v48 = vmul.f32 %v6426_v54, %v6324_v17 }
 0x6a0   : > { %v7608_v23 = vmax.f32 %v7606_v24, %v7607_v10  ;;  %v7632_v28 = vmax.f32 %v14514_v20, %v7627_v59  ;;  %7585 = vst.msk [vmem:[#allocation2 + $0x4b] sm:$0x1] %vm6569_vm10, %v7584_v47  ;;  %v7617_v33 = vrot.slane %v7616_v12, 2  ;;  %v6223_v5 = vadd.f32 %v14333_v21, %v6114_v6  ;;  %v6428_v10 = vld [vmem:[%s13514_s23 + $0x2f8] sm:$0xff] }
 0x6a1   : > { %v5226_v37 = vadd.f32 %v5225_v63, %v15472_v7  ;;  %v5230_v1 = vpop.f32.mrb[100].mxu1  ;;  %v7592_v14 = vmax.f32 %v7590_v56, %v7591_v44  ;;  %v7601_v50 = vrot.slane %v7600_v35, 1  ;;  %v7628_v32 = vrot.slane %v6528_v48, 7  ;;  %v15477_v47 = vld [vmem:[#allocation37_spill] sm:$0xff] }
 0x6a2   : > { %v7609_v60 = vrot.slane %v7608_v23, 1  ;;  %v5231_v16 = vadd.f32 %v5230_v1, %v15473_v55  ;;  %v9861_v20 = vpop.f32.mrb[101].mxu1  ;;  %v7618_v4 = vmax.f32 %v7616_v12, %v7617_v33  ;;  %v6325_v31 = vmax.f32 %v6223_v5, 0.0  ;;  %v7774_v1 = vld [vmem:[%s14857_s7 + $0x18] sm:$0xff] }
 0x6a3   : > { %v5233_v2 = vpop.f32.mrb[102].mxu1  ;;  %v7966_v19 = vmul.f32 %v8479_v25, %v14467_v42  ;;  %v7593_v40 = vrot.slane %v7592_v14, 1  ;;  %v7602_v46 = vmax.f32 %v7600_v35, %v7601_v50  ;;  %v6115_v53 = vadd.f32 %v15474_v61, %v5226_v37 }
 0x6a4   : > { %v7610_v39 = vmax.f32 %v7608_v23, %v7609_v60  ;;  %v9862_v49 = vpop.f32.mrb[103].mxu1  ;;  %v7619_v9 = vrot.slane %v7618_v4, 1  ;;  %v7629_v38 = vsel %vm5310_vm7, %v7626_v13, %v7628_v32  ;;  %v6529_v63 = vmul.f32 %v6427_v22, %v6325_v31  ;;  %v8468_v13 = vld [vmem:[%s14857_s7 + $0xd8] sm:$0xff]  ;;  %v6430_v22 = vld [vmem:[%s13514_s23 + $0x308] sm:$0xff] }
 0x6a5   : > { %v6116_v0 = vadd.f32 %v15475_v43, %v5231_v16  ;;  %v7594_v24 = vmax.f32 %v7592_v14, %v7593_v40  ;;  %7603 = vst.msk [vmem:[#allocation2 + $0x4d] sm:$0x1] %vm6569_vm10, %v7602_v46  ;;  %v7633_v30 = vmax.f32 %v14511_v58, %v7629_v38  ;;  %v6224_v57 = vadd.f32 %v14333_v21, %v6115_v53 }
 0x6a6   : > { %7611 = vst.msk [vmem:[#allocation2 + $0x4e] sm:$0x1] %vm6569_vm10, %v7610_v39  ;;  %v5234_v29 = vadd.f32 %v5233_v2, %v15476_v62  ;;  %v7620_v8 = vmax.f32 %v7618_v4, %v7619_v9  ;;  %v7636_v56 = vrot.slane %v6528_v48, 6  ;;  %v7637_v27 = vrot.slane %v6529_v63, 6  ;;  %v15478_v48 = vld [vmem:[#allocation16_spill] sm:$0xff]  ;;  %v15479_v4 = vld [vmem:[#allocation39_spill] sm:$0xff] }
 0x6a7   : > { %v7846_v17 = vmul.f32 %v8455_v36, %v14467_v42  ;;  %7595 = vst.msk [vmem:[#allocation2 + $0x4c] sm:$0x1] %vm6569_vm10, %v7594_v24  ;;  %v6326_v54 = vmax.f32 %v6224_v57, 0.0  ;;  %v6225_v58 = vadd.f32 %v14333_v21, %v6116_v0  ;;  %v7979_v59 = vsel %vm7795_vm1, %v7966_v19, 0.0  ;;  %v15481_v9 = vld [vmem:[#allocation40_spill] sm:$0xff] }
 0x6a8   : > { %v6117_v12 = vadd.f32 %v15477_v47, %v5234_v29  ;;  %7621 = vst.msk [vmem:[#allocation2 + $0x4f] sm:$0x1] %vm6569_vm10, %v7620_v8  ;;  %v7638_v15 = vsel %vm1226_vm0, %v7636_v56, %v7637_v27  ;;  %v7907_v44 = vmul.f32 %v8468_v13, %v14549_v52  ;;  %v14565_v35 = vadd.f32 %v14501_v26, %v14424_v11  ;;  %v6431_v8 = vld [vmem:[%s13514_s23 + $0x310] sm:$0xff] }
 0x6a9   : > { %v5238_v6 = vpop.f32.mrb[104].mxu1  ;;  %v7978_v42 = vadd.f32 %v14427_v3, %v14415_v41  ;;  %v7643_v23 = vmax.f32 %v7632_v28, %v7638_v15  ;;  %v6530_v25 = vmul.f32 %v6428_v10, %v6326_v54  ;;  %v14576_v11 = vadd.f32 %v14508_v18, %v14433_v34  ;;  %v6429_v18 = vld [vmem:[%s13514_s23 + $0x300] sm:$0xff] }
 0x6aa   : > { %v6226_v33 = vadd.f32 %v14333_v21, %v6117_v12  ;;  %v5239_v5 = vadd.f32 %v5238_v6, %v15478_v48  ;;  %v9865_v7 = vpop.f32.mrb[105].mxu1  ;;  %v14582_v41 = vadd.f32 %v14495_v45, %v14421_v51  ;;  %v14585_v3 = vsel %vm7795_vm1, %v7846_v17, 0.0  ;;  %v15480_v45 = vld [vmem:[#allocation144_spill] sm:$0xff] }
 0x6ab   : > { %v5241_v37 = vpop.f32.mrb[106].mxu1  ;;  %v14578_v26 = vadd.f32 %v7979_v59, %v7978_v42  ;;  %v7645_v28 = vsel %vm6561_vm8, %v7643_v23, -inf  ;;  %v7653_v14 = vsel %vm6571_vm9, %v7643_v23, -inf  ;;  %v7639_v50 = vrot.slane %v6530_v25, 6  ;;  %v6432_v48 = vld [vmem:[%s13514_s23 + $0x318] sm:$0xff] }
 0x6ac   : > { %v6327_v60 = vmax.f32 %v6225_v58, 0.0  ;;  %v9866_v55 = vpop.f32.mrb[107].mxu1  ;;  %v7646_v16 = vrot.slane %v7645_v28, 4  ;;  %v7654_v34 = vrot.slane %v7653_v14, 4  ;;  %v6328_v20 = vmax.f32 %v6226_v33, 0.0 }
 0x6ad   : > { %v6118_v32 = vadd.f32 %v15479_v4, %v5239_v5  ;;  %v7640_v51 = vsel %vm1226_vm0, %v7637_v27, %v7639_v50  ;;  %v5242_v31 = vadd.f32 %v5241_v37, %v15480_v45  ;;  %v14595_v2 = vsel %vm7795_vm1, %v7907_v44, 0.0 }
 0x6ae   : > { %v14598_v19 = vmul.f32 %v7774_v1, %v14549_v52  ;;  %v7647_v40 = vmax.f32 %v7645_v28, %v7646_v16  ;;  %v7655_v46 = vmax.f32 %v7653_v14, %v7654_v34  ;;  %v7644_v39 = vmax.f32 %v7633_v30, %v7640_v51  ;;  %v15482_v1 = vld [vmem:[#allocation18_spill] sm:$0xff]  ;;  %v8480_v14 = vld [vmem:[%s14857_s7 + $0x138] sm:$0xff]  ;;  %v15484_v51 = vld [vmem:[#allocation147_spill] sm:$0xff] }
 0x6af   : > { %v14600_v61 = vmul.f32 %v6430_v22, %v6328_v20  ;;  %v7661_v53 = vsel %vm6580_vm11, %v7643_v23, -inf  ;;  %v14603_v49 = vmul.f32 %v6429_v18, %v6327_v60  ;;  %v6227_v36 = vadd.f32 %v14333_v21, %v6118_v32  ;;  %v15483_v18 = vld [vmem:[#allocation42_spill] sm:$0xff] }
 0x6b0   : > { %v6119_v38 = vadd.f32 %v15481_v9, %v5242_v31  ;;  %v7648_v63 = vrot.slane %v7647_v40, 2  ;;  %v7656_v43 = vrot.slane %v7655_v46, 2  ;;  %v7662_v0 = vsel %vm6569_vm10, %v7644_v39, -inf  ;;  %v7760_v31 = vld [vmem:[#allocation2 + $0x20] sm:$0xff] }
 0x6b1   : > { %v7671_v24 = vsel %vm6591_vm12, %v7644_v39, -inf  ;;  %v5246_v57 = vpop.f32.mrb[108].mxu1  ;;  %v7663_v62 = vmax.f32 %v7661_v53, %v7662_v0  ;;  %v7679_v30 = vsel %vm6600_vm13, %v7644_v39, -inf  ;;  %v7690_v13 = vrot.slane %v14600_v61, 7  ;;  %v15485_v0 = vld [vmem:[#allocation43_spill] sm:$0xff] }
 0x6b2   : > { %v7672_v29 = vrot.slane %v7671_v24, 4  ;;  %v9869_v56 = vpop.f32.mrb[109].mxu1  ;;  %v7649_v27 = vmax.f32 %v7647_v40, %v7648_v63  ;;  %v7657_v10 = vmax.f32 %v7655_v46, %v7656_v43  ;;  %v7680_v17 = vrot.slane %v7679_v30, 4  ;;  %v8469_v40 = vld [vmem:[%s14857_s7 + $0xe0] sm:$0xff] }
 0x6b3   : > { %v6329_v54 = vmax.f32 %v6227_v36, 0.0  ;;  %v5249_v58 = vpop.f32.mrb[110].mxu1  ;;  %v7664_v47 = vrot.slane %v7663_v62, 4  ;;  %v7698_v59 = vmax.f32 %v6530_v25, %v7690_v13  ;;  %v6228_v15 = vadd.f32 %v14333_v21, %v6119_v38 }
 0x6b4   : > { %v7673_v12 = vmax.f32 %v7671_v24, %v7672_v29  ;;  %v9870_v6 = vpop.f32.mrb[111].mxu1  ;;  %v7650_v44 = vrot.slane %v7649_v27, 1  ;;  %v7658_v42 = vrot.slane %v7657_v10, 1  ;;  %v7681_v23 = vmax.f32 %v7679_v30, %v7680_v17  ;;  %v7775_v17 = vld [vmem:[%s14857_s7 + $0x20] sm:$0xff] }
 0x6b5   : > { %v6533_v33 = vmul.f32 %v6431_v8, %v6329_v54  ;;  %v7665_v5 = vmax.f32 %v7663_v62, %v7664_v47  ;;  %v6330_v37 = vmax.f32 %v6228_v15, 0.0  ;;  %v5247_v28 = vadd.f32 %v5246_v57, %v15482_v1  ;;  %v8456_v57 = vld [vmem:[%s14857_s7 + $0x78] sm:$0xff]  ;;  %v8481_v54 = vld [vmem:[%s14857_s7 + $0x140] sm:$0xff] }
 0x6b6   : > { %v7674_v7 = vrot.slane %v7673_v12, 2  ;;  %v7651_v50 = vmax.f32 %v7649_v27, %v7650_v44  ;;  %v7659_v60 = vmax.f32 %v7657_v10, %v7658_v42  ;;  %v7682_v25 = vrot.slane %v7681_v23, 2  ;;  %v8457_v15 = vld [vmem:[%s14857_s7 + $0x80] sm:$0xff] }
 0x6b7   : > { %v7691_v22 = vrot.slane %v6533_v33, 7  ;;  %v7666_v55 = vrot.slane %v7665_v5, 2  ;;  %v6534_v34 = vmul.f32 %v6432_v48, %v6330_v37  ;;  %v6120_v20 = vadd.f32 %v15483_v18, %v5247_v28 }
 0x6b8   : > { %v7675_v16 = vmax.f32 %v7673_v12, %v7674_v7  ;;  %7652 = vst.msk [vmem:[#allocation2 + $0x50] sm:$0x1] %vm6569_vm10, %v7651_v50  ;;  %7660 = vst.msk [vmem:[#allocation2 + $0x51] sm:$0x1] %vm6569_vm10, %v7659_v60  ;;  %v7683_v4 = vmax.f32 %v7681_v23, %v7682_v25  ;;  %v5250_v45 = vadd.f32 %v5249_v58, %v15484_v51  ;;  %v7761_v12 = vld [vmem:[#allocation2 + $0x28] sm:$0xff]  ;;  %v7801_v23 = vsel %vm7795_vm1, %v14598_v19, 0.0 }
 0x6b9   : > { %v7692_v32 = vsel %vm5310_vm7, %v7690_v13, %v7691_v22  ;;  %v7967_v46 = vmul.f32 %v8480_v14, %v14549_v52  ;;  %v7667_v39 = vmax.f32 %v7665_v5, %v7666_v55  ;;  %v7693_v9 = vrot.slane %v6534_v34, 7  ;;  %v6433_v13 = vld [vmem:[%s13514_s23 + $0x320] sm:$0xff] }
 0x6ba   : > { %v7676_v53 = vrot.slane %v7675_v16, 1  ;;  %v7699_v36 = vmax.f32 %v14603_v49, %v7692_v32  ;;  %v7684_v38 = vrot.slane %v7683_v4, 1  ;;  %v7703_v63 = vrot.slane %v6534_v34, 6 }
 0x6bb   : > { %v6229_v43 = vadd.f32 %v14333_v21, %v6120_v20  ;;  %v6121_v24 = vadd.f32 %v15485_v0, %v5250_v45  ;;  %v7668_v62 = vrot.slane %v7667_v39, 1  ;;  %v7694_v30 = vsel %vm5310_vm7, %v7691_v22, %v7693_v9  ;;  %v7776_v20 = vld [vmem:[%s14857_s7 + $0x28] sm:$0xff] }
 0x6bc   : > { %v7677_v29 = vmax.f32 %v7675_v16, %v7676_v53  ;;  %v7908_v8 = vmul.f32 %v8469_v40, %v7760_v31  ;;  %v7685_v56 = vmax.f32 %v7683_v4, %v7684_v38  ;;  %v7700_v49 = vmax.f32 %v14600_v61, %v7694_v30  ;;  %v8470_v61 = vld [vmem:[%s14857_s7 + $0xe8] sm:$0xff] }
 0x6bd   : > { %v7711_v27 = vmax.f32 %v7698_v59, %v7703_v63  ;;  %v6331_v10 = vmax.f32 %v6229_v43, 0.0  ;;  %v7669_v58 = vmax.f32 %v7667_v39, %v7668_v62  ;;  %v6230_v47 = vadd.f32 %v14333_v21, %v6121_v24  ;;  %v6434_v21 = vld [vmem:[%s13514_s23 + $0x328] sm:$0x3] }
 0x6be   : > { %7678 = vst.msk [vmem:[#allocation2 + $0x53] sm:$0x1] %vm6569_vm10, %v7677_v29  ;;  %v7922_v59 = vadd.f32 %v14595_v2, %v14565_v35  ;;  %v7847_v6 = vmul.f32 %v8456_v57, %v14549_v52  ;;  %7686 = vst.msk [vmem:[#allocation2 + $0x54] sm:$0x1] %vm6569_vm10, %v7685_v56  ;;  %v7981_v33 = vsel %vm7795_vm1, %v7967_v46, 0.0  ;;  %v7923_v48 = vsel %vm7795_vm1, %v7908_v8, 0.0 }
 0x6bf   : > { %v7714_v44 = vsel %vm6636_vm14, %v7711_v27, -inf  ;;  %v6535_v42 = vmul.f32 %v6433_v13, %v6331_v10  ;;  %7670 = vst.msk [vmem:[#allocation2 + $0x52] sm:$0x1] %vm6569_vm10, %v7669_v58  ;;  %v6332_v2 = vmax.f32 %v6230_v47, 0.0  ;;  %v7787_v5 = vmul.f32 %v7775_v17, %v7760_v31  ;;  %v7762_v17 = vld [vmem:[#allocation2 + $0x30] sm:$0xff] }
 0x6c0   : > { %v7715_v35 = vrot.slane %v7714_v44, 4  ;;  %v7909_v52 = vmul.f32 %v8470_v61, %v7761_v12  ;;  %v7968_v37 = vmul.f32 %v8481_v54, %v7760_v31  ;;  %v7848_v1 = vmul.f32 %v8457_v15, %v7760_v31  ;;  %v7777_v54 = vld [vmem:[%s14857_s7 + $0x30] sm:$0xff] }
 0x6c1   : > { %v7704_v7 = vrot.slane %v6535_v42, 6  ;;  %v6536_v14 = vmul.f32 %v6434_v21, %v6332_v2  ;;  %v7860_v50 = vadd.f32 %v14585_v3, %v14582_v41  ;;  %v7861_v19 = vsel %vm7795_vm1, %v7847_v6, 0.0  ;;  %v8482_v3 = vld [vmem:[%s14857_s7 + $0x148] sm:$0xff]  ;;  %v8483_v6 = vld [vmem:[%s14857_s7 + $0x150] sm:$0xff] }
 0x6c2   : > { %v7716_v28 = vmax.f32 %v7714_v44, %v7715_v35  ;;  %v7924_v25 = vadd.f32 %v7923_v48, %v7922_v59  ;;  %v7802_v22 = vadd.f32 %v7801_v23, %v14576_v11  ;;  %v7982_v55 = vadd.f32 %v7981_v33, %v14578_v26  ;;  %v8458_v11 = vld [vmem:[%s14857_s7 + $0x88] sm:$0xff]  ;;  %v8459_v44 = vld [vmem:[%s14857_s7 + $0x90] sm:$0xff]  ;;  %v7763_v23 = vld [vmem:[#allocation2 + $0x38] sm:$0xff] }
 0x6c3   : > { %v7705_v60 = vsel %vm1226_vm0, %v7703_v63, %v7704_v7  ;;  %v7706_v18 = vrot.slane %v6536_v14, 6  ;;  %v7803_v4 = vsel %vm7795_vm1, %v7787_v5, 0.0  ;;  %v7925_v41 = vsel %vm7795_vm1, %v7909_v52, 0.0  ;;  %v8472_v33 = vld [vmem:[%s14857_s7 + $0xf8] sm:$0xff] }
 0x6c4   : > { %v7717_v16 = vrot.slane %v7716_v28, 2  ;;  %v7712_v34 = vmax.f32 %v7699_v36, %v7705_v60  ;;  %v7983_v32 = vsel %vm7795_vm1, %v7968_v37, 0.0  ;;  %v7862_v26 = vadd.f32 %v7861_v19, %v7860_v50  ;;  %v7778_v35 = vld [vmem:[%s14857_s7 + $0x38] sm:$0xff] }
 0x6c5   : > { %v7863_v51 = vsel %vm7795_vm1, %v7848_v1, 0.0  ;;  %v7707_v46 = vsel %vm1226_vm0, %v7704_v7, %v7706_v18  ;;  %v7788_v9 = vmul.f32 %v7776_v20, %v7761_v12  ;;  %v7969_v43 = vmul.f32 %v8482_v3, %v7761_v12  ;;  %v8484_v1 = vld [vmem:[%s14857_s7 + $0x158] sm:$0xff] }
 0x6c6   : > { %v7718_v45 = vmax.f32 %v7716_v28, %v7717_v16  ;;  %v7722_v31 = vsel %vm6561_vm8, %v7712_v34, -inf  ;;  %v7730_v40 = vsel %vm6571_vm9, %v7712_v34, -inf  ;;  %v7713_v36 = vmax.f32 %v7700_v49, %v7707_v46  ;;  %v8471_v49 = vld [vmem:[%s14857_s7 + $0xf0] sm:$0xff]  ;;  %v8460_v28 = vld [vmem:[%s14857_s7 + $0x98] sm:$0xff]  ;;  %v8485_v46 = vld [vmem:[%s14857_s7 + $0x160] sm:$0xff] }
 0x6c7   : > { %v7723_v39 = vrot.slane %v7722_v31, 4  ;;  %v7731_v53 = vrot.slane %v7730_v40, 4  ;;  %v7738_v63 = vsel %vm6580_vm11, %v7712_v34, -inf  ;;  %v7849_v0 = vmul.f32 %v8458_v11, %v7761_v12  ;;  %v8473_v11 = vld [vmem:[%s14857_s7 + $0x100] sm:$0xff] }
 0x6c8   : > { %v7719_v38 = vrot.slane %v7718_v45, 1  ;;  %v7739_v62 = vsel %vm6569_vm10, %v7713_v36, -inf  ;;  %v7748_v29 = vsel %vm6591_vm12, %v7713_v36, -inf  ;;  %v7804_v56 = vadd.f32 %v7803_v4, %v7802_v22 }
 0x6c9   : > { %v7724_v24 = vmax.f32 %v7722_v31, %v7723_v39  ;;  %v7732_v57 = vmax.f32 %v7730_v40, %v7731_v53  ;;  %v7740_v13 = vmax.f32 %v7738_v63, %v7739_v62  ;;  %v7749_v8 = vrot.slane %v7748_v29, 4  ;;  %v7779_v31 = vld [vmem:[%s14857_s7 + $0x40] sm:$0xff]  ;;  %v8474_v63 = vld [vmem:[%s14857_s7 + $0x108] sm:$0xff] }
 0x6ca   : > { %v7720_v30 = vmax.f32 %v7718_v45, %v7719_v38  ;;  %v7984_v58 = vadd.f32 %v7983_v32, %v7982_v55  ;;  %v7864_v47 = vadd.f32 %v7863_v51, %v7862_v26  ;;  %v14693_v59 = vadd.f32 %v7925_v41, %v7924_v25  ;;  %v7764_v32 = vld [vmem:[#allocation2 + $0x40] sm:$0xff] }
 0x6cb   : > { %v7725_v27 = vrot.slane %v7724_v24, 2  ;;  %v7733_v10 = vrot.slane %v7732_v57, 2  ;;  %v7741_v12 = vrot.slane %v7740_v13, 4  ;;  %v7750_v61 = vmax.f32 %v7748_v29, %v7749_v8  ;;  %v8461_v53 = vld [vmem:[%s14857_s7 + $0xa0] sm:$0xff]  ;;  %v8462_v8 = vld [vmem:[%s14857_s7 + $0xa8] sm:$0xff] }
 0x6cc   : > { %7721 = vst.msk [vmem:[#allocation2 + $0x55] sm:$0x1] %vm6569_vm10, %v7720_v30  ;;  %v7805_v15 = vsel %vm7795_vm1, %v7788_v9, 0.0  ;;  %v7985_v2 = vsel %vm7795_vm1, %v7969_v43, 0.0  ;;  %v7865_v48 = vsel %vm7795_vm1, %v7849_v0, 0.0  ;;  %v7910_v52 = vmul.f32 %v8471_v49, %v7762_v17  ;;  %v7780_v0 = vld [vmem:[%s14857_s7 + $0x48] sm:$0xff] }
 0x6cd   : > { %v7726_v42 = vmax.f32 %v7724_v24, %v7725_v27  ;;  %v7734_v21 = vmax.f32 %v7732_v57, %v7733_v10  ;;  %v7742_v5 = vmax.f32 %v7740_v13, %v7741_v12  ;;  %v7751_v7 = vrot.slane %v7750_v61, 2  ;;  %v7765_v57 = vld [vmem:[#allocation2 + $0x48] sm:$0xff] }
 0x6ce   : > { %v7789_v37 = vmul.f32 %v7777_v54, %v7762_v17  ;;  %v7970_v19 = vmul.f32 %v8483_v6, %v7762_v17  ;;  %v7850_v60 = vmul.f32 %v8459_v44, %v7762_v17  ;;  %v7911_v55 = vmul.f32 %v8472_v33, %v7763_v23  ;;  %v8486_v30 = vld [vmem:[%s14857_s7 + $0x168] sm:$0xff]  ;;  %v8475_v54 = vld [vmem:[%s14857_s7 + $0x110] sm:$0xff] }
 0x6cf   : > { %v7727_v14 = vrot.slane %v7726_v42, 1  ;;  %v7735_v50 = vrot.slane %v7734_v21, 1  ;;  %v7743_v25 = vrot.slane %v7742_v5, 2  ;;  %v7752_v22 = vmax.f32 %v7750_v61, %v7751_v7  ;;  %v7781_v6 = vld [vmem:[%s14857_s7 + $0x50] sm:$0xff] }
 0x6d0   : > { %v7790_v16 = vmul.f32 %v7778_v35, %v7763_v23  ;;  %v7971_v20 = vmul.f32 %v8484_v1, %v7763_v23  ;;  %v7851_v4 = vmul.f32 %v8460_v28, %v7763_v23  ;;  %v7806_v26 = vadd.f32 %v7805_v15, %v7804_v56 }
 0x6d1   : > { %v7728_v34 = vmax.f32 %v7726_v42, %v7727_v14  ;;  %v7736_v18 = vmax.f32 %v7734_v21, %v7735_v50  ;;  %v7744_v41 = vmax.f32 %v7742_v5, %v7743_v25  ;;  %v7753_v3 = vrot.slane %v7752_v22, 1  ;;  %v8487_v42 = vld [vmem:[%s14857_s7 + $0x170] sm:$0xff] }
 0x6d2   : > { %v7986_v51 = vadd.f32 %v7985_v2, %v7984_v58  ;;  %v7927_v45 = vsel %vm7795_vm1, %v7910_v52, 0.0  ;;  %v7807_v40 = vsel %vm7795_vm1, %v7789_v37, 0.0  ;;  %v7987_v39 = vsel %vm7795_vm1, %v7970_v19, 0.0 }
 0x6d3   : > { %7729 = vst.msk [vmem:[#allocation2 + $0x56] sm:$0x1] %vm6569_vm10, %v7728_v34  ;;  %7737 = vst.msk [vmem:[#allocation2 + $0x57] sm:$0x1] %vm6569_vm10, %v7736_v18  ;;  %v7866_v36 = vadd.f32 %v7865_v48, %v7864_v47  ;;  %v7745_v9 = vrot.slane %v7744_v41, 1  ;;  %v7754_v38 = vmax.f32 %v7752_v22, %v7753_v3  ;;  %v7929_v43 = vsel %vm7795_vm1, %v7911_v55, 0.0 }
 0x6d4   : > { %v7867_v24 = vsel %vm7795_vm1, %v7850_v60, 0.0  ;;  %v7912_v62 = vmul.f32 %v8473_v11, %v7764_v32  ;;  %v7809_v29 = vsel %vm7795_vm1, %v7790_v16, 0.0  ;;  %v7989_v13 = vsel %vm7795_vm1, %v7971_v20, 0.0  ;;  %v8476_v60 = vld [vmem:[%s14857_s7 + $0x118] sm:$0x3] }
 0x6d5   : > { %v7869_v56 = vsel %vm7795_vm1, %v7851_v4, 0.0  ;;  %v7746_v27 = vmax.f32 %v7744_v41, %v7745_v9  ;;  %7755 = vst.msk [vmem:[#allocation2 + $0x59] sm:$0x1] %vm6569_vm10, %v7754_v38  ;;  %v7791_v10 = vmul.f32 %v7779_v31, %v7764_v32  ;;  %v7972_v17 = vmul.f32 %v8485_v46, %v7764_v32  ;;  %v7782_v18 = vld [vmem:[%s14857_s7 + $0x58] sm:$0x3] }
 0x6d6   : > { %v7852_v49 = vmul.f32 %v8461_v53, %v7764_v32  ;;  %v7928_v58 = vadd.f32 %v7927_v45, %v14693_v59  ;;  %v7808_v47 = vadd.f32 %v7807_v40, %v7806_v26  ;;  %v7988_v12 = vadd.f32 %v7987_v39, %v7986_v51  ;;  %v8463_v59 = vld [vmem:[%s14857_s7 + $0xb0] sm:$0xff]  ;;  %v8488_v4 = vld [vmem:[%s14857_s7 + $0x178] sm:$0x3] }
 0x6d7   : > { %v7868_v61 = vadd.f32 %v7867_v24, %v7866_v36  ;;  %7747 = vst.msk [vmem:[#allocation2 + $0x58] sm:$0x1] %vm6569_vm10, %v7746_v27  ;;  %v7913_v15 = vmul.f32 %v8474_v63, %v7765_v57  ;;  %v7792_v44 = vmul.f32 %v7780_v0, %v7765_v57  ;;  %v7973_v21 = vmul.f32 %v8486_v30, %v7765_v57  ;;  %v8464_v3 = vld [vmem:[%s14857_s7 + $0xb8] sm:$0x3] }
 0x6d8   : > { %v7853_v23 = vmul.f32 %v8462_v8, %v7765_v57  ;;  %v7930_v33 = vadd.f32 %v7929_v43, %v7928_v58  ;;  %v7810_v35 = vadd.f32 %v7809_v29, %v7808_v47  ;;  %v7990_v2 = vadd.f32 %v7989_v13, %v7988_v12 }
 0x6d9   : > { %v7870_v48 = vadd.f32 %v7869_v56, %v7868_v61  ;;  %v7931_v7 = vsel %vm7795_vm1, %v7912_v62, 0.0  ;;  %v7811_v52 = vsel %vm7795_vm1, %v7791_v10, 0.0  ;;  %v7991_v37 = vsel %vm7795_vm1, %v7972_v17, 0.0 }
 0x6da   : > { %v7766_v5 = vld [vmem:[#allocation2 + $0x50] sm:$0xff]  ;;  %v7871_v1 = vsel %vm7795_vm1, %v7852_v49, 0.0  ;;  %v7933_v25 = vsel %vm7795_vm1, %v7913_v15, 0.0  ;;  %v7813_v22 = vsel %vm7795_vm1, %v7792_v44, 0.0  ;;  %v7993_v55 = vsel %vm7795_vm1, %v7973_v21, 0.0 }
 0x6db   : > { %v7914_v28 = vmul.f32 %v8475_v54, %v7766_v5  ;;  %v7793_v14 = vmul.f32 %v7781_v6, %v7766_v5  ;;  %v7974_v50 = vmul.f32 %v8487_v42, %v7766_v5  ;;  %v7854_v19 = vmul.f32 %v8463_v59, %v7766_v5 }
 0x6dc   : > { %v7873_v16 = vsel %vm7795_vm1, %v7853_v23, 0.0  ;;  %v7932_v34 = vadd.f32 %v7931_v7, %v7930_v33  ;;  %v7812_v20 = vadd.f32 %v7811_v52, %v7810_v35  ;;  %v7992_v41 = vadd.f32 %v7991_v37, %v7990_v2 }
 0x6dd   : > { %v7872_v32 = vadd.f32 %v7871_v1, %v7870_v48  ;;  %v7935_v11 = vsel %vm7795_vm1, %v7914_v28, 0.0  ;;  %v7815_v26 = vsel %vm7795_vm1, %v7793_v14, 0.0  ;;  %v7995_v51 = vsel %vm7795_vm1, %v7974_v50, 0.0 }
 0x6de   : > { %v7875_v45 = vsel %vm7795_vm1, %v7854_v19, 0.0  ;;  %v7767_v31 = vld [vmem:[#allocation2 + $0x58] sm:$0x3]  ;;  %v7934_v40 = vadd.f32 %v7933_v25, %v7932_v34  ;;  %v7814_v46 = vadd.f32 %v7813_v22, %v7812_v20  ;;  %v7994_v39 = vadd.f32 %v7993_v55, %v7992_v41  ;;  %v7770_v34 = vld [vmem:[%s14858_s8] sm:$0x1] }
 0x6df   : > { %v7874_v53 = vadd.f32 %v7873_v16, %v7872_v32  ;;  %v7915_v36 = vmul.f32 %v8476_v60, %v7767_v31  ;;  %v7794_v9 = vmul.f32 %v7782_v18, %v7767_v31  ;;  %v7975_v38 = vmul.f32 %v8488_v4, %v7767_v31 }
 0x6e0   : > { %v7855_v63 = vmul.f32 %v8464_v3, %v7767_v31  ;;  %v7936_v43 = vadd.f32 %v7935_v11, %v7934_v40  ;;  %v7816_v0 = vadd.f32 %v7815_v26, %v7814_v46  ;;  %v7996_v24 = vadd.f32 %v7995_v51, %v7994_v39 }
 0x6e1   : > { %v7876_v57 = vadd.f32 %v7875_v45, %v7874_v53  ;;  %v7937_v62 = vsel %vm6773_vm3, %v7915_v36, 0.0  ;;  %v7817_v29 = vsel %vm6773_vm3, %v7794_v9, 0.0  ;;  %v7997_v30 = vsel %vm6773_vm3, %v7975_v38, 0.0 }
 0x6e2   : > { %v7877_v13 = vsel %vm6773_vm3, %v7855_v63, 0.0  ;;  %v7938_v8 = vadd.f32 %v7937_v62, %v7936_v43  ;;  %v7818_v56 = vadd.f32 %v7817_v29, %v7816_v0  ;;  %v7998_v27 = vadd.f32 %v7997_v30, %v7996_v24 }
 0x6e3   : > { %v7878_v10 = vadd.f32 %v7877_v13, %v7876_v57  ;;  %v7768_v25 = vlaneseq  ;;  %vm8011_vm7 = vcmask 24576  }
 0x6e4   : > { %v7939_v17 = vrot.slane %v7938_v8, 4  ;;  %v7819_v49 = vrot.slane %v7818_v56, 4  ;;  %v7999_v54 = vrot.slane %v7998_v27, 4 }
 0x6e5   : > { %v7879_v58 = vrot.slane %v7878_v10, 4  ;;  %v7769_v22 = vand.u32 127, %v7768_v25 }
 0x6e6   : > { %v7940_v47 = vadd.f32 %v7939_v17, %v7938_v8  ;;  %v7820_v12 = vadd.f32 %v7819_v49, %v7818_v56  ;;  %v8000_v61 = vadd.f32 %v7999_v54, %v7998_v27 }
 0x6e7   : > { %v7880_v15 = vadd.f32 %v7879_v58, %v7878_v10  ;;  %vm7828_vm0 = vcmp.eq.s32.totalorder %v7769_v22, 0  ;;  %vm7888_vm4 = vcmp.eq.s32.totalorder %v7769_v22, 1  ;;  %vm7948_vm5 = vcmp.eq.s32.totalorder %v7769_v22, 2 }
 0x6e8   : > { %v7941_v6 = vrot.slane %v7940_v47, 2  ;;  %v7821_v44 = vrot.slane %v7820_v12, 2  ;;  %v8001_v42 = vrot.slane %v8000_v61, 2  ;;  %vm8008_vm6 = vcmp.eq.s32.totalorder %v7769_v22, 3 }
 0x6e9   : > { %v7881_v21 = vrot.slane %v7880_v15, 2 }
 0x6ea   : > { %v7942_v59 = vadd.f32 %v7941_v6, %v7940_v47  ;;  %v7822_v23 = vadd.f32 %v7821_v44, %v7820_v12  ;;  %v8002_v33 = vadd.f32 %v8001_v42, %v8000_v61 }
 0x6eb   : > { %v7882_v35 = vadd.f32 %v7881_v21, %v7880_v15 }
 0x6ec   : > { %v7943_v2 = vrot.slane %v7942_v59, 1  ;;  %v7823_v48 = vrot.slane %v7822_v23, 1  ;;  %v8003_v5 = vrot.slane %v8002_v33, 1 }
 0x6ed   : > { %v7883_v7 = vrot.slane %v7882_v35, 1 }
 0x6ee   : > { %v7944_v52 = vadd.f32 %v7943_v2, %v7942_v59  ;;  %v7824_v37 = vadd.f32 %v7823_v48, %v7822_v23  ;;  %v8004_v14 = vadd.f32 %v8003_v5, %v8002_v33 }
 0x6ef   : > { %v7884_v50 = vadd.f32 %v7883_v7, %v7882_v35 }
 0x6f0   : > { %v7945_v1 = vsel %vm7795_vm1, %v7944_v52, 0.0  ;;  %v7825_v28 = vsel %vm7795_vm1, %v7824_v37, 0.0  ;;  %v8005_v19 = vsel %vm7795_vm1, %v8004_v14, 0.0 }
 0x6f1   : > { %7946 = vadd.xlane.f32.xlu1 %v7945_v1  ;;  %7826 = vadd.xlane.f32.xlu0 %v7825_v28  ;;  %v7885_v60 = vsel %vm7795_vm1, %v7884_v50, 0.0 }
 0x6f5   : > { %8006 = vadd.xlane.f32.xlu1 %v8005_v19  ;;  %7886 = vadd.xlane.f32.xlu0 %v7885_v60 }
 0x77e   : > { %v7947_v55 = vpop.xlane.xlu1 %7946  ;;  %v7827_v16 = vpop.xlane.xlu0 %7826 }
 0x77f   : > { %v7829_v18 = vsel %vm7828_vm0, %v7827_v16, 0.0  ;;  %v7949_v11 = vsel %vm7948_vm5, %v7947_v55, 0.0 }
 0x780   : > { %v7830_v20 = vadd.f32 %v7829_v18, %v7770_v34 }
 0x782   : > { %v7887_v4 = vpop.xlane.xlu0 %7886  ;;  %v8007_v3 = vpop.xlane.xlu1 %8006 }
 0x783   : > { %v7889_v41 = vsel %vm7888_vm4, %v7887_v4, 0.0  ;;  %v8009_v51 = vsel %vm8008_vm6, %v8007_v3, 0.0 }
 0x784   : > { %v7890_v32 = vadd.f32 %v7889_v41, %v7830_v20 }
 0x786   : > { %v7950_v26 = vadd.f32 %v7949_v11, %v7890_v32 }
 0x788   : > { %v8010_v45 = vadd.f32 %v8009_v51, %v7950_v26 }
 0x78a   : > { %v8012_v31 = vsel %vm8011_vm7, %v8010_v45, -inf }
 0x78b   : > { %8013 = vmax.xlane.f32.xlu0 %v8012_v31 }
 0x818   : > { %v8014_v40 = vpop.xlane.xlu0 %8013 }
 0x819   : > { %v8015_v46 = vsub.f32 %v8010_v45, %v8014_v40 }
 0x81b   : > { %v8016_v39 = vmul.f32 1.442695, %v8015_v46 }
 0x81d   : > { %10131 = vpow2.f32 %v8016_v39 }
 0x827   : > { %v10132_v53 = vpop.eup %10131 }
 0x828   : > { %v8018_v36 = vsel %vm8011_vm7, %v10132_v53, 0.0 }
 0x829   : > { %8019 = vadd.xlane.f32.xlu1 %v8018_v36 }
 0x8b6   : > { %v8020_v9 = vpop.xlane.xlu1 %8019 }
 0x8b7   : > { %10133 = vrcp.f32 %v8020_v9 }
 0x8c1   : > { %v10134_v38 = vpop.eup %10133 }
 0x8c2   : > { %v8022_v63 = vmul.f32 %v10134_v38, %v10132_v53 }
 0x8c4   : > { %8023 = vst.msk [vmem:[%s354_s14] sm:$0x1] %vm8011_vm7, %v8022_v63 }
 0x8c5   : > { %10153 = shalt.err (!%p10150_p3)
}
 0x8c6   : > { %s10154_s26 = scalar_lea.hbm %s14807_s17, 16  ;;  %s10158_s14 = scalar_lea.hbm %s14859_s9, 32 }
 0x8c7   : > { %p10155_p4 = scmp.ne.s32.totalorder %s14807_s17, %s10154_s26  ;;  %p10159_p9 = scmp.lt.u32.totalorder %s14807_s17, %s14859_s9 }
 0x8c8   : > { %p10160_p10 = scmp.lt.u32.totalorder %s10158_s14, %s10154_s26  ;;  %p10162_p12 = scmp.lt.u32.totalorder %s10154_s26, %s14807_s17 }
 0x8c9   : > { %p10156_p7 = pnand %p10155_p4, %p10295_p5 }
 0x8ca   : > { %p10161_p11 = por %p10160_p10, %p10159_p9 }
 0x8cb   : > { %p10157_p8 = pneg %p10156_p7 }
 0x8cc   : > { %p10163_p13 = por %p10162_p12, %p10161_p11 }
 0x8ce   : > { %p10164_p0 = pnand %p10163_p13, %p10157_p8 }
 0x8d0   : > { %10167 = shalt.err (!%p10164_p0)
}
 0x8d1   : > { %10084 = dma.vmem_to_hbm [thread:$0]  (%p10295_p5), %s14809_s16, 16, %s14807_s17, %s8025_s21  }
 0x8d2 PF: > { %p10090_p1 = scmp.ge.s32.totalorder %s10202_s12, 2  ;;  %s8049_s22 = sand.u32 1, %s10190_s30  }
 0x8d3   : > { %s8050_s13 = scalar_lea.sflag [#allocation4], %s8049_s22 }
 0x8d4   : > { %p10087_p2 = pnand %p10090_p1, %p10299_p6 }
 0x8d6   : > { %10185 = dma.done.wait (!%p10087_p2), %s8050_s13, 16  }
 0x8d7   : > { %10187 = vsyncadd (!%p10087_p2), %s8050_s13, 4294967280  ;;  %p19_p3 = scmp.ge.s32.totalorder %s10282_s15, 4   ;;  %s15486_s30 = smov %s10194_s10 }
 0x8d8   : > { %s15487_s10 = smov %s10198_s11  ;;  %s15488_s11 = smov %s10293_s18 }
 0x8d9   : > { %s15489_s12 = smov %s10282_s15  ;;  %21 = sbr.rel (!%p19_p3) target bundleno = 3 (0x3), region = 104 }
 0x8e0   :  { %8054 = vsyncpa [#allocation4], 1 }
 0x8e1   :  { %8056 = vsyncpa [#allocation4 + $0x1], 1 }

</bundles_post_ra>
